<compile_context>
chip_gen: v5e
topology: v5e:2x2
jax: 0.10.0
libtpu: 0.0.40
codegen_flags: <defaults>
</compile_context>

<pallas_src>
import math
import jax
import jax.numpy as jnp
from jax.experimental import pallas as pl
from jax.experimental.pallas import tpu as pltpu

_HIGHEST = jax.lax.Precision.HIGHEST


def _make_kernel(T, B, V, C, num_steps):
    def kernel(params_ref, tokens_ref, ectx_ref, m_ref, out_ref, ctx_ref):
        alpha = params_ref[0]
        beta_mult = params_ref[1]
        beta_power = params_ref[2]

        def timestep(t, ctx):
            # --- gather this step's per-token rows (token-only work, hoisted
            # out of the num_steps loop).  B is tiny, so a static unroll of B
            # dynamic leading-axis reads is cheap.
            ce_rows = []
            m_rows = []
            for b in range(B):
                tok = tokens_ref[t * B + b]        # scalar int32 from SMEM
                ce_rows.append(ectx_ref[tok])      # (1, C) context-embedding row
                m_rows.append(m_ref[tok])          # (C, V) folded action matrix
            ce = jnp.concatenate(ce_rows, axis=0)                        # (B, C)
            ce_norm = jnp.sqrt(jnp.sum(ce * ce, axis=1, keepdims=True))  # (B, 1)

            # --- leaky context update (num_steps: static unroll); ctx stays in
            # registers, no VMEM round-trips inside the inner loop.
            for _ in range(num_steps):
                ctx_norm = jnp.sqrt(jnp.sum(ctx * ctx, axis=1, keepdims=True))
                ratio = ce_norm / (ce_norm + ctx_norm)   # 0/0 -> NaN matches ref
                beta = alpha * jnp.power(beta_mult * ratio, beta_power)
                beta = jnp.clip(beta, 0.0, 1.0)
                ctx = (1.0 - beta) * ctx + beta * ce

            # --- only the final inner step's output is kept by the reference:
            #   out[b, v] = sum_k ctx[b, k] * M[tok_b][k, v]
            # B tiny (1,C)@(C,V) matmuls; HIGHEST keeps f32 accuracy and is
            # latency-trivial at these shapes.
            out_rows = []
            for b in range(B):
                out_rows.append(jnp.dot(ctx[b:b + 1, :], m_rows[b],
                                        precision=_HIGHEST,
                                        preferred_element_type=jnp.float32))
            out_ref[t] = jnp.concatenate(out_rows, axis=0)   # (B, V) VMEM store
            return ctx

        ctx = jnp.zeros((B, C), jnp.float32)      # init_hidden(batch)
        if T <= 16:
            # Small static T: full unroll -> every SMEM read and out_ref store
            # uses a static index; the carried-ctx chain is fully visible to
            # the LLO scheduler.
            for t in range(T):
                ctx = timestep(t, ctx)
        else:
            ctx = jax.lax.fori_loop(0, T, timestep, ctx)
        ctx_ref[...] = ctx                         # written exactly once

    return kernel


def context_ctrnn_forward(tokens, ectx, eact, w_action, alpha, beta_mult,
                          beta_power, num_steps=1):
    assert num_steps >= 1, "num_steps must be >= 1 (the reference would fail too)"
    T, B = tokens.shape
    V, C = ectx.shape

    # Fold embedding2actionable into the action weight, per token:
    #   M[tok, k, v] = sum_c eact[tok, c] * W[v*C + c, k]
    w_r = w_action.reshape(V, C, C)                                    # [v, c, k]
    m_fold = jnp.einsum('tc,vck->tkv', eact, w_r, precision=_HIGHEST)  # (V, C, V)

    params = jnp.array([alpha, beta_mult, beta_power], jnp.float32)
    tokens_flat = tokens.reshape(T * B).astype(jnp.int32)   # row-major: [t*B + b]
    ectx_rows = ectx.reshape(V, 1, C)   # leading-axis gather yields (1, C) rows

    # TODO(synk): for B >= 16 on v7x, add a leading "parallel" grid axis over
    # batch tiles (the recurrence is independent per batch row) to use both
    # TensorCores; at B=4 a single invocation is fastest.
    out, ctx = pl.pallas_call(
        _make_kernel(T, B, V, C, num_steps),
        out_shape=(jax.ShapeDtypeStruct((T, B, V), jnp.float32),
                   jax.ShapeDtypeStruct((B, C), jnp.float32)),
        in_specs=[
            pl.BlockSpec(memory_space=pltpu.MemorySpace.SMEM),  # alpha/beta_mult/beta_power
            pl.BlockSpec(memory_space=pltpu.MemorySpace.SMEM),  # token ids, (T*B,)
            pl.BlockSpec(memory_space=pltpu.MemorySpace.VMEM),  # embedding2context rows (V,1,C)
            pl.BlockSpec(memory_space=pltpu.MemorySpace.VMEM),  # folded action maps (V,C,V)
        ],
        out_specs=(
            pl.BlockSpec(memory_space=pltpu.MemorySpace.VMEM),  # (T,B,V) logits
            pl.BlockSpec(memory_space=pltpu.MemorySpace.VMEM),  # (B,C) final context
        ),
    )(params, tokens_flat, ectx_rows, m_fold)
    return out, ctx


def ref_forward(tokens, ectx, eact, w_action, alpha, beta_mult, beta_power,
                num_steps=1):
    """Pure-JAX transcription of ContextCTRNN.forward for correctness check."""
    T, B = tokens.shape
    V, C = ectx.shape
    ctx = jnp.zeros((B, C), jnp.float32)
    outs = []
    for i in range(T):
        out = None
        for _ in range(num_steps):
            ce = ectx[tokens[i]]
            ae = eact[tokens[i]]
            ce_n = jnp.linalg.norm(ce, axis=1, keepdims=True)
            c_n = jnp.linalg.norm(ctx, axis=1, keepdims=True)
            beta = alpha * (beta_mult * (ce_n / (ce_n + c_n))) ** beta_power
            beta = jnp.clip(beta, 0.0, 1.0)
            ctx = (1.0 - beta) * ctx + beta * ce
            action_map = jnp.dot(ctx, w_action.T,
                                 precision=_HIGHEST).reshape(B, V, C)
            out = jnp.einsum('bvc,bc->bv', action_map, ae, precision=_HIGHEST)
        outs.append(out)
    return jnp.stack(outs, axis=0), ctx


if __name__ == "__main__":
    key = jax.random.PRNGKey(0)
    k_tok, k_ec, k_ea, k_w = jax.random.split(key, 4)

    T, B = 8, 4            # sequence length, batch
    V, C = 16, 32          # vocab_size, context_size

    tokens = jax.random.randint(k_tok, (T, B), 0, V, dtype=jnp.int32)
    # nn.Embedding default init: N(0, 1)
    ectx = jax.random.normal(k_ec, (V, C), jnp.float32)
    eact = jax.random.normal(k_ea, (V, C), jnp.float32)
    # nn.Linear(C, C*V, bias=False) default init: U(-1/sqrt(C), 1/sqrt(C))
    bound = 1.0 / math.sqrt(C)
    w_action = jax.random.uniform(k_w, (V * C, C), jnp.float32, -bound, bound)
    # TODO(synk): context2context_map (Linear(C, C**2)) is created in __init__
    # but never used in forward(); intentionally omitted.
    alpha, beta_mult, beta_power = 1.0, 1.0, 1.0   # dt=None -> alpha = 1

    out, ctx = context_ctrnn_forward(tokens, ectx, eact, w_action,
                                     alpha, beta_mult, beta_power, num_steps=1)
    out = jax.block_until_ready(out)
    ctx = jax.block_until_ready(ctx)

    ref_out, ref_ctx = ref_forward(tokens, ectx, eact, w_action,
                                   jnp.float32(alpha), jnp.float32(beta_mult),
                                   jnp.float32(beta_power), num_steps=1)

    assert out.shape == (T, B, V) and ctx.shape == (B, C)
    assert jnp.allclose(out, ref_out, atol=1e-4, rtol=1e-4), \
        float(jnp.max(jnp.abs(out - ref_out)))
    assert jnp.allclose(ctx, ref_ctx, atol=1e-5, rtol=1e-5), \
        float(jnp.max(jnp.abs(ctx - ref_ctx)))
    print("KERNEL_OK")
</pallas_src>

<mosaic_0001>
module attributes {stable_mosaic.version = 11 : i64} {
  func.func @kernel(%arg0: memref<3xf32, #tpu.memory_space<smem>>, %arg1: memref<32xi32, #tpu.memory_space<smem>>, %arg2: memref<16x1x32xf32, #tpu.memory_space<vmem>>, %arg3: memref<16x32x16xf32, #tpu.memory_space<vmem>>, %arg4: memref<8x4x16xf32, #tpu.memory_space<vmem>>, %arg5: memref<4x32xf32, #tpu.memory_space<vmem>>) attributes {dimension_semantics = [], scalar_prefetch = 0 : i64, scratch_operands = 0 : i64, tpu.core_type = #tpu.core_type<tc>} {
    %c0 = arith.constant 0 : index
    %0 = memref.load %arg0[%c0] : memref<3xf32, #tpu.memory_space<smem>>
    %c1 = arith.constant 1 : index
    %1 = memref.load %arg0[%c1] : memref<3xf32, #tpu.memory_space<smem>>
    %c2 = arith.constant 2 : index
    %2 = memref.load %arg0[%c2] : memref<3xf32, #tpu.memory_space<smem>>
    %cst = arith.constant 0.000000e+00 : f32
    %3 = vector.broadcast %cst : f32 to vector<4x32xf32>
    %c0_0 = arith.constant 0 : index
    %4 = memref.load %arg1[%c0_0] : memref<32xi32, #tpu.memory_space<smem>>
    %5 = arith.index_cast %4 : i32 to index
    %c0_1 = arith.constant 0 : index
    %c0_2 = arith.constant 0 : index
    %6 = vector.load %arg2[%5, %c0_1, %c0_2] : memref<16x1x32xf32, #tpu.memory_space<vmem>>, vector<1x1x32xf32>
    %7 = vector.shape_cast %6 : vector<1x1x32xf32> to vector<1x32xf32>
    %8 = arith.index_cast %4 : i32 to index
    %c0_3 = arith.constant 0 : index
    %c0_4 = arith.constant 0 : index
    %9 = vector.load %arg3[%8, %c0_3, %c0_4] : memref<16x32x16xf32, #tpu.memory_space<vmem>>, vector<1x32x16xf32>
    %10 = vector.shape_cast %9 : vector<1x32x16xf32> to vector<32x16xf32>
    %c1_5 = arith.constant 1 : index
    %11 = memref.load %arg1[%c1_5] : memref<32xi32, #tpu.memory_space<smem>>
    %12 = arith.index_cast %11 : i32 to index
    %c0_6 = arith.constant 0 : index
    %c0_7 = arith.constant 0 : index
    %13 = vector.load %arg2[%12, %c0_6, %c0_7] : memref<16x1x32xf32, #tpu.memory_space<vmem>>, vector<1x1x32xf32>
    %14 = vector.shape_cast %13 : vector<1x1x32xf32> to vector<1x32xf32>
    %15 = arith.index_cast %11 : i32 to index
    %c0_8 = arith.constant 0 : index
    %c0_9 = arith.constant 0 : index
    %16 = vector.load %arg3[%15, %c0_8, %c0_9] : memref<16x32x16xf32, #tpu.memory_space<vmem>>, vector<1x32x16xf32>
    %17 = vector.shape_cast %16 : vector<1x32x16xf32> to vector<32x16xf32>
    %c2_10 = arith.constant 2 : index
    %18 = memref.load %arg1[%c2_10] : memref<32xi32, #tpu.memory_space<smem>>
    %19 = arith.index_cast %18 : i32 to index
    %c0_11 = arith.constant 0 : index
    %c0_12 = arith.constant 0 : index
    %20 = vector.load %arg2[%19, %c0_11, %c0_12] : memref<16x1x32xf32, #tpu.memory_space<vmem>>, vector<1x1x32xf32>
    %21 = vector.shape_cast %20 : vector<1x1x32xf32> to vector<1x32xf32>
    %22 = arith.index_cast %18 : i32 to index
    %c0_13 = arith.constant 0 : index
    %c0_14 = arith.constant 0 : index
    %23 = vector.load %arg3[%22, %c0_13, %c0_14] : memref<16x32x16xf32, #tpu.memory_space<vmem>>, vector<1x32x16xf32>
    %24 = vector.shape_cast %23 : vector<1x32x16xf32> to vector<32x16xf32>
    %c3 = arith.constant 3 : index
    %25 = memref.load %arg1[%c3] : memref<32xi32, #tpu.memory_space<smem>>
    %26 = arith.index_cast %25 : i32 to index
    %c0_15 = arith.constant 0 : index
    %c0_16 = arith.constant 0 : index
    %27 = vector.load %arg2[%26, %c0_15, %c0_16] : memref<16x1x32xf32, #tpu.memory_space<vmem>>, vector<1x1x32xf32>
    %28 = vector.shape_cast %27 : vector<1x1x32xf32> to vector<1x32xf32>
    %29 = arith.index_cast %25 : i32 to index
    %c0_17 = arith.constant 0 : index
    %c0_18 = arith.constant 0 : index
    %30 = vector.load %arg3[%29, %c0_17, %c0_18] : memref<16x32x16xf32, #tpu.memory_space<vmem>>, vector<1x32x16xf32>
    %31 = vector.shape_cast %30 : vector<1x32x16xf32> to vector<32x16xf32>
    %32 = tpu.concatenate %7, %14, %21, %28 in 0 : vector<1x32xf32>, vector<1x32xf32>, vector<1x32xf32>, vector<1x32xf32> -> vector<4x32xf32>
    %33 = arith.mulf %32, %32 : vector<4x32xf32>
    %cst_19 = arith.constant dense<0.000000e+00> : vector<4xf32>
    %34 = vector.multi_reduction <add>, %33, %cst_19 [1] : vector<4x32xf32> to vector<4xf32>
    %35 = vector.shape_cast %34 : vector<4xf32> to vector<4x1xf32>
    %36 = math.sqrt %35 : vector<4x1xf32>
    %37 = arith.mulf %3, %3 : vector<4x32xf32>
    %cst_20 = arith.constant dense<0.000000e+00> : vector<4xf32>
    %38 = vector.multi_reduction <add>, %37, %cst_20 [1] : vector<4x32xf32> to vector<4xf32>
    %39 = vector.shape_cast %38 : vector<4xf32> to vector<4x1xf32>
    %40 = math.sqrt %39 : vector<4x1xf32>
    %41 = arith.addf %36, %40 : vector<4x1xf32>
    %42 = arith.divf %36, %41 : vector<4x1xf32>
    %43 = vector.broadcast %1 : f32 to vector<4x1xf32>
    %44 = arith.mulf %43, %42 : vector<4x1xf32>
    %45 = vector.broadcast %2 : f32 to vector<4x1xf32>
    %46 = math.powf %44, %45 : vector<4x1xf32>
    %47 = vector.broadcast %0 : f32 to vector<4x1xf32>
    %48 = arith.mulf %47, %46 : vector<4x1xf32>
    %cst_21 = arith.constant 0.000000e+00 : f32
    %cst_22 = arith.constant 1.000000e+00 : f32
    %49 = vector.broadcast %cst_21 : f32 to vector<4x1xf32>
    %50 = arith.maximumf %49, %48 : vector<4x1xf32>
    %51 = vector.broadcast %cst_22 : f32 to vector<4x1xf32>
    %52 = arith.minimumf %51, %50 : vector<4x1xf32>
    %cst_23 = arith.constant 1.000000e+00 : f32
    %53 = vector.broadcast %cst_23 : f32 to vector<4x1xf32>
    %54 = arith.subf %53, %52 : vector<4x1xf32>
    %55 = vector.broadcast %54 : vector<4x1xf32> to vector<4x32xf32>
    %56 = arith.mulf %55, %3 : vector<4x32xf32>
    %57 = vector.broadcast %52 : vector<4x1xf32> to vector<4x32xf32>
    %58 = arith.mulf %57, %32 : vector<4x32xf32>
    %59 = arith.addf %56, %58 : vector<4x32xf32>
    %60 = vector.extract_strided_slice %59 {offsets = [0, 0], sizes = [1, 32], strides = [1, 1]} : vector<4x32xf32> to vector<1x32xf32>
    %cst_24 = arith.constant dense<0.000000e+00> : vector<1x16xf32>
    %61 = tpu.matmul %60, %10, %cst_24 {dimension_numbers = #tpu.dot_dimension_numbers<[1], [0], [0], [1], [0, 0, 1, 1], [], []>, precision = #tpu.contract_precision<fp32>} : vector<1x32xf32>, vector<32x16xf32>, vector<1x16xf32> -> vector<1x16xf32>
    %62 = vector.extract_strided_slice %59 {offsets = [1, 0], sizes = [1, 32], strides = [1, 1]} : vector<4x32xf32> to vector<1x32xf32>
    %cst_25 = arith.constant dense<0.000000e+00> : vector<1x16xf32>
    %63 = tpu.matmul %62, %17, %cst_25 {dimension_numbers = #tpu.dot_dimension_numbers<[1], [0], [0], [1], [0, 0, 1, 1], [], []>, precision = #tpu.contract_precision<fp32>} : vector<1x32xf32>, vector<32x16xf32>, vector<1x16xf32> -> vector<1x16xf32>
    %64 = vector.extract_strided_slice %59 {offsets = [2, 0], sizes = [1, 32], strides = [1, 1]} : vector<4x32xf32> to vector<1x32xf32>
    %cst_26 = arith.constant dense<0.000000e+00> : vector<1x16xf32>
    %65 = tpu.matmul %64, %24, %cst_26 {dimension_numbers = #tpu.dot_dimension_numbers<[1], [0], [0], [1], [0, 0, 1, 1], [], []>, precision = #tpu.contract_precision<fp32>} : vector<1x32xf32>, vector<32x16xf32>, vector<1x16xf32> -> vector<1x16xf32>
    %66 = vector.extract_strided_slice %59 {offsets = [3, 0], sizes = [1, 32], strides = [1, 1]} : vector<4x32xf32> to vector<1x32xf32>
    %cst_27 = arith.constant dense<0.000000e+00> : vector<1x16xf32>
    %67 = tpu.matmul %66, %31, %cst_27 {dimension_numbers = #tpu.dot_dimension_numbers<[1], [0], [0], [1], [0, 0, 1, 1], [], []>, precision = #tpu.contract_precision<fp32>} : vector<1x32xf32>, vector<32x16xf32>, vector<1x16xf32> -> vector<1x16xf32>
    %68 = tpu.concatenate %61, %63, %65, %67 in 0 : vector<1x16xf32>, vector<1x16xf32>, vector<1x16xf32>, vector<1x16xf32> -> vector<4x16xf32>
    %c0_28 = arith.constant 0 : index
    %c0_29 = arith.constant 0 : index
    %c0_30 = arith.constant 0 : index
    %69 = vector.load %arg4[%c0_28, %c0_29, %c0_30] : memref<8x4x16xf32, #tpu.memory_space<vmem>>, vector<1x4x16xf32>
    %70 = vector.shape_cast %69 : vector<1x4x16xf32> to vector<4x16xf32>
    %71 = vector.shape_cast %68 : vector<4x16xf32> to vector<1x4x16xf32>
    tpu.vector_store %arg4[%c0_28, %c0_29, %c0_30], %71 {strides = array<i32>} : memref<8x4x16xf32, #tpu.memory_space<vmem>>, vector<1x4x16xf32>,
    %c4 = arith.constant 4 : index
    %72 = memref.load %arg1[%c4] : memref<32xi32, #tpu.memory_space<smem>>
    %73 = arith.index_cast %72 : i32 to index
    %c0_31 = arith.constant 0 : index
    %c0_32 = arith.constant 0 : index
    %74 = vector.load %arg2[%73, %c0_31, %c0_32] : memref<16x1x32xf32, #tpu.memory_space<vmem>>, vector<1x1x32xf32>
    %75 = vector.shape_cast %74 : vector<1x1x32xf32> to vector<1x32xf32>
    %76 = arith.index_cast %72 : i32 to index
    %c0_33 = arith.constant 0 : index
    %c0_34 = arith.constant 0 : index
    %77 = vector.load %arg3[%76, %c0_33, %c0_34] : memref<16x32x16xf32, #tpu.memory_space<vmem>>, vector<1x32x16xf32>
    %78 = vector.shape_cast %77 : vector<1x32x16xf32> to vector<32x16xf32>
    %c5 = arith.constant 5 : index
    %79 = memref.load %arg1[%c5] : memref<32xi32, #tpu.memory_space<smem>>
    %80 = arith.index_cast %79 : i32 to index
    %c0_35 = arith.constant 0 : index
    %c0_36 = arith.constant 0 : index
    %81 = vector.load %arg2[%80, %c0_35, %c0_36] : memref<16x1x32xf32, #tpu.memory_space<vmem>>, vector<1x1x32xf32>
    %82 = vector.shape_cast %81 : vector<1x1x32xf32> to vector<1x32xf32>
    %83 = arith.index_cast %79 : i32 to index
    %c0_37 = arith.constant 0 : index
    %c0_38 = arith.constant 0 : index
    %84 = vector.load %arg3[%83, %c0_37, %c0_38] : memref<16x32x16xf32, #tpu.memory_space<vmem>>, vector<1x32x16xf32>
    %85 = vector.shape_cast %84 : vector<1x32x16xf32> to vector<32x16xf32>
    %c6 = arith.constant 6 : index
    %86 = memref.load %arg1[%c6] : memref<32xi32, #tpu.memory_space<smem>>
    %87 = arith.index_cast %86 : i32 to index
    %c0_39 = arith.constant 0 : index
    %c0_40 = arith.constant 0 : index
    %88 = vector.load %arg2[%87, %c0_39, %c0_40] : memref<16x1x32xf32, #tpu.memory_space<vmem>>, vector<1x1x32xf32>
    %89 = vector.shape_cast %88 : vector<1x1x32xf32> to vector<1x32xf32>
    %90 = arith.index_cast %86 : i32 to index
    %c0_41 = arith.constant 0 : index
    %c0_42 = arith.constant 0 : index
    %91 = vector.load %arg3[%90, %c0_41, %c0_42] : memref<16x32x16xf32, #tpu.memory_space<vmem>>, vector<1x32x16xf32>
    %92 = vector.shape_cast %91 : vector<1x32x16xf32> to vector<32x16xf32>
    %c7 = arith.constant 7 : index
    %93 = memref.load %arg1[%c7] : memref<32xi32, #tpu.memory_space<smem>>
    %94 = arith.index_cast %93 : i32 to index
    %c0_43 = arith.constant 0 : index
    %c0_44 = arith.constant 0 : index
    %95 = vector.load %arg2[%94, %c0_43, %c0_44] : memref<16x1x32xf32, #tpu.memory_space<vmem>>, vector<1x1x32xf32>
    %96 = vector.shape_cast %95 : vector<1x1x32xf32> to vector<1x32xf32>
    %97 = arith.index_cast %93 : i32 to index
    %c0_45 = arith.constant 0 : index
    %c0_46 = arith.constant 0 : index
    %98 = vector.load %arg3[%97, %c0_45, %c0_46] : memref<16x32x16xf32, #tpu.memory_space<vmem>>, vector<1x32x16xf32>
    %99 = vector.shape_cast %98 : vector<1x32x16xf32> to vector<32x16xf32>
    %100 = tpu.concatenate %75, %82, %89, %96 in 0 : vector<1x32xf32>, vector<1x32xf32>, vector<1x32xf32>, vector<1x32xf32> -> vector<4x32xf32>
    %101 = arith.mulf %100, %100 : vector<4x32xf32>
    %cst_47 = arith.constant dense<0.000000e+00> : vector<4xf32>
    %102 = vector.multi_reduction <add>, %101, %cst_47 [1] : vector<4x32xf32> to vector<4xf32>
    %103 = vector.shape_cast %102 : vector<4xf32> to vector<4x1xf32>
    %104 = math.sqrt %103 : vector<4x1xf32>
    %105 = arith.mulf %59, %59 : vector<4x32xf32>
    %cst_48 = arith.constant dense<0.000000e+00> : vector<4xf32>
    %106 = vector.multi_reduction <add>, %105, %cst_48 [1] : vector<4x32xf32> to vector<4xf32>
    %107 = vector.shape_cast %106 : vector<4xf32> to vector<4x1xf32>
    %108 = math.sqrt %107 : vector<4x1xf32>
    %109 = arith.addf %104, %108 : vector<4x1xf32>
    %110 = arith.divf %104, %109 : vector<4x1xf32>
    %111 = vector.broadcast %1 : f32 to vector<4x1xf32>
    %112 = arith.mulf %111, %110 : vector<4x1xf32>
    %113 = vector.broadcast %2 : f32 to vector<4x1xf32>
    %114 = math.powf %112, %113 : vector<4x1xf32>
    %115 = vector.broadcast %0 : f32 to vector<4x1xf32>
    %116 = arith.mulf %115, %114 : vector<4x1xf32>
    %cst_49 = arith.constant 0.000000e+00 : f32
    %cst_50 = arith.constant 1.000000e+00 : f32
    %117 = vector.broadcast %cst_49 : f32 to vector<4x1xf32>
    %118 = arith.maximumf %117, %116 : vector<4x1xf32>
    %119 = vector.broadcast %cst_50 : f32 to vector<4x1xf32>
    %120 = arith.minimumf %119, %118 : vector<4x1xf32>
    %cst_51 = arith.constant 1.000000e+00 : f32
    %121 = vector.broadcast %cst_51 : f32 to vector<4x1xf32>
    %122 = arith.subf %121, %120 : vector<4x1xf32>
    %123 = vector.broadcast %122 : vector<4x1xf32> to vector<4x32xf32>
    %124 = arith.mulf %123, %59 : vector<4x32xf32>
    %125 = vector.broadcast %120 : vector<4x1xf32> to vector<4x32xf32>
    %126 = arith.mulf %125, %100 : vector<4x32xf32>
    %127 = arith.addf %124, %126 : vector<4x32xf32>
    %128 = vector.extract_strided_slice %127 {offsets = [0, 0], sizes = [1, 32], strides = [1, 1]} : vector<4x32xf32> to vector<1x32xf32>
    %cst_52 = arith.constant dense<0.000000e+00> : vector<1x16xf32>
    %129 = tpu.matmul %128, %78, %cst_52 {dimension_numbers = #tpu.dot_dimension_numbers<[1], [0], [0], [1], [0, 0, 1, 1], [], []>, precision = #tpu.contract_precision<fp32>} : vector<1x32xf32>, vector<32x16xf32>, vector<1x16xf32> -> vector<1x16xf32>
    %130 = vector.extract_strided_slice %127 {offsets = [1, 0], sizes = [1, 32], strides = [1, 1]} : vector<4x32xf32> to vector<1x32xf32>
    %cst_53 = arith.constant dense<0.000000e+00> : vector<1x16xf32>
    %131 = tpu.matmul %130, %85, %cst_53 {dimension_numbers = #tpu.dot_dimension_numbers<[1], [0], [0], [1], [0, 0, 1, 1], [], []>, precision = #tpu.contract_precision<fp32>} : vector<1x32xf32>, vector<32x16xf32>, vector<1x16xf32> -> vector<1x16xf32>
    %132 = vector.extract_strided_slice %127 {offsets = [2, 0], sizes = [1, 32], strides = [1, 1]} : vector<4x32xf32> to vector<1x32xf32>
    %cst_54 = arith.constant dense<0.000000e+00> : vector<1x16xf32>
    %133 = tpu.matmul %132, %92, %cst_54 {dimension_numbers = #tpu.dot_dimension_numbers<[1], [0], [0], [1], [0, 0, 1, 1], [], []>, precision = #tpu.contract_precision<fp32>} : vector<1x32xf32>, vector<32x16xf32>, vector<1x16xf32> -> vector<1x16xf32>
    %134 = vector.extract_strided_slice %127 {offsets = [3, 0], sizes = [1, 32], strides = [1, 1]} : vector<4x32xf32> to vector<1x32xf32>
    %cst_55 = arith.constant dense<0.000000e+00> : vector<1x16xf32>
    %135 = tpu.matmul %134, %99, %cst_55 {dimension_numbers = #tpu.dot_dimension_numbers<[1], [0], [0], [1], [0, 0, 1, 1], [], []>, precision = #tpu.contract_precision<fp32>} : vector<1x32xf32>, vector<32x16xf32>, vector<1x16xf32> -> vector<1x16xf32>
    %136 = tpu.concatenate %129, %131, %133, %135 in 0 : vector<1x16xf32>, vector<1x16xf32>, vector<1x16xf32>, vector<1x16xf32> -> vector<4x16xf32>
    %c1_56 = arith.constant 1 : index
    %c0_57 = arith.constant 0 : index
    %c0_58 = arith.constant 0 : index
    %137 = vector.load %arg4[%c1_56, %c0_57, %c0_58] : memref<8x4x16xf32, #tpu.memory_space<vmem>>, vector<1x4x16xf32>
    %138 = vector.shape_cast %137 : vector<1x4x16xf32> to vector<4x16xf32>
    %139 = vector.shape_cast %136 : vector<4x16xf32> to vector<1x4x16xf32>
    tpu.vector_store %arg4[%c1_56, %c0_57, %c0_58], %139 {strides = array<i32>} : memref<8x4x16xf32, #tpu.memory_space<vmem>>, vector<1x4x16xf32>,
    %c8 = arith.constant 8 : index
    %140 = memref.load %arg1[%c8] : memref<32xi32, #tpu.memory_space<smem>>
    %141 = arith.index_cast %140 : i32 to index
    %c0_59 = arith.constant 0 : index
    %c0_60 = arith.constant 0 : index
    %142 = vector.load %arg2[%141, %c0_59, %c0_60] : memref<16x1x32xf32, #tpu.memory_space<vmem>>, vector<1x1x32xf32>
    %143 = vector.shape_cast %142 : vector<1x1x32xf32> to vector<1x32xf32>
    %144 = arith.index_cast %140 : i32 to index
    %c0_61 = arith.constant 0 : index
    %c0_62 = arith.constant 0 : index
    %145 = vector.load %arg3[%144, %c0_61, %c0_62] : memref<16x32x16xf32, #tpu.memory_space<vmem>>, vector<1x32x16xf32>
    %146 = vector.shape_cast %145 : vector<1x32x16xf32> to vector<32x16xf32>
    %c9 = arith.constant 9 : index
    %147 = memref.load %arg1[%c9] : memref<32xi32, #tpu.memory_space<smem>>
    %148 = arith.index_cast %147 : i32 to index
    %c0_63 = arith.constant 0 : index
    %c0_64 = arith.constant 0 : index
    %149 = vector.load %arg2[%148, %c0_63, %c0_64] : memref<16x1x32xf32, #tpu.memory_space<vmem>>, vector<1x1x32xf32>
    %150 = vector.shape_cast %149 : vector<1x1x32xf32> to vector<1x32xf32>
    %151 = arith.index_cast %147 : i32 to index
    %c0_65 = arith.constant 0 : index
    %c0_66 = arith.constant 0 : index
    %152 = vector.load %arg3[%151, %c0_65, %c0_66] : memref<16x32x16xf32, #tpu.memory_space<vmem>>, vector<1x32x16xf32>
    %153 = vector.shape_cast %152 : vector<1x32x16xf32> to vector<32x16xf32>
    %c10 = arith.constant 10 : index
    %154 = memref.load %arg1[%c10] : memref<32xi32, #tpu.memory_space<smem>>
    %155 = arith.index_cast %154 : i32 to index
    %c0_67 = arith.constant 0 : index
    %c0_68 = arith.constant 0 : index
    %156 = vector.load %arg2[%155, %c0_67, %c0_68] : memref<16x1x32xf32, #tpu.memory_space<vmem>>, vector<1x1x32xf32>
    %157 = vector.shape_cast %156 : vector<1x1x32xf32> to vector<1x32xf32>
    %158 = arith.index_cast %154 : i32 to index
    %c0_69 = arith.constant 0 : index
    %c0_70 = arith.constant 0 : index
    %159 = vector.load %arg3[%158, %c0_69, %c0_70] : memref<16x32x16xf32, #tpu.memory_space<vmem>>, vector<1x32x16xf32>
    %160 = vector.shape_cast %159 : vector<1x32x16xf32> to vector<32x16xf32>
    %c11 = arith.constant 11 : index
    %161 = memref.load %arg1[%c11] : memref<32xi32, #tpu.memory_space<smem>>
    %162 = arith.index_cast %161 : i32 to index
    %c0_71 = arith.constant 0 : index
    %c0_72 = arith.constant 0 : index
    %163 = vector.load %arg2[%162, %c0_71, %c0_72] : memref<16x1x32xf32, #tpu.memory_space<vmem>>, vector<1x1x32xf32>
    %164 = vector.shape_cast %163 : vector<1x1x32xf32> to vector<1x32xf32>
    %165 = arith.index_cast %161 : i32 to index
    %c0_73 = arith.constant 0 : index
    %c0_74 = arith.constant 0 : index
    %166 = vector.load %arg3[%165, %c0_73, %c0_74] : memref<16x32x16xf32, #tpu.memory_space<vmem>>, vector<1x32x16xf32>
    %167 = vector.shape_cast %166 : vector<1x32x16xf32> to vector<32x16xf32>
    %168 = tpu.concatenate %143, %150, %157, %164 in 0 : vector<1x32xf32>, vector<1x32xf32>, vector<1x32xf32>, vector<1x32xf32> -> vector<4x32xf32>
    %169 = arith.mulf %168, %168 : vector<4x32xf32>
    %cst_75 = arith.constant dense<0.000000e+00> : vector<4xf32>
    %170 = vector.multi_reduction <add>, %169, %cst_75 [1] : vector<4x32xf32> to vector<4xf32>
    %171 = vector.shape_cast %170 : vector<4xf32> to vector<4x1xf32>
    %172 = math.sqrt %171 : vector<4x1xf32>
    %173 = arith.mulf %127, %127 : vector<4x32xf32>
    %cst_76 = arith.constant dense<0.000000e+00> : vector<4xf32>
    %174 = vector.multi_reduction <add>, %173, %cst_76 [1] : vector<4x32xf32> to vector<4xf32>
    %175 = vector.shape_cast %174 : vector<4xf32> to vector<4x1xf32>
    %176 = math.sqrt %175 : vector<4x1xf32>
    %177 = arith.addf %172, %176 : vector<4x1xf32>
    %178 = arith.divf %172, %177 : vector<4x1xf32>
    %179 = vector.broadcast %1 : f32 to vector<4x1xf32>
    %180 = arith.mulf %179, %178 : vector<4x1xf32>
    %181 = vector.broadcast %2 : f32 to vector<4x1xf32>
    %182 = math.powf %180, %181 : vector<4x1xf32>
    %183 = vector.broadcast %0 : f32 to vector<4x1xf32>
    %184 = arith.mulf %183, %182 : vector<4x1xf32>
    %cst_77 = arith.constant 0.000000e+00 : f32
    %cst_78 = arith.constant 1.000000e+00 : f32
    %185 = vector.broadcast %cst_77 : f32 to vector<4x1xf32>
    %186 = arith.maximumf %185, %184 : vector<4x1xf32>
    %187 = vector.broadcast %cst_78 : f32 to vector<4x1xf32>
    %188 = arith.minimumf %187, %186 : vector<4x1xf32>
    %cst_79 = arith.constant 1.000000e+00 : f32
    %189 = vector.broadcast %cst_79 : f32 to vector<4x1xf32>
    %190 = arith.subf %189, %188 : vector<4x1xf32>
    %191 = vector.broadcast %190 : vector<4x1xf32> to vector<4x32xf32>
    %192 = arith.mulf %191, %127 : vector<4x32xf32>
    %193 = vector.broadcast %188 : vector<4x1xf32> to vector<4x32xf32>
    %194 = arith.mulf %193, %168 : vector<4x32xf32>
    %195 = arith.addf %192, %194 : vector<4x32xf32>
    %196 = vector.extract_strided_slice %195 {offsets = [0, 0], sizes = [1, 32], strides = [1, 1]} : vector<4x32xf32> to vector<1x32xf32>
    %cst_80 = arith.constant dense<0.000000e+00> : vector<1x16xf32>
    %197 = tpu.matmul %196, %146, %cst_80 {dimension_numbers = #tpu.dot_dimension_numbers<[1], [0], [0], [1], [0, 0, 1, 1], [], []>, precision = #tpu.contract_precision<fp32>} : vector<1x32xf32>, vector<32x16xf32>, vector<1x16xf32> -> vector<1x16xf32>
    %198 = vector.extract_strided_slice %195 {offsets = [1, 0], sizes = [1, 32], strides = [1, 1]} : vector<4x32xf32> to vector<1x32xf32>
    %cst_81 = arith.constant dense<0.000000e+00> : vector<1x16xf32>
    %199 = tpu.matmul %198, %153, %cst_81 {dimension_numbers = #tpu.dot_dimension_numbers<[1], [0], [0], [1], [0, 0, 1, 1], [], []>, precision = #tpu.contract_precision<fp32>} : vector<1x32xf32>, vector<32x16xf32>, vector<1x16xf32> -> vector<1x16xf32>
    %200 = vector.extract_strided_slice %195 {offsets = [2, 0], sizes = [1, 32], strides = [1, 1]} : vector<4x32xf32> to vector<1x32xf32>
    %cst_82 = arith.constant dense<0.000000e+00> : vector<1x16xf32>
    %201 = tpu.matmul %200, %160, %cst_82 {dimension_numbers = #tpu.dot_dimension_numbers<[1], [0], [0], [1], [0, 0, 1, 1], [], []>, precision = #tpu.contract_precision<fp32>} : vector<1x32xf32>, vector<32x16xf32>, vector<1x16xf32> -> vector<1x16xf32>
    %202 = vector.extract_strided_slice %195 {offsets = [3, 0], sizes = [1, 32], strides = [1, 1]} : vector<4x32xf32> to vector<1x32xf32>
    %cst_83 = arith.constant dense<0.000000e+00> : vector<1x16xf32>
    %203 = tpu.matmul %202, %167, %cst_83 {dimension_numbers = #tpu.dot_dimension_numbers<[1], [0], [0], [1], [0, 0, 1, 1], [], []>, precision = #tpu.contract_precision<fp32>} : vector<1x32xf32>, vector<32x16xf32>, vector<1x16xf32> -> vector<1x16xf32>
    %204 = tpu.concatenate %197, %199, %201, %203 in 0 : vector<1x16xf32>, vector<1x16xf32>, vector<1x16xf32>, vector<1x16xf32> -> vector<4x16xf32>
    %c2_84 = arith.constant 2 : index
    %c0_85 = arith.constant 0 : index
    %c0_86 = arith.constant 0 : index
    %205 = vector.load %arg4[%c2_84, %c0_85, %c0_86] : memref<8x4x16xf32, #tpu.memory_space<vmem>>, vector<1x4x16xf32>
    %206 = vector.shape_cast %205 : vector<1x4x16xf32> to vector<4x16xf32>
    %207 = vector.shape_cast %204 : vector<4x16xf32> to vector<1x4x16xf32>
    tpu.vector_store %arg4[%c2_84, %c0_85, %c0_86], %207 {strides = array<i32>} : memref<8x4x16xf32, #tpu.memory_space<vmem>>, vector<1x4x16xf32>,
    %c12 = arith.constant 12 : index
    %208 = memref.load %arg1[%c12] : memref<32xi32, #tpu.memory_space<smem>>
    %209 = arith.index_cast %208 : i32 to index
    %c0_87 = arith.constant 0 : index
    %c0_88 = arith.constant 0 : index
    %210 = vector.load %arg2[%209, %c0_87, %c0_88] : memref<16x1x32xf32, #tpu.memory_space<vmem>>, vector<1x1x32xf32>
    %211 = vector.shape_cast %210 : vector<1x1x32xf32> to vector<1x32xf32>
    %212 = arith.index_cast %208 : i32 to index
    %c0_89 = arith.constant 0 : index
    %c0_90 = arith.constant 0 : index
    %213 = vector.load %arg3[%212, %c0_89, %c0_90] : memref<16x32x16xf32, #tpu.memory_space<vmem>>, vector<1x32x16xf32>
    %214 = vector.shape_cast %213 : vector<1x32x16xf32> to vector<32x16xf32>
    %c13 = arith.constant 13 : index
    %215 = memref.load %arg1[%c13] : memref<32xi32, #tpu.memory_space<smem>>
    %216 = arith.index_cast %215 : i32 to index
    %c0_91 = arith.constant 0 : index
    %c0_92 = arith.constant 0 : index
    %217 = vector.load %arg2[%216, %c0_91, %c0_92] : memref<16x1x32xf32, #tpu.memory_space<vmem>>, vector<1x1x32xf32>
    %218 = vector.shape_cast %217 : vector<1x1x32xf32> to vector<1x32xf32>
    %219 = arith.index_cast %215 : i32 to index
    %c0_93 = arith.constant 0 : index
    %c0_94 = arith.constant 0 : index
    %220 = vector.load %arg3[%219, %c0_93, %c0_94] : memref<16x32x16xf32, #tpu.memory_space<vmem>>, vector<1x32x16xf32>
    %221 = vector.shape_cast %220 : vector<1x32x16xf32> to vector<32x16xf32>
    %c14 = arith.constant 14 : index
    %222 = memref.load %arg1[%c14] : memref<32xi32, #tpu.memory_space<smem>>
    %223 = arith.index_cast %222 : i32 to index
    %c0_95 = arith.constant 0 : index
    %c0_96 = arith.constant 0 : index
    %224 = vector.load %arg2[%223, %c0_95, %c0_96] : memref<16x1x32xf32, #tpu.memory_space<vmem>>, vector<1x1x32xf32>
    %225 = vector.shape_cast %224 : vector<1x1x32xf32> to vector<1x32xf32>
    %226 = arith.index_cast %222 : i32 to index
    %c0_97 = arith.constant 0 : index
    %c0_98 = arith.constant 0 : index
    %227 = vector.load %arg3[%226, %c0_97, %c0_98] : memref<16x32x16xf32, #tpu.memory_space<vmem>>, vector<1x32x16xf32>
    %228 = vector.shape_cast %227 : vector<1x32x16xf32> to vector<32x16xf32>
    %c15 = arith.constant 15 : index
    %229 = memref.load %arg1[%c15] : memref<32xi32, #tpu.memory_space<smem>>
    %230 = arith.index_cast %229 : i32 to index
    %c0_99 = arith.constant 0 : index
    %c0_100 = arith.constant 0 : index
    %231 = vector.load %arg2[%230, %c0_99, %c0_100] : memref<16x1x32xf32, #tpu.memory_space<vmem>>, vector<1x1x32xf32>
    %232 = vector.shape_cast %231 : vector<1x1x32xf32> to vector<1x32xf32>
    %233 = arith.index_cast %229 : i32 to index
    %c0_101 = arith.constant 0 : index
    %c0_102 = arith.constant 0 : index
    %234 = vector.load %arg3[%233, %c0_101, %c0_102] : memref<16x32x16xf32, #tpu.memory_space<vmem>>, vector<1x32x16xf32>
    %235 = vector.shape_cast %234 : vector<1x32x16xf32> to vector<32x16xf32>
    %236 = tpu.concatenate %211, %218, %225, %232 in 0 : vector<1x32xf32>, vector<1x32xf32>, vector<1x32xf32>, vector<1x32xf32> -> vector<4x32xf32>
    %237 = arith.mulf %236, %236 : vector<4x32xf32>
    %cst_103 = arith.constant dense<0.000000e+00> : vector<4xf32>
    %238 = vector.multi_reduction <add>, %237, %cst_103 [1] : vector<4x32xf32> to vector<4xf32>
    %239 = vector.shape_cast %238 : vector<4xf32> to vector<4x1xf32>
    %240 = math.sqrt %239 : vector<4x1xf32>
    %241 = arith.mulf %195, %195 : vector<4x32xf32>
    %cst_104 = arith.constant dense<0.000000e+00> : vector<4xf32>
    %242 = vector.multi_reduction <add>, %241, %cst_104 [1] : vector<4x32xf32> to vector<4xf32>
    %243 = vector.shape_cast %242 : vector<4xf32> to vector<4x1xf32>
    %244 = math.sqrt %243 : vector<4x1xf32>
    %245 = arith.addf %240, %244 : vector<4x1xf32>
    %246 = arith.divf %240, %245 : vector<4x1xf32>
    %247 = vector.broadcast %1 : f32 to vector<4x1xf32>
    %248 = arith.mulf %247, %246 : vector<4x1xf32>
    %249 = vector.broadcast %2 : f32 to vector<4x1xf32>
    %250 = math.powf %248, %249 : vector<4x1xf32>
    %251 = vector.broadcast %0 : f32 to vector<4x1xf32>
    %252 = arith.mulf %251, %250 : vector<4x1xf32>
    %cst_105 = arith.constant 0.000000e+00 : f32
    %cst_106 = arith.constant 1.000000e+00 : f32
    %253 = vector.broadcast %cst_105 : f32 to vector<4x1xf32>
    %254 = arith.maximumf %253, %252 : vector<4x1xf32>
    %255 = vector.broadcast %cst_106 : f32 to vector<4x1xf32>
    %256 = arith.minimumf %255, %254 : vector<4x1xf32>
    %cst_107 = arith.constant 1.000000e+00 : f32
    %257 = vector.broadcast %cst_107 : f32 to vector<4x1xf32>
    %258 = arith.subf %257, %256 : vector<4x1xf32>
    %259 = vector.broadcast %258 : vector<4x1xf32> to vector<4x32xf32>
    %260 = arith.mulf %259, %195 : vector<4x32xf32>
    %261 = vector.broadcast %256 : vector<4x1xf32> to vector<4x32xf32>
    %262 = arith.mulf %261, %236 : vector<4x32xf32>
    %263 = arith.addf %260, %262 : vector<4x32xf32>
    %264 = vector.extract_strided_slice %263 {offsets = [0, 0], sizes = [1, 32], strides = [1, 1]} : vector<4x32xf32> to vector<1x32xf32>
    %cst_108 = arith.constant dense<0.000000e+00> : vector<1x16xf32>
    %265 = tpu.matmul %264, %214, %cst_108 {dimension_numbers = #tpu.dot_dimension_numbers<[1], [0], [0], [1], [0, 0, 1, 1], [], []>, precision = #tpu.contract_precision<fp32>} : vector<1x32xf32>, vector<32x16xf32>, vector<1x16xf32> -> vector<1x16xf32>
    %266 = vector.extract_strided_slice %263 {offsets = [1, 0], sizes = [1, 32], strides = [1, 1]} : vector<4x32xf32> to vector<1x32xf32>
    %cst_109 = arith.constant dense<0.000000e+00> : vector<1x16xf32>
    %267 = tpu.matmul %266, %221, %cst_109 {dimension_numbers = #tpu.dot_dimension_numbers<[1], [0], [0], [1], [0, 0, 1, 1], [], []>, precision = #tpu.contract_precision<fp32>} : vector<1x32xf32>, vector<32x16xf32>, vector<1x16xf32> -> vector<1x16xf32>
    %268 = vector.extract_strided_slice %263 {offsets = [2, 0], sizes = [1, 32], strides = [1, 1]} : vector<4x32xf32> to vector<1x32xf32>
    %cst_110 = arith.constant dense<0.000000e+00> : vector<1x16xf32>
    %269 = tpu.matmul %268, %228, %cst_110 {dimension_numbers = #tpu.dot_dimension_numbers<[1], [0], [0], [1], [0, 0, 1, 1], [], []>, precision = #tpu.contract_precision<fp32>} : vector<1x32xf32>, vector<32x16xf32>, vector<1x16xf32> -> vector<1x16xf32>
    %270 = vector.extract_strided_slice %263 {offsets = [3, 0], sizes = [1, 32], strides = [1, 1]} : vector<4x32xf32> to vector<1x32xf32>
    %cst_111 = arith.constant dense<0.000000e+00> : vector<1x16xf32>
    %271 = tpu.matmul %270, %235, %cst_111 {dimension_numbers = #tpu.dot_dimension_numbers<[1], [0], [0], [1], [0, 0, 1, 1], [], []>, precision = #tpu.contract_precision<fp32>} : vector<1x32xf32>, vector<32x16xf32>, vector<1x16xf32> -> vector<1x16xf32>
    %272 = tpu.concatenate %265, %267, %269, %271 in 0 : vector<1x16xf32>, vector<1x16xf32>, vector<1x16xf32>, vector<1x16xf32> -> vector<4x16xf32>
    %c3_112 = arith.constant 3 : index
    %c0_113 = arith.constant 0 : index
    %c0_114 = arith.constant 0 : index
    %273 = vector.load %arg4[%c3_112, %c0_113, %c0_114] : memref<8x4x16xf32, #tpu.memory_space<vmem>>, vector<1x4x16xf32>
    %274 = vector.shape_cast %273 : vector<1x4x16xf32> to vector<4x16xf32>
    %275 = vector.shape_cast %272 : vector<4x16xf32> to vector<1x4x16xf32>
    tpu.vector_store %arg4[%c3_112, %c0_113, %c0_114], %275 {strides = array<i32>} : memref<8x4x16xf32, #tpu.memory_space<vmem>>, vector<1x4x16xf32>,
    %c16 = arith.constant 16 : index
    %276 = memref.load %arg1[%c16] : memref<32xi32, #tpu.memory_space<smem>>
    %277 = arith.index_cast %276 : i32 to index
    %c0_115 = arith.constant 0 : index
    %c0_116 = arith.constant 0 : index
    %278 = vector.load %arg2[%277, %c0_115, %c0_116] : memref<16x1x32xf32, #tpu.memory_space<vmem>>, vector<1x1x32xf32>
    %279 = vector.shape_cast %278 : vector<1x1x32xf32> to vector<1x32xf32>
    %280 = arith.index_cast %276 : i32 to index
    %c0_117 = arith.constant 0 : index
    %c0_118 = arith.constant 0 : index
    %281 = vector.load %arg3[%280, %c0_117, %c0_118] : memref<16x32x16xf32, #tpu.memory_space<vmem>>, vector<1x32x16xf32>
    %282 = vector.shape_cast %281 : vector<1x32x16xf32> to vector<32x16xf32>
    %c17 = arith.constant 17 : index
    %283 = memref.load %arg1[%c17] : memref<32xi32, #tpu.memory_space<smem>>
    %284 = arith.index_cast %283 : i32 to index
    %c0_119 = arith.constant 0 : index
    %c0_120 = arith.constant 0 : index
    %285 = vector.load %arg2[%284, %c0_119, %c0_120] : memref<16x1x32xf32, #tpu.memory_space<vmem>>, vector<1x1x32xf32>
    %286 = vector.shape_cast %285 : vector<1x1x32xf32> to vector<1x32xf32>
    %287 = arith.index_cast %283 : i32 to index
    %c0_121 = arith.constant 0 : index
    %c0_122 = arith.constant 0 : index
    %288 = vector.load %arg3[%287, %c0_121, %c0_122] : memref<16x32x16xf32, #tpu.memory_space<vmem>>, vector<1x32x16xf32>
    %289 = vector.shape_cast %288 : vector<1x32x16xf32> to vector<32x16xf32>
    %c18 = arith.constant 18 : index
    %290 = memref.load %arg1[%c18] : memref<32xi32, #tpu.memory_space<smem>>
    %291 = arith.index_cast %290 : i32 to index
    %c0_123 = arith.constant 0 : index
    %c0_124 = arith.constant 0 : index
    %292 = vector.load %arg2[%291, %c0_123, %c0_124] : memref<16x1x32xf32, #tpu.memory_space<vmem>>, vector<1x1x32xf32>
    %293 = vector.shape_cast %292 : vector<1x1x32xf32> to vector<1x32xf32>
    %294 = arith.index_cast %290 : i32 to index
    %c0_125 = arith.constant 0 : index
    %c0_126 = arith.constant 0 : index
    %295 = vector.load %arg3[%294, %c0_125, %c0_126] : memref<16x32x16xf32, #tpu.memory_space<vmem>>, vector<1x32x16xf32>
    %296 = vector.shape_cast %295 : vector<1x32x16xf32> to vector<32x16xf32>
    %c19 = arith.constant 19 : index
    %297 = memref.load %arg1[%c19] : memref<32xi32, #tpu.memory_space<smem>>
    %298 = arith.index_cast %297 : i32 to index
    %c0_127 = arith.constant 0 : index
    %c0_128 = arith.constant 0 : index
    %299 = vector.load %arg2[%298, %c0_127, %c0_128] : memref<16x1x32xf32, #tpu.memory_space<vmem>>, vector<1x1x32xf32>
    %300 = vector.shape_cast %299 : vector<1x1x32xf32> to vector<1x32xf32>
    %301 = arith.index_cast %297 : i32 to index
    %c0_129 = arith.constant 0 : index
    %c0_130 = arith.constant 0 : index
    %302 = vector.load %arg3[%301, %c0_129, %c0_130] : memref<16x32x16xf32, #tpu.memory_space<vmem>>, vector<1x32x16xf32>
    %303 = vector.shape_cast %302 : vector<1x32x16xf32> to vector<32x16xf32>
    %304 = tpu.concatenate %279, %286, %293, %300 in 0 : vector<1x32xf32>, vector<1x32xf32>, vector<1x32xf32>, vector<1x32xf32> -> vector<4x32xf32>
    %305 = arith.mulf %304, %304 : vector<4x32xf32>
    %cst_131 = arith.constant dense<0.000000e+00> : vector<4xf32>
    %306 = vector.multi_reduction <add>, %305, %cst_131 [1] : vector<4x32xf32> to vector<4xf32>
    %307 = vector.shape_cast %306 : vector<4xf32> to vector<4x1xf32>
    %308 = math.sqrt %307 : vector<4x1xf32>
    %309 = arith.mulf %263, %263 : vector<4x32xf32>
    %cst_132 = arith.constant dense<0.000000e+00> : vector<4xf32>
    %310 = vector.multi_reduction <add>, %309, %cst_132 [1] : vector<4x32xf32> to vector<4xf32>
    %311 = vector.shape_cast %310 : vector<4xf32> to vector<4x1xf32>
    %312 = math.sqrt %311 : vector<4x1xf32>
    %313 = arith.addf %308, %312 : vector<4x1xf32>
    %314 = arith.divf %308, %313 : vector<4x1xf32>
    %315 = vector.broadcast %1 : f32 to vector<4x1xf32>
    %316 = arith.mulf %315, %314 : vector<4x1xf32>
    %317 = vector.broadcast %2 : f32 to vector<4x1xf32>
    %318 = math.powf %316, %317 : vector<4x1xf32>
    %319 = vector.broadcast %0 : f32 to vector<4x1xf32>
    %320 = arith.mulf %319, %318 : vector<4x1xf32>
    %cst_133 = arith.constant 0.000000e+00 : f32
    %cst_134 = arith.constant 1.000000e+00 : f32
    %321 = vector.broadcast %cst_133 : f32 to vector<4x1xf32>
    %322 = arith.maximumf %321, %320 : vector<4x1xf32>
    %323 = vector.broadcast %cst_134 : f32 to vector<4x1xf32>
    %324 = arith.minimumf %323, %322 : vector<4x1xf32>
    %cst_135 = arith.constant 1.000000e+00 : f32
    %325 = vector.broadcast %cst_135 : f32 to vector<4x1xf32>
    %326 = arith.subf %325, %324 : vector<4x1xf32>
    %327 = vector.broadcast %326 : vector<4x1xf32> to vector<4x32xf32>
    %328 = arith.mulf %327, %263 : vector<4x32xf32>
    %329 = vector.broadcast %324 : vector<4x1xf32> to vector<4x32xf32>
    %330 = arith.mulf %329, %304 : vector<4x32xf32>
    %331 = arith.addf %328, %330 : vector<4x32xf32>
    %332 = vector.extract_strided_slice %331 {offsets = [0, 0], sizes = [1, 32], strides = [1, 1]} : vector<4x32xf32> to vector<1x32xf32>
    %cst_136 = arith.constant dense<0.000000e+00> : vector<1x16xf32>
    %333 = tpu.matmul %332, %282, %cst_136 {dimension_numbers = #tpu.dot_dimension_numbers<[1], [0], [0], [1], [0, 0, 1, 1], [], []>, precision = #tpu.contract_precision<fp32>} : vector<1x32xf32>, vector<32x16xf32>, vector<1x16xf32> -> vector<1x16xf32>
    %334 = vector.extract_strided_slice %331 {offsets = [1, 0], sizes = [1, 32], strides = [1, 1]} : vector<4x32xf32> to vector<1x32xf32>
    %cst_137 = arith.constant dense<0.000000e+00> : vector<1x16xf32>
    %335 = tpu.matmul %334, %289, %cst_137 {dimension_numbers = #tpu.dot_dimension_numbers<[1], [0], [0], [1], [0, 0, 1, 1], [], []>, precision = #tpu.contract_precision<fp32>} : vector<1x32xf32>, vector<32x16xf32>, vector<1x16xf32> -> vector<1x16xf32>
    %336 = vector.extract_strided_slice %331 {offsets = [2, 0], sizes = [1, 32], strides = [1, 1]} : vector<4x32xf32> to vector<1x32xf32>
    %cst_138 = arith.constant dense<0.000000e+00> : vector<1x16xf32>
    %337 = tpu.matmul %336, %296, %cst_138 {dimension_numbers = #tpu.dot_dimension_numbers<[1], [0], [0], [1], [0, 0, 1, 1], [], []>, precision = #tpu.contract_precision<fp32>} : vector<1x32xf32>, vector<32x16xf32>, vector<1x16xf32> -> vector<1x16xf32>
    %338 = vector.extract_strided_slice %331 {offsets = [3, 0], sizes = [1, 32], strides = [1, 1]} : vector<4x32xf32> to vector<1x32xf32>
    %cst_139 = arith.constant dense<0.000000e+00> : vector<1x16xf32>
    %339 = tpu.matmul %338, %303, %cst_139 {dimension_numbers = #tpu.dot_dimension_numbers<[1], [0], [0], [1], [0, 0, 1, 1], [], []>, precision = #tpu.contract_precision<fp32>} : vector<1x32xf32>, vector<32x16xf32>, vector<1x16xf32> -> vector<1x16xf32>
    %340 = tpu.concatenate %333, %335, %337, %339 in 0 : vector<1x16xf32>, vector<1x16xf32>, vector<1x16xf32>, vector<1x16xf32> -> vector<4x16xf32>
    %c4_140 = arith.constant 4 : index
    %c0_141 = arith.constant 0 : index
    %c0_142 = arith.constant 0 : index
    %341 = vector.load %arg4[%c4_140, %c0_141, %c0_142] : memref<8x4x16xf32, #tpu.memory_space<vmem>>, vector<1x4x16xf32>
    %342 = vector.shape_cast %341 : vector<1x4x16xf32> to vector<4x16xf32>
    %343 = vector.shape_cast %340 : vector<4x16xf32> to vector<1x4x16xf32>
    tpu.vector_store %arg4[%c4_140, %c0_141, %c0_142], %343 {strides = array<i32>} : memref<8x4x16xf32, #tpu.memory_space<vmem>>, vector<1x4x16xf32>,
    %c20 = arith.constant 20 : index
    %344 = memref.load %arg1[%c20] : memref<32xi32, #tpu.memory_space<smem>>
    %345 = arith.index_cast %344 : i32 to index
    %c0_143 = arith.constant 0 : index
    %c0_144 = arith.constant 0 : index
    %346 = vector.load %arg2[%345, %c0_143, %c0_144] : memref<16x1x32xf32, #tpu.memory_space<vmem>>, vector<1x1x32xf32>
    %347 = vector.shape_cast %346 : vector<1x1x32xf32> to vector<1x32xf32>
    %348 = arith.index_cast %344 : i32 to index
    %c0_145 = arith.constant 0 : index
    %c0_146 = arith.constant 0 : index
    %349 = vector.load %arg3[%348, %c0_145, %c0_146] : memref<16x32x16xf32, #tpu.memory_space<vmem>>, vector<1x32x16xf32>
    %350 = vector.shape_cast %349 : vector<1x32x16xf32> to vector<32x16xf32>
    %c21 = arith.constant 21 : index
    %351 = memref.load %arg1[%c21] : memref<32xi32, #tpu.memory_space<smem>>
    %352 = arith.index_cast %351 : i32 to index
    %c0_147 = arith.constant 0 : index
    %c0_148 = arith.constant 0 : index
    %353 = vector.load %arg2[%352, %c0_147, %c0_148] : memref<16x1x32xf32, #tpu.memory_space<vmem>>, vector<1x1x32xf32>
    %354 = vector.shape_cast %353 : vector<1x1x32xf32> to vector<1x32xf32>
    %355 = arith.index_cast %351 : i32 to index
    %c0_149 = arith.constant 0 : index
    %c0_150 = arith.constant 0 : index
    %356 = vector.load %arg3[%355, %c0_149, %c0_150] : memref<16x32x16xf32, #tpu.memory_space<vmem>>, vector<1x32x16xf32>
    %357 = vector.shape_cast %356 : vector<1x32x16xf32> to vector<32x16xf32>
    %c22 = arith.constant 22 : index
    %358 = memref.load %arg1[%c22] : memref<32xi32, #tpu.memory_space<smem>>
    %359 = arith.index_cast %358 : i32 to index
    %c0_151 = arith.constant 0 : index
    %c0_152 = arith.constant 0 : index
    %360 = vector.load %arg2[%359, %c0_151, %c0_152] : memref<16x1x32xf32, #tpu.memory_space<vmem>>, vector<1x1x32xf32>
    %361 = vector.shape_cast %360 : vector<1x1x32xf32> to vector<1x32xf32>
    %362 = arith.index_cast %358 : i32 to index
    %c0_153 = arith.constant 0 : index
    %c0_154 = arith.constant 0 : index
    %363 = vector.load %arg3[%362, %c0_153, %c0_154] : memref<16x32x16xf32, #tpu.memory_space<vmem>>, vector<1x32x16xf32>
    %364 = vector.shape_cast %363 : vector<1x32x16xf32> to vector<32x16xf32>
    %c23 = arith.constant 23 : index
    %365 = memref.load %arg1[%c23] : memref<32xi32, #tpu.memory_space<smem>>
    %366 = arith.index_cast %365 : i32 to index
    %c0_155 = arith.constant 0 : index
    %c0_156 = arith.constant 0 : index
    %367 = vector.load %arg2[%366, %c0_155, %c0_156] : memref<16x1x32xf32, #tpu.memory_space<vmem>>, vector<1x1x32xf32>
    %368 = vector.shape_cast %367 : vector<1x1x32xf32> to vector<1x32xf32>
    %369 = arith.index_cast %365 : i32 to index
    %c0_157 = arith.constant 0 : index
    %c0_158 = arith.constant 0 : index
    %370 = vector.load %arg3[%369, %c0_157, %c0_158] : memref<16x32x16xf32, #tpu.memory_space<vmem>>, vector<1x32x16xf32>
    %371 = vector.shape_cast %370 : vector<1x32x16xf32> to vector<32x16xf32>
    %372 = tpu.concatenate %347, %354, %361, %368 in 0 : vector<1x32xf32>, vector<1x32xf32>, vector<1x32xf32>, vector<1x32xf32> -> vector<4x32xf32>
    %373 = arith.mulf %372, %372 : vector<4x32xf32>
    %cst_159 = arith.constant dense<0.000000e+00> : vector<4xf32>
    %374 = vector.multi_reduction <add>, %373, %cst_159 [1] : vector<4x32xf32> to vector<4xf32>
    %375 = vector.shape_cast %374 : vector<4xf32> to vector<4x1xf32>
    %376 = math.sqrt %375 : vector<4x1xf32>
    %377 = arith.mulf %331, %331 : vector<4x32xf32>
    %cst_160 = arith.constant dense<0.000000e+00> : vector<4xf32>
    %378 = vector.multi_reduction <add>, %377, %cst_160 [1] : vector<4x32xf32> to vector<4xf32>
    %379 = vector.shape_cast %378 : vector<4xf32> to vector<4x1xf32>
    %380 = math.sqrt %379 : vector<4x1xf32>
    %381 = arith.addf %376, %380 : vector<4x1xf32>
    %382 = arith.divf %376, %381 : vector<4x1xf32>
    %383 = vector.broadcast %1 : f32 to vector<4x1xf32>
    %384 = arith.mulf %383, %382 : vector<4x1xf32>
    %385 = vector.broadcast %2 : f32 to vector<4x1xf32>
    %386 = math.powf %384, %385 : vector<4x1xf32>
    %387 = vector.broadcast %0 : f32 to vector<4x1xf32>
    %388 = arith.mulf %387, %386 : vector<4x1xf32>
    %cst_161 = arith.constant 0.000000e+00 : f32
    %cst_162 = arith.constant 1.000000e+00 : f32
    %389 = vector.broadcast %cst_161 : f32 to vector<4x1xf32>
    %390 = arith.maximumf %389, %388 : vector<4x1xf32>
    %391 = vector.broadcast %cst_162 : f32 to vector<4x1xf32>
    %392 = arith.minimumf %391, %390 : vector<4x1xf32>
    %cst_163 = arith.constant 1.000000e+00 : f32
    %393 = vector.broadcast %cst_163 : f32 to vector<4x1xf32>
    %394 = arith.subf %393, %392 : vector<4x1xf32>
    %395 = vector.broadcast %394 : vector<4x1xf32> to vector<4x32xf32>
    %396 = arith.mulf %395, %331 : vector<4x32xf32>
    %397 = vector.broadcast %392 : vector<4x1xf32> to vector<4x32xf32>
    %398 = arith.mulf %397, %372 : vector<4x32xf32>
    %399 = arith.addf %396, %398 : vector<4x32xf32>
    %400 = vector.extract_strided_slice %399 {offsets = [0, 0], sizes = [1, 32], strides = [1, 1]} : vector<4x32xf32> to vector<1x32xf32>
    %cst_164 = arith.constant dense<0.000000e+00> : vector<1x16xf32>
    %401 = tpu.matmul %400, %350, %cst_164 {dimension_numbers = #tpu.dot_dimension_numbers<[1], [0], [0], [1], [0, 0, 1, 1], [], []>, precision = #tpu.contract_precision<fp32>} : vector<1x32xf32>, vector<32x16xf32>, vector<1x16xf32> -> vector<1x16xf32>
    %402 = vector.extract_strided_slice %399 {offsets = [1, 0], sizes = [1, 32], strides = [1, 1]} : vector<4x32xf32> to vector<1x32xf32>
    %cst_165 = arith.constant dense<0.000000e+00> : vector<1x16xf32>
    %403 = tpu.matmul %402, %357, %cst_165 {dimension_numbers = #tpu.dot_dimension_numbers<[1], [0], [0], [1], [0, 0, 1, 1], [], []>, precision = #tpu.contract_precision<fp32>} : vector<1x32xf32>, vector<32x16xf32>, vector<1x16xf32> -> vector<1x16xf32>
    %404 = vector.extract_strided_slice %399 {offsets = [2, 0], sizes = [1, 32], strides = [1, 1]} : vector<4x32xf32> to vector<1x32xf32>
    %cst_166 = arith.constant dense<0.000000e+00> : vector<1x16xf32>
    %405 = tpu.matmul %404, %364, %cst_166 {dimension_numbers = #tpu.dot_dimension_numbers<[1], [0], [0], [1], [0, 0, 1, 1], [], []>, precision = #tpu.contract_precision<fp32>} : vector<1x32xf32>, vector<32x16xf32>, vector<1x16xf32> -> vector<1x16xf32>
    %406 = vector.extract_strided_slice %399 {offsets = [3, 0], sizes = [1, 32], strides = [1, 1]} : vector<4x32xf32> to vector<1x32xf32>
    %cst_167 = arith.constant dense<0.000000e+00> : vector<1x16xf32>
    %407 = tpu.matmul %406, %371, %cst_167 {dimension_numbers = #tpu.dot_dimension_numbers<[1], [0], [0], [1], [0, 0, 1, 1], [], []>, precision = #tpu.contract_precision<fp32>} : vector<1x32xf32>, vector<32x16xf32>, vector<1x16xf32> -> vector<1x16xf32>
    %408 = tpu.concatenate %401, %403, %405, %407 in 0 : vector<1x16xf32>, vector<1x16xf32>, vector<1x16xf32>, vector<1x16xf32> -> vector<4x16xf32>
    %c5_168 = arith.constant 5 : index
    %c0_169 = arith.constant 0 : index
    %c0_170 = arith.constant 0 : index
    %409 = vector.load %arg4[%c5_168, %c0_169, %c0_170] : memref<8x4x16xf32, #tpu.memory_space<vmem>>, vector<1x4x16xf32>
    %410 = vector.shape_cast %409 : vector<1x4x16xf32> to vector<4x16xf32>
    %411 = vector.shape_cast %408 : vector<4x16xf32> to vector<1x4x16xf32>
    tpu.vector_store %arg4[%c5_168, %c0_169, %c0_170], %411 {strides = array<i32>} : memref<8x4x16xf32, #tpu.memory_space<vmem>>, vector<1x4x16xf32>,
    %c24 = arith.constant 24 : index
    %412 = memref.load %arg1[%c24] : memref<32xi32, #tpu.memory_space<smem>>
    %413 = arith.index_cast %412 : i32 to index
    %c0_171 = arith.constant 0 : index
    %c0_172 = arith.constant 0 : index
    %414 = vector.load %arg2[%413, %c0_171, %c0_172] : memref<16x1x32xf32, #tpu.memory_space<vmem>>, vector<1x1x32xf32>
    %415 = vector.shape_cast %414 : vector<1x1x32xf32> to vector<1x32xf32>
    %416 = arith.index_cast %412 : i32 to index
    %c0_173 = arith.constant 0 : index
    %c0_174 = arith.constant 0 : index
    %417 = vector.load %arg3[%416, %c0_173, %c0_174] : memref<16x32x16xf32, #tpu.memory_space<vmem>>, vector<1x32x16xf32>
    %418 = vector.shape_cast %417 : vector<1x32x16xf32> to vector<32x16xf32>
    %c25 = arith.constant 25 : index
    %419 = memref.load %arg1[%c25] : memref<32xi32, #tpu.memory_space<smem>>
    %420 = arith.index_cast %419 : i32 to index
    %c0_175 = arith.constant 0 : index
    %c0_176 = arith.constant 0 : index
    %421 = vector.load %arg2[%420, %c0_175, %c0_176] : memref<16x1x32xf32, #tpu.memory_space<vmem>>, vector<1x1x32xf32>
    %422 = vector.shape_cast %421 : vector<1x1x32xf32> to vector<1x32xf32>
    %423 = arith.index_cast %419 : i32 to index
    %c0_177 = arith.constant 0 : index
    %c0_178 = arith.constant 0 : index
    %424 = vector.load %arg3[%423, %c0_177, %c0_178] : memref<16x32x16xf32, #tpu.memory_space<vmem>>, vector<1x32x16xf32>
    %425 = vector.shape_cast %424 : vector<1x32x16xf32> to vector<32x16xf32>
    %c26 = arith.constant 26 : index
    %426 = memref.load %arg1[%c26] : memref<32xi32, #tpu.memory_space<smem>>
    %427 = arith.index_cast %426 : i32 to index
    %c0_179 = arith.constant 0 : index
    %c0_180 = arith.constant 0 : index
    %428 = vector.load %arg2[%427, %c0_179, %c0_180] : memref<16x1x32xf32, #tpu.memory_space<vmem>>, vector<1x1x32xf32>
    %429 = vector.shape_cast %428 : vector<1x1x32xf32> to vector<1x32xf32>
    %430 = arith.index_cast %426 : i32 to index
    %c0_181 = arith.constant 0 : index
    %c0_182 = arith.constant 0 : index
    %431 = vector.load %arg3[%430, %c0_181, %c0_182] : memref<16x32x16xf32, #tpu.memory_space<vmem>>, vector<1x32x16xf32>
    %432 = vector.shape_cast %431 : vector<1x32x16xf32> to vector<32x16xf32>
    %c27 = arith.constant 27 : index
    %433 = memref.load %arg1[%c27] : memref<32xi32, #tpu.memory_space<smem>>
    %434 = arith.index_cast %433 : i32 to index
    %c0_183 = arith.constant 0 : index
    %c0_184 = arith.constant 0 : index
    %435 = vector.load %arg2[%434, %c0_183, %c0_184] : memref<16x1x32xf32, #tpu.memory_space<vmem>>, vector<1x1x32xf32>
    %436 = vector.shape_cast %435 : vector<1x1x32xf32> to vector<1x32xf32>
    %437 = arith.index_cast %433 : i32 to index
    %c0_185 = arith.constant 0 : index
    %c0_186 = arith.constant 0 : index
    %438 = vector.load %arg3[%437, %c0_185, %c0_186] : memref<16x32x16xf32, #tpu.memory_space<vmem>>, vector<1x32x16xf32>
    %439 = vector.shape_cast %438 : vector<1x32x16xf32> to vector<32x16xf32>
    %440 = tpu.concatenate %415, %422, %429, %436 in 0 : vector<1x32xf32>, vector<1x32xf32>, vector<1x32xf32>, vector<1x32xf32> -> vector<4x32xf32>
    %441 = arith.mulf %440, %440 : vector<4x32xf32>
    %cst_187 = arith.constant dense<0.000000e+00> : vector<4xf32>
    %442 = vector.multi_reduction <add>, %441, %cst_187 [1] : vector<4x32xf32> to vector<4xf32>
    %443 = vector.shape_cast %442 : vector<4xf32> to vector<4x1xf32>
    %444 = math.sqrt %443 : vector<4x1xf32>
    %445 = arith.mulf %399, %399 : vector<4x32xf32>
    %cst_188 = arith.constant dense<0.000000e+00> : vector<4xf32>
    %446 = vector.multi_reduction <add>, %445, %cst_188 [1] : vector<4x32xf32> to vector<4xf32>
    %447 = vector.shape_cast %446 : vector<4xf32> to vector<4x1xf32>
    %448 = math.sqrt %447 : vector<4x1xf32>
    %449 = arith.addf %444, %448 : vector<4x1xf32>
    %450 = arith.divf %444, %449 : vector<4x1xf32>
    %451 = vector.broadcast %1 : f32 to vector<4x1xf32>
    %452 = arith.mulf %451, %450 : vector<4x1xf32>
    %453 = vector.broadcast %2 : f32 to vector<4x1xf32>
    %454 = math.powf %452, %453 : vector<4x1xf32>
    %455 = vector.broadcast %0 : f32 to vector<4x1xf32>
    %456 = arith.mulf %455, %454 : vector<4x1xf32>
    %cst_189 = arith.constant 0.000000e+00 : f32
    %cst_190 = arith.constant 1.000000e+00 : f32
    %457 = vector.broadcast %cst_189 : f32 to vector<4x1xf32>
    %458 = arith.maximumf %457, %456 : vector<4x1xf32>
    %459 = vector.broadcast %cst_190 : f32 to vector<4x1xf32>
    %460 = arith.minimumf %459, %458 : vector<4x1xf32>
    %cst_191 = arith.constant 1.000000e+00 : f32
    %461 = vector.broadcast %cst_191 : f32 to vector<4x1xf32>
    %462 = arith.subf %461, %460 : vector<4x1xf32>
    %463 = vector.broadcast %462 : vector<4x1xf32> to vector<4x32xf32>
    %464 = arith.mulf %463, %399 : vector<4x32xf32>
    %465 = vector.broadcast %460 : vector<4x1xf32> to vector<4x32xf32>
    %466 = arith.mulf %465, %440 : vector<4x32xf32>
    %467 = arith.addf %464, %466 : vector<4x32xf32>
    %468 = vector.extract_strided_slice %467 {offsets = [0, 0], sizes = [1, 32], strides = [1, 1]} : vector<4x32xf32> to vector<1x32xf32>
    %cst_192 = arith.constant dense<0.000000e+00> : vector<1x16xf32>
    %469 = tpu.matmul %468, %418, %cst_192 {dimension_numbers = #tpu.dot_dimension_numbers<[1], [0], [0], [1], [0, 0, 1, 1], [], []>, precision = #tpu.contract_precision<fp32>} : vector<1x32xf32>, vector<32x16xf32>, vector<1x16xf32> -> vector<1x16xf32>
    %470 = vector.extract_strided_slice %467 {offsets = [1, 0], sizes = [1, 32], strides = [1, 1]} : vector<4x32xf32> to vector<1x32xf32>
    %cst_193 = arith.constant dense<0.000000e+00> : vector<1x16xf32>
    %471 = tpu.matmul %470, %425, %cst_193 {dimension_numbers = #tpu.dot_dimension_numbers<[1], [0], [0], [1], [0, 0, 1, 1], [], []>, precision = #tpu.contract_precision<fp32>} : vector<1x32xf32>, vector<32x16xf32>, vector<1x16xf32> -> vector<1x16xf32>
    %472 = vector.extract_strided_slice %467 {offsets = [2, 0], sizes = [1, 32], strides = [1, 1]} : vector<4x32xf32> to vector<1x32xf32>
    %cst_194 = arith.constant dense<0.000000e+00> : vector<1x16xf32>
    %473 = tpu.matmul %472, %432, %cst_194 {dimension_numbers = #tpu.dot_dimension_numbers<[1], [0], [0], [1], [0, 0, 1, 1], [], []>, precision = #tpu.contract_precision<fp32>} : vector<1x32xf32>, vector<32x16xf32>, vector<1x16xf32> -> vector<1x16xf32>
    %474 = vector.extract_strided_slice %467 {offsets = [3, 0], sizes = [1, 32], strides = [1, 1]} : vector<4x32xf32> to vector<1x32xf32>
    %cst_195 = arith.constant dense<0.000000e+00> : vector<1x16xf32>
    %475 = tpu.matmul %474, %439, %cst_195 {dimension_numbers = #tpu.dot_dimension_numbers<[1], [0], [0], [1], [0, 0, 1, 1], [], []>, precision = #tpu.contract_precision<fp32>} : vector<1x32xf32>, vector<32x16xf32>, vector<1x16xf32> -> vector<1x16xf32>
    %476 = tpu.concatenate %469, %471, %473, %475 in 0 : vector<1x16xf32>, vector<1x16xf32>, vector<1x16xf32>, vector<1x16xf32> -> vector<4x16xf32>
    %c6_196 = arith.constant 6 : index
    %c0_197 = arith.constant 0 : index
    %c0_198 = arith.constant 0 : index
    %477 = vector.load %arg4[%c6_196, %c0_197, %c0_198] : memref<8x4x16xf32, #tpu.memory_space<vmem>>, vector<1x4x16xf32>
    %478 = vector.shape_cast %477 : vector<1x4x16xf32> to vector<4x16xf32>
    %479 = vector.shape_cast %476 : vector<4x16xf32> to vector<1x4x16xf32>
    tpu.vector_store %arg4[%c6_196, %c0_197, %c0_198], %479 {strides = array<i32>} : memref<8x4x16xf32, #tpu.memory_space<vmem>>, vector<1x4x16xf32>,
    %c28 = arith.constant 28 : index
    %480 = memref.load %arg1[%c28] : memref<32xi32, #tpu.memory_space<smem>>
    %481 = arith.index_cast %480 : i32 to index
    %c0_199 = arith.constant 0 : index
    %c0_200 = arith.constant 0 : index
    %482 = vector.load %arg2[%481, %c0_199, %c0_200] : memref<16x1x32xf32, #tpu.memory_space<vmem>>, vector<1x1x32xf32>
    %483 = vector.shape_cast %482 : vector<1x1x32xf32> to vector<1x32xf32>
    %484 = arith.index_cast %480 : i32 to index
    %c0_201 = arith.constant 0 : index
    %c0_202 = arith.constant 0 : index
    %485 = vector.load %arg3[%484, %c0_201, %c0_202] : memref<16x32x16xf32, #tpu.memory_space<vmem>>, vector<1x32x16xf32>
    %486 = vector.shape_cast %485 : vector<1x32x16xf32> to vector<32x16xf32>
    %c29 = arith.constant 29 : index
    %487 = memref.load %arg1[%c29] : memref<32xi32, #tpu.memory_space<smem>>
    %488 = arith.index_cast %487 : i32 to index
    %c0_203 = arith.constant 0 : index
    %c0_204 = arith.constant 0 : index
    %489 = vector.load %arg2[%488, %c0_203, %c0_204] : memref<16x1x32xf32, #tpu.memory_space<vmem>>, vector<1x1x32xf32>
    %490 = vector.shape_cast %489 : vector<1x1x32xf32> to vector<1x32xf32>
    %491 = arith.index_cast %487 : i32 to index
    %c0_205 = arith.constant 0 : index
    %c0_206 = arith.constant 0 : index
    %492 = vector.load %arg3[%491, %c0_205, %c0_206] : memref<16x32x16xf32, #tpu.memory_space<vmem>>, vector<1x32x16xf32>
    %493 = vector.shape_cast %492 : vector<1x32x16xf32> to vector<32x16xf32>
    %c30 = arith.constant 30 : index
    %494 = memref.load %arg1[%c30] : memref<32xi32, #tpu.memory_space<smem>>
    %495 = arith.index_cast %494 : i32 to index
    %c0_207 = arith.constant 0 : index
    %c0_208 = arith.constant 0 : index
    %496 = vector.load %arg2[%495, %c0_207, %c0_208] : memref<16x1x32xf32, #tpu.memory_space<vmem>>, vector<1x1x32xf32>
    %497 = vector.shape_cast %496 : vector<1x1x32xf32> to vector<1x32xf32>
    %498 = arith.index_cast %494 : i32 to index
    %c0_209 = arith.constant 0 : index
    %c0_210 = arith.constant 0 : index
    %499 = vector.load %arg3[%498, %c0_209, %c0_210] : memref<16x32x16xf32, #tpu.memory_space<vmem>>, vector<1x32x16xf32>
    %500 = vector.shape_cast %499 : vector<1x32x16xf32> to vector<32x16xf32>
    %c31 = arith.constant 31 : index
    %501 = memref.load %arg1[%c31] : memref<32xi32, #tpu.memory_space<smem>>
    %502 = arith.index_cast %501 : i32 to index
    %c0_211 = arith.constant 0 : index
    %c0_212 = arith.constant 0 : index
    %503 = vector.load %arg2[%502, %c0_211, %c0_212] : memref<16x1x32xf32, #tpu.memory_space<vmem>>, vector<1x1x32xf32>
    %504 = vector.shape_cast %503 : vector<1x1x32xf32> to vector<1x32xf32>
    %505 = arith.index_cast %501 : i32 to index
    %c0_213 = arith.constant 0 : index
    %c0_214 = arith.constant 0 : index
    %506 = vector.load %arg3[%505, %c0_213, %c0_214] : memref<16x32x16xf32, #tpu.memory_space<vmem>>, vector<1x32x16xf32>
    %507 = vector.shape_cast %506 : vector<1x32x16xf32> to vector<32x16xf32>
    %508 = tpu.concatenate %483, %490, %497, %504 in 0 : vector<1x32xf32>, vector<1x32xf32>, vector<1x32xf32>, vector<1x32xf32> -> vector<4x32xf32>
    %509 = arith.mulf %508, %508 : vector<4x32xf32>
    %cst_215 = arith.constant dense<0.000000e+00> : vector<4xf32>
    %510 = vector.multi_reduction <add>, %509, %cst_215 [1] : vector<4x32xf32> to vector<4xf32>
    %511 = vector.shape_cast %510 : vector<4xf32> to vector<4x1xf32>
    %512 = math.sqrt %511 : vector<4x1xf32>
    %513 = arith.mulf %467, %467 : vector<4x32xf32>
    %cst_216 = arith.constant dense<0.000000e+00> : vector<4xf32>
    %514 = vector.multi_reduction <add>, %513, %cst_216 [1] : vector<4x32xf32> to vector<4xf32>
    %515 = vector.shape_cast %514 : vector<4xf32> to vector<4x1xf32>
    %516 = math.sqrt %515 : vector<4x1xf32>
    %517 = arith.addf %512, %516 : vector<4x1xf32>
    %518 = arith.divf %512, %517 : vector<4x1xf32>
    %519 = vector.broadcast %1 : f32 to vector<4x1xf32>
    %520 = arith.mulf %519, %518 : vector<4x1xf32>
    %521 = vector.broadcast %2 : f32 to vector<4x1xf32>
    %522 = math.powf %520, %521 : vector<4x1xf32>
    %523 = vector.broadcast %0 : f32 to vector<4x1xf32>
    %524 = arith.mulf %523, %522 : vector<4x1xf32>
    %cst_217 = arith.constant 0.000000e+00 : f32
    %cst_218 = arith.constant 1.000000e+00 : f32
    %525 = vector.broadcast %cst_217 : f32 to vector<4x1xf32>
    %526 = arith.maximumf %525, %524 : vector<4x1xf32>
    %527 = vector.broadcast %cst_218 : f32 to vector<4x1xf32>
    %528 = arith.minimumf %527, %526 : vector<4x1xf32>
    %cst_219 = arith.constant 1.000000e+00 : f32
    %529 = vector.broadcast %cst_219 : f32 to vector<4x1xf32>
    %530 = arith.subf %529, %528 : vector<4x1xf32>
    %531 = vector.broadcast %530 : vector<4x1xf32> to vector<4x32xf32>
    %532 = arith.mulf %531, %467 : vector<4x32xf32>
    %533 = vector.broadcast %528 : vector<4x1xf32> to vector<4x32xf32>
    %534 = arith.mulf %533, %508 : vector<4x32xf32>
    %535 = arith.addf %532, %534 : vector<4x32xf32>
    %536 = vector.extract_strided_slice %535 {offsets = [0, 0], sizes = [1, 32], strides = [1, 1]} : vector<4x32xf32> to vector<1x32xf32>
    %cst_220 = arith.constant dense<0.000000e+00> : vector<1x16xf32>
    %537 = tpu.matmul %536, %486, %cst_220 {dimension_numbers = #tpu.dot_dimension_numbers<[1], [0], [0], [1], [0, 0, 1, 1], [], []>, precision = #tpu.contract_precision<fp32>} : vector<1x32xf32>, vector<32x16xf32>, vector<1x16xf32> -> vector<1x16xf32>
    %538 = vector.extract_strided_slice %535 {offsets = [1, 0], sizes = [1, 32], strides = [1, 1]} : vector<4x32xf32> to vector<1x32xf32>
    %cst_221 = arith.constant dense<0.000000e+00> : vector<1x16xf32>
    %539 = tpu.matmul %538, %493, %cst_221 {dimension_numbers = #tpu.dot_dimension_numbers<[1], [0], [0], [1], [0, 0, 1, 1], [], []>, precision = #tpu.contract_precision<fp32>} : vector<1x32xf32>, vector<32x16xf32>, vector<1x16xf32> -> vector<1x16xf32>
    %540 = vector.extract_strided_slice %535 {offsets = [2, 0], sizes = [1, 32], strides = [1, 1]} : vector<4x32xf32> to vector<1x32xf32>
    %cst_222 = arith.constant dense<0.000000e+00> : vector<1x16xf32>
    %541 = tpu.matmul %540, %500, %cst_222 {dimension_numbers = #tpu.dot_dimension_numbers<[1], [0], [0], [1], [0, 0, 1, 1], [], []>, precision = #tpu.contract_precision<fp32>} : vector<1x32xf32>, vector<32x16xf32>, vector<1x16xf32> -> vector<1x16xf32>
    %542 = vector.extract_strided_slice %535 {offsets = [3, 0], sizes = [1, 32], strides = [1, 1]} : vector<4x32xf32> to vector<1x32xf32>
    %cst_223 = arith.constant dense<0.000000e+00> : vector<1x16xf32>
    %543 = tpu.matmul %542, %507, %cst_223 {dimension_numbers = #tpu.dot_dimension_numbers<[1], [0], [0], [1], [0, 0, 1, 1], [], []>, precision = #tpu.contract_precision<fp32>} : vector<1x32xf32>, vector<32x16xf32>, vector<1x16xf32> -> vector<1x16xf32>
    %544 = tpu.concatenate %537, %539, %541, %543 in 0 : vector<1x16xf32>, vector<1x16xf32>, vector<1x16xf32>, vector<1x16xf32> -> vector<4x16xf32>
    %c7_224 = arith.constant 7 : index
    %c0_225 = arith.constant 0 : index
    %c0_226 = arith.constant 0 : index
    %545 = vector.load %arg4[%c7_224, %c0_225, %c0_226] : memref<8x4x16xf32, #tpu.memory_space<vmem>>, vector<1x4x16xf32>
    %546 = vector.shape_cast %545 : vector<1x4x16xf32> to vector<4x16xf32>
    %547 = vector.shape_cast %544 : vector<4x16xf32> to vector<1x4x16xf32>
    tpu.vector_store %arg4[%c7_224, %c0_225, %c0_226], %547 {strides = array<i32>} : memref<8x4x16xf32, #tpu.memory_space<vmem>>, vector<1x4x16xf32>,
    %c0_227 = arith.constant 0 : index
    %c0_228 = arith.constant 0 : index
    %548 = vector.load %arg5[%c0_227, %c0_228] : memref<4x32xf32, #tpu.memory_space<vmem>>, vector<4x32xf32>
    tpu.vector_store %arg5[%c0_227, %c0_228], %535 {strides = array<i32>} : memref<4x32xf32, #tpu.memory_space<vmem>>, vector<4x32xf32>,
    return
  }
}

</mosaic_0001>

<bundles_post_ra>
// kernel: tpu_custom_call.1
= control target key start
LH: loop header
LB: loop body
LE: loop exit
PB: predicated region body
PF: predicated region fallthrough
CT: control target
= control target key end

     0   :  { %11 = vsyncpa [#allocation4], 0  ;;  %s11510_s0 = inlined_call_operand.vmem [shape: f32[3], index: 0, kind: input, shape index: {}]   ;;  %s11511_s1 = inlined_call_operand.vmem [shape: s32[32], index: 1, kind: input, shape index: {}]   ;;  %s11512_s2 = inlined_call_operand.vmem [shape: f32[16,1,32], index: 2, kind: input, shape index: {}]   ;;  %s11513_s3 = inlined_call_operand.vmem [shape: f32[16,32,16], index: 3, kind: input, shape index: {}]   ;;  %s11514_s4 = inlined_call_operand.hbm [shape: f32[8,4,16], index: 4, kind: output, shape index: {0}]   ;;  %s11515_s5 = inlined_call_operand.hbm [shape: f32[4,32], index: 5, kind: output, shape index: {1}]  }
   0x1   :  { %12 = vsyncpa [#allocation6], 0 }
   0x2   :  { %13 = vsyncpa [#allocation3], 0 }
   0x3   :  { %14 = vsyncpa [#allocation9], 0  ;;  %s20_s20 = sshll.u32 %s11510_s0, 4  ;;  %s29_s23 = sshll.u32 %s11511_s1, 4  ;;  %s21_s20 = int_to_ptr.vmem [resolvable:$true] %s20_s20  ;;  %s30_s23 = int_to_ptr.vmem [resolvable:$true] %s29_s23 }
   0x4   :  { %s8206_s24 = smov [#allocation2]   ;;  %s8207_s25 = smov [#allocation5]  }
   0x5   :  { %23 = dma.vmem_to_smem %s21_s20, 16, %s8206_s24, [#allocation4]  }
   0x6   :  { %32 = dma.vmem_to_smem %s30_s23, 16, %s8207_s25, [#allocation6]  }
   0x7   :  { %8198 = dma.done.wait [#allocation4], 16  }
   0x8   :  { %8199 = vsyncadd [#allocation4], 4294967280 }
   0x9   :  { %8200 = dma.done.wait [#allocation6], 16  }
   0xa   :  { %8201 = vsyncadd [#allocation6], 4294967280 }
   0xb   :  { %45 = sfence }
   0xc   :  { %s8251_s26 = sld [smem:[#allocation5]]  ;;  %vm11520_vm0 = vcmask 1040384   ;;  %vm11519_vm1 = vcmask 1041408   ;;  %vm11518_vm2 = vcmask 1042432   ;;  %vm101_vm3 = vcmask 257024  }
   0xd   :  { %s8253_s27 = sld [smem:[#allocation5 + $0x1]]  ;;  %v8208_v9 = vmov 0.0  }
   0xe   :  { %s8255_s0 = sld [smem:[#allocation5 + $0x2]] }
   0xf   :  { %s8257_s1 = sld [smem:[#allocation5 + $0x3]] }
  0x10   :  { %s8283_s15 = sld [smem:[#allocation5 + $0x5]] }
  0x11   :  { %s8285_s16 = sld [smem:[#allocation5 + $0x6]] }
  0x12   :  { %s50_s30 = scalar_lea.vmem %s11512_s2, %s8251_s26  ;;  %s8287_s17 = sld [smem:[#allocation5 + $0x7]] }
  0x13   :  { %v51_v0 = vld [vmem:[%s50_s30] sm:$0x1]  ;;  %s59_s8 = scalar_lea.vmem %s11512_s2, %s8253_s27  ;;  %s8301_s29 = sld [smem:[#allocation5 + $0x4]] }
  0x14   :  { %s68_s11 = scalar_lea.vmem %s11512_s2, %s8255_s0  ;;  %v8038_v1 = vld [vmem:[%s59_s8] ss:$0 sm:$0xff]  ;;  %s7158_s30 = sshll.u32 %s8251_s26, 5 }
  0x15   :  { %s77_s14 = scalar_lea.vmem %s11512_s2, %s8257_s1  ;;  %v8039_v2 = vld [vmem:[%s68_s11] ss:$0 sm:$0xff]  ;;  %v95_v4 = vsel %vm11520_vm0, %v51_v0, %v8038_v1  ;;  %s53_s11 = scalar_lea.vmem %s11513_s3, %s7158_s30 }
  0x16   :  { %v8040_v3 = vld [vmem:[%s77_s14] ss:$0 sm:$0xff]  ;;  %v97_v5 = vsel %vm11519_vm1, %v95_v4, %v8039_v2  ;;  %s936_s20 = scalar_lea.vmem %s11512_s2, %s8283_s15  ;;  %v57_v29 = vld [vmem:[%s53_s11 + $0x18] sm:$0xff]  ;;  %v56_v30 = vld [vmem:[%s53_s11 + $0x10] sm:$0xff]  ;;  %s7156_s26 = sld [smem:[#allocation2 + $0x1]] }
  0x17   :  { %v8278_v6 = vsel %vm11518_vm2, %v97_v5, %v8040_v3  ;;  %s945_s23 = scalar_lea.vmem %s11512_s2, %s8285_s16  ;;  %v8041_v25 = vld [vmem:[%s936_s20] ss:$0 sm:$0xff]  ;;  %v175_v33 = vand.u32 4294901760, %v57_v29  ;;  %v177_v34 = vand.u32 4294901760, %v56_v30  ;;  %v55_v35 = vld [vmem:[%s53_s11 + $0x8] sm:$0xff]  ;;  %s7157_s12 = sld [smem:[#allocation2 + $0x2]] }
  0x18   :  { %v100_v7 = vmul.f32 %v8278_v6, %v8278_v6  ;;  %s954_s28 = scalar_lea.vmem %s11512_s2, %s8287_s17  ;;  %v8042_v26 = vld [vmem:[%s945_s23] ss:$0 sm:$0xff]  ;;  %v179_v39 = vand.u32 4294901760, %v55_v35  ;;  %s7160_s13 = sshll.u32 %s8253_s27, 5 }
  0x19   :  { %s927_s8 = scalar_lea.vmem %s11512_s2, %s8301_s29  ;;  %v8043_v28 = vld [vmem:[%s954_s28] ss:$0 sm:$0xff]  ;;  %v205_v42 = vsub.f32 %v57_v29, %v175_v33  ;;  %v211_v43 = vsub.f32 %v56_v30, %v177_v34  ;;  %276 = vmatpush.msra.mxu3 %v175_v33  ;;  %176 = vmatpush.msra.mxu0 %v175_v33  ;;  %s8369_s19 = scalar_lea.vmem %s11513_s3, %s7160_s13 }
  0x1a   :  { %v102_v8 = vsel %vm101_vm3, %v100_v7, 0.0  ;;  %v928_v24 = vld [vmem:[%s927_s8] sm:$0x1]  ;;  %v217_v46 = vsub.f32 %v55_v35, %v179_v39  ;;  %s8426_s27 = sld [smem:[#allocation2]]  ;;  %s7162_s20 = sshll.u32 %s8255_s0, 5 }
  0x1b   :  { %103 = vadd.xlane.f32.xlu0 %v102_v8  ;;  %v971_v32 = vsel %vm11520_vm0, %v928_v24, %v8041_v25  ;;  %v54_v36 = vld [vmem:[%s53_s11] sm:$0xff]  ;;  %v206_v50 = vand.u32 4294901760, %v205_v42  ;;  %v212_v51 = vand.u32 4294901760, %v211_v43  ;;  %247 = vmatpush.msra.mxu2 %v205_v42  ;;  %s71_s22 = scalar_lea.vmem %s11513_s3, %s7162_s20  ;;  %s7164_s23 = sshll.u32 %s8257_s1, 5 }
  0x1c   :  { %v972_v38 = vsel %vm11519_vm1, %v971_v32, %v8042_v26  ;;  %v8313_v40 = vand.u32 4294901760, %v54_v36  ;;  %278 = vmatpush.msra.mxu3 %v177_v34  ;;  %v218_v54 = vand.u32 4294901760, %v217_v46  ;;  %178 = vmatpush.msra.mxu0 %v177_v34  ;;  %s8551_s25 = scalar_lea.vmem %s11513_s3, %s7164_s23  ;;  %s8699_s28 = sld [smem:[#allocation5 + $0x9]] }
  0x1d   :  { %v8316_v41 = vsel %vm11518_vm2, %v972_v38, %v8043_v28  ;;  %v207_v57 = vsub.f32 %v205_v42, %v206_v50  ;;  %v213_v58 = vsub.f32 %v211_v43, %v212_v51  ;;  %250 = vmatpush.msra.mxu2 %v211_v43  ;;  %s8701_s30 = sld [smem:[#allocation5 + $0xa]] }
  0x1e   :  { %v974_v45 = vmul.f32 %v8316_v41, %v8316_v41  ;;  %v223_v47 = vsub.f32 %v54_v36, %v8313_v40  ;;  %v219_v60 = vsub.f32 %v217_v46, %v218_v54  ;;  %280 = vmatpush.msra.mxu3 %v179_v39  ;;  %180 = vmatpush.msra.mxu0 %v179_v39  ;;  %s8703_s6 = sld [smem:[#allocation5 + $0xb]] }
  0x1f   :  { %v208_v61 = vand.u32 4294901760, %v207_v57  ;;  %v214_v62 = vand.u32 4294901760, %v213_v58  ;;  %253 = vmatpush.msra.mxu2 %v217_v46  ;;  %s8729_s18 = sld [smem:[#allocation5 + $0x8]] }
  0x20   :  { %v975_v53 = vsel %vm101_vm3, %v974_v45, 0.0  ;;  %v224_v55 = vand.u32 4294901760, %v223_v47  ;;  %282 = vmatpush.msra.mxu3 %v8313_v40  ;;  %182 = vmatpush.msra.mxu0 %v8313_v40  ;;  %v220_v0 = vand.u32 4294901760, %v219_v60  ;;  %s9112_s20 = sld [smem:[#allocation5 + $0xd]] }
  0x21   :  { %976 = vadd.xlane.f32.xlu1 %v975_v53  ;;  %209 = vmatpush.msra.mxu1 %v208_v61  ;;  %s9116_s21 = sld [smem:[#allocation5 + $0xf]] }
  0x22   :  { %v225_v63 = vsub.f32 %v223_v47, %v224_v55  ;;  %256 = vmatpush.msra.mxu2 %v223_v47  ;;  %305 = vmatpush.msrb.mxu0 %v206_v50  ;;  %s1807_s9 = scalar_lea.vmem %s11512_s2, %s8699_s28  ;;  %s9142_s10 = sld [smem:[#allocation5 + $0xc]] }
  0x23   :  { %117 = vadd.xlane.f32.xlu0 %v8208_v9  ;;  %215 = vmatpush.msra.mxu1 %v214_v62  ;;  %s9548_s24 = sld [smem:[#allocation5 + $0x10]] }
  0x24   :  { %v226_v1 = vand.u32 4294901760, %v225_v63  ;;  %309 = vmatpush.msrb.mxu0 %v212_v51  ;;  %s1825_s14 = scalar_lea.vmem %s11512_s2, %s8703_s6  ;;  %s9928_s7 = sld [smem:[#allocation5 + $0x17]] }
  0x25   :  { %221 = vmatpush.msra.mxu1 %v220_v0  ;;  %v8209_v0 = vmov 2139095040   ;;  %s1798_s0 = scalar_lea.vmem %s11512_s2, %s8729_s18  ;;  %s7174_s11 = sshll.u32 %s8729_s18, 5 }
  0x26   :  { %313 = vmatpush.msrb.mxu0 %v218_v54 }
  0x27   :  { %227 = vmatpush.msra.mxu1 %v226_v1 }
  0x28   :  { %317 = vmatpush.msrb.mxu0 %v224_v55  ;;  %s7182_s1 = sshll.u32 %s9142_s10, 5 }
  0x29   :  { %336 = vmatpush.msrb.mxu1 %v175_v33  ;;  %v8339_v33 = vstv %s7157_s12  ;;  %s9522_s12 = sld [smem:[#allocation5 + $0x13]] }
  0x2a   :  { %v7274_v45 = vceil.f32 %v8339_v33  ;;  %v7275_v46 = vfloor.f32 %v8339_v33  ;;  %vm7273_vm13 = vcmp.lt.s32.totalorder %v8339_v33, 0 }
  0x2b   :  { %338 = vmatpush.msrb.mxu1 %v177_v34 }
  0x2d   :  { %340 = vmatpush.msrb.mxu1 %v179_v39  ;;  %v8342_v39 = vand.u32 2147483647, %v8339_v33 }
  0x2f   :  { %342 = vmatpush.msrb.mxu1 %v8313_v40  ;;  %v7281_v47 = vfloor.f32 %v8342_v39  ;;  %vm7269_vm14 = vcmp.eq.f32.partialorder %v8342_v39, 2139095040 }
  0x31   :  { %v7282_v53 = vcvt.f32.s32 %v7281_v47 }
  0x33   :  { %v7283_v57 = vand.u32 1, %v7282_v53 }
  0x8e   :  { %v104_v10 = vpop.xlane.xlu0 %103 }
  0x8f   :  { %8062 = vrsqrt.f32 %v104_v10  ;;  %vm112_vm4 = vcmp.eq.f32.partialorder %v104_v10, inf  ;;  %vm114_vm5 = vcmp.eq.f32.partialorder %v104_v10, 0.0  ;;  %v115_v22 = vand.u32 2147483648, %v104_v10 }
  0x95   :  { %v8063_v11 = vpop.eup %8062 }
  0x96   :  { %v106_v12 = vmul.f32 %v8063_v11, %v104_v10  ;;  %v118_v13 = vpop.xlane.xlu0 %117 }
  0x97   :  { %8064 = vrsqrt.f32 %v118_v13  ;;  %vm126_vm6 = vcmp.eq.f32.partialorder %v118_v13, inf  ;;  %vm128_vm7 = vcmp.eq.f32.partialorder %v118_v13, 0.0  ;;  %v129_v49 = vand.u32 2147483648, %v118_v13 }
  0x98   :  { %v107_v14 = vmul.f32 %v8063_v11, %v106_v12 }
  0x9a   :  { %v108_v15 = vmul.f32 0.5, %v107_v14 }
  0x9c   :  { %v109_v16 = vsub.f32 1.5, %v108_v15 }
  0x9d   :  { %v8065_v17 = vpop.eup %8064 }
  0x9e   :  { %v110_v18 = vmul.f32 %v8063_v11, %v109_v16  ;;  %v120_v19 = vmul.f32 %v8065_v17, %v118_v13 }
  0xa0   :  { %v121_v20 = vmul.f32 %v8065_v17, %v120_v19  ;;  %v111_v21 = vmul.f32 %v110_v18, %v104_v10 }
  0xa2   :  { %v122_v23 = vmul.f32 0.5, %v121_v20  ;;  %v113_v31 = vsel %vm112_vm4, %v104_v10, %v111_v21 }
  0xa3   :  { %v116_v48 = vsel %vm114_vm5, %v115_v22, %v113_v31 }
  0xa4   :  { %v123_v27 = vsub.f32 1.5, %v122_v23 }
  0xa6   :  { %v124_v37 = vmul.f32 %v8065_v17, %v123_v27 }
  0xa8   :  { %v125_v44 = vmul.f32 %v124_v37, %v118_v13 }
  0xaa   :  { %v127_v52 = vsel %vm126_vm6, %v118_v13, %v125_v44  ;;  %v8328_v13 = vstv %s7156_s26  ;;  %s1816_s26 = scalar_lea.vmem %s11512_s2, %s8701_s30 }
  0xab   :  { %v130_v56 = vsel %vm128_vm7, %v129_v49, %v127_v52  ;;  %v7276_v52 = vsel %vm7273_vm13, %v7274_v45, %v7275_v46  ;;  %vm7279_vm13 = vcmp.lt.f32.partialorder %v8342_v39, 1266679808 }
  0xac   :  { %v131_v59 = vadd.f32 %v130_v56, %v116_v48  ;;  %vm7277_vm15 = vcmp.ne.f32.partialorder %v8339_v33, %v7276_v52 }
  0xad   :  { %vm8356_vm6 = vmor %vm7277_vm15, %vm7269_vm14 }
  0xae   :  { %8066 = vrcp.f32 %v131_v59  ;;  %v143_v5 = vand.u32 2147483648, %v131_v59  ;;  %v141_v8 = vand.u32 2147483647, %v131_v59  ;;  %vm137_vm9 = vweird.f32 %v131_v59 }
  0xb0   :  { %v144_v10 = vor.u32 1.1754944e-38, %v143_v5  ;;  %vm142_vm11 = vcmp.eq.f32.partialorder %v141_v8, 8.507059e+37 }
  0xb4   :  { %v8067_v2 = vpop.eup %8066 }
  0xb5   :  { %v133_v3 = vmul.f32 %v8067_v2, %v131_v59  ;;  %vm138_vm8 = vweird.f32 %v8067_v2 }
  0xb6   :  { %vm139_vm10 = vmor %vm137_vm9, %vm138_vm8  ;;  %vm11516_vm9 = vcmp.lt.f32.partialorder %v8339_v33, 0 }
  0xb7   :  { %v134_v4 = vsub.f32 1.0, %v133_v3  ;;  %v8375_v1 = vsel %vm11516_vm9, 0, %v8209_v0 }
  0xb8   :  { %v7309_v5 = vxor.u32 2147483648, %v8375_v1 }
  0xb9   :  { %v135_v7 = vmul.f32 %v8067_v2, %v134_v4 }
  0xbb   :  { %v136_v9 = vadd.f32 %v8067_v2, %v135_v7  ;;  %v65_v7 = vld [vmem:[%s8369_s19 + $0x10] sm:$0xff] }
  0xbd   :  { %v140_v11 = vsel %vm139_vm10, %v8067_v2, %v136_v9  ;;  %vm7284_vm10 = vcmp.eq.s32.totalorder %v7283_v57, 1  ;;  %v66_v2 = vld [vmem:[%s8369_s19 + $0x18] sm:$0xff]  ;;  %v8396_v9 = vand.u32 4294901760, %v65_v7 }
  0xbe   :  { %v145_v12 = vsel %vm142_vm11, %v144_v10, %v140_v11  ;;  %vm7285_vm11 = vmneg %vm8356_vm6  ;;  %v8380_v3 = vand.u32 4294901760, %v66_v2 }
  0xbf   :  { %v146_v14 = vmul.f32 %v145_v12, %v116_v48  ;;  %vm7286_vm15 = vmand %vm7284_vm10, %vm7285_vm11  ;;  %v64_v12 = vld [vmem:[%s8369_s19 + $0x8] sm:$0xff] }
  0xc0   :  { %364 = vmatpush.msrb.mxu2 %v8380_v3  ;;  %v8399_v10 = vsub.f32 %v66_v2, %v8380_v3 }
  0xc1   :  { %v8331_v15 = vmul.f32 %v8328_v13, %v146_v14  ;;  %v8210_v14 = vmov 0  }
  0xc2   :  { %366 = vmatpush.msrb.mxu2 %v8396_v9 }
  0xc3   :  { %v8334_v16 = vand.u32 2147483647, %v8331_v15 }
  0xc5   :  { %v7227_v17 = vand.u32 8388607, %v8334_v16  ;;  %v7223_v25 = vand.u32 2139095040, %v8334_v16  ;;  %vm7261_vm4 = vweird.f32 %v8334_v16  ;;  %vm7260_vm5 = vcmp.lt.f32.partialorder %v8334_v16, 0.0 }
  0xc6   :  { %vm7259_vm7 = vcmp.eq.f32.partialorder %v8334_v16, 0.0  ;;  %vm7258_vm8 = vcmp.eq.f32.partialorder %v8334_v16, 1.0 }
  0xc7   :  { %v7228_v18 = vor.u32 8388608, %v7227_v17  ;;  %v7224_v30 = vshrl.u32 %v7223_v25, 23  ;;  %v8413_v17 = vsel %vm11516_vm9, 2139095040, %v8210_v14 }
  0xc9   :  { %v7230_v19 = vand.u32 8388607, %v7228_v18  ;;  %v7320_v36 = vadd.s32 4294967169, %v7224_v30  ;;  %v394_v18 = vand.u32 4294901760, %v8399_v10 }
  0xcb   :  { %v7231_v20 = vor.u32 1065353216, %v7230_v19  ;;  %v7235_v43 = vadd.s32 1, %v7320_v36  ;;  %v8421_v19 = vand.u32 4294901760, %v64_v12  ;;  %v395_v25 = vsub.f32 %v8399_v10, %v394_v18 }
  0xcd   :  { %vm7232_vm12 = vcmp.ge.f32.partialorder %v7231_v20, 1.4142135  ;;  %v7233_v21 = vmul.f32 0.5, %v7231_v20  ;;  %368 = vmatpush.msrb.mxu2 %v8421_v19 }
  0xce   :  { %v7236_v50 = vsel %vm7232_vm12, %v7235_v43, %v7320_v36 }
  0xcf   :  { %v7234_v22 = vsel %vm7232_vm12, %v7233_v21, %v7231_v20  ;;  %v7256_v55 = vcvt.s32.f32 %v7236_v50  ;;  %vm7292_vm12 = vcmp.gt.f32.partialorder %v8334_v16, 1065353216  ;;  %v8424_v20 = vsub.f32 %v65_v7, %v8396_v9  ;;  %v72_v7 = vld [vmem:[%s71_s22] sm:$0xff] }
  0xd0   :  { %v7321_v23 = vadd.f32 -1.0, %v7234_v22 }
  0xd2   :  { %v7238_v24 = vmul.f32 %v7321_v23, %v7321_v23 }
  0xd4   :  { %v7239_v26 = vmul.f32 0.12621109, %v7238_v24  ;;  %v7241_v27 = vmul.f32 -0.20706727, %v7238_v24 }
  0xd6   :  { %v7240_v28 = vadd.f32 0.21545328, %v7239_v26  ;;  %v7242_v29 = vadd.f32 -0.23896284, %v7241_v27  ;;  %v400_v26 = vand.u32 4294901760, %v8424_v20 }
  0xd8   :  { %v7243_v31 = vmul.f32 %v7240_v28, %v7238_v24  ;;  %v7245_v32 = vmul.f32 %v7242_v29, %v7238_v24 }
  0xda   :  { %v7244_v34 = vadd.f32 0.28795174, %v7243_v31  ;;  %v7246_v35 = vadd.f32 -0.3607037, %v7245_v32  ;;  %v8463_v31 = vsub.f32 %v64_v12, %v8421_v19 }
  0xdc   :  { %v7247_v37 = vmul.f32 %v7244_v34, %v7238_v24  ;;  %v7249_v38 = vmul.f32 %v7246_v35, %v7238_v24  ;;  %v396_v34 = vand.u32 4294901760, %v395_v25  ;;  %v401_v35 = vsub.f32 %v8424_v20, %v400_v26 }
  0xdd   :  { %v8537_v25 = vand.u32 4294901760, %v72_v7 }
  0xde   :  { %v7248_v40 = vadd.f32 0.48090908, %v7247_v37  ;;  %v7250_v42 = vadd.f32 -0.72134733, %v7249_v38  ;;  %v406_v37 = vand.u32 4294901760, %v8463_v31  ;;  %397 = vmatpush.msrb.mxu3 %v396_v34 }
  0xe0   :  { %v7251_v44 = vmul.f32 %v7248_v40, %v7238_v24  ;;  %v7253_v49 = vmul.f32 %v7321_v23, %v7250_v42  ;;  %v402_v42 = vand.u32 4294901760, %v401_v35  ;;  %v407_v46 = vsub.f32 %v8463_v31, %v406_v37 }
  0xe2   :  { %v7252_v48 = vadd.f32 1.442695, %v7251_v44  ;;  %403 = vmatpush.msrb.mxu3 %v402_v42  ;;  %v408_v50 = vand.u32 4294901760, %v407_v46 }
  0xe4   :  { %v7254_v51 = vadd.f32 %v7253_v49, %v7252_v48  ;;  %v8504_v49 = vstv %s8426_s27  ;;  %409 = vmatpush.msrb.mxu3 %v408_v50 }
  0xe6   :  { %v7255_v54 = vmul.f32 %v7321_v23, %v7254_v51  ;;  %v63_v23 = vld [vmem:[%s8369_s19] sm:$0xff]  ;;  %s7166_s19 = sshll.u32 %s8301_s29, 5  ;;  %s2678_s29 = scalar_lea.vmem %s11512_s2, %s9112_s20 }
  0xe7   :  { %v8445_v27 = vand.u32 4294901760, %v63_v23  ;;  %s930_s23 = scalar_lea.vmem %s11513_s3, %s7166_s19  ;;  %s9954_s19 = sld [smem:[#allocation5 + $0x14]] }
  0xe8   :  { %v7257_v56 = vadd.f32 %v7256_v55, %v7255_v54  ;;  %v75_v55 = vld [vmem:[%s71_s22 + $0x18] sm:$0xff] }
  0xe9   :  { %370 = vmatpush.msrb.mxu2 %v8445_v27  ;;  %v8470_v36 = vsub.f32 %v63_v23, %v8445_v27  ;;  %v8513_v57 = vand.u32 4294901760, %v75_v55 }
  0xea   :  { %v7262_v58 = vsel %vm7261_vm4, %v8334_v16, %v7257_v56  ;;  %vm7289_vm4 = vcmp.eq.f32.partialorder %v8331_v15, 0 }
  0xeb   :  { %v7263_v60 = vsel %vm7260_vm5, nan, %v7262_v58  ;;  %vm8384_vm5 = vmxor %vm11516_vm9, %vm7292_vm12  ;;  %vm7270_vm12 = vcmp.eq.f32.partialorder %v8339_v33, 0  ;;  %v412_v43 = vand.u32 4294901760, %v8470_v36 }
  0xec   :  { %v7264_v61 = vsel %vm7259_vm7, -inf, %v7263_v60  ;;  %vm8390_vm7 = vmand %vm7279_vm13, %vm7286_vm15  ;;  %vm7291_vm13 = vcmp.lt.s32.totalorder %v8331_v15, 0  ;;  %v74_v60 = vld [vmem:[%s71_s22 + $0x10] sm:$0xff] }
  0xed   :  { %v7265_v62 = vsel %vm7258_vm8, 0.0, %v7264_v61  ;;  %vm7288_vm8 = vcmp.lt.f32.partialorder %v8331_v15, 0  ;;  %vm8405_vm10 = vmand %vm11516_vm9, %vm7289_vm4  ;;  %v8437_v22 = vsel %vm8390_vm7, %v7309_v5, %v8375_v1  ;;  %vm7293_vm9 = vcmp.eq.f32.partialorder %v8334_v16, 2139095040 }
  0xee   :  { %v7266_v63 = vmul.f32 %v7265_v62, %v8339_v33  ;;  %vm7303_vm11 = vmor %vm8405_vm10, %vm8384_vm5  ;;  %vm7305_vm10 = vcmp.eq.f32.partialorder %v8331_v15, 3212836864  ;;  %v7311_v45 = vsel %vm7288_vm8, %v8437_v22, %v8375_v1  ;;  %v413_v16 = vsub.f32 %v8470_v36, %v412_v43 }
  0xef   :  { %vm7294_vm15 = vmand %vm7288_vm8, %vm8356_vm6  ;;  %v7304_v29 = vsel %vm7303_vm11, 2139095040, %v8210_v14  ;;  %vm7313_vm11 = vcmp.ne.f32.partialorder %v8331_v15, %v8331_v15  ;;  %v8516_v62 = vsub.f32 %v75_v55, %v8513_v57 }
  0xf0   :  { %8068 = vpow2.f32 %v7266_v63  ;;  %vm7298_vm5 = vmand %vm7291_vm13, %vm8390_vm7  ;;  %v7306_v40 = vsel %vm7305_vm10, 1065353216, %v7304_v29  ;;  %vm7271_vm13 = vcmp.eq.f32.partialorder %v8339_v33, 1065353216  ;;  %v414_v52 = vand.u32 4294901760, %v413_v16  ;;  %v73_v63 = vld [vmem:[%s71_s22 + $0x8] sm:$0xff]  ;;  %s10334_s22 = sld [smem:[#allocation5 + $0x1b]] }
  0xf1   :  { %v8523_v5 = vand.u32 4294901760, %v73_v63  ;;  %v582_v11 = vand.u32 4294901760, %v8516_v62 }
  0xf2   :  { %415 = vmatpush.msrb.mxu3 %v414_v52 }
  0xf6   :  { %v8069_v21 = vpop.eup %8068 }
  0xf7   :  { %v7295_v24 = vsel %vm7294_vm15, 2143289344, %v8069_v21  ;;  %vm8458_vm15 = vcmp.ne.f32.partialorder %v8339_v33, %v8339_v33 }
  0xf8   :  { %v7297_v28 = vsel %vm7289_vm4, %v8413_v17, %v7295_v24  ;;  %vm7290_vm4 = vcmp.eq.f32.partialorder %v8331_v15, 1065353216 }
  0xf9   :  { %v7299_v32 = vxor.u32 2147483648, %v7297_v28  ;;  %vm7317_vm8 = vmor %vm7290_vm4, %vm7270_vm12 }
  0xfb   :  { %v7300_v38 = vsel %vm7298_vm5, %v7299_v32, %v7297_v28  ;;  %vm7315_vm5 = vmor %vm7313_vm11, %vm8458_vm15  ;;  %v8542_v32 = vsub.f32 %v73_v63, %v8523_v5 }
  0xfc   :  { %v7307_v44 = vsel %vm7269_vm14, %v7306_v40, %v7300_v38  ;;  %v583_v38 = vsub.f32 %v8516_v62, %v582_v11 }
  0xfd   :  { %v7312_v47 = vsel %vm7293_vm9, %v7311_v45, %v7307_v44  ;;  %vm159_vm9 = vcmask 261120   ;;  %v8562_v45 = vsub.f32 %v72_v7, %v8537_v25  ;;  %v594_v46 = vand.u32 4294901760, %v8542_v32 }
  0xfe   :  { %v7316_v48 = vsel %vm7315_vm5, 2143289344, %v7312_v47  ;;  %v84_v47 = vld [vmem:[%s8551_s25 + $0x18] sm:$0xff]  ;;  %v584_v50 = vand.u32 4294901760, %v583_v38 }
  0xff   :  { %v7318_v51 = vsel %vm7317_vm8, 1065353216, %v7316_v48 }
 0x100   :  { %v7319_v53 = vsel %vm7271_vm13, %v8331_v15, %v7318_v51  ;;  %v8519_v15 = vand.u32 4294901760, %v74_v60 }
 0x101   :  { %v152_v54 = vmul.f32 %v7319_v53, %v8504_v49  ;;  %v600_v53 = vand.u32 4294901760, %v8562_v45 }
 0x103   :  { %v153_v56 = vmax.f32 %v152_v54, 0.0  ;;  %v8579_v54 = vand.u32 4294901760, %v84_v47 }
 0x105   :  { %v154_v58 = vmin.f32 %v153_v56, 1.0  ;;  %v83_v56 = vld [vmem:[%s8551_s25 + $0x10] sm:$0xff] }
 0x106   :  { %v8599_v63 = vand.u32 4294901760, %v83_v56 }
 0x107   :  { %v155_v61 = vsub.f32 1.0, %v154_v58  ;;  %v157_v2 = vmul.f32 %v154_v58, %v8278_v6  ;;  %v8532_v6 = vsub.f32 %v74_v60, %v8519_v15  ;;  %v601_v60 = vsub.f32 %v8562_v45, %v600_v53 }
 0x109   :  { %v156_v0 = vmul.f32 0.0, %v155_v61  ;;  %v588_v40 = vand.u32 4294901760, %v8532_v6  ;;  %v8597_v61 = vsub.f32 %v84_v47, %v8579_v54 }
 0x10b   :  { %v8521_v4 = vadd.f32 %v157_v2, %v156_v0  ;;  %v589_v51 = vsub.f32 %v8532_v6, %v588_v40  ;;  %v82_v0 = vld [vmem:[%s8551_s25 + $0x8] sm:$0xff]  ;;  %v81_v2 = vld [vmem:[%s8551_s25] sm:$0xff] }
 0x10c   :  { %v8610_v7 = vand.u32 4294901760, %v82_v0 }
 0x10d   :  { %v990_v12 = vmul.f32 %v8521_v4, %v8521_v4  ;;  %v161_v21 = vsel %vm159_vm9, %v8521_v4, 0  ;;  %v348_v23 = vrot.slane %v8521_v4, 1  ;;  %v536_v55 = vrot.slane %v8521_v4, 2 }
 0x10e   :  { %v8535_v24 = vand.u32 4294901760, %v161_v21  ;;  %v590_v58 = vand.u32 4294901760, %v589_v51 }
 0x10f   :  { %v991_v28 = vsel %vm101_vm3, %v990_v12, 0.0  ;;  %v349_v29 = vsel %vm159_vm9, %v348_v23, 0  ;;  %v8619_v23 = vsub.f32 %v83_v56, %v8599_v63 }
 0x110   :  { %992 = vadd.xlane.f32.xlu1 %v991_v28  ;;  %229 = vmatmul.f32.vlgmr.msra.gmra.mxu1 %v8535_v24  ;;  %v184_v34 = vsub.f32 %v161_v21, %v8535_v24  ;;  %v8546_v35 = vand.u32 4294901760, %v349_v29  ;;  %v770_v21 = vand.u32 4294901760, %v8597_v61 }
 0x111   :  { %464 = vmatpush.msra.mxu1 %v8380_v3 }
 0x112   :  { %259 = vmatmul.f32.vlgmr.msra.gmra.mxu2 %v184_v34  ;;  %v185_v42 = vand.u32 4294901760, %v184_v34  ;;  %v8559_v44 = vsub.f32 %v349_v29, %v8546_v35  ;;  %v771_v29 = vsub.f32 %v8597_v61, %v770_v21 }
 0x113   :  { %466 = vmatpush.msra.mxu1 %v8396_v9  ;;  %493 = vmatpush.msra.mxu2 %v394_v18 }
 0x114   :  { %286 = vmatmul.f32.vlgmr.msra.gmra.mxu3 %v185_v42  ;;  %v186_v16 = vsub.f32 %v184_v34, %v185_v42  ;;  %v373_v48 = vand.u32 4294901760, %v8559_v44  ;;  %v772_v47 = vand.u32 4294901760, %v771_v29 }
 0x115   :  { %468 = vmatpush.msra.mxu1 %v8421_v19  ;;  %497 = vmatpush.msra.mxu2 %v400_v26  ;;  %v595_v26 = vsub.f32 %v8542_v32, %v594_v46 }
 0x116   :  { %v187_v52 = vand.u32 4294901760, %v186_v16  ;;  %v374_v18 = vsub.f32 %v8559_v44, %v373_v48  ;;  %524 = vmatpush.msra.mxu3 %v8380_v3 }
 0x117   :  { %470 = vmatpush.msra.mxu1 %v8445_v27  ;;  %501 = vmatpush.msra.mxu2 %v406_v37  ;;  %v724_v37 = vrot.slane %v8521_v4, 3 }
 0x118   :  { %188 = vmatmul.f32.vlgmr.msra.gmra.mxu0 %v187_v52  ;;  %344 = vmatmul.f32.vlgmr.msrb.gmra.mxu1 %v8535_v24  ;;  %v375_v3 = vand.u32 4294901760, %v374_v18 }
 0x119   :  { %526 = vmatpush.msra.mxu3 %v8396_v9  ;;  %435 = vmatpush.msra.mxu0 %v8399_v10  ;;  %v596_v9 = vand.u32 4294901760, %v595_v26  ;;  %v537_v10 = vsel %vm159_vm9, %v536_v55, 0  ;;  %v725_v12 = vsel %vm159_vm9, %v724_v37, 0 }
 0x11a   :  { %376 = vmatmul.f32.vlgmr.msrb.gmra.mxu2 %v375_v3  ;;  %585 = vmatpush.msrb.mxu1 %v584_v50 }
 0x11b   :  { %505 = vmatpush.msra.mxu2 %v412_v43  ;;  %528 = vmatpush.msra.mxu3 %v8421_v19  ;;  %v602_v19 = vand.u32 4294901760, %v601_v60  ;;  %v8615_v43 = vand.u32 4294901760, %v537_v10 }
 0x11c   :  { %417 = vmatmul.f32.vlgmr.msrb.gmra.mxu3 %v8546_v35  ;;  %438 = vmatpush.msra.mxu0 %v8424_v20  ;;  %v8622_v20 = vand.u32 4294901760, %v81_v2 }
 0x11d   :  { %530 = vmatpush.msra.mxu3 %v8445_v27  ;;  %591 = vmatpush.msrb.mxu1 %v590_v58  ;;  %v8625_v27 = vand.u32 4294901760, %v725_v12  ;;  %v560_v28 = vsub.f32 %v537_v10, %v8615_v43 }
 0x11e   :  { %623 = vmatpush.msrb.mxu2 %v8516_v62  ;;  %441 = vmatpush.msra.mxu0 %v8463_v31  ;;  %v8630_v31 = vsub.f32 %v82_v0, %v8610_v7  ;;  %v977_v62 = vpop.xlane.xlu1 %976 }
 0x11f   :  { %597 = vmatpush.msrb.mxu1 %v596_v9  ;;  %652 = vmatpush.msrb.mxu3 %v8513_v57  ;;  %v8646_v34 = vsub.f32 %v725_v12, %v8625_v27  ;;  %v561_v42 = vand.u32 4294901760, %v560_v28  ;;  %8070 = vrsqrt.f32 %v977_v62  ;;  %vm985_vm4 = vcmp.eq.f32.partialorder %v977_v62, inf }
 0x120   :  { %319 = vmatmul.f32.vlgmr.msrb.gmra.mxu0 %v8535_v24  ;;  %474 = vmatmul.f32.vlgmr.msra.gmra.mxu1 %v373_v48  ;;  %v776_v24 = vand.u32 4294901760, %v8619_v23  ;;  %v782_v38 = vand.u32 4294901760, %v8630_v31  ;;  %vm987_vm10 = vcmp.eq.f32.partialorder %v977_v62, 0.0 }
 0x121   :  { %626 = vmatpush.msrb.mxu2 %v8532_v6  ;;  %444 = vmatpush.msra.mxu0 %v8470_v36  ;;  %v8641_v36 = vsub.f32 %v81_v2, %v8622_v20  ;;  %v749_v48 = vand.u32 4294901760, %v8646_v34  ;;  %v562_v51 = vsub.f32 %v560_v28, %v561_v42 }
 0x122   :  { %507 = vmatmul.f32.vlgmr.msra.gmra.mxu2 %v8546_v35  ;;  %603 = vmatpush.msrb.mxu1 %v602_v19  ;;  %v777_v16 = vsub.f32 %v8619_v23, %v776_v24 }
 0x123   :  { %629 = vmatpush.msrb.mxu2 %v8542_v32  ;;  %654 = vmatpush.msrb.mxu3 %v8519_v15  ;;  %v750_v52 = vsub.f32 %v8646_v34, %v749_v48  ;;  %v563_v18 = vand.u32 4294901760, %v562_v51  ;;  %v8044_v51 = vld [vmem:[%s1807_s9] ss:$0 sm:$0xff]  ;;  %s7168_s9 = sshll.u32 %s8283_s15, 5  ;;  %s7170_s15 = sshll.u32 %s8285_s16, 5 }
 0x124   :  { %532 = vmatmul.f32.vlgmr.msra.gmra.mxu3 %v8546_v35  ;;  %552 = vmatpush.msrb.mxu0 %v8513_v57  ;;  %v788_v35 = vand.u32 4294901760, %v8641_v36  ;;  %v778_v50 = vand.u32 4294901760, %v777_v16  ;;  %s948_s13 = scalar_lea.vmem %s11513_s3, %s7170_s15  ;;  %s2669_s16 = scalar_lea.vmem %s11512_s2, %s9142_s10 }
 0x125   :  { %632 = vmatpush.msrb.mxu2 %v8562_v45  ;;  %656 = vmatpush.msrb.mxu3 %v8523_v5  ;;  %v751_v26 = vand.u32 4294901760, %v750_v52  ;;  %s9518_s15 = sld [smem:[#allocation5 + $0x11]] }
 0x126   :  { %712 = vmatpush.msra.mxu1 %v8513_v57  ;;  %554 = vmatpush.msrb.mxu0 %v8519_v15  ;;  %v783_v57 = vsub.f32 %v8630_v31, %v782_v38 }
 0x127   :  { %658 = vmatpush.msrb.mxu3 %v8537_v25  ;;  %740 = vmatpush.msra.mxu2 %v8579_v54 }
 0x128   :  { %447 = vmatmul.f32.vlgmr.msra.gmra.mxu0 %v8559_v44  ;;  %605 = vmatmul.f32.vlgmr.msrb.gmra.mxu1 %v8615_v43  ;;  %v789_v44 = vsub.f32 %v8641_v36, %v788_v35 }
 0x129   :  { %714 = vmatpush.msra.mxu1 %v8519_v15  ;;  %556 = vmatpush.msrb.mxu0 %v8523_v5  ;;  %v784_v15 = vand.u32 4294901760, %v783_v57 }
 0x12a   :  { %635 = vmatmul.f32.vlgmr.msrb.gmra.mxu2 %v560_v28  ;;  %773 = vmatpush.msra.mxu3 %v772_v47 }
 0x12b   :  { %716 = vmatpush.msra.mxu1 %v8523_v5  ;;  %742 = vmatpush.msra.mxu2 %v8599_v63  ;;  %v790_v5 = vand.u32 4294901760, %v789_v44  ;;  %v8045_v44 = vld [vmem:[%s1816_s26] ss:$0 sm:$0xff]  ;;  %s939_s26 = scalar_lea.vmem %s11513_s3, %s7168_s9  ;;  %s2696_s9 = scalar_lea.vmem %s11512_s2, %s9116_s21 }
 0x12c   :  { %662 = vmatmul.f32.vlgmr.msrb.gmra.mxu3 %v561_v42  ;;  %558 = vmatpush.msrb.mxu0 %v8537_v25  ;;  %s3549_s18 = scalar_lea.vmem %s11512_s2, %s9518_s15 }
 0x12d   :  { %718 = vmatpush.msra.mxu1 %v8537_v25  ;;  %744 = vmatpush.msra.mxu2 %v8610_v7 }
 0x12e   :  { %779 = vmatpush.msra.mxu3 %v778_v50  ;;  %681 = vmatpush.msra.mxu0 %v582_v11  ;;  %v8071_v11 = vpop.eup %8070  ;;  %v1799_v50 = vld [vmem:[%s1798_s0] sm:$0x1]  ;;  %s9114_s0 = sld [smem:[#allocation5 + $0xe]] }
 0x12f   :  { %746 = vmatpush.msra.mxu2 %v8622_v20  ;;  %840 = vmatpush.msrb.mxu1 %v8579_v54  ;;  %v979_v6 = vmul.f32 %v8071_v11, %v977_v62 }
 0x130   :  { %564 = vmatmul.f32.vlgmr.msrb.gmra.mxu0 %v563_v18  ;;  %720 = vmatmul.f32.vlgmr.msra.gmra.mxu1 %v8615_v43  ;;  %v934_v18 = vld [vmem:[%s930_s23 + $0x18] sm:$0xff] }
 0x131   :  { %785 = vmatpush.msra.mxu3 %v784_v15  ;;  %685 = vmatpush.msra.mxu0 %v588_v40  ;;  %v980_v25 = vmul.f32 %v8071_v11, %v979_v6  ;;  %v8046_v15 = vld [vmem:[%s1825_s14] ss:$0 sm:$0xff]  ;;  %v8761_v6 = vand.u32 4294901760, %v934_v18  ;;  %s7172_s14 = sshll.u32 %s8287_s17, 5  ;;  %s7190_s17 = sshll.u32 %s9548_s24, 5 }
 0x132   :  { %752 = vmatmul.f32.vlgmr.msra.gmra.mxu2 %v751_v26  ;;  %842 = vmatpush.msrb.mxu1 %v8599_v63  ;;  %s8964_s27 = scalar_lea.vmem %s11513_s3, %s7172_s14  ;;  %s1801_s14 = scalar_lea.vmem %s11513_s3, %s7174_s11 }
 0x133   :  { %791 = vmatpush.msra.mxu3 %v790_v5  ;;  %869 = vmatpush.msrb.mxu2 %v770_v21  ;;  %v981_v40 = vmul.f32 0.5, %v980_v25  ;;  %v933_v5 = vld [vmem:[%s930_s23 + $0x10] sm:$0xff]  ;;  %s10360_s11 = sld [smem:[#allocation5 + $0x18]] }
 0x134   :  { %793 = vmatmul.f32.vlgmr.msra.gmra.mxu3 %v8625_v27  ;;  %689 = vmatpush.msra.mxu0 %v594_v46  ;;  %v8763_v25 = vand.u32 4294901760, %v933_v5  ;;  %s2687_s25 = scalar_lea.vmem %s11512_s2, %s9114_s0 }
 0x135   :  { %844 = vmatpush.msrb.mxu1 %v8610_v7  ;;  %873 = vmatpush.msrb.mxu2 %v776_v24  ;;  %v982_v45 = vsub.f32 1.5, %v981_v40  ;;  %v931_v40 = vld [vmem:[%s930_s23] sm:$0xff] }
 0x136   :  { %900 = vmatpush.msrb.mxu3 %v8579_v54  ;;  %693 = vmatpush.msra.mxu0 %v600_v53 }
 0x137   :  { %846 = vmatpush.msrb.mxu1 %v8622_v20  ;;  %877 = vmatpush.msrb.mxu2 %v782_v38  ;;  %v983_v54 = vmul.f32 %v8071_v11, %v982_v45  ;;  %v1842_v11 = vsel %vm11520_vm0, %v1799_v50, %v8044_v51 }
 0x138   :  { %902 = vmatpush.msrb.mxu3 %v8599_v63  ;;  %695 = vmatmul.f32.vlgmr.msra.gmra.mxu0 %v8615_v43 }
 0x139   :  { %850 = vmatmul.f32.vlgmr.msrb.gmra.mxu1 %v749_v48  ;;  %811 = vmatpush.msrb.mxu0 %v8597_v61  ;;  %v984_v58 = vmul.f32 %v983_v54, %v977_v62  ;;  %v988_v61 = vand.u32 2147483648, %v977_v62 }
 0x13a   :  { %881 = vmatpush.msrb.mxu2 %v788_v35  ;;  %904 = vmatpush.msrb.mxu3 %v8610_v7 }
 0x13b   :  { %883 = vmatmul.f32.vlgmr.msrb.gmra.mxu2 %v8625_v27  ;;  %814 = vmatpush.msrb.mxu0 %v8619_v23  ;;  %v986_v63 = vsel %vm985_vm4, %v977_v62, %v984_v58  ;;  %v1076_v58 = vsub.f32 %v934_v18, %v8761_v6 }
 0x13c   :  { %906 = vmatpush.msrb.mxu3 %v8622_v20  ;;  %v989_v43 = vsel %vm987_vm10, %v988_v61, %v986_v63 }
 0x13d   :  { %908 = vmatmul.f32.vlgmr.msrb.gmra.mxu3 %v8625_v27  ;;  %817 = vmatpush.msrb.mxu0 %v8630_v31 }
 0x13e   :  { %1147 = vmatpush.msra.mxu3 %v8761_v6  ;;  %1118 = vmatpush.msra.mxu2 %v1076_v58 }
 0x13f   :  { %820 = vmatpush.msrb.mxu0 %v8641_v36 }
 0x140   :  { %823 = vmatmul.f32.vlgmr.msrb.gmra.mxu0 %v8646_v34  ;;  %1149 = vmatpush.msra.mxu3 %v8763_v25 }
 0x141   :  { %1047 = vmatpush.msra.mxu0 %v8761_v6 }
 0x143   :  { %1049 = vmatpush.msra.mxu0 %v8763_v25 }
 0x183   :  { %v993_v32 = vpop.xlane.xlu1 %992 }
 0x184   :  { %8072 = vrsqrt.f32 %v993_v32  ;;  %vm1001_vm11 = vcmp.eq.f32.partialorder %v993_v32, inf  ;;  %v1004_v2 = vand.u32 2147483648, %v993_v32  ;;  %vm1003_vm5 = vcmp.eq.f32.partialorder %v993_v32, 0.0 }
 0x18a   :  { %v8073_v46 = vpop.eup %8072 }
 0x18b   :  { %v995_v53 = vmul.f32 %v8073_v46, %v993_v32 }
 0x18d   :  { %v996_v55 = vmul.f32 %v8073_v46, %v995_v53  ;;  %v8717_v56 = vpop.f32.mrf.mxu1 }
 0x18f   :  { %v997_v3 = vmul.f32 0.5, %v996_v55 }
 0x191   :  { %v998_v37 = vsub.f32 1.5, %v997_v3 }
 0x193   :  { %v999_v60 = vmul.f32 %v8073_v46, %v998_v37  ;;  %v1843_v46 = vsel %vm11519_vm1, %v1842_v11, %v8045_v44  ;;  %v1082_v37 = vsub.f32 %v933_v5, %v8763_v25 }
 0x194   :  { %v8769_v3 = vsel %vm11518_vm2, %v1843_v46, %v8046_v15 }
 0x195   :  { %v1000_v0 = vmul.f32 %v999_v60, %v993_v32  ;;  %v8719_v9 = vpop.f32.mrf.mxu0  ;;  %v8721_v10 = vpop.f32.mrf.mxu2  ;;  %v8774_v60 = vand.u32 4294901760, %v931_v40  ;;  %v1845_v63 = vmul.f32 %v8769_v3, %v8769_v3  ;;  %1121 = vmatpush.msra.mxu2 %v1082_v37 }
 0x196   :  { %v8723_v12 = vpop.f32.mrf.mxu1 }
 0x197   :  { %v1002_v7 = vsel %vm1001_vm11, %v993_v32, %v1000_v0  ;;  %v8725_v19 = vpop.f32.mrf.mxu3  ;;  %v932_v32 = vld [vmem:[%s930_s23 + $0x8] sm:$0xff] }
 0x198   :  { %v1005_v21 = vsel %vm1003_vm5, %v1004_v2, %v1002_v7  ;;  %v8766_v53 = vand.u32 4294901760, %v932_v32  ;;  %v1077_v2 = vand.u32 4294901760, %v1076_v58  ;;  %v1083_v7 = vand.u32 4294901760, %v1082_v37 }
 0x199   :  { %v1006_v23 = vadd.f32 %v1005_v21, %v989_v43  ;;  %v1094_v21 = vsub.f32 %v931_v40, %v8774_v60 }
 0x19a   :  { %1151 = vmatpush.msra.mxu3 %v8766_v53  ;;  %1051 = vmatpush.msra.mxu0 %v8766_v53 }
 0x19b   :  { %8074 = vrcp.f32 %v1006_v23  ;;  %v1018_v34 = vand.u32 2147483648, %v1006_v23  ;;  %v1016_v16 = vand.u32 2147483647, %v1006_v23  ;;  %vm1012_vm4 = vweird.f32 %v1006_v23 }
 0x19c   :  { %1153 = vmatpush.msra.mxu3 %v8774_v60  ;;  %1053 = vmatpush.msra.mxu0 %v8774_v60 }
 0x19d   :  { %v8727_v20 = vpop.f32.mrf.mxu0  ;;  %v377_v27 = vpop.f32.mrf.mxu2  ;;  %v1019_v57 = vor.u32 1.1754944e-38, %v1018_v34  ;;  %vm1017_vm11 = vcmp.eq.f32.partialorder %v1016_v16, 8.507059e+37  ;;  %v1078_v34 = vsub.f32 %v1076_v58, %v1077_v2 }
 0x19e   :  { %v8731_v29 = vpop.f32.mrf.mxu1  ;;  %1176 = vmatpush.msrb.mxu0 %v1077_v2 }
 0x19f   :  { %v418_v31 = vpop.f32.mrf.mxu3  ;;  %v1079_v51 = vand.u32 4294901760, %v1078_v34 }
 0x1a0   :  { %1180 = vmatpush.msrb.mxu0 %v1083_v7 }
 0x1a1   :  { %v8075_v28 = vpop.eup %8074  ;;  %1080 = vmatpush.msra.mxu1 %v1079_v51 }
 0x1a2   :  { %v1008_v24 = vmul.f32 %v8075_v28, %v1006_v23  ;;  %vm1013_vm8 = vweird.f32 %v8075_v28 }
 0x1a3   :  { %vm1014_vm10 = vmor %vm1012_vm4, %vm1013_vm8  ;;  %vm11517_vm8 = vcmask 125952  }
 0x1a4   :  { %v1009_v36 = vsub.f32 1.0, %v1008_v24 }
 0x1a5   :  { %v448_v38 = vpop.f32.mrf.mxu0  ;;  %v8734_v42 = vpop.f32.mrf.mxu2 }
 0x1a6   :  { %v1010_v47 = vmul.f32 %v8075_v28, %v1009_v36  ;;  %v606_v62 = vpop.f32.mrf.mxu1  ;;  %v1846_v36 = vsel %vm101_vm3, %v1845_v63, 0.0 }
 0x1a7   :  { %v8740_v35 = vpop.f32.mrf.mxu3  ;;  %1847 = vadd.xlane.f32.xlu2 %v1846_v36 }
 0x1a8   :  { %v1011_v48 = vadd.f32 %v8075_v28, %v1010_v47  ;;  %v1084_v47 = vsub.f32 %v1082_v37, %v1083_v7 }
 0x1aa   :  { %v1015_v52 = vsel %vm1014_vm10, %v8075_v28, %v1011_v48  ;;  %v419_v28 = vadd.f32 %v418_v31, %v377_v27  ;;  %v1095_v48 = vand.u32 4294901760, %v1094_v21  ;;  %v1085_v27 = vand.u32 4294901760, %v1084_v47 }
 0x1ab   :  { %v1020_v26 = vsel %vm1017_vm11, %v1019_v57, %v1015_v52 }
 0x1ac   :  { %v1021_v45 = vmul.f32 %v1020_v26, %v989_v43  ;;  %v1088_v43 = vsub.f32 %v932_v32, %v8766_v53  ;;  %v449_v57 = vadd.f32 %v448_v38, %v419_v28  ;;  %v1096_v44 = vsub.f32 %v1094_v21, %v1095_v48  ;;  %1086 = vmatpush.msra.mxu1 %v1085_v27 }
 0x1ad   :  { %v565_v54 = vpop.f32.mrf.mxu0  ;;  %v636_v55 = vpop.f32.mrf.mxu2  ;;  %v231_v26 = vadd.f32 %v8717_v56, %v8719_v9 }
 0x1ae   :  { %v8778_v61 = vmul.f32 %v1021_v45, %v8328_v13  ;;  %v607_v24 = vadd.f32 %v606_v62, %v565_v54  ;;  %v1089_v16 = vand.u32 4294901760, %v1088_v43  ;;  %1124 = vmatpush.msra.mxu2 %v1088_v43  ;;  %v721_v18 = vpop.f32.mrf.mxu1  ;;  %v476_v62 = vadd.f32 %v8731_v29, %v449_v57 }
 0x1af   :  { %v663_v0 = vpop.f32.mrf.mxu3  ;;  %v1097_v40 = vand.u32 4294901760, %v1096_v44 }
 0x1b0   :  { %v8786_v23 = vand.u32 2147483647, %v8778_v61  ;;  %v1090_v31 = vsub.f32 %v1088_v43, %v1089_v16  ;;  %v637_v15 = vadd.f32 %v636_v55, %v607_v24  ;;  %1127 = vmatpush.msra.mxu2 %v1094_v21  ;;  %v261_v55 = vadd.f32 %v8721_v10, %v231_v26  ;;  %1184 = vmatpush.msrb.mxu0 %v1089_v16 }
 0x1b1   :  { %v509_v58 = vadd.f32 %v8734_v42, %v476_v62 }
 0x1b2   :  { %v7328_v50 = vand.u32 8388607, %v8786_v23  ;;  %v1091_v38 = vand.u32 4294901760, %v1090_v31  ;;  %v664_v46 = vadd.f32 %v663_v0, %v637_v15  ;;  %1188 = vmatpush.msrb.mxu0 %v1095_v48  ;;  %v288_v10 = vadd.f32 %v8725_v19, %v261_v55 }
 0x1b3   :  { %v534_v42 = vadd.f32 %v8740_v35, %v509_v58  ;;  %v7324_v36 = vand.u32 2139095040, %v8786_v23  ;;  %vm7362_vm4 = vweird.f32 %v8786_v23  ;;  %vm7361_vm10 = vcmp.lt.f32.partialorder %v8786_v23, 0.0 }
 0x1b4   :  { %v7329_v52 = vor.u32 8388608, %v7328_v50  ;;  %1092 = vmatpush.msra.mxu1 %v1091_v38  ;;  %v321_v28 = vadd.f32 %v8727_v20, %v288_v10  ;;  %vm7360_vm11 = vcmp.eq.f32.partialorder %v8786_v23, 0.0 }
 0x1b5   :  { %v696_v5 = vpop.f32.mrf.mxu0  ;;  %v753_v32 = vpop.f32.mrf.mxu2  ;;  %v913_v16 = vrot.slane %v534_v42, 7  ;;  %v7325_v20 = vshrl.u32 %v7324_v36, 23  ;;  %v943_v42 = vld [vmem:[%s939_s26 + $0x18] sm:$0xff] }
 0x1b6   :  { %v7331_v11 = vand.u32 8388607, %v7329_v52  ;;  %v697_v9 = vadd.f32 %v696_v5, %v664_v46  ;;  %1098 = vmatpush.msra.mxu1 %v1097_v40  ;;  %v851_v43 = vpop.f32.mrf.mxu1  ;;  %v346_v50 = vadd.f32 %v8723_v12, %v321_v28 }
 0x1b7   :  { %v794_v54 = vpop.f32.mrf.mxu3  ;;  %v7421_v5 = vadd.s32 4294967169, %v7325_v20 }
 0x1b8   :  { %v8798_v45 = vor.u32 1065353216, %v7331_v11  ;;  %v795_v29 = vadd.f32 %v794_v54, %v753_v32  ;;  %1207 = vmatpush.msrb.mxu1 %v8761_v6  ;;  %v722_v7 = vadd.f32 %v721_v18, %v697_v9  ;;  %v921_v44 = vsel %vm11520_vm0, %v346_v50, %v913_v16 }
 0x1b9   :  { %v7336_v11 = vadd.s32 1, %v7421_v5 }
 0x1ba   :  { %vm7333_vm5 = vcmp.ge.f32.partialorder %v8798_v45, 1.4142135  ;;  %v7334_v56 = vmul.f32 0.5, %v8798_v45  ;;  %1209 = vmatpush.msrb.mxu1 %v8763_v25  ;;  %v916_v35 = vrot.slane %v722_v7, 6  ;;  %v942_v7 = vld [vmem:[%s939_s26 + $0x10] sm:$0xff] }
 0x1bb   :  { %v7337_v54 = vsel %vm7333_vm5, %v7336_v11, %v7421_v5  ;;  %v8853_v28 = vand.u32 4294901760, %v942_v7 }
 0x1bc   :  { %v7335_v37 = vsel %vm7333_vm5, %v7334_v56, %v8798_v45  ;;  %1211 = vmatpush.msrb.mxu1 %v8766_v53  ;;  %v922_v52 = vsel %vm11519_vm1, %v921_v44, %v916_v35  ;;  %v7357_v56 = vcvt.s32.f32 %v7337_v54  ;;  %vm7393_vm5 = vcmp.gt.f32.partialorder %v8786_v23, 1065353216  ;;  %v940_v35 = vld [vmem:[%s939_s26] sm:$0xff]  ;;  %v952_v54 = vld [vmem:[%s948_s13 + $0x18] sm:$0xff] }
 0x1bd   :  { %v824_v63 = vpop.f32.mrf.mxu0  ;;  %v7422_v0 = vadd.f32 -1.0, %v7335_v37  ;;  %v8866_v16 = vsub.f32 %v942_v7, %v8853_v28  ;;  %v949_v7 = vld [vmem:[%s948_s13] sm:$0xff] }
 0x1be   :  { %v825_v2 = vadd.f32 %v824_v63, %v795_v29  ;;  %v884_v6 = vpop.f32.mrf.mxu2  ;;  %1213 = vmatpush.msrb.mxu1 %v8774_v60 }
 0x1bf   :  { %v7339_v21 = vmul.f32 %v7422_v0, %v7422_v0  ;;  %v1271_v50 = vand.u32 4294901760, %v8866_v16 }
 0x1c0   :  { %v852_v24 = vadd.f32 %v851_v43, %v825_v2  ;;  %v909_v48 = vpop.f32.mrf.mxu3  ;;  %v8845_v2 = vand.u32 4294901760, %v943_v42  ;;  %v941_v43 = vld [vmem:[%s939_s26 + $0x8] sm:$0xff] }
 0x1c1   :  { %v7340_v34 = vmul.f32 0.12621109, %v7339_v21  ;;  %v7342_v47 = vmul.f32 -0.20706727, %v7339_v21 }
 0x1c2   :  { %v885_v19 = vadd.f32 %v884_v6, %v852_v24  ;;  %1235 = vmatpush.msrb.mxu2 %v8845_v2  ;;  %v8855_v24 = vand.u32 4294901760, %v941_v43 }
 0x1c3   :  { %v7341_v25 = vadd.f32 0.21545328, %v7340_v34  ;;  %v7343_v57 = vadd.f32 -0.23896284, %v7342_v47 }
 0x1c4   :  { %v910_v51 = vadd.f32 %v909_v48, %v885_v19  ;;  %1237 = vmatpush.msrb.mxu2 %v8853_v28  ;;  %v8873_v48 = vsub.f32 %v941_v43, %v8855_v24 }
 0x1c5   :  { %v7344_v27 = vmul.f32 %v7341_v25, %v7339_v21  ;;  %v7346_v31 = vmul.f32 %v7343_v57, %v7339_v21 }
 0x1c6   :  { %v919_v53 = vrot.slane %v910_v51, 5  ;;  %1239 = vmatpush.msrb.mxu2 %v8855_v24  ;;  %v8880_v51 = vand.u32 4294901760, %v940_v35 }
 0x1c7   :  { %v7345_v15 = vadd.f32 0.28795174, %v7344_v27  ;;  %v7347_v18 = vadd.f32 -0.3607037, %v7346_v31  ;;  %v1277_v27 = vand.u32 4294901760, %v8873_v48 }
 0x1c8   :  { %v923_v60 = vsel %vm11518_vm2, %v922_v52, %v919_v53  ;;  %vm7390_vm2 = vcmp.eq.f32.partialorder %v8778_v61, 0  ;;  %v1272_v53 = vsub.f32 %v8866_v16, %v1271_v50  ;;  %1241 = vmatpush.msrb.mxu2 %v8880_v51  ;;  %v8895_v52 = vsub.f32 %v940_v35, %v8880_v51 }
 0x1c9   :  { %925 = vst.msk [vmem:[#allocation7] sm:$0xf] %vm11517_vm8, %v923_v60  ;;  %v7348_v38 = vmul.f32 %v7345_v15, %v7339_v21  ;;  %v7350_v26 = vmul.f32 %v7347_v18, %v7339_v21  ;;  %vm7359_vm8 = vcmp.eq.f32.partialorder %v8786_v23, 1.0  ;;  %v1278_v60 = vsub.f32 %v8873_v48, %v1277_v27 }
 0x1cb   :  { %v7349_v12 = vadd.f32 0.48090908, %v7348_v38  ;;  %v7351_v62 = vadd.f32 -0.72134733, %v7350_v26  ;;  %v1273_v38 = vand.u32 4294901760, %v1272_v53 }
 0x1cd   :  { %v7352_v32 = vmul.f32 %v7349_v12, %v7339_v21  ;;  %v7354_v46 = vmul.f32 %v7422_v0, %v7351_v62  ;;  %v8851_v21 = vsub.f32 %v943_v42, %v8845_v2  ;;  %v1279_v12 = vand.u32 4294901760, %v1278_v60 }
 0x1cf   :  { %v7353_v40 = vadd.f32 1.442695, %v7352_v32  ;;  %v1265_v47 = vand.u32 4294901760, %v8851_v21 }
 0x1d1   :  { %v7355_v55 = vadd.f32 %v7354_v46, %v7353_v40  ;;  %v1266_v57 = vsub.f32 %v8851_v21, %v1265_v47 }
 0x1d3   :  { %v7356_v58 = vmul.f32 %v7422_v0, %v7355_v55  ;;  %v1267_v44 = vand.u32 4294901760, %v1266_v57 }
 0x1d5   :  { %v7358_v9 = vadd.f32 %v7357_v56, %v7356_v58  ;;  %1268 = vmatpush.msrb.mxu3 %v1267_v44  ;;  %v8925_v58 = vand.u32 4294901760, %v952_v54 }
 0x1d7   :  { %v7363_v29 = vsel %vm7362_vm4, %v8786_v23, %v7358_v9  ;;  %vm11531_vm4 = vcmp.lt.f32.partialorder %v8339_v33, 0  ;;  %1274 = vmatpush.msrb.mxu3 %v1273_v38  ;;  %v951_v9 = vld [vmem:[%s948_s13 + $0x10] sm:$0xff]  ;;  %v961_v38 = vld [vmem:[%s8964_s27 + $0x18] sm:$0xff] }
 0x1d8   :  { %v7364_v37 = vsel %vm7361_vm10, nan, %v7363_v29  ;;  %vm8836_vm1 = vmxor %vm11531_vm4, %vm7393_vm5  ;;  %vm7392_vm5 = vcmp.lt.s32.totalorder %v8778_v61, 0 }
 0x1d9   :  { %v7365_v63 = vsel %vm7360_vm11, -inf, %v7364_v37  ;;  %vm11534_vm10 = vmmov %vm11531_vm4  ;;  %1280 = vmatpush.msrb.mxu3 %v1279_v12  ;;  %v8928_v37 = vsub.f32 %v952_v54, %v8925_v58 }
 0x1da   :  { %v7366_v10 = vsel %vm7359_vm8, 0.0, %v7365_v63  ;;  %vm7389_vm8 = vcmp.lt.f32.partialorder %v8778_v61, 0  ;;  %vm7402_vm11 = vmand %vm11534_vm10, %vm7390_vm2  ;;  %vm7414_vm10 = vcmp.ne.f32.partialorder %v8778_v61, %v8778_v61  ;;  %v950_v63 = vld [vmem:[%s948_s13 + $0x8] sm:$0xff]  ;;  %s10740_s13 = sld [smem:[#allocation5 + $0x1f]] }
 0x1db   :  { %v7367_v45 = vmul.f32 %v7366_v10, %v8339_v33  ;;  %vm7404_vm0 = vmor %vm7402_vm11, %vm8836_vm1  ;;  %vm7406_vm1 = vcmp.eq.f32.partialorder %v8778_v61, 3212836864  ;;  %vm7394_vm11 = vcmp.eq.f32.partialorder %v8786_v23, 2139095040  ;;  %v7412_v18 = vsel %vm7389_vm8, %v8437_v22, %v8375_v1 }
 0x1dc   :  { %vm7395_vm4 = vmand %vm7389_vm8, %vm8356_vm6  ;;  %v7405_v34 = vsel %vm7404_vm0, 2139095040, %v8210_v14  ;;  %vm7391_vm0 = vcmp.eq.f32.partialorder %v8778_v61, 1065353216  ;;  %v1283_v23 = vand.u32 4294901760, %v8895_v52  ;;  %v8936_v42 = vand.u32 4294901760, %v950_v63 }
 0x1dd   :  { %8076 = vpow2.f32 %v7367_v45  ;;  %v7407_v20 = vsel %vm7406_vm1, 1065353216, %v7405_v34  ;;  %v8932_v45 = vand.u32 4294901760, %v951_v9  ;;  %v1453_v43 = vand.u32 4294901760, %v8928_v37 }
 0x1de   :  { %v1284_v11 = vsub.f32 %v8895_v52, %v1283_v23  ;;  %v8955_v57 = vsub.f32 %v950_v63, %v8936_v42 }
 0x1df   :  { %v1454_v44 = vsub.f32 %v8928_v37, %v1453_v43 }
 0x1e0   :  { %v1285_v46 = vand.u32 4294901760, %v1284_v11 }
 0x1e2   :  { %1286 = vmatpush.msrb.mxu3 %v1285_v46  ;;  %v8992_v46 = vand.u32 4294901760, %v961_v38 }
 0x1e3   :  { %v8077_v36 = vpop.eup %8076 }
 0x1e4   :  { %v7396_v6 = vsel %vm7395_vm4, 2143289344, %v8077_v36  ;;  %vm7418_vm4 = vmor %vm7391_vm0, %vm7270_vm12 }
 0x1e5   :  { %v7398_v19 = vsel %vm7390_vm2, %v8413_v17, %v7396_v6  ;;  %vm7399_vm2 = vmand %vm7392_vm5, %vm8390_vm7 }
 0x1e6   :  { %v7400_v25 = vxor.u32 2147483648, %v7398_v19  ;;  %vm7416_vm5 = vmor %vm7414_vm10, %vm8458_vm15 }
 0x1e8   :  { %v7401_v31 = vsel %vm7399_vm2, %v7400_v25, %v7398_v19  ;;  %v8950_v19 = vand.u32 4294901760, %v949_v7 }
 0x1e9   :  { %v7408_v15 = vsel %vm7269_vm14, %v7407_v20, %v7401_v31 }
 0x1ea   :  { %v7413_v5 = vsel %vm7394_vm11, %v7412_v18, %v7408_v15  ;;  %v8975_v60 = vsub.f32 %v949_v7, %v8950_v19 }
 0x1eb   :  { %v7417_v26 = vsel %vm7416_vm5, 2143289344, %v7413_v5  ;;  %v1465_v5 = vand.u32 4294901760, %v8955_v57 }
 0x1ec   :  { %v7419_v62 = vsel %vm7418_vm4, 1065353216, %v7417_v26 }
 0x1ed   :  { %v7420_v32 = vsel %vm7271_vm13, %v8778_v61, %v7419_v62  ;;  %v1455_v62 = vand.u32 4294901760, %v1454_v44 }
 0x1ee   :  { %v1024_v40 = vmul.f32 %v7420_v32, %v8504_v49 }
 0x1f0   :  { %v1025_v55 = vmax.f32 %v1024_v40, 0.0  ;;  %v1471_v40 = vand.u32 4294901760, %v8975_v60 }
 0x1f2   :  { %v1026_v56 = vmin.f32 %v1025_v55, 1.0  ;;  %v960_v55 = vld [vmem:[%s8964_s27 + $0x10] sm:$0xff] }
 0x1f3   :  { %v9012_v63 = vand.u32 4294901760, %v960_v55 }
 0x1f4   :  { %v1027_v29 = vsub.f32 1.0, %v1026_v56  ;;  %v1029_v61 = vmul.f32 %v1026_v56, %v8316_v41 }
 0x1f6   :  { %v1028_v10 = vmul.f32 %v1027_v29, %v8521_v4  ;;  %v8945_v4 = vsub.f32 %v951_v9, %v8932_v45  ;;  %v1472_v9 = vsub.f32 %v8975_v60, %v1471_v40  ;;  %v9010_v29 = vsub.f32 %v961_v38, %v8992_v46 }
 0x1f8   :  { %v8934_v0 = vadd.f32 %v1029_v61, %v1028_v10  ;;  %v1459_v53 = vand.u32 4294901760, %v8945_v4  ;;  %v959_v10 = vld [vmem:[%s8964_s27 + $0x8] sm:$0xff]  ;;  %v958_v61 = vld [vmem:[%s8964_s27] sm:$0xff] }
 0x1f9   :  { %v9023_v7 = vand.u32 4294901760, %v959_v10 }
 0x1fa   :  { %v1861_v36 = vmul.f32 %v8934_v0, %v8934_v0  ;;  %v1032_v6 = vsel %vm159_vm9, %v8934_v0, 0  ;;  %v1219_v34 = vrot.slane %v8934_v0, 1  ;;  %v1460_v11 = vsub.f32 %v8945_v4, %v1459_v53 }
 0x1fb   :  { %v8948_v41 = vand.u32 4294901760, %v1032_v6  ;;  %v1407_v54 = vrot.slane %v8934_v0, 2 }
 0x1fc   :  { %v1862_v35 = vsel %vm101_vm3, %v1861_v36, 0.0  ;;  %v1220_v25 = vsel %vm159_vm9, %v1219_v34, 0  ;;  %v1461_v56 = vand.u32 4294901760, %v1460_v11  ;;  %v9032_v34 = vsub.f32 %v960_v55, %v9012_v63 }
 0x1fd   :  { %1863 = vadd.xlane.f32.xlu2 %v1862_v35  ;;  %1100 = vmatmul.f32.vlgmr.msra.gmra.mxu1 %v8948_v41  ;;  %v1055_v20 = vsub.f32 %v1032_v6, %v8948_v41  ;;  %v8959_v31 = vand.u32 4294901760, %v1220_v25  ;;  %v1641_v6 = vand.u32 4294901760, %v9010_v29 }
 0x1fe   :  { %1335 = vmatpush.msra.mxu1 %v8845_v2 }
 0x1ff   :  { %1130 = vmatmul.f32.vlgmr.msra.gmra.mxu2 %v1055_v20  ;;  %v1056_v15 = vand.u32 4294901760, %v1055_v20  ;;  %v8972_v18 = vsub.f32 %v1220_v25, %v8959_v31  ;;  %v1642_v25 = vsub.f32 %v9010_v29, %v1641_v6 }
 0x200   :  { %1337 = vmatpush.msra.mxu1 %v8853_v28  ;;  %1364 = vmatpush.msra.mxu2 %v1265_v47 }
 0x201   :  { %1157 = vmatmul.f32.vlgmr.msra.gmra.mxu3 %v1056_v15  ;;  %v1057_v26 = vsub.f32 %v1055_v20, %v1056_v15  ;;  %v1244_v12 = vand.u32 4294901760, %v8972_v18  ;;  %v1643_v38 = vand.u32 4294901760, %v1642_v25 }
 0x202   :  { %1339 = vmatpush.msra.mxu1 %v8855_v24  ;;  %1368 = vmatpush.msra.mxu2 %v1271_v50  ;;  %v1466_v50 = vsub.f32 %v8955_v57, %v1465_v5 }
 0x203   :  { %v1058_v32 = vand.u32 4294901760, %v1057_v26  ;;  %v1245_v47 = vsub.f32 %v8972_v18, %v1244_v12  ;;  %1395 = vmatpush.msra.mxu3 %v8845_v2 }
 0x204   :  { %1341 = vmatpush.msra.mxu1 %v8880_v51  ;;  %1372 = vmatpush.msra.mxu2 %v1277_v27  ;;  %v1595_v27 = vrot.slane %v8934_v0, 3 }
 0x205   :  { %1059 = vmatmul.f32.vlgmr.msra.gmra.mxu0 %v1058_v32  ;;  %1215 = vmatmul.f32.vlgmr.msrb.gmra.mxu1 %v8948_v41  ;;  %v1246_v2 = vand.u32 4294901760, %v1245_v47 }
 0x206   :  { %1397 = vmatpush.msra.mxu3 %v8853_v28  ;;  %1306 = vmatpush.msra.mxu0 %v8851_v21  ;;  %v1467_v21 = vand.u32 4294901760, %v1466_v50  ;;  %v1408_v28 = vsel %vm159_vm9, %v1407_v54, 0  ;;  %v1596_v36 = vsel %vm159_vm9, %v1595_v27, 0 }
 0x207   :  { %1247 = vmatmul.f32.vlgmr.msrb.gmra.mxu2 %v1246_v2  ;;  %1456 = vmatpush.msrb.mxu1 %v1455_v62 }
 0x208   :  { %1376 = vmatpush.msra.mxu2 %v1283_v23  ;;  %1399 = vmatpush.msra.mxu3 %v8855_v24  ;;  %v1473_v24 = vand.u32 4294901760, %v1472_v9  ;;  %v9028_v23 = vand.u32 4294901760, %v1408_v28 }
 0x209   :  { %1288 = vmatmul.f32.vlgmr.msrb.gmra.mxu3 %v8959_v31  ;;  %1309 = vmatpush.msra.mxu0 %v8866_v16  ;;  %v9035_v16 = vand.u32 4294901760, %v958_v61 }
 0x20a   :  { %1401 = vmatpush.msra.mxu3 %v8880_v51  ;;  %1462 = vmatpush.msrb.mxu1 %v1461_v56  ;;  %v9038_v51 = vand.u32 4294901760, %v1596_v36  ;;  %v1431_v35 = vsub.f32 %v1408_v28, %v9028_v23 }
 0x20b   :  { %1494 = vmatpush.msrb.mxu2 %v8928_v37  ;;  %1312 = vmatpush.msra.mxu0 %v8873_v48  ;;  %v9043_v48 = vsub.f32 %v959_v10, %v9023_v7 }
 0x20c   :  { %1468 = vmatpush.msrb.mxu1 %v1467_v21  ;;  %1523 = vmatpush.msrb.mxu3 %v8925_v58  ;;  %v9059_v20 = vsub.f32 %v1596_v36, %v9038_v51  ;;  %v1432_v15 = vand.u32 4294901760, %v1431_v35 }
 0x20d   :  { %1190 = vmatmul.f32.vlgmr.msrb.gmra.mxu0 %v8948_v41  ;;  %1345 = vmatmul.f32.vlgmr.msra.gmra.mxu1 %v1244_v12  ;;  %v1647_v41 = vand.u32 4294901760, %v9032_v34  ;;  %v1653_v44 = vand.u32 4294901760, %v9043_v48 }
 0x20e   :  { %1497 = vmatpush.msrb.mxu2 %v8945_v4  ;;  %1315 = vmatpush.msra.mxu0 %v8895_v52  ;;  %v9054_v52 = vsub.f32 %v958_v61, %v9035_v16  ;;  %v1620_v12 = vand.u32 4294901760, %v9059_v20  ;;  %v1433_v11 = vsub.f32 %v1431_v35, %v1432_v15 }
 0x20f   :  { %1378 = vmatmul.f32.vlgmr.msra.gmra.mxu2 %v8959_v31  ;;  %1474 = vmatpush.msrb.mxu1 %v1473_v24  ;;  %v1648_v26 = vsub.f32 %v9032_v34, %v1647_v41 }
 0x210   :  { %1500 = vmatpush.msrb.mxu2 %v8955_v57  ;;  %1525 = vmatpush.msrb.mxu3 %v8932_v45  ;;  %v1621_v32 = vsub.f32 %v9059_v20, %v1620_v12  ;;  %v1434_v47 = vand.u32 4294901760, %v1433_v11  ;;  %v8047_v11 = vld [vmem:[%s2678_s29] ss:$0 sm:$0xff]  ;;  %s7176_s29 = sshll.u32 %s8699_s28, 5  ;;  %s7178_s28 = sshll.u32 %s8701_s30, 5 }
 0x211   :  { %1403 = vmatmul.f32.vlgmr.msra.gmra.mxu3 %v8959_v31  ;;  %1423 = vmatpush.msrb.mxu0 %v8925_v58  ;;  %v1659_v31 = vand.u32 4294901760, %v9054_v52  ;;  %v1649_v62 = vand.u32 4294901760, %v1648_v26  ;;  %s1819_s8 = scalar_lea.vmem %s11513_s3, %s7178_s28  ;;  %s3540_s30 = scalar_lea.vmem %s11512_s2, %s9548_s24 }
 0x212   :  { %1503 = vmatpush.msrb.mxu2 %v8975_v60  ;;  %1527 = vmatpush.msrb.mxu3 %v8936_v42  ;;  %v1622_v50 = vand.u32 4294901760, %v1621_v32  ;;  %s9924_s28 = sld [smem:[#allocation5 + $0x15]] }
 0x213   :  { %1583 = vmatpush.msra.mxu1 %v8925_v58  ;;  %1425 = vmatpush.msrb.mxu0 %v8932_v45  ;;  %v1654_v58 = vsub.f32 %v9043_v48, %v1653_v44 }
 0x214   :  { %1529 = vmatpush.msrb.mxu3 %v8950_v19  ;;  %1611 = vmatpush.msra.mxu2 %v8992_v46 }
 0x215   :  { %1318 = vmatmul.f32.vlgmr.msra.gmra.mxu0 %v8972_v18  ;;  %1476 = vmatmul.f32.vlgmr.msrb.gmra.mxu1 %v9028_v23  ;;  %v1660_v18 = vsub.f32 %v9054_v52, %v1659_v31 }
 0x216   :  { %1585 = vmatpush.msra.mxu1 %v8932_v45  ;;  %1427 = vmatpush.msrb.mxu0 %v8936_v42  ;;  %v1655_v45 = vand.u32 4294901760, %v1654_v58 }
 0x217   :  { %1506 = vmatmul.f32.vlgmr.msrb.gmra.mxu2 %v1431_v35  ;;  %1644 = vmatpush.msra.mxu3 %v1643_v38 }
 0x218   :  { %1587 = vmatpush.msra.mxu1 %v8936_v42  ;;  %1613 = vmatpush.msra.mxu2 %v9012_v63  ;;  %v1661_v42 = vand.u32 4294901760, %v1660_v18  ;;  %v8048_v18 = vld [vmem:[%s2687_s25] ss:$0 sm:$0xff]  ;;  %s1810_s25 = scalar_lea.vmem %s11513_s3, %s7176_s29  ;;  %s3567_s29 = scalar_lea.vmem %s11512_s2, %s9522_s12 }
 0x219   :  { %1533 = vmatmul.f32.vlgmr.msrb.gmra.mxu3 %v1432_v15  ;;  %1429 = vmatpush.msrb.mxu0 %v8950_v19  ;;  %s4420_s10 = scalar_lea.vmem %s11512_s2, %s9924_s28 }
 0x21a   :  { %1589 = vmatpush.msra.mxu1 %v8950_v19  ;;  %1615 = vmatpush.msra.mxu2 %v9023_v7  ;;  %v1848_v37 = vpop.xlane.xlu2 %1847 }
 0x21b   :  { %1650 = vmatpush.msra.mxu3 %v1649_v62  ;;  %1552 = vmatpush.msra.mxu0 %v1453_v43  ;;  %8078 = vrsqrt.f32 %v1848_v37  ;;  %vm1856_vm8 = vcmp.eq.f32.partialorder %v1848_v37, inf  ;;  %vm1858_vm1 = vcmp.eq.f32.partialorder %v1848_v37, 0.0  ;;  %v2670_v62 = vld [vmem:[%s2669_s16] sm:$0x1]  ;;  %s9520_s16 = sld [smem:[#allocation5 + $0x12]] }
 0x21c   :  { %1617 = vmatpush.msra.mxu2 %v9035_v16  ;;  %1711 = vmatpush.msrb.mxu1 %v8992_v46 }
 0x21d   :  { %1435 = vmatmul.f32.vlgmr.msrb.gmra.mxu0 %v1434_v47  ;;  %1591 = vmatmul.f32.vlgmr.msra.gmra.mxu1 %v9028_v23  ;;  %v1805_v47 = vld [vmem:[%s1801_s14 + $0x18] sm:$0xff] }
 0x21e   :  { %1656 = vmatpush.msra.mxu3 %v1655_v45  ;;  %1556 = vmatpush.msra.mxu0 %v1459_v53  ;;  %v8049_v45 = vld [vmem:[%s2696_s9] ss:$0 sm:$0xff]  ;;  %s7180_s9 = sshll.u32 %s8703_s6, 5  ;;  %s7198_s6 = sshll.u32 %s9954_s19, 5 }
 0x21f   :  { %1623 = vmatmul.f32.vlgmr.msra.gmra.mxu2 %v1622_v50  ;;  %1713 = vmatpush.msrb.mxu1 %v9012_v63  ;;  %s9370_s26 = scalar_lea.vmem %s11513_s3, %s7180_s9  ;;  %s2672_s9 = scalar_lea.vmem %s11513_s3, %s7182_s1 }
 0x220   :  { %1662 = vmatpush.msra.mxu3 %v1661_v42  ;;  %1740 = vmatpush.msrb.mxu2 %v1641_v6  ;;  %v1804_v42 = vld [vmem:[%s1801_s14 + $0x10] sm:$0xff]  ;;  %s10766_s1 = sld [smem:[#allocation5 + $0x1c]] }
 0x221   :  { %1664 = vmatmul.f32.vlgmr.msra.gmra.mxu3 %v9038_v51  ;;  %1560 = vmatpush.msra.mxu0 %v1465_v5  ;;  %v8079_v43 = vpop.eup %8078  ;;  %s3558_s27 = scalar_lea.vmem %s11512_s2, %s9520_s16 }
 0x222   :  { %1715 = vmatpush.msrb.mxu1 %v9023_v7  ;;  %1744 = vmatpush.msrb.mxu2 %v1647_v41  ;;  %v1850_v4 = vmul.f32 %v8079_v43, %v1848_v37 }
 0x223   :  { %1771 = vmatpush.msrb.mxu3 %v8992_v46  ;;  %1564 = vmatpush.msra.mxu0 %v1471_v40 }
 0x224   :  { %1717 = vmatpush.msrb.mxu1 %v9035_v16  ;;  %1748 = vmatpush.msrb.mxu2 %v1653_v44  ;;  %v1851_v19 = vmul.f32 %v8079_v43, %v1850_v4  ;;  %v9174_v4 = vand.u32 4294901760, %v1805_v47 }
 0x225   :  { %1773 = vmatpush.msrb.mxu3 %v9012_v63  ;;  %1566 = vmatmul.f32.vlgmr.msra.gmra.mxu0 %v9028_v23 }
 0x226   :  { %1721 = vmatmul.f32.vlgmr.msrb.gmra.mxu1 %v1620_v12  ;;  %1682 = vmatpush.msrb.mxu0 %v9010_v29  ;;  %v1852_v53 = vmul.f32 0.5, %v1851_v19  ;;  %v1859_v29 = vand.u32 2147483648, %v1848_v37  ;;  %v9176_v19 = vand.u32 4294901760, %v1804_v42 }
 0x227   :  { %1752 = vmatpush.msrb.mxu2 %v1659_v31  ;;  %1775 = vmatpush.msrb.mxu3 %v9023_v7 }
 0x228   :  { %1754 = vmatmul.f32.vlgmr.msrb.gmra.mxu2 %v9038_v51  ;;  %1685 = vmatpush.msrb.mxu0 %v9032_v34  ;;  %v1853_v60 = vsub.f32 1.5, %v1852_v53  ;;  %v1802_v53 = vld [vmem:[%s1801_s14] sm:$0xff] }
 0x229   :  { %1777 = vmatpush.msrb.mxu3 %v9035_v16 }
 0x22a   :  { %1779 = vmatmul.f32.vlgmr.msrb.gmra.mxu3 %v9038_v51  ;;  %1688 = vmatpush.msrb.mxu0 %v9043_v48  ;;  %v1854_v46 = vmul.f32 %v8079_v43, %v1853_v60 }
 0x22b   :  { %2018 = vmatpush.msra.mxu3 %v9174_v4 }
 0x22c   :  { %1691 = vmatpush.msrb.mxu0 %v9054_v52  ;;  %v1855_v56 = vmul.f32 %v1854_v46, %v1848_v37 }
 0x22d   :  { %1694 = vmatmul.f32.vlgmr.msrb.gmra.mxu0 %v9059_v20  ;;  %2020 = vmatpush.msra.mxu3 %v9176_v19 }
 0x22e   :  { %v1857_v63 = vsel %vm1856_vm8, %v1848_v37, %v1855_v56  ;;  %vm11535_vm8 = vcmask 1040384   ;;  %v1947_v56 = vsub.f32 %v1805_v47, %v9174_v4  ;;  %1918 = vmatpush.msra.mxu0 %v9174_v4 }
 0x22f   :  { %v1860_v23 = vsel %vm1858_vm1, %v1859_v29, %v1857_v63  ;;  %v2713_v43 = vsel %vm11535_vm8, %v2670_v62, %v8047_v11  ;;  %vm11536_vm1 = vcmask 1041408  }
 0x230   :  { %1989 = vmatpush.msra.mxu2 %v1947_v56  ;;  %1920 = vmatpush.msra.mxu0 %v9176_v19 }
 0x270   :  { %v1864_v57 = vpop.xlane.xlu2 %1863 }
 0x271   :  { %8080 = vrsqrt.f32 %v1864_v57  ;;  %vm1872_vm0 = vcmp.eq.f32.partialorder %v1864_v57, inf  ;;  %v1875_v61 = vand.u32 2147483648, %v1864_v57  ;;  %vm1874_vm2 = vcmp.eq.f32.partialorder %v1864_v57, 0.0 }
 0x277   :  { %v8081_v5 = vpop.eup %8080 }
 0x278   :  { %v1866_v40 = vmul.f32 %v8081_v5, %v1864_v57 }
 0x27a   :  { %v1867_v54 = vmul.f32 %v8081_v5, %v1866_v40  ;;  %v9130_v55 = vpop.f32.mrf.mxu1 }
 0x27c   :  { %v1868_v2 = vmul.f32 0.5, %v1867_v54 }
 0x27e   :  { %v1869_v27 = vsub.f32 1.5, %v1868_v2 }
 0x280   :  { %v1870_v9 = vmul.f32 %v8081_v5, %v1869_v27  ;;  %v2714_v5 = vsel %vm11536_vm1, %v2713_v43, %v8048_v18  ;;  %v1953_v27 = vsub.f32 %v1804_v42, %v9176_v19 }
 0x282   :  { %v1871_v10 = vmul.f32 %v1870_v9, %v1864_v57  ;;  %v9132_v21 = vpop.f32.mrf.mxu0  ;;  %v9134_v28 = vpop.f32.mrf.mxu2  ;;  %v9187_v9 = vand.u32 4294901760, %v1802_v53  ;;  %1992 = vmatpush.msra.mxu2 %v1953_v27 }
 0x283   :  { %v9136_v36 = vpop.f32.mrf.mxu1 }
 0x284   :  { %v1873_v7 = vsel %vm1872_vm0, %v1864_v57, %v1871_v10  ;;  %v9138_v24 = vpop.f32.mrf.mxu3  ;;  %v1803_v57 = vld [vmem:[%s1801_s14 + $0x8] sm:$0xff]  ;;  %vm11537_vm0 = vcmask 1042432  }
 0x285   :  { %v1876_v6 = vsel %vm1874_vm2, %v1875_v61, %v1873_v7  ;;  %v9179_v40 = vand.u32 4294901760, %v1803_v57  ;;  %v9182_v2 = vsel %vm11537_vm0, %v2714_v5, %v8049_v45  ;;  %v1948_v61 = vand.u32 4294901760, %v1947_v56 }
 0x286   :  { %v1877_v34 = vadd.f32 %v1876_v6, %v1860_v23  ;;  %v2716_v63 = vmul.f32 %v9182_v2, %v9182_v2  ;;  %v1954_v7 = vand.u32 4294901760, %v1953_v27  ;;  %v1965_v6 = vsub.f32 %v1802_v53, %v9187_v9 }
 0x287   :  { %2022 = vmatpush.msra.mxu3 %v9179_v40  ;;  %1922 = vmatpush.msra.mxu0 %v9179_v40 }
 0x288   :  { %8082 = vrcp.f32 %v1877_v34  ;;  %v1889_v20 = vand.u32 2147483648, %v1877_v34  ;;  %v1887_v26 = vand.u32 2147483647, %v1877_v34  ;;  %vm1883_vm11 = vweird.f32 %v1877_v34 }
 0x289   :  { %2024 = vmatpush.msra.mxu3 %v9187_v9  ;;  %1924 = vmatpush.msra.mxu0 %v9187_v9 }
 0x28a   :  { %v9140_v16 = vpop.f32.mrf.mxu0  ;;  %v1248_v51 = vpop.f32.mrf.mxu2  ;;  %v1890_v58 = vor.u32 1.1754944e-38, %v1889_v20  ;;  %vm1888_vm4 = vcmp.eq.f32.partialorder %v1887_v26, 8.507059e+37  ;;  %v1949_v20 = vsub.f32 %v1947_v56, %v1948_v61 }
 0x28b   :  { %v9144_v25 = vpop.f32.mrf.mxu1  ;;  %2047 = vmatpush.msrb.mxu0 %v1948_v61 }
 0x28c   :  { %v1289_v48 = vpop.f32.mrf.mxu3  ;;  %v1950_v11 = vand.u32 4294901760, %v1949_v20 }
 0x28d   :  { %2051 = vmatpush.msrb.mxu0 %v1954_v7 }
 0x28e   :  { %v8083_v35 = vpop.eup %8082  ;;  %1951 = vmatpush.msra.mxu1 %v1950_v11 }
 0x28f   :  { %v1879_v41 = vmul.f32 %v8083_v35, %v1877_v34  ;;  %vm1884_vm10 = vweird.f32 %v8083_v35 }
 0x290   :  { %vm1885_vm5 = vmor %vm1883_vm11, %vm1884_vm10 }
 0x291   :  { %v1880_v52 = vsub.f32 1.0, %v1879_v41  ;;  %vm11538_vm10 = vmmov %vm11535_vm8 }
 0x292   :  { %v1319_v44 = vpop.f32.mrf.mxu0  ;;  %v9147_v15 = vpop.f32.mrf.mxu2  ;;  %vm11539_vm11 = vmmov %vm11536_vm1 }
 0x293   :  { %v1881_v38 = vmul.f32 %v8083_v35, %v1880_v52  ;;  %v1477_v37 = vpop.f32.mrf.mxu1  ;;  %v2717_v52 = vsel %vm101_vm3, %v2716_v63, 0.0 }
 0x294   :  { %v9153_v31 = vpop.f32.mrf.mxu3  ;;  %2718 = vadd.xlane.f32.xlu0 %v2717_v52 }
 0x295   :  { %v1882_v12 = vadd.f32 %v8083_v35, %v1881_v38  ;;  %v1955_v38 = vsub.f32 %v1953_v27, %v1954_v7 }
 0x297   :  { %v1886_v32 = vsel %vm1885_vm5, %v8083_v35, %v1882_v12  ;;  %v1290_v35 = vadd.f32 %v1289_v48, %v1248_v51  ;;  %v1966_v12 = vand.u32 4294901760, %v1965_v6  ;;  %v1956_v51 = vand.u32 4294901760, %v1955_v38  ;;  %vm11540_vm5 = vmmov %vm11537_vm0 }
 0x298   :  { %v1891_v50 = vsel %vm1888_vm4, %v1890_v58, %v1886_v32  ;;  %vm11541_vm4 = vcmask 125952  }
 0x299   :  { %v1892_v60 = vmul.f32 %v1891_v50, %v1860_v23  ;;  %v1959_v23 = vsub.f32 %v1803_v57, %v9179_v40  ;;  %v1320_v58 = vadd.f32 %v1319_v44, %v1290_v35  ;;  %v1967_v18 = vsub.f32 %v1965_v6, %v1966_v12  ;;  %1957 = vmatpush.msra.mxu1 %v1956_v51 }
 0x29a   :  { %v1436_v46 = vpop.f32.mrf.mxu0  ;;  %v1507_v54 = vpop.f32.mrf.mxu2  ;;  %v1102_v50 = vadd.f32 %v9130_v55, %v9132_v21 }
 0x29b   :  { %v9191_v29 = vmul.f32 %v1892_v60, %v8328_v13  ;;  %v1478_v41 = vadd.f32 %v1477_v37, %v1436_v46  ;;  %v1960_v26 = vand.u32 4294901760, %v1959_v23  ;;  %1995 = vmatpush.msra.mxu2 %v1959_v23  ;;  %v1592_v47 = vpop.f32.mrf.mxu1  ;;  %v1347_v37 = vadd.f32 %v9144_v25, %v1320_v58 }
 0x29c   :  { %v1534_v10 = vpop.f32.mrf.mxu3  ;;  %v1968_v53 = vand.u32 4294901760, %v1967_v18 }
 0x29d   :  { %v9199_v34 = vand.u32 2147483647, %v9191_v29  ;;  %v1961_v48 = vsub.f32 %v1959_v23, %v1960_v26  ;;  %v1508_v45 = vadd.f32 %v1507_v54, %v1478_v41  ;;  %1998 = vmatpush.msra.mxu2 %v1965_v6  ;;  %v1132_v54 = vadd.f32 %v9134_v28, %v1102_v50  ;;  %2055 = vmatpush.msrb.mxu0 %v1960_v26 }
 0x29e   :  { %v1380_v56 = vadd.f32 %v9147_v15, %v1347_v37 }
 0x29f   :  { %v7429_v62 = vand.u32 8388607, %v9199_v34  ;;  %v1962_v44 = vand.u32 4294901760, %v1961_v48  ;;  %v1535_v5 = vadd.f32 %v1534_v10, %v1508_v45  ;;  %2059 = vmatpush.msrb.mxu0 %v1966_v12  ;;  %v1159_v10 = vadd.f32 %v9138_v24, %v1132_v54 }
 0x2a0   :  { %v1405_v7 = vadd.f32 %v9153_v31, %v1380_v56  ;;  %v7425_v52 = vand.u32 2139095040, %v9199_v34  ;;  %vm7463_vm8 = vweird.f32 %v9199_v34  ;;  %vm7462_vm1 = vcmp.lt.f32.partialorder %v9199_v34, 0.0 }
 0x2a1   :  { %v7430_v32 = vor.u32 8388608, %v7429_v62  ;;  %1963 = vmatpush.msra.mxu1 %v1962_v44  ;;  %v1192_v35 = vadd.f32 %v9140_v16, %v1159_v10  ;;  %vm7461_vm0 = vcmp.eq.f32.partialorder %v9199_v34, 0.0 }
 0x2a2   :  { %v1567_v42 = vpop.f32.mrf.mxu0  ;;  %v1624_v57 = vpop.f32.mrf.mxu2  ;;  %v1784_v26 = vrot.slane %v1405_v7, 7  ;;  %v7426_v16 = vshrl.u32 %v7425_v52, 23  ;;  %v1814_v7 = vld [vmem:[%s1810_s25 + $0x18] sm:$0xff] }
 0x2a3   :  { %v7432_v43 = vand.u32 8388607, %v7430_v32  ;;  %v1568_v55 = vadd.f32 %v1567_v42, %v1535_v5  ;;  %1969 = vmatpush.msra.mxu1 %v1968_v53  ;;  %v1722_v23 = vpop.f32.mrf.mxu1  ;;  %v1217_v62 = vadd.f32 %v9136_v36, %v1192_v35 }
 0x2a4   :  { %v1665_v46 = vpop.f32.mrf.mxu3 }
 0x2a5   :  { %v7433_v60 = vor.u32 1065353216, %v7432_v43  ;;  %v1666_v21 = vadd.f32 %v1665_v46, %v1624_v57  ;;  %2078 = vmatpush.msrb.mxu1 %v9174_v4  ;;  %v1593_v15 = vadd.f32 %v1592_v47, %v1568_v55  ;;  %v1792_v18 = vsel %vm11538_vm10, %v1217_v62, %v1784_v26 }
 0x2a6   :  { %vm7460_vm10 = vcmp.eq.f32.partialorder %v9199_v34, 1.0 }
 0x2a7   :  { %vm7434_vm2 = vcmp.ge.f32.partialorder %v7433_v60, 1.4142135  ;;  %v7435_v27 = vmul.f32 0.5, %v7433_v60  ;;  %2080 = vmatpush.msrb.mxu1 %v9176_v19  ;;  %v1787_v31 = vrot.slane %v1593_v15, 6  ;;  %v1813_v15 = vld [vmem:[%s1810_s25 + $0x10] sm:$0xff] }
 0x2a8   :  { %v9259_v35 = vand.u32 4294901760, %v1813_v15 }
 0x2a9   :  { %v7436_v25 = vsel %vm7434_vm2, %v7435_v27, %v7433_v60  ;;  %2082 = vmatpush.msrb.mxu1 %v9179_v40  ;;  %v1793_v32 = vsel %vm11539_vm11, %v1792_v18, %v1787_v31  ;;  %vm7491_vm11 = vcmp.eq.f32.partialorder %v9191_v29, 0  ;;  %v1811_v31 = vld [vmem:[%s1810_s25] sm:$0xff] }
 0x2aa   :  { %v1695_v63 = vpop.f32.mrf.mxu0  ;;  %v7523_v61 = vadd.f32 -1.0, %v7436_v25  ;;  %v9272_v26 = vsub.f32 %v1813_v15, %v9259_v35  ;;  %v1820_v15 = vld [vmem:[%s1819_s8] sm:$0xff] }
 0x2ab   :  { %v1696_v28 = vadd.f32 %v1695_v63, %v1666_v21  ;;  %v1755_v4 = vpop.f32.mrf.mxu2  ;;  %2084 = vmatpush.msrb.mxu1 %v9187_v9  ;;  %v7522_v9 = vadd.s32 4294967169, %v7426_v16 }
 0x2ac   :  { %v7440_v6 = vmul.f32 %v7523_v61, %v7523_v61  ;;  %v2142_v62 = vand.u32 4294901760, %v9272_v26 }
 0x2ad   :  { %v1723_v41 = vadd.f32 %v1722_v23, %v1696_v28  ;;  %v1780_v12 = vpop.f32.mrf.mxu3  ;;  %v7437_v43 = vadd.s32 1, %v7522_v9  ;;  %v9251_v28 = vand.u32 4294901760, %v1814_v7  ;;  %v1812_v23 = vld [vmem:[%s1810_s25 + $0x8] sm:$0xff] }
 0x2ae   :  { %v7441_v20 = vmul.f32 0.12621109, %v7440_v6  ;;  %v7443_v38 = vmul.f32 -0.20706727, %v7440_v6 }
 0x2af   :  { %v1756_v24 = vadd.f32 %v1755_v4, %v1723_v41  ;;  %v7438_v46 = vsel %vm7434_vm2, %v7437_v43, %v7522_v9  ;;  %vm7494_vm2 = vcmp.gt.f32.partialorder %v9199_v34, 1065353216  ;;  %2106 = vmatpush.msrb.mxu2 %v9251_v28  ;;  %v9261_v41 = vand.u32 4294901760, %v1812_v23 }
 0x2b0   :  { %v7442_v19 = vadd.f32 0.21545328, %v7441_v20  ;;  %v7444_v58 = vadd.f32 -0.23896284, %v7443_v38  ;;  %v7458_v27 = vcvt.s32.f32 %v7438_v46  ;;  %v1823_v46 = vld [vmem:[%s1819_s8 + $0x18] sm:$0xff] }
 0x2b1   :  { %v1781_v11 = vadd.f32 %v1780_v12, %v1756_v24  ;;  %2108 = vmatpush.msrb.mxu2 %v9259_v35  ;;  %v9279_v12 = vsub.f32 %v1812_v23, %v9261_v41 }
 0x2b2   :  { %v7445_v51 = vmul.f32 %v7442_v19, %v7440_v6  ;;  %v7447_v48 = vmul.f32 %v7444_v58, %v7440_v6 }
 0x2b3   :  { %v1790_v40 = vrot.slane %v1781_v11, 5  ;;  %2110 = vmatpush.msrb.mxu2 %v9261_v41  ;;  %v9286_v11 = vand.u32 4294901760, %v1811_v31 }
 0x2b4   :  { %v7446_v45 = vadd.f32 0.28795174, %v7445_v51  ;;  %v7448_v47 = vadd.f32 -0.3607037, %v7447_v48  ;;  %v2148_v51 = vand.u32 4294901760, %v9279_v12 }
 0x2b5   :  { %v1794_v42 = vsel %vm11540_vm5, %v1793_v32, %v1790_v40  ;;  %vm11542_vm5 = vcmp.lt.f32.partialorder %v8339_v33, 0  ;;  %v2143_v40 = vsub.f32 %v9272_v26, %v2142_v62  ;;  %2112 = vmatpush.msrb.mxu2 %v9286_v11  ;;  %v9301_v32 = vsub.f32 %v1811_v31, %v9286_v11 }
 0x2b6   :  { %1796 = vst.msk [vmem:[#allocation7 + $0x4] sm:$0xf] %vm11541_vm4, %v1794_v42  ;;  %v7449_v44 = vmul.f32 %v7446_v45, %v7440_v6  ;;  %v7451_v50 = vmul.f32 %v7448_v47, %v7440_v6  ;;  %vm9242_vm4 = vmxor %vm11542_vm5, %vm7494_vm2  ;;  %vm7493_vm2 = vcmp.lt.s32.totalorder %v9191_v29, 0  ;;  %v2149_v42 = vsub.f32 %v9279_v12, %v2148_v51 }
 0x2b8   :  { %v7450_v37 = vadd.f32 0.48090908, %v7449_v44  ;;  %v7452_v36 = vadd.f32 -0.72134733, %v7451_v50  ;;  %v2144_v44 = vand.u32 4294901760, %v2143_v40 }
 0x2ba   :  { %v7453_v57 = vmul.f32 %v7450_v37, %v7440_v6  ;;  %v7455_v5 = vmul.f32 %v7523_v61, %v7452_v36  ;;  %v9257_v6 = vsub.f32 %v1814_v7, %v9251_v28  ;;  %v2150_v37 = vand.u32 4294901760, %v2149_v42 }
 0x2bc   :  { %v7454_v53 = vadd.f32 1.442695, %v7453_v57  ;;  %v2136_v38 = vand.u32 4294901760, %v9257_v6 }
 0x2be   :  { %v7456_v54 = vadd.f32 %v7455_v5, %v7454_v53  ;;  %v2137_v58 = vsub.f32 %v9257_v6, %v2136_v38 }
 0x2c0   :  { %v7457_v56 = vmul.f32 %v7523_v61, %v7456_v54  ;;  %v2138_v18 = vand.u32 4294901760, %v2137_v58 }
 0x2c2   :  { %v7459_v55 = vadd.f32 %v7458_v27, %v7457_v56  ;;  %2139 = vmatpush.msrb.mxu3 %v2138_v18  ;;  %v9331_v56 = vand.u32 4294901760, %v1823_v46 }
 0x2c4   :  { %v7464_v21 = vsel %vm7463_vm8, %v9199_v34, %v7459_v55  ;;  %vm7490_vm8 = vcmp.lt.f32.partialorder %v9191_v29, 0  ;;  %2145 = vmatpush.msrb.mxu3 %v2144_v44  ;;  %v1822_v55 = vld [vmem:[%s1819_s8 + $0x10] sm:$0xff]  ;;  %v1832_v44 = vld [vmem:[%s9370_s26 + $0x18] sm:$0xff] }
 0x2c5   :  { %v7465_v25 = vsel %vm7462_vm1, nan, %v7464_v21  ;;  %vm11545_vm1 = vmmov %vm11542_vm5  ;;  %v7513_v47 = vsel %vm7490_vm8, %v8437_v22, %v8375_v1 }
 0x2c6   :  { %v7466_v63 = vsel %vm7461_vm0, -inf, %v7465_v25  ;;  %vm7503_vm0 = vmand %vm11545_vm1, %vm7491_vm11  ;;  %2151 = vmatpush.msrb.mxu3 %v2150_v37  ;;  %v9334_v25 = vsub.f32 %v1823_v46, %v9331_v56 }
 0x2c7   :  { %v7467_v10 = vsel %vm7460_vm10, 0.0, %v7466_v63  ;;  %vm7505_vm10 = vmor %vm7503_vm0, %vm9242_vm4  ;;  %vm7507_vm4 = vcmp.eq.f32.partialorder %v9191_v29, 3212836864  ;;  %vm7515_vm0 = vcmp.ne.f32.partialorder %v9191_v29, %v9191_v29  ;;  %v1821_v63 = vld [vmem:[%s1819_s8 + $0x8] sm:$0xff] }
 0x2c8   :  { %v7468_v60 = vmul.f32 %v7467_v10, %v8339_v33  ;;  %vm7496_vm5 = vmand %vm7490_vm8, %vm8356_vm6  ;;  %v7506_v20 = vsel %vm7505_vm10, 2139095040, %v8210_v14  ;;  %vm7495_vm10 = vcmp.eq.f32.partialorder %v9199_v34, 2139095040  ;;  %v2154_v34 = vand.u32 4294901760, %v9301_v32 }
 0x2c9   :  { %vm7500_vm1 = vmand %vm7493_vm2, %vm8390_vm7  ;;  %v7508_v16 = vsel %vm7507_vm4, 1065353216, %v7506_v20  ;;  %v9342_v7 = vand.u32 4294901760, %v1821_v63  ;;  %v2324_v23 = vand.u32 4294901760, %v9334_v25 }
 0x2ca   :  { %8084 = vpow2.f32 %v7468_v60  ;;  %vm7517_vm2 = vmor %vm7515_vm0, %vm8458_vm15  ;;  %v2155_v43 = vsub.f32 %v9301_v32, %v2154_v34  ;;  %v9338_v60 = vand.u32 4294901760, %v1822_v55 }
 0x2cb   :  { %v9361_v58 = vsub.f32 %v1821_v63, %v9342_v7  ;;  %v2325_v18 = vsub.f32 %v9334_v25, %v2324_v23 }
 0x2cc   :  { %v2156_v5 = vand.u32 4294901760, %v2155_v43 }
 0x2ce   :  { %2157 = vmatpush.msrb.mxu3 %v2156_v5  ;;  %v9398_v5 = vand.u32 4294901760, %v1832_v44 }
 0x2d0   :  { %v8085_v52 = vpop.eup %8084 }
 0x2d1   :  { %v7497_v4 = vsel %vm7496_vm5, 2143289344, %v8085_v52 }
 0x2d2   :  { %v7499_v24 = vsel %vm7491_vm11, %v8413_v17, %v7497_v4  ;;  %vm7492_vm11 = vcmp.eq.f32.partialorder %v9191_v29, 1065353216 }
 0x2d3   :  { %v7501_v19 = vxor.u32 2147483648, %v7499_v24  ;;  %vm7519_vm5 = vmor %vm7492_vm11, %vm7270_vm12 }
 0x2d5   :  { %v7502_v48 = vsel %vm7500_vm1, %v7501_v19, %v7499_v24  ;;  %v9356_v24 = vand.u32 4294901760, %v1820_v15 }
 0x2d6   :  { %v7509_v45 = vsel %vm7269_vm14, %v7508_v16, %v7502_v48 }
 0x2d7   :  { %v7514_v9 = vsel %vm7495_vm10, %v7513_v47, %v7509_v45  ;;  %v9381_v42 = vsub.f32 %v1820_v15, %v9356_v24 }
 0x2d8   :  { %v7518_v50 = vsel %vm7517_vm2, 2143289344, %v7514_v9  ;;  %v2336_v9 = vand.u32 4294901760, %v9361_v58 }
 0x2d9   :  { %v7520_v36 = vsel %vm7519_vm5, 1065353216, %v7518_v50 }
 0x2da   :  { %v7521_v57 = vsel %vm7271_vm13, %v9191_v29, %v7520_v36  ;;  %v2326_v36 = vand.u32 4294901760, %v2325_v18 }
 0x2db   :  { %v1895_v53 = vmul.f32 %v7521_v57, %v8504_v49 }
 0x2dd   :  { %v1896_v54 = vmax.f32 %v1895_v53, 0.0  ;;  %v2342_v53 = vand.u32 4294901760, %v9381_v42 }
 0x2df   :  { %v1897_v27 = vmin.f32 %v1896_v54, 1.0  ;;  %v1831_v54 = vld [vmem:[%s9370_s26 + $0x10] sm:$0xff] }
 0x2e0   :  { %v9418_v63 = vand.u32 4294901760, %v1831_v54 }
 0x2e1   :  { %v1898_v21 = vsub.f32 1.0, %v1897_v27  ;;  %v1900_v29 = vmul.f32 %v1897_v27, %v8769_v3 }
 0x2e3   :  { %v1899_v10 = vmul.f32 %v1898_v21, %v8934_v0  ;;  %v9351_v0 = vsub.f32 %v1822_v55, %v9338_v60  ;;  %v2343_v55 = vsub.f32 %v9381_v42, %v2342_v53  ;;  %v9416_v21 = vsub.f32 %v1832_v44, %v9398_v5 }
 0x2e5   :  { %v9340_v61 = vadd.f32 %v1900_v29, %v1899_v10  ;;  %v2330_v40 = vand.u32 4294901760, %v9351_v0  ;;  %v1830_v10 = vld [vmem:[%s9370_s26 + $0x8] sm:$0xff]  ;;  %v1829_v29 = vld [vmem:[%s9370_s26] sm:$0xff] }
 0x2e6   :  { %v9429_v15 = vand.u32 4294901760, %v1830_v10 }
 0x2e7   :  { %v2732_v52 = vmul.f32 %v9340_v61, %v9340_v61  ;;  %v1903_v4 = vsel %vm159_vm9, %v9340_v61, 0  ;;  %v2090_v20 = vrot.slane %v9340_v61, 1  ;;  %v2331_v43 = vsub.f32 %v9351_v0, %v2330_v40 }
 0x2e8   :  { %v9354_v3 = vand.u32 4294901760, %v1903_v4  ;;  %v2278_v46 = vrot.slane %v9340_v61, 2 }
 0x2e9   :  { %v2733_v31 = vsel %vm101_vm3, %v2732_v52, 0.0  ;;  %v2091_v19 = vsel %vm159_vm9, %v2090_v20, 0  ;;  %v2332_v27 = vand.u32 4294901760, %v2331_v43  ;;  %v9438_v20 = vsub.f32 %v1831_v54, %v9418_v63 }
 0x2ea   :  { %2734 = vadd.xlane.f32.xlu1 %v2733_v31  ;;  %1971 = vmatmul.f32.vlgmr.msra.gmra.mxu1 %v9354_v3  ;;  %v1926_v16 = vsub.f32 %v1903_v4, %v9354_v3  ;;  %v9365_v48 = vand.u32 4294901760, %v2091_v19  ;;  %v2512_v4 = vand.u32 4294901760, %v9416_v21 }
 0x2eb   :  { %2206 = vmatpush.msra.mxu1 %v9251_v28 }
 0x2ec   :  { %2001 = vmatmul.f32.vlgmr.msra.gmra.mxu2 %v1926_v16  ;;  %v1927_v45 = vand.u32 4294901760, %v1926_v16  ;;  %v9378_v47 = vsub.f32 %v2091_v19, %v9365_v48  ;;  %v2513_v19 = vsub.f32 %v9416_v21, %v2512_v4 }
 0x2ed   :  { %2208 = vmatpush.msra.mxu1 %v9259_v35  ;;  %2235 = vmatpush.msra.mxu2 %v2136_v38 }
 0x2ee   :  { %2028 = vmatmul.f32.vlgmr.msra.gmra.mxu3 %v1927_v45  ;;  %v1928_v50 = vsub.f32 %v1926_v16, %v1927_v45  ;;  %v2115_v37 = vand.u32 4294901760, %v9378_v47  ;;  %v2514_v44 = vand.u32 4294901760, %v2513_v19 }
 0x2ef   :  { %2210 = vmatpush.msra.mxu1 %v9261_v41  ;;  %2239 = vmatpush.msra.mxu2 %v2142_v62  ;;  %v2337_v62 = vsub.f32 %v9361_v58, %v2336_v9 }
 0x2f0   :  { %v1929_v57 = vand.u32 4294901760, %v1928_v50  ;;  %v2116_v38 = vsub.f32 %v9378_v47, %v2115_v37  ;;  %2266 = vmatpush.msra.mxu3 %v9251_v28 }
 0x2f1   :  { %2212 = vmatpush.msra.mxu1 %v9286_v11  ;;  %2243 = vmatpush.msra.mxu2 %v2148_v51  ;;  %v2466_v51 = vrot.slane %v9340_v61, 3 }
 0x2f2   :  { %1930 = vmatmul.f32.vlgmr.msra.gmra.mxu0 %v1929_v57  ;;  %2086 = vmatmul.f32.vlgmr.msrb.gmra.mxu1 %v9354_v3  ;;  %v2117_v28 = vand.u32 4294901760, %v2116_v38 }
 0x2f3   :  { %2268 = vmatpush.msra.mxu3 %v9259_v35  ;;  %2177 = vmatpush.msra.mxu0 %v9257_v6  ;;  %v2338_v6 = vand.u32 4294901760, %v2337_v62  ;;  %v2279_v35 = vsel %vm159_vm9, %v2278_v46, 0  ;;  %v2467_v52 = vsel %vm159_vm9, %v2466_v51, 0 }
 0x2f4   :  { %2118 = vmatmul.f32.vlgmr.msrb.gmra.mxu2 %v2117_v28  ;;  %2327 = vmatpush.msrb.mxu1 %v2326_v36 }
 0x2f5   :  { %2247 = vmatpush.msra.mxu2 %v2154_v34  ;;  %2270 = vmatpush.msra.mxu3 %v9261_v41  ;;  %v2344_v41 = vand.u32 4294901760, %v2343_v55  ;;  %v9434_v34 = vand.u32 4294901760, %v2279_v35 }
 0x2f6   :  { %2159 = vmatmul.f32.vlgmr.msrb.gmra.mxu3 %v9365_v48  ;;  %2180 = vmatpush.msra.mxu0 %v9272_v26  ;;  %v9441_v26 = vand.u32 4294901760, %v1829_v29 }
 0x2f7   :  { %2272 = vmatpush.msra.mxu3 %v9286_v11  ;;  %2333 = vmatpush.msrb.mxu1 %v2332_v27  ;;  %v9444_v11 = vand.u32 4294901760, %v2467_v52  ;;  %v2302_v31 = vsub.f32 %v2279_v35, %v9434_v34 }
 0x2f8   :  { %2365 = vmatpush.msrb.mxu2 %v9334_v25  ;;  %2183 = vmatpush.msra.mxu0 %v9279_v12  ;;  %v9449_v12 = vsub.f32 %v1830_v10, %v9429_v15 }
 0x2f9   :  { %2339 = vmatpush.msrb.mxu1 %v2338_v6  ;;  %2394 = vmatpush.msrb.mxu3 %v9331_v56  ;;  %v9465_v16 = vsub.f32 %v2467_v52, %v9444_v11  ;;  %v2303_v45 = vand.u32 4294901760, %v2302_v31 }
 0x2fa   :  { %2061 = vmatmul.f32.vlgmr.msrb.gmra.mxu0 %v9354_v3  ;;  %2216 = vmatmul.f32.vlgmr.msra.gmra.mxu1 %v2115_v37  ;;  %v2518_v3 = vand.u32 4294901760, %v9438_v20  ;;  %v2524_v18 = vand.u32 4294901760, %v9449_v12 }
 0x2fb   :  { %2368 = vmatpush.msrb.mxu2 %v9351_v0  ;;  %2186 = vmatpush.msra.mxu0 %v9301_v32  ;;  %v9460_v32 = vsub.f32 %v1829_v29, %v9441_v26  ;;  %v2491_v37 = vand.u32 4294901760, %v9465_v16  ;;  %v2304_v43 = vsub.f32 %v2302_v31, %v2303_v45 }
 0x2fc   :  { %2249 = vmatmul.f32.vlgmr.msra.gmra.mxu2 %v9365_v48  ;;  %2345 = vmatpush.msrb.mxu1 %v2344_v41  ;;  %v2519_v50 = vsub.f32 %v9438_v20, %v2518_v3 }
 0x2fd   :  { %2371 = vmatpush.msrb.mxu2 %v9361_v58  ;;  %2396 = vmatpush.msrb.mxu3 %v9338_v60  ;;  %v2492_v57 = vsub.f32 %v9465_v16, %v2491_v37  ;;  %v2305_v38 = vand.u32 4294901760, %v2304_v43  ;;  %v8050_v43 = vld [vmem:[%s3549_s18] ss:$0 sm:$0xff]  ;;  %s7184_s18 = sshll.u32 %s9112_s20, 5  ;;  %s7186_s20 = sshll.u32 %s9114_s0, 5 }
 0x2fe   :  { %2274 = vmatmul.f32.vlgmr.msra.gmra.mxu3 %v9365_v48  ;;  %2294 = vmatpush.msrb.mxu0 %v9331_v56  ;;  %v2530_v48 = vand.u32 4294901760, %v9460_v32  ;;  %v2520_v36 = vand.u32 4294901760, %v2519_v50  ;;  %s2690_s23 = scalar_lea.vmem %s11513_s3, %s7186_s20  ;;  %s4411_s0 = scalar_lea.vmem %s11512_s2, %s9954_s19 }
 0x2ff   :  { %2374 = vmatpush.msrb.mxu2 %v9381_v42  ;;  %2398 = vmatpush.msrb.mxu3 %v9342_v7  ;;  %v2493_v62 = vand.u32 4294901760, %v2492_v57  ;;  %s10330_s20 = sld [smem:[#allocation5 + $0x19]] }
 0x300   :  { %2454 = vmatpush.msra.mxu1 %v9331_v56  ;;  %2296 = vmatpush.msrb.mxu0 %v9338_v60  ;;  %v2525_v56 = vsub.f32 %v9449_v12, %v2524_v18 }
 0x301   :  { %2400 = vmatpush.msrb.mxu3 %v9356_v24  ;;  %2482 = vmatpush.msra.mxu2 %v9398_v5 }
 0x302   :  { %2189 = vmatmul.f32.vlgmr.msra.gmra.mxu0 %v9378_v47  ;;  %2347 = vmatmul.f32.vlgmr.msrb.gmra.mxu1 %v9434_v34  ;;  %v2531_v47 = vsub.f32 %v9460_v32, %v2530_v48 }
 0x303   :  { %2456 = vmatpush.msra.mxu1 %v9338_v60  ;;  %2298 = vmatpush.msrb.mxu0 %v9342_v7  ;;  %v2526_v60 = vand.u32 4294901760, %v2525_v56 }
 0x304   :  { %2377 = vmatmul.f32.vlgmr.msrb.gmra.mxu2 %v2302_v31  ;;  %2515 = vmatpush.msra.mxu3 %v2514_v44 }
 0x305   :  { %2458 = vmatpush.msra.mxu1 %v9342_v7  ;;  %2484 = vmatpush.msra.mxu2 %v9418_v63  ;;  %v2532_v7 = vand.u32 4294901760, %v2531_v47  ;;  %v8051_v47 = vld [vmem:[%s3558_s27] ss:$0 sm:$0xff]  ;;  %s2681_s27 = scalar_lea.vmem %s11513_s3, %s7184_s18  ;;  %s4438_s18 = scalar_lea.vmem %s11512_s2, %s9928_s7 }
 0x306   :  { %2404 = vmatmul.f32.vlgmr.msrb.gmra.mxu3 %v2303_v45  ;;  %2300 = vmatpush.msrb.mxu0 %v9356_v24  ;;  %s5291_s24 = scalar_lea.vmem %s11512_s2, %s10330_s20 }
 0x307   :  { %2460 = vmatpush.msra.mxu1 %v9356_v24  ;;  %2486 = vmatpush.msra.mxu2 %v9429_v15  ;;  %v2719_v25 = vpop.xlane.xlu0 %2718 }
 0x308   :  { %2521 = vmatpush.msra.mxu3 %v2520_v36  ;;  %2423 = vmatpush.msra.mxu0 %v2324_v23  ;;  %8086 = vrsqrt.f32 %v2719_v25  ;;  %vm2727_vm8 = vcmp.eq.f32.partialorder %v2719_v25, inf  ;;  %vm2729_vm4 = vcmp.eq.f32.partialorder %v2719_v25, 0.0  ;;  %v3541_v36 = vld [vmem:[%s3540_s30] sm:$0x1]  ;;  %s9926_s30 = sld [smem:[#allocation5 + $0x16]] }
 0x309   :  { %2488 = vmatpush.msra.mxu2 %v9441_v26  ;;  %2582 = vmatpush.msrb.mxu1 %v9398_v5 }
 0x30a   :  { %2306 = vmatmul.f32.vlgmr.msrb.gmra.mxu0 %v2305_v38  ;;  %2462 = vmatmul.f32.vlgmr.msra.gmra.mxu1 %v9434_v34  ;;  %v2676_v38 = vld [vmem:[%s2672_s9 + $0x18] sm:$0xff] }
 0x30b   :  { %2527 = vmatpush.msra.mxu3 %v2526_v60  ;;  %2427 = vmatpush.msra.mxu0 %v2330_v40  ;;  %v8052_v60 = vld [vmem:[%s3567_s29] ss:$0 sm:$0xff]  ;;  %s7188_s29 = sshll.u32 %s9116_s21, 5  ;;  %s7206_s21 = sshll.u32 %s10360_s11, 5 }
 0x30c   :  { %2494 = vmatmul.f32.vlgmr.msra.gmra.mxu2 %v2493_v62  ;;  %2584 = vmatpush.msrb.mxu1 %v9418_v63  ;;  %s9776_s25 = scalar_lea.vmem %s11513_s3, %s7188_s29  ;;  %s3543_s29 = scalar_lea.vmem %s11513_s3, %s7190_s17 }
 0x30d   :  { %2533 = vmatpush.msra.mxu3 %v2532_v7  ;;  %2611 = vmatpush.msrb.mxu2 %v2512_v4  ;;  %v2675_v7 = vld [vmem:[%s2672_s9 + $0x10] sm:$0xff] }
 0x30e   :  { %2535 = vmatmul.f32.vlgmr.msra.gmra.mxu3 %v9444_v11  ;;  %2431 = vmatpush.msra.mxu0 %v2336_v9  ;;  %v8087_v23 = vpop.eup %8086  ;;  %s4429_s26 = scalar_lea.vmem %s11512_s2, %s9926_s30 }
 0x30f   :  { %2586 = vmatpush.msrb.mxu1 %v9429_v15  ;;  %2615 = vmatpush.msrb.mxu2 %v2518_v3  ;;  %v2721_v0 = vmul.f32 %v8087_v23, %v2719_v25 }
 0x310   :  { %2642 = vmatpush.msrb.mxu3 %v9398_v5  ;;  %2435 = vmatpush.msra.mxu0 %v2342_v53 }
 0x311   :  { %2588 = vmatpush.msrb.mxu1 %v9441_v26  ;;  %2619 = vmatpush.msrb.mxu2 %v2524_v18  ;;  %v2722_v24 = vmul.f32 %v8087_v23, %v2721_v0  ;;  %v9580_v0 = vand.u32 4294901760, %v2676_v38 }
 0x312   :  { %2644 = vmatpush.msrb.mxu3 %v9418_v63  ;;  %2437 = vmatmul.f32.vlgmr.msra.gmra.mxu0 %v9434_v34 }
 0x313   :  { %2592 = vmatmul.f32.vlgmr.msrb.gmra.mxu1 %v2491_v37  ;;  %2553 = vmatpush.msrb.mxu0 %v9416_v21  ;;  %v2723_v40 = vmul.f32 0.5, %v2722_v24  ;;  %v2730_v21 = vand.u32 2147483648, %v2719_v25  ;;  %v9582_v24 = vand.u32 4294901760, %v2675_v7 }
 0x314   :  { %2623 = vmatpush.msrb.mxu2 %v2530_v48  ;;  %2646 = vmatpush.msrb.mxu3 %v9429_v15 }
 0x315   :  { %2625 = vmatmul.f32.vlgmr.msrb.gmra.mxu2 %v9444_v11  ;;  %2556 = vmatpush.msrb.mxu0 %v9438_v20  ;;  %v2724_v42 = vsub.f32 1.5, %v2723_v40  ;;  %v2673_v40 = vld [vmem:[%s2672_s9] sm:$0xff] }
 0x316   :  { %2648 = vmatpush.msrb.mxu3 %v9441_v26 }
 0x317   :  { %2650 = vmatmul.f32.vlgmr.msrb.gmra.mxu3 %v9444_v11  ;;  %2559 = vmatpush.msrb.mxu0 %v9449_v12  ;;  %v2725_v5 = vmul.f32 %v8087_v23, %v2724_v42 }
 0x318   :  { %2889 = vmatpush.msra.mxu3 %v9580_v0 }
 0x319   :  { %2562 = vmatpush.msrb.mxu0 %v9460_v32  ;;  %v2726_v27 = vmul.f32 %v2725_v5, %v2719_v25 }
 0x31a   :  { %2565 = vmatmul.f32.vlgmr.msrb.gmra.mxu0 %v9465_v16  ;;  %2891 = vmatpush.msra.mxu3 %v9582_v24 }
 0x31b   :  { %v2728_v63 = vsel %vm2727_vm8, %v2719_v25, %v2726_v27  ;;  %vm11546_vm8 = vcmask 1040384   ;;  %v2818_v27 = vsub.f32 %v2676_v38, %v9580_v0  ;;  %2789 = vmatpush.msra.mxu0 %v9580_v0 }
 0x31c   :  { %v2731_v34 = vsel %vm2729_vm4, %v2730_v21, %v2728_v63  ;;  %v3584_v23 = vsel %vm11546_vm8, %v3541_v36, %v8050_v43  ;;  %vm11547_vm4 = vcmask 1041408  }
 0x31d   :  { %2860 = vmatpush.msra.mxu2 %v2818_v27  ;;  %2791 = vmatpush.msra.mxu0 %v9582_v24 }
 0x35d   :  { %v2735_v58 = vpop.xlane.xlu1 %2734 }
 0x35e   :  { %8088 = vrsqrt.f32 %v2735_v58  ;;  %vm2743_vm11 = vcmp.eq.f32.partialorder %v2735_v58, inf  ;;  %v2746_v29 = vand.u32 2147483648, %v2735_v58  ;;  %vm2745_vm1 = vcmp.eq.f32.partialorder %v2735_v58, 0.0 }
 0x364   :  { %v8089_v9 = vpop.eup %8088 }
 0x365   :  { %v2737_v53 = vmul.f32 %v8089_v9, %v2735_v58 }
 0x367   :  { %v2738_v46 = vmul.f32 %v8089_v9, %v2737_v53  ;;  %v9536_v54 = vpop.f32.mrf.mxu1 }
 0x369   :  { %v2739_v28 = vmul.f32 0.5, %v2738_v46 }
 0x36b   :  { %v2740_v51 = vsub.f32 1.5, %v2739_v28 }
 0x36d   :  { %v2741_v55 = vmul.f32 %v8089_v9, %v2740_v51  ;;  %v3585_v9 = vsel %vm11547_vm4, %v3584_v23, %v8051_v47  ;;  %v2824_v51 = vsub.f32 %v2675_v7, %v9582_v24 }
 0x36f   :  { %v2742_v10 = vmul.f32 %v2741_v55, %v2735_v58  ;;  %v9538_v6 = vpop.f32.mrf.mxu0  ;;  %v9540_v35 = vpop.f32.mrf.mxu2  ;;  %v9593_v55 = vand.u32 4294901760, %v2673_v40  ;;  %2863 = vmatpush.msra.mxu2 %v2824_v51 }
 0x370   :  { %v9542_v52 = vpop.f32.mrf.mxu1 }
 0x371   :  { %v2744_v15 = vsel %vm2743_vm11, %v2735_v58, %v2742_v10  ;;  %v9544_v41 = vpop.f32.mrf.mxu3  ;;  %v2674_v58 = vld [vmem:[%s2672_s9 + $0x8] sm:$0xff]  ;;  %vm11548_vm11 = vcmask 1042432  }
 0x372   :  { %v2747_v4 = vsel %vm2745_vm1, %v2746_v29, %v2744_v15  ;;  %v9585_v53 = vand.u32 4294901760, %v2674_v58  ;;  %v9588_v28 = vsel %vm11548_vm11, %v3585_v9, %v8052_v60  ;;  %v2819_v29 = vand.u32 4294901760, %v2818_v27 }
 0x373   :  { %v2748_v20 = vadd.f32 %v2747_v4, %v2731_v34  ;;  %v3587_v63 = vmul.f32 %v9588_v28, %v9588_v28  ;;  %v2825_v15 = vand.u32 4294901760, %v2824_v51  ;;  %v2836_v4 = vsub.f32 %v2673_v40, %v9593_v55 }
 0x374   :  { %2893 = vmatpush.msra.mxu3 %v9585_v53  ;;  %2793 = vmatpush.msra.mxu0 %v9585_v53 }
 0x375   :  { %8090 = vrcp.f32 %v2748_v20  ;;  %v2760_v16 = vand.u32 2147483648, %v2748_v20  ;;  %v2758_v50 = vand.u32 2147483647, %v2748_v20  ;;  %vm2754_vm10 = vweird.f32 %v2748_v20 }
 0x376   :  { %2895 = vmatpush.msra.mxu3 %v9593_v55  ;;  %2795 = vmatpush.msra.mxu0 %v9593_v55 }
 0x377   :  { %v9546_v26 = vpop.f32.mrf.mxu0  ;;  %v2119_v11 = vpop.f32.mrf.mxu2  ;;  %v2761_v56 = vor.u32 1.1754944e-38, %v2760_v16  ;;  %vm2759_vm5 = vcmp.eq.f32.partialorder %v2758_v50, 8.507059e+37  ;;  %v2820_v16 = vsub.f32 %v2818_v27, %v2819_v29 }
 0x378   :  { %v9550_v19 = vpop.f32.mrf.mxu1  ;;  %2918 = vmatpush.msrb.mxu0 %v2819_v29 }
 0x379   :  { %v2160_v12 = vpop.f32.mrf.mxu3  ;;  %v2821_v43 = vand.u32 4294901760, %v2820_v16 }
 0x37a   :  { %2922 = vmatpush.msrb.mxu0 %v2825_v15 }
 0x37b   :  { %v8091_v31 = vpop.eup %8090  ;;  %2822 = vmatpush.msra.mxu1 %v2821_v43 }
 0x37c   :  { %v2750_v3 = vmul.f32 %v8091_v31, %v2748_v20  ;;  %vm2755_vm0 = vweird.f32 %v8091_v31 }
 0x37d   :  { %vm2756_vm2 = vmor %vm2754_vm10, %vm2755_vm0 }
 0x37e   :  { %v2751_v32 = vsub.f32 1.0, %v2750_v3  ;;  %vm11549_vm0 = vmmov %vm11546_vm8 }
 0x37f   :  { %v2190_v18 = vpop.f32.mrf.mxu0  ;;  %v9553_v45 = vpop.f32.mrf.mxu2  ;;  %vm11550_vm10 = vmmov %vm11547_vm4 }
 0x380   :  { %v2752_v44 = vmul.f32 %v8091_v31, %v2751_v32  ;;  %v2348_v25 = vpop.f32.mrf.mxu1  ;;  %v3588_v32 = vsel %vm101_vm3, %v3587_v63, 0.0 }
 0x381   :  { %v9559_v48 = vpop.f32.mrf.mxu3  ;;  %3589 = vadd.xlane.f32.xlu2 %v3588_v32 }
 0x382   :  { %v2753_v37 = vadd.f32 %v8091_v31, %v2752_v44  ;;  %v2826_v44 = vsub.f32 %v2824_v51, %v2825_v15 }
 0x384   :  { %v2757_v57 = vsel %vm2756_vm2, %v8091_v31, %v2753_v37  ;;  %v2161_v31 = vadd.f32 %v2160_v12, %v2119_v11  ;;  %v2837_v37 = vand.u32 4294901760, %v2836_v4  ;;  %v2827_v11 = vand.u32 4294901760, %v2826_v44  ;;  %vm11551_vm2 = vmmov %vm11548_vm11 }
 0x385   :  { %v2762_v62 = vsel %vm2759_vm5, %v2761_v56, %v2757_v57  ;;  %vm11552_vm5 = vcmask 125952  }
 0x386   :  { %v2763_v42 = vmul.f32 %v2762_v62, %v2731_v34  ;;  %v2830_v34 = vsub.f32 %v2674_v58, %v9585_v53  ;;  %v2191_v56 = vadd.f32 %v2190_v18, %v2161_v31  ;;  %v2838_v47 = vsub.f32 %v2836_v4, %v2837_v37  ;;  %2828 = vmatpush.msra.mxu1 %v2827_v11 }
 0x387   :  { %v2307_v5 = vpop.f32.mrf.mxu0  ;;  %v2378_v46 = vpop.f32.mrf.mxu2  ;;  %v1973_v62 = vadd.f32 %v9536_v54, %v9538_v6 }
 0x388   :  { %v9597_v21 = vmul.f32 %v2763_v42, %v8328_v13  ;;  %v2349_v3 = vadd.f32 %v2348_v25, %v2307_v5  ;;  %v2831_v50 = vand.u32 4294901760, %v2830_v34  ;;  %2866 = vmatpush.msra.mxu2 %v2830_v34  ;;  %v2463_v38 = vpop.f32.mrf.mxu1  ;;  %v2218_v25 = vadd.f32 %v9550_v19, %v2191_v56 }
 0x389   :  { %v2405_v10 = vpop.f32.mrf.mxu3  ;;  %v2839_v40 = vand.u32 4294901760, %v2838_v47 }
 0x38a   :  { %v9605_v20 = vand.u32 2147483647, %v9597_v21  ;;  %v2832_v12 = vsub.f32 %v2830_v34, %v2831_v50  ;;  %v2379_v60 = vadd.f32 %v2378_v46, %v2349_v3  ;;  %2869 = vmatpush.msra.mxu2 %v2836_v4  ;;  %v2003_v46 = vadd.f32 %v9540_v35, %v1973_v62  ;;  %2926 = vmatpush.msrb.mxu0 %v2831_v50 }
 0x38b   :  { %v2251_v27 = vadd.f32 %v9553_v45, %v2218_v25 }
 0x38c   :  { %v7530_v36 = vand.u32 8388607, %v9605_v20  ;;  %v2833_v18 = vand.u32 4294901760, %v2832_v12  ;;  %v2406_v9 = vadd.f32 %v2405_v10, %v2379_v60  ;;  %2930 = vmatpush.msrb.mxu0 %v2837_v37  ;;  %v2030_v10 = vadd.f32 %v9544_v41, %v2003_v46 }
 0x38d   :  { %v2276_v15 = vadd.f32 %v9559_v48, %v2251_v27  ;;  %v7526_v32 = vand.u32 2139095040, %v9605_v20  ;;  %vm7564_vm8 = vweird.f32 %v9605_v20  ;;  %vm7563_vm4 = vcmp.lt.f32.partialorder %v9605_v20, 0.0 }
 0x38e   :  { %v7531_v57 = vor.u32 8388608, %v7530_v36  ;;  %2834 = vmatpush.msra.mxu1 %v2833_v18  ;;  %v2063_v31 = vadd.f32 %v9546_v26, %v2030_v10  ;;  %vm7562_vm11 = vcmp.eq.f32.partialorder %v9605_v20, 0.0 }
 0x38f   :  { %v2438_v7 = vpop.f32.mrf.mxu0  ;;  %v2495_v58 = vpop.f32.mrf.mxu2  ;;  %v2655_v50 = vrot.slane %v2276_v15, 7  ;;  %v7527_v26 = vshrl.u32 %v7526_v32, 23  ;;  %v2685_v15 = vld [vmem:[%s2681_s27 + $0x18] sm:$0xff] }
 0x390   :  { %v7533_v23 = vand.u32 8388607, %v7531_v57  ;;  %v2439_v54 = vadd.f32 %v2438_v7, %v2406_v9  ;;  %2840 = vmatpush.msra.mxu1 %v2839_v40  ;;  %v2593_v34 = vpop.f32.mrf.mxu1  ;;  %v2088_v36 = vadd.f32 %v9542_v52, %v2063_v31 }
 0x391   :  { %v2536_v5 = vpop.f32.mrf.mxu3 }
 0x392   :  { %v7534_v42 = vor.u32 1065353216, %v7533_v23  ;;  %v2537_v6 = vadd.f32 %v2536_v5, %v2495_v58  ;;  %2949 = vmatpush.msrb.mxu1 %v9580_v0  ;;  %v2464_v45 = vadd.f32 %v2463_v38, %v2439_v54  ;;  %v2663_v47 = vsel %vm11549_vm0, %v2088_v36, %v2655_v50 }
 0x393   :  { %vm7561_vm0 = vcmp.eq.f32.partialorder %v9605_v20, 1.0 }
 0x394   :  { %vm7535_vm1 = vcmp.ge.f32.partialorder %v7534_v42, 1.4142135  ;;  %v7536_v51 = vmul.f32 0.5, %v7534_v42  ;;  %2951 = vmatpush.msrb.mxu1 %v9582_v24  ;;  %v2658_v48 = vrot.slane %v2464_v45, 6  ;;  %v2684_v45 = vld [vmem:[%s2681_s27 + $0x10] sm:$0xff] }
 0x395   :  { %v9665_v31 = vand.u32 4294901760, %v2684_v45 }
 0x396   :  { %v7537_v19 = vsel %vm7535_vm1, %v7536_v51, %v7534_v42  ;;  %2953 = vmatpush.msrb.mxu1 %v9585_v53  ;;  %v2664_v57 = vsel %vm11550_vm10, %v2663_v47, %v2658_v48  ;;  %vm7592_vm10 = vcmp.eq.f32.partialorder %v9597_v21, 0  ;;  %v2682_v48 = vld [vmem:[%s2681_s27] sm:$0xff] }
 0x397   :  { %v2566_v63 = vpop.f32.mrf.mxu0  ;;  %v7624_v29 = vadd.f32 -1.0, %v7537_v19  ;;  %v9678_v50 = vsub.f32 %v2684_v45, %v9665_v31  ;;  %v2691_v45 = vld [vmem:[%s2690_s23] sm:$0xff] }
 0x398   :  { %v2567_v35 = vadd.f32 %v2566_v63, %v2537_v6  ;;  %v2626_v0 = vpop.f32.mrf.mxu2  ;;  %2955 = vmatpush.msrb.mxu1 %v9593_v55  ;;  %v7623_v55 = vadd.s32 4294967169, %v7527_v26 }
 0x399   :  { %v7541_v4 = vmul.f32 %v7624_v29, %v7624_v29  ;;  %v3013_v36 = vand.u32 4294901760, %v9678_v50 }
 0x39a   :  { %v2594_v3 = vadd.f32 %v2593_v34, %v2567_v35  ;;  %v2651_v37 = vpop.f32.mrf.mxu3  ;;  %v7538_v23 = vadd.s32 1, %v7623_v55  ;;  %v9657_v35 = vand.u32 4294901760, %v2685_v15  ;;  %v2683_v34 = vld [vmem:[%s2681_s27 + $0x8] sm:$0xff] }
 0x39b   :  { %v7542_v16 = vmul.f32 0.12621109, %v7541_v4  ;;  %v7544_v44 = vmul.f32 -0.20706727, %v7541_v4 }
 0x39c   :  { %v2627_v41 = vadd.f32 %v2626_v0, %v2594_v3  ;;  %v7539_v5 = vsel %vm7535_vm1, %v7538_v23, %v7623_v55  ;;  %vm7595_vm1 = vcmp.gt.f32.partialorder %v9605_v20, 1065353216  ;;  %2977 = vmatpush.msrb.mxu2 %v9657_v35  ;;  %v9667_v3 = vand.u32 4294901760, %v2683_v34 }
 0x39d   :  { %v7543_v24 = vadd.f32 0.21545328, %v7542_v16  ;;  %v7545_v56 = vadd.f32 -0.23896284, %v7544_v44  ;;  %v7559_v51 = vcvt.s32.f32 %v7539_v5  ;;  %v2694_v5 = vld [vmem:[%s2690_s23 + $0x18] sm:$0xff] }
 0x39e   :  { %v2652_v43 = vadd.f32 %v2651_v37, %v2627_v41  ;;  %2979 = vmatpush.msrb.mxu2 %v9665_v31  ;;  %v9685_v37 = vsub.f32 %v2683_v34, %v9667_v3 }
 0x39f   :  { %v7546_v11 = vmul.f32 %v7543_v24, %v7541_v4  ;;  %v7548_v12 = vmul.f32 %v7545_v56, %v7541_v4 }
 0x3a0   :  { %v2661_v53 = vrot.slane %v2652_v43, 5  ;;  %2981 = vmatpush.msrb.mxu2 %v9667_v3  ;;  %v9692_v43 = vand.u32 4294901760, %v2682_v48 }
 0x3a1   :  { %v7547_v60 = vadd.f32 0.28795174, %v7546_v11  ;;  %v7549_v38 = vadd.f32 -0.3607037, %v7548_v12  ;;  %v3019_v11 = vand.u32 4294901760, %v9685_v37 }
 0x3a2   :  { %v2665_v7 = vsel %vm11551_vm2, %v2664_v57, %v2661_v53  ;;  %vm11553_vm2 = vcmp.lt.f32.partialorder %v8339_v33, 0  ;;  %v3014_v53 = vsub.f32 %v9678_v50, %v3013_v36  ;;  %2983 = vmatpush.msrb.mxu2 %v9692_v43  ;;  %v9707_v57 = vsub.f32 %v2682_v48, %v9692_v43 }
 0x3a3   :  { %2667 = vst.msk [vmem:[#allocation7 + $0x8] sm:$0xf] %vm11552_vm5, %v2665_v7  ;;  %v7550_v18 = vmul.f32 %v7547_v60, %v7541_v4  ;;  %v7552_v62 = vmul.f32 %v7549_v38, %v7541_v4  ;;  %vm9648_vm5 = vmxor %vm11553_vm2, %vm7595_vm1  ;;  %vm7594_vm1 = vcmp.lt.s32.totalorder %v9597_v21, 0  ;;  %v3020_v7 = vsub.f32 %v9685_v37, %v3019_v11 }
 0x3a5   :  { %v7551_v25 = vadd.f32 0.48090908, %v7550_v18  ;;  %v7553_v52 = vadd.f32 -0.72134733, %v7552_v62  ;;  %v3015_v18 = vand.u32 4294901760, %v3014_v53 }
 0x3a7   :  { %v7554_v58 = vmul.f32 %v7551_v25, %v7541_v4  ;;  %v7556_v9 = vmul.f32 %v7624_v29, %v7553_v52  ;;  %v9663_v4 = vsub.f32 %v2685_v15, %v9657_v35  ;;  %v3021_v25 = vand.u32 4294901760, %v3020_v7 }
 0x3a9   :  { %v7555_v40 = vadd.f32 1.442695, %v7554_v58  ;;  %v3007_v44 = vand.u32 4294901760, %v9663_v4 }
 0x3ab   :  { %v7557_v46 = vadd.f32 %v7556_v9, %v7555_v40  ;;  %v3008_v56 = vsub.f32 %v9663_v4, %v3007_v44 }
 0x3ad   :  { %v7558_v27 = vmul.f32 %v7624_v29, %v7557_v46  ;;  %v3009_v47 = vand.u32 4294901760, %v3008_v56 }
 0x3af   :  { %v7560_v54 = vadd.f32 %v7559_v51, %v7558_v27  ;;  %3010 = vmatpush.msrb.mxu3 %v3009_v47  ;;  %v9737_v27 = vand.u32 4294901760, %v2694_v5 }
 0x3b1   :  { %v7565_v6 = vsel %vm7564_vm8, %v9605_v20, %v7560_v54  ;;  %vm7591_vm8 = vcmp.lt.f32.partialorder %v9597_v21, 0  ;;  %3016 = vmatpush.msrb.mxu3 %v3015_v18  ;;  %v2693_v54 = vld [vmem:[%s2690_s23 + $0x10] sm:$0xff]  ;;  %v2703_v18 = vld [vmem:[%s9776_s25 + $0x18] sm:$0xff] }
 0x3b2   :  { %v7566_v19 = vsel %vm7563_vm4, nan, %v7565_v6  ;;  %vm11556_vm4 = vmmov %vm11553_vm2  ;;  %v7614_v38 = vsel %vm7591_vm8, %v8437_v22, %v8375_v1 }
 0x3b3   :  { %v7567_v63 = vsel %vm7562_vm11, -inf, %v7566_v19  ;;  %vm7604_vm11 = vmand %vm11556_vm4, %vm7592_vm10  ;;  %3022 = vmatpush.msrb.mxu3 %v3021_v25  ;;  %v9740_v19 = vsub.f32 %v2694_v5, %v9737_v27 }
 0x3b4   :  { %v7568_v10 = vsel %vm7561_vm0, 0.0, %v7567_v63  ;;  %vm7606_vm0 = vmor %vm7604_vm11, %vm9648_vm5  ;;  %vm7608_vm5 = vcmp.eq.f32.partialorder %v9597_v21, 3212836864  ;;  %vm7616_vm11 = vcmp.ne.f32.partialorder %v9597_v21, %v9597_v21  ;;  %v2692_v63 = vld [vmem:[%s2690_s23 + $0x8] sm:$0xff] }
 0x3b5   :  { %v7569_v42 = vmul.f32 %v7568_v10, %v8339_v33  ;;  %vm7597_vm2 = vmand %vm7591_vm8, %vm8356_vm6  ;;  %v7607_v16 = vsel %vm7606_vm0, 2139095040, %v8210_v14  ;;  %vm7596_vm0 = vcmp.eq.f32.partialorder %v9605_v20, 2139095040  ;;  %v3025_v20 = vand.u32 4294901760, %v9707_v57 }
 0x3b6   :  { %vm7601_vm4 = vmand %vm7594_vm1, %vm8390_vm7  ;;  %v7609_v26 = vsel %vm7608_vm5, 1065353216, %v7607_v16  ;;  %v9748_v15 = vand.u32 4294901760, %v2692_v63  ;;  %v3195_v34 = vand.u32 4294901760, %v9740_v19 }
 0x3b7   :  { %8092 = vpow2.f32 %v7569_v42  ;;  %vm7618_vm1 = vmor %vm7616_vm11, %vm8458_vm15  ;;  %v3026_v23 = vsub.f32 %v9707_v57, %v3025_v20  ;;  %v9744_v42 = vand.u32 4294901760, %v2693_v54 }
 0x3b8   :  { %v9767_v56 = vsub.f32 %v2692_v63, %v9748_v15  ;;  %v3196_v47 = vsub.f32 %v9740_v19, %v3195_v34 }
 0x3b9   :  { %v3027_v9 = vand.u32 4294901760, %v3026_v23 }
 0x3bb   :  { %3028 = vmatpush.msrb.mxu3 %v3027_v9  ;;  %v9804_v9 = vand.u32 4294901760, %v2703_v18 }
 0x3bd   :  { %v8093_v32 = vpop.eup %8092 }
 0x3be   :  { %v7598_v0 = vsel %vm7597_vm2, 2143289344, %v8093_v32 }
 0x3bf   :  { %v7600_v41 = vsel %vm7592_vm10, %v8413_v17, %v7598_v0  ;;  %vm7593_vm10 = vcmp.eq.f32.partialorder %v9597_v21, 1065353216 }
 0x3c0   :  { %v7602_v24 = vxor.u32 2147483648, %v7600_v41  ;;  %vm7620_vm2 = vmor %vm7593_vm10, %vm7270_vm12 }
 0x3c2   :  { %v7603_v12 = vsel %vm7601_vm4, %v7602_v24, %v7600_v41  ;;  %v9762_v41 = vand.u32 4294901760, %v2691_v45 }
 0x3c3   :  { %v7610_v60 = vsel %vm7269_vm14, %v7609_v26, %v7603_v12 }
 0x3c4   :  { %v7615_v55 = vsel %vm7596_vm0, %v7614_v38, %v7610_v60  ;;  %v9787_v7 = vsub.f32 %v2691_v45, %v9762_v41 }
 0x3c5   :  { %v7619_v62 = vsel %vm7618_vm1, 2143289344, %v7615_v55  ;;  %v3207_v55 = vand.u32 4294901760, %v9767_v56 }
 0x3c6   :  { %v7621_v52 = vsel %vm7620_vm2, 1065353216, %v7619_v62 }
 0x3c7   :  { %v7622_v58 = vsel %vm7271_vm13, %v9597_v21, %v7621_v52  ;;  %v3197_v52 = vand.u32 4294901760, %v3196_v47 }
 0x3c8   :  { %v2766_v40 = vmul.f32 %v7622_v58, %v8504_v49 }
 0x3ca   :  { %v2767_v46 = vmax.f32 %v2766_v40, 0.0  ;;  %v3213_v40 = vand.u32 4294901760, %v9787_v7 }
 0x3cc   :  { %v2768_v51 = vmin.f32 %v2767_v46, 1.0  ;;  %v2702_v46 = vld [vmem:[%s9776_s25 + $0x10] sm:$0xff] }
 0x3cd   :  { %v9824_v63 = vand.u32 4294901760, %v2702_v46 }
 0x3ce   :  { %v2769_v6 = vsub.f32 1.0, %v2768_v51  ;;  %v2771_v21 = vmul.f32 %v2768_v51, %v9182_v2 }
 0x3d0   :  { %v2770_v10 = vmul.f32 %v2769_v6, %v9340_v61  ;;  %v9757_v61 = vsub.f32 %v2693_v54, %v9744_v42  ;;  %v3214_v54 = vsub.f32 %v9787_v7, %v3213_v40  ;;  %v9822_v6 = vsub.f32 %v2703_v18, %v9804_v9 }
 0x3d2   :  { %v9746_v29 = vadd.f32 %v2771_v21, %v2770_v10  ;;  %v3201_v53 = vand.u32 4294901760, %v9757_v61  ;;  %v2701_v10 = vld [vmem:[%s9776_s25 + $0x8] sm:$0xff]  ;;  %v2700_v21 = vld [vmem:[%s9776_s25] sm:$0xff] }
 0x3d3   :  { %v9835_v45 = vand.u32 4294901760, %v2701_v10 }
 0x3d4   :  { %v3603_v32 = vmul.f32 %v9746_v29, %v9746_v29  ;;  %v2774_v0 = vsel %vm159_vm9, %v9746_v29, 0  ;;  %v2961_v16 = vrot.slane %v9746_v29, 1  ;;  %v3202_v23 = vsub.f32 %v9757_v61, %v3201_v53 }
 0x3d5   :  { %v9760_v2 = vand.u32 4294901760, %v2774_v0  ;;  %v3149_v5 = vrot.slane %v9746_v29, 2 }
 0x3d6   :  { %v3604_v48 = vsel %vm101_vm3, %v3603_v32, 0.0  ;;  %v2962_v24 = vsel %vm159_vm9, %v2961_v16, 0  ;;  %v3203_v51 = vand.u32 4294901760, %v3202_v23  ;;  %v9844_v16 = vsub.f32 %v2702_v46, %v9824_v63 }
 0x3d7   :  { %3605 = vadd.xlane.f32.xlu0 %v3604_v48  ;;  %2842 = vmatmul.f32.vlgmr.msra.gmra.mxu1 %v9760_v2  ;;  %v2797_v26 = vsub.f32 %v2774_v0, %v9760_v2  ;;  %v9771_v12 = vand.u32 4294901760, %v2962_v24  ;;  %v3383_v0 = vand.u32 4294901760, %v9822_v6 }
 0x3d8   :  { %3077 = vmatpush.msra.mxu1 %v9657_v35 }
 0x3d9   :  { %2872 = vmatmul.f32.vlgmr.msra.gmra.mxu2 %v2797_v26  ;;  %v2798_v60 = vand.u32 4294901760, %v2797_v26  ;;  %v9784_v38 = vsub.f32 %v2962_v24, %v9771_v12  ;;  %v3384_v24 = vsub.f32 %v9822_v6, %v3383_v0 }
 0x3da   :  { %3079 = vmatpush.msra.mxu1 %v9665_v31  ;;  %3106 = vmatpush.msra.mxu2 %v3007_v44 }
 0x3db   :  { %2899 = vmatmul.f32.vlgmr.msra.gmra.mxu3 %v2798_v60  ;;  %v2799_v62 = vsub.f32 %v2797_v26, %v2798_v60  ;;  %v2986_v25 = vand.u32 4294901760, %v9784_v38  ;;  %v3385_v18 = vand.u32 4294901760, %v3384_v24 }
 0x3dc   :  { %3081 = vmatpush.msra.mxu1 %v9667_v3  ;;  %3110 = vmatpush.msra.mxu2 %v3013_v36  ;;  %v3208_v36 = vsub.f32 %v9767_v56, %v3207_v55 }
 0x3dd   :  { %v2800_v58 = vand.u32 4294901760, %v2799_v62  ;;  %v2987_v44 = vsub.f32 %v9784_v38, %v2986_v25  ;;  %3137 = vmatpush.msra.mxu3 %v9657_v35 }
 0x3de   :  { %3083 = vmatpush.msra.mxu1 %v9692_v43  ;;  %3114 = vmatpush.msra.mxu2 %v3019_v11  ;;  %v3337_v11 = vrot.slane %v9746_v29, 3 }
 0x3df   :  { %2801 = vmatmul.f32.vlgmr.msra.gmra.mxu0 %v2800_v58  ;;  %2957 = vmatmul.f32.vlgmr.msrb.gmra.mxu1 %v9760_v2  ;;  %v2988_v35 = vand.u32 4294901760, %v2987_v44 }
 0x3e0   :  { %3139 = vmatpush.msra.mxu3 %v9665_v31  ;;  %3048 = vmatpush.msra.mxu0 %v9663_v4  ;;  %v3209_v4 = vand.u32 4294901760, %v3208_v36  ;;  %v3150_v31 = vsel %vm159_vm9, %v3149_v5, 0  ;;  %v3338_v32 = vsel %vm159_vm9, %v3337_v11, 0 }
 0x3e1   :  { %2989 = vmatmul.f32.vlgmr.msrb.gmra.mxu2 %v2988_v35  ;;  %3198 = vmatpush.msrb.mxu1 %v3197_v52 }
 0x3e2   :  { %3118 = vmatpush.msra.mxu2 %v3025_v20  ;;  %3141 = vmatpush.msra.mxu3 %v9667_v3  ;;  %v3215_v3 = vand.u32 4294901760, %v3214_v54  ;;  %v9840_v20 = vand.u32 4294901760, %v3150_v31 }
 0x3e3   :  { %3030 = vmatmul.f32.vlgmr.msrb.gmra.mxu3 %v9771_v12  ;;  %3051 = vmatpush.msra.mxu0 %v9678_v50  ;;  %v9847_v50 = vand.u32 4294901760, %v2700_v21 }
 0x3e4   :  { %3143 = vmatpush.msra.mxu3 %v9692_v43  ;;  %3204 = vmatpush.msrb.mxu1 %v3203_v51  ;;  %v9850_v43 = vand.u32 4294901760, %v3338_v32  ;;  %v3173_v48 = vsub.f32 %v3150_v31, %v9840_v20 }
 0x3e5   :  { %3236 = vmatpush.msrb.mxu2 %v9740_v19  ;;  %3054 = vmatpush.msra.mxu0 %v9685_v37  ;;  %v9855_v37 = vsub.f32 %v2701_v10, %v9835_v45 }
 0x3e6   :  { %3210 = vmatpush.msrb.mxu1 %v3209_v4  ;;  %3265 = vmatpush.msrb.mxu3 %v9737_v27  ;;  %v9871_v26 = vsub.f32 %v3338_v32, %v9850_v43  ;;  %v3174_v60 = vand.u32 4294901760, %v3173_v48 }
 0x3e7   :  { %2932 = vmatmul.f32.vlgmr.msrb.gmra.mxu0 %v9760_v2  ;;  %3087 = vmatmul.f32.vlgmr.msra.gmra.mxu1 %v2986_v25  ;;  %v3389_v2 = vand.u32 4294901760, %v9844_v16  ;;  %v3395_v47 = vand.u32 4294901760, %v9855_v37 }
 0x3e8   :  { %3239 = vmatpush.msrb.mxu2 %v9757_v61  ;;  %3057 = vmatpush.msra.mxu0 %v9707_v57  ;;  %v9866_v57 = vsub.f32 %v2700_v21, %v9847_v50  ;;  %v3362_v25 = vand.u32 4294901760, %v9871_v26  ;;  %v3175_v23 = vsub.f32 %v3173_v48, %v3174_v60 }
 0x3e9   :  { %3120 = vmatmul.f32.vlgmr.msra.gmra.mxu2 %v9771_v12  ;;  %3216 = vmatpush.msrb.mxu1 %v3215_v3  ;;  %v3390_v62 = vsub.f32 %v9844_v16, %v3389_v2 }
 0x3ea   :  { %3242 = vmatpush.msrb.mxu2 %v9767_v56  ;;  %3267 = vmatpush.msrb.mxu3 %v9744_v42  ;;  %v3363_v58 = vsub.f32 %v9871_v26, %v3362_v25  ;;  %v3176_v44 = vand.u32 4294901760, %v3175_v23  ;;  %v8053_v23 = vld [vmem:[%s4420_s10] ss:$0 sm:$0xff]  ;;  %s7192_s10 = sshll.u32 %s9518_s15, 5  ;;  %s7194_s15 = sshll.u32 %s9520_s16, 5 }
 0x3eb   :  { %3145 = vmatmul.f32.vlgmr.msra.gmra.mxu3 %v9771_v12  ;;  %3165 = vmatpush.msrb.mxu0 %v9737_v27  ;;  %v3401_v12 = vand.u32 4294901760, %v9866_v57  ;;  %v3391_v52 = vand.u32 4294901760, %v3390_v62  ;;  %s3561_s14 = scalar_lea.vmem %s11513_s3, %s7194_s15  ;;  %s5282_s16 = scalar_lea.vmem %s11512_s2, %s10360_s11 }
 0x3ec   :  { %3245 = vmatpush.msrb.mxu2 %v9787_v7  ;;  %3269 = vmatpush.msrb.mxu3 %v9748_v15  ;;  %v3364_v36 = vand.u32 4294901760, %v3363_v58  ;;  %s10736_s15 = sld [smem:[#allocation5 + $0x1d]] }
 0x3ed   :  { %3325 = vmatpush.msra.mxu1 %v9737_v27  ;;  %3167 = vmatpush.msrb.mxu0 %v9744_v42  ;;  %v3396_v27 = vsub.f32 %v9855_v37, %v3395_v47 }
 0x3ee   :  { %3271 = vmatpush.msrb.mxu3 %v9762_v41  ;;  %3353 = vmatpush.msra.mxu2 %v9804_v9 }
 0x3ef   :  { %3060 = vmatmul.f32.vlgmr.msra.gmra.mxu0 %v9784_v38  ;;  %3218 = vmatmul.f32.vlgmr.msrb.gmra.mxu1 %v9840_v20  ;;  %v3402_v38 = vsub.f32 %v9866_v57, %v3401_v12 }
 0x3f0   :  { %3327 = vmatpush.msra.mxu1 %v9744_v42  ;;  %3169 = vmatpush.msrb.mxu0 %v9748_v15  ;;  %v3397_v42 = vand.u32 4294901760, %v3396_v27 }
 0x3f1   :  { %3248 = vmatmul.f32.vlgmr.msrb.gmra.mxu2 %v3173_v48  ;;  %3386 = vmatpush.msra.mxu3 %v3385_v18 }
 0x3f2   :  { %3329 = vmatpush.msra.mxu1 %v9748_v15  ;;  %3355 = vmatpush.msra.mxu2 %v9824_v63  ;;  %v3403_v15 = vand.u32 4294901760, %v3402_v38  ;;  %v8054_v38 = vld [vmem:[%s4429_s26] ss:$0 sm:$0xff]  ;;  %s3552_s26 = scalar_lea.vmem %s11513_s3, %s7192_s10  ;;  %s5309_s10 = scalar_lea.vmem %s11512_s2, %s10334_s22 }
 0x3f3   :  { %3275 = vmatmul.f32.vlgmr.msrb.gmra.mxu3 %v3174_v60  ;;  %3171 = vmatpush.msrb.mxu0 %v9762_v41  ;;  %s6162_s19 = scalar_lea.vmem %s11512_s2, %s10736_s15 }
 0x3f4   :  { %3331 = vmatpush.msra.mxu1 %v9762_v41  ;;  %3357 = vmatpush.msra.mxu2 %v9835_v45  ;;  %v3590_v19 = vpop.xlane.xlu2 %3589 }
 0x3f5   :  { %3392 = vmatpush.msra.mxu3 %v3391_v52  ;;  %3294 = vmatpush.msra.mxu0 %v3195_v34  ;;  %8094 = vrsqrt.f32 %v3590_v19  ;;  %vm3598_vm8 = vcmp.eq.f32.partialorder %v3590_v19, inf  ;;  %vm3600_vm5 = vcmp.eq.f32.partialorder %v3590_v19, 0.0  ;;  %v4412_v52 = vld [vmem:[%s4411_s0] sm:$0x1]  ;;  %s10332_s0 = sld [smem:[#allocation5 + $0x1a]] }
 0x3f6   :  { %3359 = vmatpush.msra.mxu2 %v9847_v50  ;;  %3453 = vmatpush.msrb.mxu1 %v9804_v9 }
 0x3f7   :  { %3177 = vmatmul.f32.vlgmr.msrb.gmra.mxu0 %v3176_v44  ;;  %3333 = vmatmul.f32.vlgmr.msra.gmra.mxu1 %v9840_v20  ;;  %v3547_v44 = vld [vmem:[%s3543_s29 + $0x18] sm:$0xff] }
 0x3f8   :  { %3398 = vmatpush.msra.mxu3 %v3397_v42  ;;  %3298 = vmatpush.msra.mxu0 %v3201_v53  ;;  %v8055_v42 = vld [vmem:[%s4438_s18] ss:$0 sm:$0xff]  ;;  %s7196_s18 = sshll.u32 %s9522_s12, 5 }
 0x3f9   :  { %3365 = vmatmul.f32.vlgmr.msra.gmra.mxu2 %v3364_v36  ;;  %3455 = vmatpush.msrb.mxu1 %v9824_v63  ;;  %s10182_s27 = scalar_lea.vmem %s11513_s3, %s7196_s18  ;;  %s4414_s18 = scalar_lea.vmem %s11513_s3, %s7198_s6 }
 0x3fa   :  { %3404 = vmatpush.msra.mxu3 %v3403_v15  ;;  %3482 = vmatpush.msrb.mxu2 %v3383_v0  ;;  %v3546_v15 = vld [vmem:[%s3543_s29 + $0x10] sm:$0xff] }
 0x3fb   :  { %3406 = vmatmul.f32.vlgmr.msra.gmra.mxu3 %v9850_v43  ;;  %3302 = vmatpush.msra.mxu0 %v3207_v55  ;;  %v8095_v34 = vpop.eup %8094  ;;  %s5300_s25 = scalar_lea.vmem %s11512_s2, %s10332_s0 }
 0x3fc   :  { %3457 = vmatpush.msrb.mxu1 %v9835_v45  ;;  %3486 = vmatpush.msrb.mxu2 %v3389_v2  ;;  %v3592_v61 = vmul.f32 %v8095_v34, %v3590_v19 }
 0x3fd   :  { %3513 = vmatpush.msrb.mxu3 %v9804_v9  ;;  %3306 = vmatpush.msra.mxu0 %v3213_v40 }
 0x3fe   :  { %3459 = vmatpush.msrb.mxu1 %v9847_v50  ;;  %3490 = vmatpush.msrb.mxu2 %v3395_v47  ;;  %v3593_v41 = vmul.f32 %v8095_v34, %v3592_v61  ;;  %v9986_v61 = vand.u32 4294901760, %v3547_v44 }
 0x3ff   :  { %3515 = vmatpush.msrb.mxu3 %v9824_v63  ;;  %3308 = vmatmul.f32.vlgmr.msra.gmra.mxu0 %v9840_v20 }
 0x400   :  { %3463 = vmatmul.f32.vlgmr.msrb.gmra.mxu1 %v3362_v25  ;;  %3424 = vmatpush.msrb.mxu0 %v9822_v6  ;;  %v3594_v53 = vmul.f32 0.5, %v3593_v41  ;;  %v3601_v6 = vand.u32 2147483648, %v3590_v19  ;;  %v9988_v41 = vand.u32 4294901760, %v3546_v15 }
 0x401   :  { %3494 = vmatpush.msrb.mxu2 %v3401_v12  ;;  %3517 = vmatpush.msrb.mxu3 %v9835_v45 }
 0x402   :  { %3496 = vmatmul.f32.vlgmr.msrb.gmra.mxu2 %v9850_v43  ;;  %3427 = vmatpush.msrb.mxu0 %v9844_v16  ;;  %v3595_v7 = vsub.f32 1.5, %v3594_v53  ;;  %v3544_v53 = vld [vmem:[%s3543_s29] sm:$0xff] }
 0x403   :  { %3519 = vmatpush.msrb.mxu3 %v9847_v50 }
 0x404   :  { %3521 = vmatmul.f32.vlgmr.msrb.gmra.mxu3 %v9850_v43  ;;  %3430 = vmatpush.msrb.mxu0 %v9855_v37  ;;  %v3596_v9 = vmul.f32 %v8095_v34, %v3595_v7 }
 0x405   :  { %3760 = vmatpush.msra.mxu3 %v9986_v61 }
 0x406   :  { %3433 = vmatpush.msrb.mxu0 %v9866_v57  ;;  %v3597_v51 = vmul.f32 %v3596_v9, %v3590_v19 }
 0x407   :  { %3436 = vmatmul.f32.vlgmr.msrb.gmra.mxu0 %v9871_v26  ;;  %3762 = vmatpush.msra.mxu3 %v9988_v41 }
 0x408   :  { %v3599_v63 = vsel %vm3598_vm8, %v3590_v19, %v3597_v51  ;;  %vm11557_vm8 = vcmask 1040384   ;;  %v3689_v51 = vsub.f32 %v3547_v44, %v9986_v61  ;;  %3660 = vmatpush.msra.mxu0 %v9986_v61 }
 0x409   :  { %v3602_v20 = vsel %vm3600_vm5, %v3601_v6, %v3599_v63  ;;  %v4455_v34 = vsel %vm11557_vm8, %v4412_v52, %v8053_v23  ;;  %vm11558_vm5 = vcmask 1041408  }
 0x40a   :  { %3731 = vmatpush.msra.mxu2 %v3689_v51  ;;  %3662 = vmatpush.msra.mxu0 %v9988_v41 }
 0x44a   :  { %v3606_v56 = vpop.xlane.xlu0 %3605 }
 0x44b   :  { %8096 = vrsqrt.f32 %v3606_v56  ;;  %vm3614_vm10 = vcmp.eq.f32.partialorder %v3606_v56, inf  ;;  %v3617_v21 = vand.u32 2147483648, %v3606_v56  ;;  %vm3616_vm4 = vcmp.eq.f32.partialorder %v3606_v56, 0.0 }
 0x451   :  { %v8097_v55 = vpop.eup %8096 }
 0x452   :  { %v3608_v40 = vmul.f32 %v8097_v55, %v3606_v56 }
 0x454   :  { %v3609_v5 = vmul.f32 %v8097_v55, %v3608_v40  ;;  %v9942_v46 = vpop.f32.mrf.mxu1 }
 0x456   :  { %v3610_v35 = vmul.f32 0.5, %v3609_v5 }
 0x458   :  { %v3611_v11 = vsub.f32 1.5, %v3610_v35 }
 0x45a   :  { %v3612_v54 = vmul.f32 %v8097_v55, %v3611_v11  ;;  %v4456_v55 = vsel %vm11558_vm5, %v4455_v34, %v8054_v38  ;;  %v3695_v11 = vsub.f32 %v3546_v15, %v9988_v41 }
 0x45c   :  { %v3613_v10 = vmul.f32 %v3612_v54, %v3606_v56  ;;  %v9944_v4 = vpop.f32.mrf.mxu0  ;;  %v9946_v31 = vpop.f32.mrf.mxu2  ;;  %v9999_v54 = vand.u32 4294901760, %v3544_v53  ;;  %3734 = vmatpush.msra.mxu2 %v3695_v11 }
 0x45d   :  { %v9948_v32 = vpop.f32.mrf.mxu1 }
 0x45e   :  { %v3615_v45 = vsel %vm3614_vm10, %v3606_v56, %v3613_v10  ;;  %v9950_v3 = vpop.f32.mrf.mxu3  ;;  %v3545_v56 = vld [vmem:[%s3543_s29 + $0x8] sm:$0xff]  ;;  %vm11559_vm10 = vcmask 1042432   ;;  %s7212_s29 = sshll.u32 %s10334_s22, 5 }
 0x45f   :  { %v3618_v0 = vsel %vm3616_vm4, %v3617_v21, %v3615_v45  ;;  %v9991_v40 = vand.u32 4294901760, %v3545_v56  ;;  %v9994_v35 = vsel %vm11559_vm10, %v4456_v55, %v8055_v42  ;;  %v3690_v21 = vand.u32 4294901760, %v3689_v51 }
 0x460   :  { %v3619_v16 = vadd.f32 %v3618_v0, %v3602_v20  ;;  %v4458_v63 = vmul.f32 %v9994_v35, %v9994_v35  ;;  %v3696_v45 = vand.u32 4294901760, %v3695_v11  ;;  %v3707_v0 = vsub.f32 %v3544_v53, %v9999_v54 }
 0x461   :  { %3764 = vmatpush.msra.mxu3 %v9991_v40  ;;  %3664 = vmatpush.msra.mxu0 %v9991_v40 }
 0x462   :  { %8098 = vrcp.f32 %v3619_v16  ;;  %v3631_v26 = vand.u32 2147483648, %v3619_v16  ;;  %v3629_v62 = vand.u32 2147483647, %v3619_v16  ;;  %vm3625_vm0 = vweird.f32 %v3619_v16 }
 0x463   :  { %3766 = vmatpush.msra.mxu3 %v9999_v54  ;;  %3666 = vmatpush.msra.mxu0 %v9999_v54 }
 0x464   :  { %v9952_v50 = vpop.f32.mrf.mxu0  ;;  %v2990_v43 = vpop.f32.mrf.mxu2  ;;  %v3632_v27 = vor.u32 1.1754944e-38, %v3631_v26  ;;  %vm3630_vm2 = vcmp.eq.f32.partialorder %v3629_v62, 8.507059e+37  ;;  %v3691_v26 = vsub.f32 %v3689_v51, %v3690_v21 }
 0x465   :  { %v9956_v24 = vpop.f32.mrf.mxu1  ;;  %3789 = vmatpush.msrb.mxu0 %v3690_v21 }
 0x466   :  { %v3031_v37 = vpop.f32.mrf.mxu3  ;;  %v3692_v23 = vand.u32 4294901760, %v3691_v26 }
 0x467   :  { %3793 = vmatpush.msrb.mxu0 %v3696_v45 }
 0x468   :  { %v8099_v48 = vpop.eup %8098  ;;  %3693 = vmatpush.msra.mxu1 %v3692_v23 }
 0x469   :  { %v3621_v2 = vmul.f32 %v8099_v48, %v3619_v16  ;;  %vm3626_vm11 = vweird.f32 %v8099_v48 }
 0x46a   :  { %vm3627_vm1 = vmor %vm3625_vm0, %vm3626_vm11 }
 0x46b   :  { %v3622_v57 = vsub.f32 1.0, %v3621_v2  ;;  %vm11560_vm11 = vmmov %vm11557_vm8 }
 0x46c   :  { %v3061_v47 = vpop.f32.mrf.mxu0  ;;  %v9959_v60 = vpop.f32.mrf.mxu2  ;;  %vm11561_vm0 = vmmov %vm11558_vm5 }
 0x46d   :  { %v3623_v18 = vmul.f32 %v8099_v48, %v3622_v57  ;;  %v3219_v19 = vpop.f32.mrf.mxu1  ;;  %v4459_v57 = vsel %vm101_vm3, %v4458_v63, 0.0 }
 0x46e   :  { %v9965_v12 = vpop.f32.mrf.mxu3  ;;  %4460 = vadd.xlane.f32.xlu1 %v4459_v57 }
 0x46f   :  { %v3624_v25 = vadd.f32 %v8099_v48, %v3623_v18  ;;  %v3697_v18 = vsub.f32 %v3695_v11, %v3696_v45 }
 0x471   :  { %v3628_v58 = vsel %vm3627_vm1, %v8099_v48, %v3624_v25  ;;  %v3032_v48 = vadd.f32 %v3031_v37, %v2990_v43  ;;  %v3708_v25 = vand.u32 4294901760, %v3707_v0  ;;  %v3698_v43 = vand.u32 4294901760, %v3697_v18  ;;  %vm11562_vm1 = vmmov %vm11559_vm10 }
 0x472   :  { %v3633_v36 = vsel %vm3630_vm2, %v3632_v27, %v3628_v58  ;;  %vm11563_vm2 = vcmask 125952  }
 0x473   :  { %v3634_v7 = vmul.f32 %v3633_v36, %v3602_v20  ;;  %v3701_v20 = vsub.f32 %v3545_v56, %v9991_v40  ;;  %v3062_v27 = vadd.f32 %v3061_v47, %v3032_v48  ;;  %v3709_v38 = vsub.f32 %v3707_v0, %v3708_v25  ;;  %3699 = vmatpush.msra.mxu1 %v3698_v43 }
 0x474   :  { %v3178_v9 = vpop.f32.mrf.mxu0  ;;  %v3249_v5 = vpop.f32.mrf.mxu2  ;;  %v2844_v36 = vadd.f32 %v9942_v46, %v9944_v4 }
 0x475   :  { %v10003_v6 = vmul.f32 %v3634_v7, %v8328_v13  ;;  %v3220_v2 = vadd.f32 %v3219_v19, %v3178_v9  ;;  %v3702_v62 = vand.u32 4294901760, %v3701_v20  ;;  %3737 = vmatpush.msra.mxu2 %v3701_v20  ;;  %v3334_v44 = vpop.f32.mrf.mxu1  ;;  %v3089_v19 = vadd.f32 %v9956_v24, %v3062_v27 }
 0x476   :  { %v3276_v10 = vpop.f32.mrf.mxu3  ;;  %v3710_v53 = vand.u32 4294901760, %v3709_v38 }
 0x477   :  { %v10011_v16 = vand.u32 2147483647, %v10003_v6  ;;  %v3703_v37 = vsub.f32 %v3701_v20, %v3702_v62  ;;  %v3250_v42 = vadd.f32 %v3249_v5, %v3220_v2  ;;  %3740 = vmatpush.msra.mxu2 %v3707_v0  ;;  %v2874_v5 = vadd.f32 %v9946_v31, %v2844_v36  ;;  %3797 = vmatpush.msrb.mxu0 %v3702_v62 }
 0x478   :  { %v3122_v51 = vadd.f32 %v9959_v60, %v3089_v19 }
 0x479   :  { %v7631_v52 = vand.u32 8388607, %v10011_v16  ;;  %v3704_v47 = vand.u32 4294901760, %v3703_v37  ;;  %v3277_v55 = vadd.f32 %v3276_v10, %v3250_v42  ;;  %3801 = vmatpush.msrb.mxu0 %v3708_v25  ;;  %v2901_v10 = vadd.f32 %v9950_v3, %v2874_v5 }
 0x47a   :  { %v3147_v45 = vadd.f32 %v9965_v12, %v3122_v51  ;;  %v7627_v57 = vand.u32 2139095040, %v10011_v16  ;;  %vm7665_vm8 = vweird.f32 %v10011_v16  ;;  %vm7664_vm5 = vcmp.lt.f32.partialorder %v10011_v16, 0.0 }
 0x47b   :  { %v7632_v58 = vor.u32 8388608, %v7631_v52  ;;  %3705 = vmatpush.msra.mxu1 %v3704_v47  ;;  %v2934_v48 = vadd.f32 %v9952_v50, %v2901_v10  ;;  %vm7663_vm10 = vcmp.eq.f32.partialorder %v10011_v16, 0.0 }
 0x47c   :  { %v3309_v15 = vpop.f32.mrf.mxu0  ;;  %v3366_v56 = vpop.f32.mrf.mxu2  ;;  %v3526_v62 = vrot.slane %v3147_v45, 7  ;;  %v7628_v50 = vshrl.u32 %v7627_v57, 23  ;;  %v3556_v45 = vld [vmem:[%s3552_s26 + $0x18] sm:$0xff] }
 0x47d   :  { %v7634_v34 = vand.u32 8388607, %v7632_v58  ;;  %v3310_v46 = vadd.f32 %v3309_v15, %v3277_v55  ;;  %3711 = vmatpush.msra.mxu1 %v3710_v53  ;;  %v3464_v20 = vpop.f32.mrf.mxu1  ;;  %v2959_v52 = vadd.f32 %v9948_v32, %v2934_v48 }
 0x47e   :  { %v3407_v9 = vpop.f32.mrf.mxu3 }
 0x47f   :  { %v7635_v7 = vor.u32 1065353216, %v7634_v34  ;;  %v3408_v4 = vadd.f32 %v3407_v9, %v3366_v56  ;;  %3820 = vmatpush.msrb.mxu1 %v9986_v61  ;;  %v3335_v60 = vadd.f32 %v3334_v44, %v3310_v46  ;;  %v3534_v38 = vsel %vm11560_vm11, %v2959_v52, %v3526_v62 }
 0x480   :  { %vm7662_vm11 = vcmp.eq.f32.partialorder %v10011_v16, 1.0 }
 0x481   :  { %vm7636_vm4 = vcmp.ge.f32.partialorder %v7635_v7, 1.4142135  ;;  %v7637_v11 = vmul.f32 0.5, %v7635_v7  ;;  %3822 = vmatpush.msrb.mxu1 %v9988_v41  ;;  %v3529_v12 = vrot.slane %v3335_v60, 6  ;;  %v3555_v60 = vld [vmem:[%s3552_s26 + $0x10] sm:$0xff] }
 0x482   :  { %v10071_v48 = vand.u32 4294901760, %v3555_v60 }
 0x483   :  { %v7638_v24 = vsel %vm7636_vm4, %v7637_v11, %v7635_v7  ;;  %3824 = vmatpush.msrb.mxu1 %v9991_v40  ;;  %v3535_v58 = vsel %vm11561_vm0, %v3534_v38, %v3529_v12  ;;  %vm7693_vm0 = vcmp.eq.f32.partialorder %v10003_v6, 0  ;;  %v3553_v12 = vld [vmem:[%s3552_s26] sm:$0xff] }
 0x484   :  { %v3437_v63 = vpop.f32.mrf.mxu0  ;;  %v7725_v21 = vadd.f32 -1.0, %v7638_v24  ;;  %v10084_v62 = vsub.f32 %v3555_v60, %v10071_v48  ;;  %v3562_v60 = vld [vmem:[%s3561_s14] sm:$0xff] }
 0x485   :  { %v3438_v31 = vadd.f32 %v3437_v63, %v3408_v4  ;;  %v3497_v61 = vpop.f32.mrf.mxu2  ;;  %3826 = vmatpush.msrb.mxu1 %v9999_v54  ;;  %v7724_v54 = vadd.s32 4294967169, %v7628_v50 }
 0x486   :  { %v7642_v0 = vmul.f32 %v7725_v21, %v7725_v21  ;;  %v3884_v52 = vand.u32 4294901760, %v10084_v62 }
 0x487   :  { %v3465_v2 = vadd.f32 %v3464_v20, %v3438_v31  ;;  %v3522_v25 = vpop.f32.mrf.mxu3  ;;  %v7639_v34 = vadd.s32 1, %v7724_v54  ;;  %v10063_v31 = vand.u32 4294901760, %v3556_v45  ;;  %v3554_v20 = vld [vmem:[%s3552_s26 + $0x8] sm:$0xff] }
 0x488   :  { %v7643_v26 = vmul.f32 0.12621109, %v7642_v0  ;;  %v7645_v18 = vmul.f32 -0.20706727, %v7642_v0 }
 0x489   :  { %v3498_v3 = vadd.f32 %v3497_v61, %v3465_v2  ;;  %v7640_v9 = vsel %vm7636_vm4, %v7639_v34, %v7724_v54  ;;  %vm7696_vm4 = vcmp.gt.f32.partialorder %v10011_v16, 1065353216  ;;  %3848 = vmatpush.msrb.mxu2 %v10063_v31  ;;  %v10073_v2 = vand.u32 4294901760, %v3554_v20 }
 0x48a   :  { %v7644_v41 = vadd.f32 0.21545328, %v7643_v26  ;;  %v7646_v27 = vadd.f32 -0.23896284, %v7645_v18  ;;  %v7660_v11 = vcvt.s32.f32 %v7640_v9  ;;  %v3565_v9 = vld [vmem:[%s3561_s14 + $0x18] sm:$0xff] }
 0x48b   :  { %v3523_v23 = vadd.f32 %v3522_v25, %v3498_v3  ;;  %3850 = vmatpush.msrb.mxu2 %v10071_v48  ;;  %v10091_v25 = vsub.f32 %v3554_v20, %v10073_v2 }
 0x48c   :  { %v7647_v43 = vmul.f32 %v7644_v41, %v7642_v0  ;;  %v7649_v37 = vmul.f32 %v7646_v27, %v7642_v0 }
 0x48d   :  { %v3532_v40 = vrot.slane %v3523_v23, 5  ;;  %3852 = vmatpush.msrb.mxu2 %v10073_v2  ;;  %v10098_v23 = vand.u32 4294901760, %v3553_v12 }
 0x48e   :  { %v7648_v42 = vadd.f32 0.28795174, %v7647_v43  ;;  %v7650_v44 = vadd.f32 -0.3607037, %v7649_v37  ;;  %v3890_v43 = vand.u32 4294901760, %v10091_v25 }
 0x48f   :  { %v3536_v15 = vsel %vm11562_vm1, %v3535_v58, %v3532_v40  ;;  %vm11564_vm1 = vcmp.lt.f32.partialorder %v8339_v33, 0  ;;  %v3885_v40 = vsub.f32 %v10084_v62, %v3884_v52  ;;  %3854 = vmatpush.msrb.mxu2 %v10098_v23  ;;  %v10113_v58 = vsub.f32 %v3553_v12, %v10098_v23 }
 0x490   :  { %3538 = vst.msk [vmem:[#allocation7 + $0xc] sm:$0xf] %vm11563_vm2, %v3536_v15  ;;  %v7651_v47 = vmul.f32 %v7648_v42, %v7642_v0  ;;  %v7653_v36 = vmul.f32 %v7650_v44, %v7642_v0  ;;  %vm10054_vm2 = vmxor %vm11564_vm1, %vm7696_vm4  ;;  %vm7695_vm4 = vcmp.lt.s32.totalorder %v10003_v6, 0  ;;  %v3891_v15 = vsub.f32 %v10091_v25, %v3890_v43 }
 0x492   :  { %v7652_v19 = vadd.f32 0.48090908, %v7651_v47  ;;  %v7654_v32 = vadd.f32 -0.72134733, %v7653_v36  ;;  %v3886_v47 = vand.u32 4294901760, %v3885_v40 }
 0x494   :  { %v7655_v56 = vmul.f32 %v7652_v19, %v7642_v0  ;;  %v7657_v55 = vmul.f32 %v7725_v21, %v7654_v32  ;;  %v10069_v0 = vsub.f32 %v3556_v45, %v10063_v31  ;;  %v3892_v19 = vand.u32 4294901760, %v3891_v15 }
 0x496   :  { %v7656_v53 = vadd.f32 1.442695, %v7655_v56  ;;  %v3878_v18 = vand.u32 4294901760, %v10069_v0 }
 0x498   :  { %v7658_v5 = vadd.f32 %v7657_v55, %v7656_v53  ;;  %v3879_v27 = vsub.f32 %v10069_v0, %v3878_v18 }
 0x49a   :  { %v7659_v51 = vmul.f32 %v7725_v21, %v7658_v5  ;;  %v3880_v38 = vand.u32 4294901760, %v3879_v27 }
 0x49c   :  { %v7661_v46 = vadd.f32 %v7660_v11, %v7659_v51  ;;  %3881 = vmatpush.msrb.mxu3 %v3880_v38  ;;  %v10143_v51 = vand.u32 4294901760, %v3565_v9 }
 0x49e   :  { %v7666_v4 = vsel %vm7665_vm8, %v10011_v16, %v7661_v46  ;;  %vm7692_vm8 = vcmp.lt.f32.partialorder %v10003_v6, 0  ;;  %3887 = vmatpush.msrb.mxu3 %v3886_v47  ;;  %v3564_v46 = vld [vmem:[%s3561_s14 + $0x10] sm:$0xff]  ;;  %v3574_v47 = vld [vmem:[%s10182_s27 + $0x18] sm:$0xff] }
 0x49f   :  { %v7667_v24 = vsel %vm7664_vm5, nan, %v7666_v4  ;;  %vm11567_vm5 = vmmov %vm11564_vm1  ;;  %v7715_v44 = vsel %vm7692_vm8, %v8437_v22, %v8375_v1 }
 0x4a0   :  { %v7668_v63 = vsel %vm7663_vm10, -inf, %v7667_v24  ;;  %vm7705_vm10 = vmand %vm11567_vm5, %vm7693_vm0  ;;  %3893 = vmatpush.msrb.mxu3 %v3892_v19  ;;  %v10146_v24 = vsub.f32 %v3565_v9, %v10143_v51 }
 0x4a1   :  { %v7669_v10 = vsel %vm7662_vm11, 0.0, %v7668_v63  ;;  %vm7707_vm11 = vmor %vm7705_vm10, %vm10054_vm2  ;;  %vm7709_vm2 = vcmp.eq.f32.partialorder %v10003_v6, 3212836864  ;;  %vm7717_vm10 = vcmp.ne.f32.partialorder %v10003_v6, %v10003_v6  ;;  %v3563_v63 = vld [vmem:[%s3561_s14 + $0x8] sm:$0xff] }
 0x4a2   :  { %v7670_v7 = vmul.f32 %v7669_v10, %v8339_v33  ;;  %vm7698_vm1 = vmand %vm7692_vm8, %vm8356_vm6  ;;  %v7708_v26 = vsel %vm7707_vm11, 2139095040, %v8210_v14  ;;  %vm7697_vm11 = vcmp.eq.f32.partialorder %v10011_v16, 2139095040  ;;  %v3896_v16 = vand.u32 4294901760, %v10113_v58 }
 0x4a3   :  { %vm7702_vm5 = vmand %vm7695_vm4, %vm8390_vm7  ;;  %v7710_v50 = vsel %vm7709_vm2, 1065353216, %v7708_v26  ;;  %v10154_v45 = vand.u32 4294901760, %v3563_v63  ;;  %v4066_v20 = vand.u32 4294901760, %v10146_v24 }
 0x4a4   :  { %8100 = vpow2.f32 %v7670_v7  ;;  %vm7719_vm4 = vmor %vm7717_vm10, %vm8458_vm15  ;;  %v3897_v34 = vsub.f32 %v10113_v58, %v3896_v16  ;;  %v10150_v7 = vand.u32 4294901760, %v3564_v46 }
 0x4a5   :  { %v10173_v27 = vsub.f32 %v3563_v63, %v10154_v45  ;;  %v4067_v38 = vsub.f32 %v10146_v24, %v4066_v20 }
 0x4a6   :  { %v3898_v55 = vand.u32 4294901760, %v3897_v34 }
 0x4a8   :  { %3899 = vmatpush.msrb.mxu3 %v3898_v55  ;;  %v10210_v55 = vand.u32 4294901760, %v3574_v47 }
 0x4aa   :  { %v8101_v57 = vpop.eup %8100 }
 0x4ab   :  { %v7699_v61 = vsel %vm7698_vm1, 2143289344, %v8101_v57 }
 0x4ac   :  { %v7701_v3 = vsel %vm7693_vm0, %v8413_v17, %v7699_v61  ;;  %vm7694_vm0 = vcmp.eq.f32.partialorder %v10003_v6, 1065353216 }
 0x4ad   :  { %v7703_v41 = vxor.u32 2147483648, %v7701_v3  ;;  %vm7721_vm1 = vmor %vm7694_vm0, %vm7270_vm12 }
 0x4af   :  { %v7704_v37 = vsel %vm7702_vm5, %v7703_v41, %v7701_v3  ;;  %v10168_v3 = vand.u32 4294901760, %v3562_v60 }
 0x4b0   :  { %v7711_v42 = vsel %vm7269_vm14, %v7710_v50, %v7704_v37 }
 0x4b1   :  { %v7716_v54 = vsel %vm7697_vm11, %v7715_v44, %v7711_v42  ;;  %v10193_v15 = vsub.f32 %v3562_v60, %v10168_v3 }
 0x4b2   :  { %v7720_v36 = vsel %vm7719_vm4, 2143289344, %v7716_v54  ;;  %v4078_v54 = vand.u32 4294901760, %v10173_v27 }
 0x4b3   :  { %v7722_v32 = vsel %vm7721_vm1, 1065353216, %v7720_v36 }
 0x4b4   :  { %v7723_v56 = vsel %vm7271_vm13, %v10003_v6, %v7722_v32  ;;  %v4068_v32 = vand.u32 4294901760, %v4067_v38 }
 0x4b5   :  { %v3637_v53 = vmul.f32 %v7723_v56, %v8504_v49 }
 0x4b7   :  { %v3638_v5 = vmax.f32 %v3637_v53, 0.0  ;;  %v4084_v53 = vand.u32 4294901760, %v10193_v15 }
 0x4b9   :  { %v3639_v11 = vmin.f32 %v3638_v5, 1.0  ;;  %v3573_v5 = vld [vmem:[%s10182_s27 + $0x10] sm:$0xff] }
 0x4ba   :  { %v10230_v63 = vand.u32 4294901760, %v3573_v5 }
 0x4bb   :  { %v3640_v4 = vsub.f32 1.0, %v3639_v11  ;;  %v3642_v6 = vmul.f32 %v3639_v11, %v9588_v28 }
 0x4bd   :  { %v3641_v10 = vmul.f32 %v3640_v4, %v9746_v29  ;;  %v10163_v29 = vsub.f32 %v3564_v46, %v10150_v7  ;;  %v4085_v46 = vsub.f32 %v10193_v15, %v4084_v53  ;;  %v10228_v4 = vsub.f32 %v3574_v47, %v10210_v55 }
 0x4bf   :  { %v10152_v21 = vadd.f32 %v3642_v6, %v3641_v10  ;;  %v4072_v40 = vand.u32 4294901760, %v10163_v29  ;;  %v3572_v10 = vld [vmem:[%s10182_s27 + $0x8] sm:$0xff]  ;;  %v3571_v6 = vld [vmem:[%s10182_s27] sm:$0xff] }
 0x4c0   :  { %v10241_v60 = vand.u32 4294901760, %v3572_v10 }
 0x4c1   :  { %v4474_v57 = vmul.f32 %v10152_v21, %v10152_v21  ;;  %v3645_v61 = vsel %vm159_vm9, %v10152_v21, 0  ;;  %v3832_v26 = vrot.slane %v10152_v21, 1  ;;  %v4073_v34 = vsub.f32 %v10163_v29, %v4072_v40 }
 0x4c2   :  { %v10166_v28 = vand.u32 4294901760, %v3645_v61  ;;  %v4020_v9 = vrot.slane %v10152_v21, 2 }
 0x4c3   :  { %v4475_v12 = vsel %vm101_vm3, %v4474_v57, 0.0  ;;  %v3833_v41 = vsel %vm159_vm9, %v3832_v26, 0  ;;  %v4074_v11 = vand.u32 4294901760, %v4073_v34  ;;  %v10250_v26 = vsub.f32 %v3573_v5, %v10230_v63 }
 0x4c4   :  { %4476 = vadd.xlane.f32.xlu2 %v4475_v12  ;;  %3713 = vmatmul.f32.vlgmr.msra.gmra.mxu1 %v10166_v28  ;;  %v3668_v50 = vsub.f32 %v3645_v61, %v10166_v28  ;;  %v10177_v37 = vand.u32 4294901760, %v3833_v41  ;;  %v4254_v61 = vand.u32 4294901760, %v10228_v4 }
 0x4c5   :  { %3948 = vmatpush.msra.mxu1 %v10063_v31 }
 0x4c6   :  { %3743 = vmatmul.f32.vlgmr.msra.gmra.mxu2 %v3668_v50  ;;  %v3669_v42 = vand.u32 4294901760, %v3668_v50  ;;  %v10190_v44 = vsub.f32 %v3833_v41, %v10177_v37  ;;  %v4255_v41 = vsub.f32 %v10228_v4, %v4254_v61 }
 0x4c7   :  { %3950 = vmatpush.msra.mxu1 %v10071_v48  ;;  %3977 = vmatpush.msra.mxu2 %v3878_v18 }
 0x4c8   :  { %3770 = vmatmul.f32.vlgmr.msra.gmra.mxu3 %v3669_v42  ;;  %v3670_v36 = vsub.f32 %v3668_v50, %v3669_v42  ;;  %v3857_v19 = vand.u32 4294901760, %v10190_v44  ;;  %v4256_v47 = vand.u32 4294901760, %v4255_v41 }
 0x4c9   :  { %3952 = vmatpush.msra.mxu1 %v10073_v2  ;;  %3981 = vmatpush.msra.mxu2 %v3884_v52  ;;  %v4079_v52 = vsub.f32 %v10173_v27, %v4078_v54 }
 0x4ca   :  { %v3671_v56 = vand.u32 4294901760, %v3670_v36  ;;  %v3858_v18 = vsub.f32 %v10190_v44, %v3857_v19  ;;  %4008 = vmatpush.msra.mxu3 %v10063_v31 }
 0x4cb   :  { %3954 = vmatpush.msra.mxu1 %v10098_v23  ;;  %3985 = vmatpush.msra.mxu2 %v3890_v43  ;;  %v4208_v43 = vrot.slane %v10152_v21, 3 }
 0x4cc   :  { %3672 = vmatmul.f32.vlgmr.msra.gmra.mxu0 %v3671_v56  ;;  %3828 = vmatmul.f32.vlgmr.msrb.gmra.mxu1 %v10166_v28  ;;  %v3859_v31 = vand.u32 4294901760, %v3858_v18 }
 0x4cd   :  { %4010 = vmatpush.msra.mxu3 %v10071_v48  ;;  %3919 = vmatpush.msra.mxu0 %v10069_v0  ;;  %v4080_v0 = vand.u32 4294901760, %v4079_v52  ;;  %v4021_v48 = vsel %vm159_vm9, %v4020_v9, 0  ;;  %v4209_v57 = vsel %vm159_vm9, %v4208_v43, 0 }
 0x4ce   :  { %3860 = vmatmul.f32.vlgmr.msrb.gmra.mxu2 %v3859_v31  ;;  %4069 = vmatpush.msrb.mxu1 %v4068_v32 }
 0x4cf   :  { %3989 = vmatpush.msra.mxu2 %v3896_v16  ;;  %4012 = vmatpush.msra.mxu3 %v10073_v2  ;;  %v4086_v2 = vand.u32 4294901760, %v4085_v46  ;;  %v10246_v16 = vand.u32 4294901760, %v4021_v48 }
 0x4d0   :  { %3901 = vmatmul.f32.vlgmr.msrb.gmra.mxu3 %v10177_v37  ;;  %3922 = vmatpush.msra.mxu0 %v10084_v62  ;;  %v10253_v62 = vand.u32 4294901760, %v3571_v6 }
 0x4d1   :  { %4014 = vmatpush.msra.mxu3 %v10098_v23  ;;  %4075 = vmatpush.msrb.mxu1 %v4074_v11  ;;  %v10256_v23 = vand.u32 4294901760, %v4209_v57  ;;  %v4044_v12 = vsub.f32 %v4021_v48, %v10246_v16 }
 0x4d2   :  { %4107 = vmatpush.msrb.mxu2 %v10146_v24  ;;  %3925 = vmatpush.msra.mxu0 %v10091_v25  ;;  %v10261_v25 = vsub.f32 %v3572_v10, %v10241_v60 }
 0x4d3   :  { %4081 = vmatpush.msrb.mxu1 %v4080_v0  ;;  %4136 = vmatpush.msrb.mxu3 %v10143_v51  ;;  %v10277_v50 = vsub.f32 %v4209_v57, %v10256_v23  ;;  %v4045_v42 = vand.u32 4294901760, %v4044_v12 }
 0x4d4   :  { %3803 = vmatmul.f32.vlgmr.msrb.gmra.mxu0 %v10166_v28  ;;  %3958 = vmatmul.f32.vlgmr.msra.gmra.mxu1 %v3857_v19  ;;  %v4260_v28 = vand.u32 4294901760, %v10250_v26  ;;  %v4266_v38 = vand.u32 4294901760, %v10261_v25 }
 0x4d5   :  { %4110 = vmatpush.msrb.mxu2 %v10163_v29  ;;  %3928 = vmatpush.msra.mxu0 %v10113_v58  ;;  %v10272_v58 = vsub.f32 %v3571_v6, %v10253_v62  ;;  %v4233_v19 = vand.u32 4294901760, %v10277_v50  ;;  %v4046_v34 = vsub.f32 %v4044_v12, %v4045_v42 }
 0x4d6   :  { %3991 = vmatmul.f32.vlgmr.msra.gmra.mxu2 %v10177_v37  ;;  %4087 = vmatpush.msrb.mxu1 %v4086_v2  ;;  %v4261_v36 = vsub.f32 %v10250_v26, %v4260_v28 }
 0x4d7   :  { %4113 = vmatpush.msrb.mxu2 %v10173_v27  ;;  %4138 = vmatpush.msrb.mxu3 %v10150_v7  ;;  %v4234_v56 = vsub.f32 %v10277_v50, %v4233_v19  ;;  %v4047_v18 = vand.u32 4294901760, %v4046_v34  ;;  %v8056_v34 = vld [vmem:[%s5291_s24] ss:$0 sm:$0xff]  ;;  %s7200_s24 = sshll.u32 %s9924_s28, 5  ;;  %s7202_s28 = sshll.u32 %s9926_s30, 5 }
 0x4d8   :  { %4016 = vmatmul.f32.vlgmr.msra.gmra.mxu3 %v10177_v37  ;;  %4036 = vmatpush.msrb.mxu0 %v10143_v51  ;;  %v4272_v37 = vand.u32 4294901760, %v10272_v58  ;;  %v4262_v32 = vand.u32 4294901760, %v4261_v36  ;;  %s4432_s9 = scalar_lea.vmem %s11513_s3, %s7202_s28  ;;  %s6153_s30 = scalar_lea.vmem %s11512_s2, %s10766_s1 }
 0x4d9   :  { %4116 = vmatpush.msrb.mxu2 %v10193_v15  ;;  %4140 = vmatpush.msrb.mxu3 %v10154_v45  ;;  %v4235_v52 = vand.u32 4294901760, %v4234_v56 }
 0x4da   :  { %4196 = vmatpush.msra.mxu1 %v10143_v51  ;;  %4038 = vmatpush.msrb.mxu0 %v10150_v7  ;;  %v4267_v51 = vsub.f32 %v10261_v25, %v4266_v38 }
 0x4db   :  { %4142 = vmatpush.msrb.mxu3 %v10168_v3  ;;  %4224 = vmatpush.msra.mxu2 %v10210_v55 }
 0x4dc   :  { %3931 = vmatmul.f32.vlgmr.msra.gmra.mxu0 %v10190_v44  ;;  %4089 = vmatmul.f32.vlgmr.msrb.gmra.mxu1 %v10246_v16  ;;  %v4273_v44 = vsub.f32 %v10272_v58, %v4272_v37 }
 0x4dd   :  { %4198 = vmatpush.msra.mxu1 %v10150_v7  ;;  %4040 = vmatpush.msrb.mxu0 %v10154_v45  ;;  %v4268_v7 = vand.u32 4294901760, %v4267_v51 }
 0x4de   :  { %4119 = vmatmul.f32.vlgmr.msrb.gmra.mxu2 %v4044_v12  ;;  %4257 = vmatpush.msra.mxu3 %v4256_v47 }
 0x4df   :  { %4200 = vmatpush.msra.mxu1 %v10154_v45  ;;  %4226 = vmatpush.msra.mxu2 %v10230_v63  ;;  %v4274_v45 = vand.u32 4294901760, %v4273_v44  ;;  %v8057_v44 = vld [vmem:[%s5300_s25] ss:$0 sm:$0xff]  ;;  %s4423_s25 = scalar_lea.vmem %s11513_s3, %s7200_s24  ;;  %s6180_s24 = scalar_lea.vmem %s11512_s2, %s10740_s13 }
 0x4e0   :  { %4146 = vmatmul.f32.vlgmr.msrb.gmra.mxu3 %v4045_v42  ;;  %4042 = vmatpush.msrb.mxu0 %v10168_v3 }
 0x4e1   :  { %4202 = vmatpush.msra.mxu1 %v10168_v3  ;;  %4228 = vmatpush.msra.mxu2 %v10241_v60  ;;  %v4461_v24 = vpop.xlane.xlu1 %4460 }
 0x4e2   :  { %4263 = vmatpush.msra.mxu3 %v4262_v32  ;;  %4165 = vmatpush.msra.mxu0 %v4066_v20  ;;  %8102 = vrsqrt.f32 %v4461_v24  ;;  %vm4469_vm8 = vcmp.eq.f32.partialorder %v4461_v24, inf  ;;  %vm4471_vm2 = vcmp.eq.f32.partialorder %v4461_v24, 0.0  ;;  %v5283_v32 = vld [vmem:[%s5282_s16] sm:$0x1]  ;;  %s10738_s16 = sld [smem:[#allocation5 + $0x1e]] }
 0x4e3   :  { %4230 = vmatpush.msra.mxu2 %v10253_v62  ;;  %4324 = vmatpush.msrb.mxu1 %v10210_v55 }
 0x4e4   :  { %4048 = vmatmul.f32.vlgmr.msrb.gmra.mxu0 %v4047_v18  ;;  %4204 = vmatmul.f32.vlgmr.msra.gmra.mxu1 %v10246_v16  ;;  %v4418_v18 = vld [vmem:[%s4414_s18 + $0x18] sm:$0xff] }
 0x4e5   :  { %4269 = vmatpush.msra.mxu3 %v4268_v7  ;;  %4169 = vmatpush.msra.mxu0 %v4072_v40  ;;  %v8058_v7 = vld [vmem:[%s5309_s10] ss:$0 sm:$0xff]  ;;  %s7204_s10 = sshll.u32 %s9928_s7, 5 }
 0x4e6   :  { %4236 = vmatmul.f32.vlgmr.msra.gmra.mxu2 %v4235_v52  ;;  %4326 = vmatpush.msrb.mxu1 %v10230_v63  ;;  %s10588_s26 = scalar_lea.vmem %s11513_s3, %s7204_s10  ;;  %s5285_s10 = scalar_lea.vmem %s11513_s3, %s7206_s21 }
 0x4e7   :  { %4275 = vmatpush.msra.mxu3 %v4274_v45  ;;  %4353 = vmatpush.msrb.mxu2 %v4254_v61  ;;  %v4417_v45 = vld [vmem:[%s4414_s18 + $0x10] sm:$0xff]  ;;  %s10994_s21 = scalar_lea.vmem %s11513_s3, %s7212_s29  ;;  %s8213_s29 = smov 64  }
 0x4e8   :  { %4277 = vmatmul.f32.vlgmr.msra.gmra.mxu3 %v10256_v23  ;;  %4173 = vmatpush.msra.mxu0 %v4078_v54  ;;  %v8103_v20 = vpop.eup %8102  ;;  %s6171_s27 = scalar_lea.vmem %s11512_s2, %s10738_s16  ;;  %s7208_s2 = sshll.u32 %s10330_s20, 5 }
 0x4e9   :  { %4328 = vmatpush.msrb.mxu1 %v10241_v60  ;;  %4357 = vmatpush.msrb.mxu2 %v4260_v28  ;;  %v4463_v29 = vmul.f32 %v8103_v20, %v4461_v24  ;;  %s5294_s12 = scalar_lea.vmem %s11513_s3, %s7208_s2  ;;  %s7210_s20 = sshll.u32 %s10332_s0, 5 }
 0x4ea   :  { %4384 = vmatpush.msrb.mxu3 %v10210_v55  ;;  %4177 = vmatpush.msra.mxu0 %v4084_v53  ;;  %s5303_s23 = scalar_lea.vmem %s11513_s3, %s7210_s20 }
 0x4eb   :  { %4330 = vmatpush.msrb.mxu1 %v10253_v62  ;;  %4361 = vmatpush.msrb.mxu2 %v4266_v38  ;;  %v4464_v3 = vmul.f32 %v8103_v20, %v4463_v29  ;;  %v10392_v29 = vand.u32 4294901760, %v4418_v18 }
 0x4ec   :  { %4386 = vmatpush.msrb.mxu3 %v10230_v63  ;;  %4179 = vmatmul.f32.vlgmr.msra.gmra.mxu0 %v10246_v16 }
 0x4ed   :  { %4334 = vmatmul.f32.vlgmr.msrb.gmra.mxu1 %v4233_v19  ;;  %4295 = vmatpush.msrb.mxu0 %v10228_v4  ;;  %v4465_v40 = vmul.f32 0.5, %v4464_v3  ;;  %v4472_v4 = vand.u32 2147483648, %v4461_v24  ;;  %v10394_v3 = vand.u32 4294901760, %v4417_v45 }
 0x4ee   :  { %4365 = vmatpush.msrb.mxu2 %v4272_v37  ;;  %4388 = vmatpush.msrb.mxu3 %v10241_v60 }
 0x4ef   :  { %4367 = vmatmul.f32.vlgmr.msrb.gmra.mxu2 %v10256_v23  ;;  %4298 = vmatpush.msrb.mxu0 %v10250_v26  ;;  %v4466_v15 = vsub.f32 1.5, %v4465_v40  ;;  %v4415_v40 = vld [vmem:[%s4414_s18] sm:$0xff] }
 0x4f0   :  { %4390 = vmatpush.msrb.mxu3 %v10253_v62 }
 0x4f1   :  { %4392 = vmatmul.f32.vlgmr.msrb.gmra.mxu3 %v10256_v23  ;;  %4301 = vmatpush.msrb.mxu0 %v10261_v25  ;;  %v4467_v55 = vmul.f32 %v8103_v20, %v4466_v15 }
 0x4f2   :  { %4631 = vmatpush.msra.mxu3 %v10392_v29 }
 0x4f3   :  { %4304 = vmatpush.msrb.mxu0 %v10272_v58  ;;  %v4468_v11 = vmul.f32 %v4467_v55, %v4461_v24 }
 0x4f4   :  { %4307 = vmatmul.f32.vlgmr.msrb.gmra.mxu0 %v10277_v50  ;;  %4633 = vmatpush.msra.mxu3 %v10394_v3 }
 0x4f5   :  { %v4470_v63 = vsel %vm4469_vm8, %v4461_v24, %v4468_v11  ;;  %vm11568_vm8 = vcmask 1040384   ;;  %v4560_v11 = vsub.f32 %v4418_v18, %v10392_v29  ;;  %4531 = vmatpush.msra.mxu0 %v10392_v29 }
 0x4f6   :  { %v4473_v16 = vsel %vm4471_vm2, %v4472_v4, %v4470_v63  ;;  %v5326_v20 = vsel %vm11568_vm8, %v5283_v32, %v8056_v34  ;;  %vm11569_vm2 = vcmask 1041408  }
 0x4f7   :  { %4602 = vmatpush.msra.mxu2 %v4560_v11  ;;  %4533 = vmatpush.msra.mxu0 %v10394_v3 }
 0x537   :  { %v4477_v27 = vpop.xlane.xlu2 %4476 }
 0x538   :  { %8104 = vrsqrt.f32 %v4477_v27  ;;  %vm4485_vm0 = vcmp.eq.f32.partialorder %v4477_v27, inf  ;;  %v4488_v6 = vand.u32 2147483648, %v4477_v27  ;;  %vm4487_vm5 = vcmp.eq.f32.partialorder %v4477_v27, 0.0 }
 0x53e   :  { %v8105_v54 = vpop.eup %8104 }
 0x53f   :  { %v4479_v53 = vmul.f32 %v8105_v54, %v4477_v27 }
 0x541   :  { %v4480_v9 = vmul.f32 %v8105_v54, %v4479_v53  ;;  %v10348_v5 = vpop.f32.mrf.mxu1 }
 0x543   :  { %v4481_v31 = vmul.f32 0.5, %v4480_v9 }
 0x545   :  { %v4482_v43 = vsub.f32 1.5, %v4481_v31 }
 0x547   :  { %v4483_v46 = vmul.f32 %v8105_v54, %v4482_v43  ;;  %v5327_v54 = vsel %vm11569_vm2, %v5326_v20, %v8057_v44  ;;  %v4566_v43 = vsub.f32 %v4417_v45, %v10394_v3 }
 0x549   :  { %v4484_v10 = vmul.f32 %v4483_v46, %v4477_v27  ;;  %v10350_v0 = vpop.f32.mrf.mxu0  ;;  %v10352_v48 = vpop.f32.mrf.mxu2  ;;  %v10405_v46 = vand.u32 4294901760, %v4415_v40  ;;  %4605 = vmatpush.msra.mxu2 %v4566_v43 }
 0x54a   :  { %v10354_v57 = vpop.f32.mrf.mxu1 }
 0x54b   :  { %v4486_v60 = vsel %vm4485_vm0, %v4477_v27, %v4484_v10  ;;  %v10356_v2 = vpop.f32.mrf.mxu3  ;;  %v4416_v27 = vld [vmem:[%s4414_s18 + $0x8] sm:$0xff]  ;;  %vm11570_vm0 = vcmask 1042432  }
 0x54c   :  { %v4489_v61 = vsel %vm4487_vm5, %v4488_v6, %v4486_v60  ;;  %v10397_v53 = vand.u32 4294901760, %v4416_v27  ;;  %v10400_v31 = vsel %vm11570_vm0, %v5327_v54, %v8058_v7  ;;  %v4561_v6 = vand.u32 4294901760, %v4560_v11 }
 0x54d   :  { %v4490_v26 = vadd.f32 %v4489_v61, %v4473_v16  ;;  %v5329_v63 = vmul.f32 %v10400_v31, %v10400_v31  ;;  %v4567_v60 = vand.u32 4294901760, %v4566_v43  ;;  %v4578_v61 = vsub.f32 %v4415_v40, %v10405_v46 }
 0x54e   :  { %4635 = vmatpush.msra.mxu3 %v10397_v53  ;;  %4535 = vmatpush.msra.mxu0 %v10397_v53 }
 0x54f   :  { %8106 = vrcp.f32 %v4490_v26  ;;  %v4502_v50 = vand.u32 2147483648, %v4490_v26  ;;  %v4500_v36 = vand.u32 2147483647, %v4490_v26  ;;  %vm4496_vm11 = vweird.f32 %v4490_v26 }
 0x550   :  { %4637 = vmatpush.msra.mxu3 %v10405_v46  ;;  %4537 = vmatpush.msra.mxu0 %v10405_v46 }
 0x551   :  { %v10358_v62 = vpop.f32.mrf.mxu0  ;;  %v3861_v23 = vpop.f32.mrf.mxu2  ;;  %v4503_v51 = vor.u32 1.1754944e-38, %v4502_v50  ;;  %vm4501_vm1 = vcmp.eq.f32.partialorder %v4500_v36, 8.507059e+37  ;;  %v4562_v50 = vsub.f32 %v4560_v11, %v4561_v6 }
 0x552   :  { %v10362_v41 = vpop.f32.mrf.mxu1  ;;  %4660 = vmatpush.msrb.mxu0 %v4561_v6 }
 0x553   :  { %v3902_v25 = vpop.f32.mrf.mxu3  ;;  %v4563_v34 = vand.u32 4294901760, %v4562_v50 }
 0x554   :  { %4664 = vmatpush.msrb.mxu0 %v4567_v60 }
 0x555   :  { %v8107_v12 = vpop.eup %8106  ;;  %4564 = vmatpush.msra.mxu1 %v4563_v34 }
 0x556   :  { %v4492_v28 = vmul.f32 %v8107_v12, %v4490_v26  ;;  %vm4497_vm10 = vweird.f32 %v8107_v12 }
 0x557   :  { %vm4498_vm4 = vmor %vm4496_vm11, %vm4497_vm10 }
 0x558   :  { %v4493_v58 = vsub.f32 1.0, %v4492_v28  ;;  %vm11571_vm10 = vmmov %vm11568_vm8 }
 0x559   :  { %v3932_v38 = vpop.f32.mrf.mxu0  ;;  %v10365_v42 = vpop.f32.mrf.mxu2  ;;  %vm11572_vm11 = vmmov %vm11569_vm2 }
 0x55a   :  { %v4494_v47 = vmul.f32 %v8107_v12, %v4493_v58  ;;  %v4090_v24 = vpop.f32.mrf.mxu1  ;;  %v5330_v58 = vsel %vm101_vm3, %v5329_v63, 0.0 }
 0x55b   :  { %v10371_v37 = vpop.f32.mrf.mxu3  ;;  %5331 = vadd.xlane.f32.xlu0 %v5330_v58 }
 0x55c   :  { %v4495_v19 = vadd.f32 %v8107_v12, %v4494_v47  ;;  %v4568_v47 = vsub.f32 %v4566_v43, %v4567_v60 }
 0x55e   :  { %v4499_v56 = vsel %vm4498_vm4, %v8107_v12, %v4495_v19  ;;  %v3903_v12 = vadd.f32 %v3902_v25, %v3861_v23  ;;  %v4579_v19 = vand.u32 4294901760, %v4578_v61  ;;  %v4569_v23 = vand.u32 4294901760, %v4568_v47  ;;  %vm11573_vm4 = vmmov %vm11570_vm0 }
 0x55f   :  { %v4504_v52 = vsel %vm4501_vm1, %v4503_v51, %v4499_v56  ;;  %vm11574_vm1 = vcmask 125952  }
 0x560   :  { %v4505_v15 = vmul.f32 %v4504_v52, %v4473_v16  ;;  %v4572_v16 = vsub.f32 %v4416_v27, %v10397_v53  ;;  %v3933_v51 = vadd.f32 %v3932_v38, %v3903_v12  ;;  %v4580_v44 = vsub.f32 %v4578_v61, %v4579_v19  ;;  %4570 = vmatpush.msra.mxu1 %v4569_v23 }
 0x561   :  { %v4049_v55 = vpop.f32.mrf.mxu0  ;;  %v4120_v9 = vpop.f32.mrf.mxu2  ;;  %v3715_v52 = vadd.f32 %v10348_v5, %v10350_v0 }
 0x562   :  { %v10409_v4 = vmul.f32 %v4505_v15, %v8328_v13  ;;  %v4091_v28 = vadd.f32 %v4090_v24, %v4049_v55  ;;  %v4573_v36 = vand.u32 4294901760, %v4572_v16  ;;  %4608 = vmatpush.msra.mxu2 %v4572_v16  ;;  %v4205_v18 = vpop.f32.mrf.mxu1  ;;  %v3960_v24 = vadd.f32 %v10362_v41, %v3933_v51 }
 0x563   :  { %v4147_v10 = vpop.f32.mrf.mxu3  ;;  %v4581_v40 = vand.u32 4294901760, %v4580_v44 }
 0x564   :  { %v10417_v26 = vand.u32 2147483647, %v10409_v4  ;;  %v4574_v25 = vsub.f32 %v4572_v16, %v4573_v36  ;;  %v4121_v7 = vadd.f32 %v4120_v9, %v4091_v28  ;;  %4611 = vmatpush.msra.mxu2 %v4578_v61  ;;  %v3745_v9 = vadd.f32 %v10352_v48, %v3715_v52  ;;  %4668 = vmatpush.msrb.mxu0 %v4573_v36 }
 0x565   :  { %v3993_v11 = vadd.f32 %v10365_v42, %v3960_v24 }
 0x566   :  { %v7732_v32 = vand.u32 8388607, %v10417_v26  ;;  %v4575_v38 = vand.u32 4294901760, %v4574_v25  ;;  %v4148_v54 = vadd.f32 %v4147_v10, %v4121_v7  ;;  %4672 = vmatpush.msrb.mxu0 %v4579_v19  ;;  %v3772_v10 = vadd.f32 %v10356_v2, %v3745_v9 }
 0x567   :  { %v4018_v60 = vadd.f32 %v10371_v37, %v3993_v11  ;;  %v7728_v58 = vand.u32 2139095040, %v10417_v26  ;;  %vm7766_vm8 = vweird.f32 %v10417_v26  ;;  %vm7765_vm2 = vcmp.lt.f32.partialorder %v10417_v26, 0.0 }
 0x568   :  { %v7733_v56 = vor.u32 8388608, %v7732_v32  ;;  %4576 = vmatpush.msra.mxu1 %v4575_v38  ;;  %v3805_v12 = vadd.f32 %v10358_v62, %v3772_v10  ;;  %vm7764_vm0 = vcmp.eq.f32.partialorder %v10417_v26, 0.0 }
 0x569   :  { %v4180_v45 = vpop.f32.mrf.mxu0  ;;  %v4237_v27 = vpop.f32.mrf.mxu2  ;;  %v4397_v36 = vrot.slane %v4018_v60, 7  ;;  %v7729_v62 = vshrl.u32 %v7728_v58, 23  ;;  %v4427_v60 = vld [vmem:[%s4423_s25 + $0x18] sm:$0xff] }
 0x56a   :  { %v7735_v20 = vand.u32 8388607, %v7733_v56  ;;  %v4181_v5 = vadd.f32 %v4180_v45, %v4148_v54  ;;  %4582 = vmatpush.msra.mxu1 %v4581_v40  ;;  %v4335_v16 = vpop.f32.mrf.mxu1  ;;  %v3830_v32 = vadd.f32 %v10354_v57, %v3805_v12 }
 0x56b   :  { %v4278_v55 = vpop.f32.mrf.mxu3 }
 0x56c   :  { %v7736_v15 = vor.u32 1065353216, %v7735_v20  ;;  %v4279_v0 = vadd.f32 %v4278_v55, %v4237_v27  ;;  %4691 = vmatpush.msrb.mxu1 %v10392_v29  ;;  %v4206_v42 = vadd.f32 %v4205_v18, %v4181_v5  ;;  %v4405_v44 = vsel %vm11571_vm10, %v3830_v32, %v4397_v36 }
 0x56d   :  { %vm7763_vm10 = vcmp.eq.f32.partialorder %v10417_v26, 1.0 }
 0x56e   :  { %vm7737_vm5 = vcmp.ge.f32.partialorder %v7736_v15, 1.4142135  ;;  %v7738_v43 = vmul.f32 0.5, %v7736_v15  ;;  %4693 = vmatpush.msrb.mxu1 %v10394_v3  ;;  %v4400_v37 = vrot.slane %v4206_v42, 6  ;;  %v4426_v42 = vld [vmem:[%s4423_s25 + $0x10] sm:$0xff] }
 0x56f   :  { %v10477_v12 = vand.u32 4294901760, %v4426_v42 }
 0x570   :  { %v7739_v41 = vsel %vm7737_vm5, %v7738_v43, %v7736_v15  ;;  %4695 = vmatpush.msrb.mxu1 %v10397_v53  ;;  %v4406_v56 = vsel %vm11572_vm11, %v4405_v44, %v4400_v37  ;;  %vm7794_vm11 = vcmp.eq.f32.partialorder %v10409_v4, 0  ;;  %v4424_v37 = vld [vmem:[%s4423_s25] sm:$0xff] }
 0x571   :  { %v4308_v63 = vpop.f32.mrf.mxu0  ;;  %v7826_v6 = vadd.f32 -1.0, %v7739_v41  ;;  %v10490_v36 = vsub.f32 %v4426_v42, %v10477_v12  ;;  %v4433_v42 = vld [vmem:[%s4432_s9] sm:$0xff] }
 0x572   :  { %v4309_v48 = vadd.f32 %v4308_v63, %v4279_v0  ;;  %v4368_v29 = vpop.f32.mrf.mxu2  ;;  %4697 = vmatpush.msrb.mxu1 %v10405_v46  ;;  %v7825_v46 = vadd.s32 4294967169, %v7729_v62 }
 0x573   :  { %v7743_v61 = vmul.f32 %v7826_v6, %v7826_v6  ;;  %v4755_v32 = vand.u32 4294901760, %v10490_v36 }
 0x574   :  { %v4336_v28 = vadd.f32 %v4335_v16, %v4309_v48  ;;  %v4393_v19 = vpop.f32.mrf.mxu3  ;;  %v7740_v20 = vadd.s32 1, %v7825_v46  ;;  %v10469_v48 = vand.u32 4294901760, %v4427_v60  ;;  %v4425_v16 = vld [vmem:[%s4423_s25 + $0x8] sm:$0xff]  ;;  %s7214_s25 = sshll.u32 %s10766_s1, 5  ;;  %s7216_s1 = sshll.u32 %s10736_s15, 5 }
 0x575   :  { %v7744_v50 = vmul.f32 0.12621109, %v7743_v61  ;;  %v7746_v47 = vmul.f32 -0.20706727, %v7743_v61  ;;  %s6156_s8 = scalar_lea.vmem %s11513_s3, %s7214_s25  ;;  %s6165_s11 = scalar_lea.vmem %s11513_s3, %s7216_s1 }
 0x576   :  { %v4369_v2 = vadd.f32 %v4368_v29, %v4336_v28  ;;  %v7741_v55 = vsel %vm7737_vm5, %v7740_v20, %v7825_v46  ;;  %vm7797_vm5 = vcmp.gt.f32.partialorder %v10417_v26, 1065353216  ;;  %4719 = vmatpush.msrb.mxu2 %v10469_v48  ;;  %v10479_v28 = vand.u32 4294901760, %v4425_v16  ;;  %v6166_v59 = vld [vmem:[%s6165_s11] sm:$0xff]  ;;  %s7218_s15 = sshll.u32 %s10738_s16, 5 }
 0x577   :  { %v7745_v3 = vadd.f32 0.21545328, %v7744_v50  ;;  %v7747_v51 = vadd.f32 -0.23896284, %v7746_v47  ;;  %v7761_v43 = vcvt.s32.f32 %v7741_v55  ;;  %v4436_v55 = vld [vmem:[%s4432_s9 + $0x18] sm:$0xff]  ;;  %s6174_s7 = scalar_lea.vmem %s11513_s3, %s7218_s15 }
 0x578   :  { %v4394_v34 = vadd.f32 %v4393_v19, %v4369_v2  ;;  %4721 = vmatpush.msrb.mxu2 %v10477_v12  ;;  %v10497_v19 = vsub.f32 %v4425_v16, %v10479_v28 }
 0x579   :  { %v7748_v23 = vmul.f32 %v7745_v3, %v7743_v61  ;;  %v7750_v25 = vmul.f32 %v7747_v51, %v7743_v61 }
 0x57a   :  { %v4403_v53 = vrot.slane %v4394_v34, 5  ;;  %4723 = vmatpush.msrb.mxu2 %v10479_v28  ;;  %v10504_v34 = vand.u32 4294901760, %v4424_v37 }
 0x57b   :  { %v7749_v7 = vadd.f32 0.28795174, %v7748_v23  ;;  %v7751_v18 = vadd.f32 -0.3607037, %v7750_v25  ;;  %v4761_v23 = vand.u32 4294901760, %v10497_v19 }
 0x57c   :  { %v4407_v45 = vsel %vm11573_vm4, %v4406_v56, %v4403_v53  ;;  %vm11575_vm4 = vcmp.lt.f32.partialorder %v8339_v33, 0  ;;  %v4756_v53 = vsub.f32 %v10490_v36, %v4755_v32  ;;  %4725 = vmatpush.msrb.mxu2 %v10504_v34  ;;  %v10519_v56 = vsub.f32 %v4424_v37, %v10504_v34 }
 0x57d   :  { %4409 = vst.msk [vmem:[#allocation7 + $0x10] sm:$0xf] %vm11574_vm1, %v4407_v45  ;;  %v7752_v38 = vmul.f32 %v7749_v7, %v7743_v61  ;;  %v7754_v52 = vmul.f32 %v7751_v18, %v7743_v61  ;;  %vm10460_vm1 = vmxor %vm11575_vm4, %vm7797_vm5  ;;  %vm7796_vm5 = vcmp.lt.s32.totalorder %v10409_v4, 0  ;;  %v4762_v45 = vsub.f32 %v10497_v19, %v4761_v23 }
 0x57f   :  { %v7753_v24 = vadd.f32 0.48090908, %v7752_v38  ;;  %v7755_v57 = vadd.f32 -0.72134733, %v7754_v52  ;;  %v4757_v38 = vand.u32 4294901760, %v4756_v53 }
 0x581   :  { %v7756_v27 = vmul.f32 %v7753_v24, %v7743_v61  ;;  %v7758_v54 = vmul.f32 %v7826_v6, %v7755_v57  ;;  %v10475_v61 = vsub.f32 %v4427_v60, %v10469_v48  ;;  %v4763_v24 = vand.u32 4294901760, %v4762_v45 }
 0x583   :  { %v7757_v40 = vadd.f32 1.442695, %v7756_v27  ;;  %v4749_v47 = vand.u32 4294901760, %v10475_v61 }
 0x585   :  { %v7759_v9 = vadd.f32 %v7758_v54, %v7757_v40  ;;  %v4750_v51 = vsub.f32 %v10475_v61, %v4749_v47 }
 0x587   :  { %v7760_v11 = vmul.f32 %v7826_v6, %v7759_v9  ;;  %v4751_v44 = vand.u32 4294901760, %v4750_v51 }
 0x589   :  { %v7762_v5 = vadd.f32 %v7761_v43, %v7760_v11  ;;  %4752 = vmatpush.msrb.mxu3 %v4751_v44  ;;  %v10549_v11 = vand.u32 4294901760, %v4436_v55 }
 0x58b   :  { %v7767_v0 = vsel %vm7766_vm8, %v10417_v26, %v7762_v5  ;;  %vm7793_vm8 = vcmp.lt.f32.partialorder %v10409_v4, 0  ;;  %4758 = vmatpush.msrb.mxu3 %v4757_v38  ;;  %v4435_v5 = vld [vmem:[%s4432_s9 + $0x10] sm:$0xff]  ;;  %v4445_v38 = vld [vmem:[%s10588_s26 + $0x18] sm:$0xff] }
 0x58c   :  { %v7768_v41 = vsel %vm7765_vm2, nan, %v7767_v0  ;;  %vm11578_vm2 = vmmov %vm11575_vm4  ;;  %v7816_v18 = vsel %vm7793_vm8, %v8437_v22, %v8375_v1 }
 0x58d   :  { %v7769_v63 = vsel %vm7764_vm0, -inf, %v7768_v41  ;;  %vm7806_vm0 = vmand %vm11578_vm2, %vm7794_vm11  ;;  %4764 = vmatpush.msrb.mxu3 %v4763_v24  ;;  %v10552_v41 = vsub.f32 %v4436_v55, %v10549_v11 }
 0x58e   :  { %v7770_v10 = vsel %vm7763_vm10, 0.0, %v7769_v63  ;;  %vm7808_vm10 = vmor %vm7806_vm0, %vm10460_vm1  ;;  %vm7810_vm1 = vcmp.eq.f32.partialorder %v10409_v4, 3212836864  ;;  %vm7818_vm0 = vcmp.ne.f32.partialorder %v10409_v4, %v10409_v4  ;;  %v4434_v63 = vld [vmem:[%s4432_s9 + $0x8] sm:$0xff] }
 0x58f   :  { %v7771_v15 = vmul.f32 %v7770_v10, %v8339_v33  ;;  %vm7799_vm4 = vmand %vm7793_vm8, %vm8356_vm6  ;;  %v7809_v50 = vsel %vm7808_vm10, 2139095040, %v8210_v14  ;;  %vm7798_vm10 = vcmp.eq.f32.partialorder %v10417_v26, 2139095040  ;;  %v4767_v26 = vand.u32 4294901760, %v10519_v56 }
 0x590   :  { %vm7803_vm2 = vmand %vm7796_vm5, %vm8390_vm7  ;;  %v7811_v62 = vsel %vm7810_vm1, 1065353216, %v7809_v50  ;;  %v10560_v60 = vand.u32 4294901760, %v4434_v63  ;;  %v4937_v16 = vand.u32 4294901760, %v10552_v41 }
 0x591   :  { %8108 = vpow2.f32 %v7771_v15  ;;  %vm7820_vm5 = vmor %vm7818_vm0, %vm8458_vm15  ;;  %v4768_v20 = vsub.f32 %v10519_v56, %v4767_v26  ;;  %v10556_v15 = vand.u32 4294901760, %v4435_v5 }
 0x592   :  { %v10579_v51 = vsub.f32 %v4434_v63, %v10560_v60  ;;  %v4938_v44 = vsub.f32 %v10552_v41, %v4937_v16 }
 0x593   :  { %v4769_v54 = vand.u32 4294901760, %v4768_v20 }
 0x595   :  { %4770 = vmatpush.msrb.mxu3 %v4769_v54  ;;  %v10616_v54 = vand.u32 4294901760, %v4445_v38 }
 0x597   :  { %v8109_v58 = vpop.eup %8108 }
 0x598   :  { %v7800_v29 = vsel %vm7799_vm4, 2143289344, %v8109_v58 }
 0x599   :  { %v7802_v2 = vsel %vm7794_vm11, %v8413_v17, %v7800_v29  ;;  %vm7795_vm11 = vcmp.eq.f32.partialorder %v10409_v4, 1065353216 }
 0x59a   :  { %v7804_v3 = vxor.u32 2147483648, %v7802_v2  ;;  %vm7822_vm4 = vmor %vm7795_vm11, %vm7270_vm12 }
 0x59c   :  { %v7805_v25 = vsel %vm7803_vm2, %v7804_v3, %v7802_v2  ;;  %v10574_v2 = vand.u32 4294901760, %v4433_v42 }
 0x59d   :  { %v7812_v7 = vsel %vm7269_vm14, %v7811_v62, %v7805_v25 }
 0x59e   :  { %v7817_v46 = vsel %vm7798_vm10, %v7816_v18, %v7812_v7  ;;  %v10599_v45 = vsub.f32 %v4433_v42, %v10574_v2 }
 0x59f   :  { %v7821_v52 = vsel %vm7820_vm5, 2143289344, %v7817_v46  ;;  %v4949_v46 = vand.u32 4294901760, %v10579_v51 }
 0x5a0   :  { %v7823_v57 = vsel %vm7822_vm4, 1065353216, %v7821_v52 }
 0x5a1   :  { %v7824_v27 = vsel %vm7271_vm13, %v10409_v4, %v7823_v57  ;;  %v4939_v57 = vand.u32 4294901760, %v4938_v44 }
 0x5a2   :  { %v4508_v40 = vmul.f32 %v7824_v27, %v8504_v49 }
 0x5a4   :  { %v4509_v9 = vmax.f32 %v4508_v40, 0.0  ;;  %v4955_v40 = vand.u32 4294901760, %v10599_v45 }
 0x5a6   :  { %v4510_v43 = vmin.f32 %v4509_v9, 1.0  ;;  %v4444_v9 = vld [vmem:[%s10588_s26 + $0x10] sm:$0xff] }
 0x5a7   :  { %v10636_v63 = vand.u32 4294901760, %v4444_v9 }
 0x5a8   :  { %v4511_v0 = vsub.f32 1.0, %v4510_v43  ;;  %v4513_v4 = vmul.f32 %v4510_v43, %v9994_v35 }
 0x5aa   :  { %v4512_v10 = vmul.f32 %v4511_v0, %v10152_v21  ;;  %v10569_v21 = vsub.f32 %v4435_v5, %v10556_v15  ;;  %v4956_v5 = vsub.f32 %v10599_v45, %v4955_v40  ;;  %v10634_v0 = vsub.f32 %v4445_v38, %v10616_v54 }
 0x5ac   :  { %v10558_v6 = vadd.f32 %v4513_v4, %v4512_v10  ;;  %v4943_v53 = vand.u32 4294901760, %v10569_v21  ;;  %v4443_v10 = vld [vmem:[%s10588_s26 + $0x8] sm:$0xff]  ;;  %v4442_v4 = vld [vmem:[%s10588_s26] sm:$0xff]  ;;  %s7220_s26 = sshll.u32 %s10740_s13, 5 }
 0x5ad   :  { %v10647_v42 = vand.u32 4294901760, %v4443_v10  ;;  %s11352_s2 = scalar_lea.vmem %s11513_s3, %s7220_s26  ;;  %s8211_s3 = smov [#allocation8]  }
 0x5ae   :  { %v5345_v58 = vmul.f32 %v10558_v6, %v10558_v6  ;;  %v4516_v29 = vsel %vm159_vm9, %v10558_v6, 0  ;;  %v4703_v50 = vrot.slane %v10558_v6, 1  ;;  %v4944_v20 = vsub.f32 %v10569_v21, %v4943_v53  ;;  %s7042_s13 = sshll.u32 %s8211_s3, 4  ;;  %s7043_s13 = int_to_ptr.vmem [resolvable:$true] %s7042_s13 }
 0x5af   :  { %v10572_v35 = vand.u32 4294901760, %v4516_v29  ;;  %v4891_v55 = vrot.slane %v10558_v6, 2 }
 0x5b0   :  { %v5346_v37 = vsel %vm101_vm3, %v5345_v58, 0.0  ;;  %v4704_v3 = vsel %vm159_vm9, %v4703_v50, 0  ;;  %v4945_v43 = vand.u32 4294901760, %v4944_v20  ;;  %v10656_v50 = vsub.f32 %v4444_v9, %v10636_v63 }
 0x5b1   :  { %5347 = vadd.xlane.f32.xlu1 %v5346_v37  ;;  %4584 = vmatmul.f32.vlgmr.msra.gmra.mxu1 %v10572_v35  ;;  %v4539_v62 = vsub.f32 %v4516_v29, %v10572_v35  ;;  %v10583_v25 = vand.u32 4294901760, %v4704_v3  ;;  %v5125_v29 = vand.u32 4294901760, %v10634_v0 }
 0x5b2   :  { %4819 = vmatpush.msra.mxu1 %v10469_v48 }
 0x5b3   :  { %4614 = vmatmul.f32.vlgmr.msra.gmra.mxu2 %v4539_v62  ;;  %v4540_v7 = vand.u32 4294901760, %v4539_v62  ;;  %v10596_v18 = vsub.f32 %v4704_v3, %v10583_v25  ;;  %v5126_v3 = vsub.f32 %v10634_v0, %v5125_v29 }
 0x5b4   :  { %4821 = vmatpush.msra.mxu1 %v10477_v12  ;;  %4848 = vmatpush.msra.mxu2 %v4749_v47 }
 0x5b5   :  { %4641 = vmatmul.f32.vlgmr.msra.gmra.mxu3 %v4540_v7  ;;  %v4541_v52 = vsub.f32 %v4539_v62, %v4540_v7  ;;  %v4728_v24 = vand.u32 4294901760, %v10596_v18  ;;  %v5127_v38 = vand.u32 4294901760, %v5126_v3 }
 0x5b6   :  { %4823 = vmatpush.msra.mxu1 %v10479_v28  ;;  %4852 = vmatpush.msra.mxu2 %v4755_v32  ;;  %v4950_v32 = vsub.f32 %v10579_v51, %v4949_v46 }
 0x5b7   :  { %v4542_v27 = vand.u32 4294901760, %v4541_v52  ;;  %v4729_v47 = vsub.f32 %v10596_v18, %v4728_v24  ;;  %4879 = vmatpush.msra.mxu3 %v10469_v48 }
 0x5b8   :  { %4825 = vmatpush.msra.mxu1 %v10504_v34  ;;  %4856 = vmatpush.msra.mxu2 %v4761_v23  ;;  %v5079_v23 = vrot.slane %v10558_v6, 3 }
 0x5b9   :  { %4543 = vmatmul.f32.vlgmr.msra.gmra.mxu0 %v4542_v27  ;;  %4699 = vmatmul.f32.vlgmr.msrb.gmra.mxu1 %v10572_v35  ;;  %v4730_v48 = vand.u32 4294901760, %v4729_v47 }
 0x5ba   :  { %4881 = vmatpush.msra.mxu3 %v10477_v12  ;;  %4790 = vmatpush.msra.mxu0 %v10475_v61  ;;  %v4951_v61 = vand.u32 4294901760, %v4950_v32  ;;  %v4892_v12 = vsel %vm159_vm9, %v4891_v55, 0  ;;  %v5080_v58 = vsel %vm159_vm9, %v5079_v23, 0 }
 0x5bb   :  { %4731 = vmatmul.f32.vlgmr.msrb.gmra.mxu2 %v4730_v48  ;;  %4940 = vmatpush.msrb.mxu1 %v4939_v57 }
 0x5bc   :  { %4860 = vmatpush.msra.mxu2 %v4767_v26  ;;  %4883 = vmatpush.msra.mxu3 %v10479_v28  ;;  %v4957_v28 = vand.u32 4294901760, %v4956_v5  ;;  %v10652_v26 = vand.u32 4294901760, %v4892_v12 }
 0x5bd   :  { %4772 = vmatmul.f32.vlgmr.msrb.gmra.mxu3 %v10583_v25  ;;  %4793 = vmatpush.msra.mxu0 %v10490_v36  ;;  %v10659_v36 = vand.u32 4294901760, %v4442_v4 }
 0x5be   :  { %4885 = vmatpush.msra.mxu3 %v10504_v34  ;;  %4946 = vmatpush.msrb.mxu1 %v4945_v43  ;;  %v10662_v34 = vand.u32 4294901760, %v5080_v58  ;;  %v4915_v37 = vsub.f32 %v4892_v12, %v10652_v26 }
 0x5bf   :  { %4978 = vmatpush.msrb.mxu2 %v10552_v41  ;;  %4796 = vmatpush.msra.mxu0 %v10497_v19  ;;  %v10667_v19 = vsub.f32 %v4443_v10, %v10647_v42 }
 0x5c0   :  { %4952 = vmatpush.msrb.mxu1 %v4951_v61  ;;  %5007 = vmatpush.msrb.mxu3 %v10549_v11  ;;  %v10683_v62 = vsub.f32 %v5080_v58, %v10662_v34  ;;  %v4916_v7 = vand.u32 4294901760, %v4915_v37 }
 0x5c1   :  { %4674 = vmatmul.f32.vlgmr.msrb.gmra.mxu0 %v10572_v35  ;;  %4829 = vmatmul.f32.vlgmr.msra.gmra.mxu1 %v4728_v24  ;;  %v5131_v35 = vand.u32 4294901760, %v10656_v50  ;;  %v5137_v44 = vand.u32 4294901760, %v10667_v19 }
 0x5c2   :  { %4981 = vmatpush.msrb.mxu2 %v10569_v21  ;;  %4799 = vmatpush.msra.mxu0 %v10519_v56  ;;  %v10678_v56 = vsub.f32 %v4442_v4, %v10659_v36  ;;  %v5104_v24 = vand.u32 4294901760, %v10683_v62  ;;  %v4917_v20 = vsub.f32 %v4915_v37, %v4916_v7 }
 0x5c3   :  { %4862 = vmatmul.f32.vlgmr.msra.gmra.mxu2 %v10583_v25  ;;  %4958 = vmatpush.msrb.mxu1 %v4957_v28  ;;  %v5132_v52 = vsub.f32 %v10656_v50, %v5131_v35 }
 0x5c4   :  { %4984 = vmatpush.msrb.mxu2 %v10579_v51  ;;  %5009 = vmatpush.msrb.mxu3 %v10556_v15  ;;  %v5105_v27 = vsub.f32 %v10683_v62, %v5104_v24  ;;  %v4918_v47 = vand.u32 4294901760, %v4917_v20  ;;  %v8059_v20 = vld [vmem:[%s6162_s19] ss:$0 sm:$0xff] }
 0x5c5   :  { %4887 = vmatmul.f32.vlgmr.msra.gmra.mxu3 %v10583_v25  ;;  %4907 = vmatpush.msrb.mxu0 %v10549_v11  ;;  %v5143_v25 = vand.u32 4294901760, %v10678_v56  ;;  %v5133_v57 = vand.u32 4294901760, %v5132_v52 }
 0x5c6   :  { %4987 = vmatpush.msrb.mxu2 %v10599_v45  ;;  %5011 = vmatpush.msrb.mxu3 %v10560_v60  ;;  %v5106_v32 = vand.u32 4294901760, %v5105_v27 }
 0x5c7   :  { %5067 = vmatpush.msra.mxu1 %v10549_v11  ;;  %4909 = vmatpush.msrb.mxu0 %v10556_v15  ;;  %v5138_v11 = vsub.f32 %v10667_v19, %v5137_v44 }
 0x5c8   :  { %5013 = vmatpush.msrb.mxu3 %v10574_v2  ;;  %5095 = vmatpush.msra.mxu2 %v10616_v54 }
 0x5c9   :  { %4802 = vmatmul.f32.vlgmr.msra.gmra.mxu0 %v10596_v18  ;;  %4960 = vmatmul.f32.vlgmr.msrb.gmra.mxu1 %v10652_v26  ;;  %v5144_v18 = vsub.f32 %v10678_v56, %v5143_v25 }
 0x5ca   :  { %5069 = vmatpush.msra.mxu1 %v10556_v15  ;;  %4911 = vmatpush.msrb.mxu0 %v10560_v60  ;;  %v5139_v15 = vand.u32 4294901760, %v5138_v11 }
 0x5cb   :  { %4990 = vmatmul.f32.vlgmr.msrb.gmra.mxu2 %v4915_v37  ;;  %5128 = vmatpush.msra.mxu3 %v5127_v38 }
 0x5cc   :  { %5071 = vmatpush.msra.mxu1 %v10560_v60  ;;  %5097 = vmatpush.msra.mxu2 %v10636_v63  ;;  %v5145_v60 = vand.u32 4294901760, %v5144_v18  ;;  %v8060_v18 = vld [vmem:[%s6171_s27] ss:$0 sm:$0xff] }
 0x5cd   :  { %5017 = vmatmul.f32.vlgmr.msrb.gmra.mxu3 %v4916_v7  ;;  %4913 = vmatpush.msrb.mxu0 %v10574_v2 }
 0x5ce   :  { %5073 = vmatpush.msra.mxu1 %v10574_v2  ;;  %5099 = vmatpush.msra.mxu2 %v10647_v42  ;;  %v5332_v41 = vpop.xlane.xlu0 %5331 }
 0x5cf   :  { %5134 = vmatpush.msra.mxu3 %v5133_v57  ;;  %5036 = vmatpush.msra.mxu0 %v4937_v16  ;;  %8110 = vrsqrt.f32 %v5332_v41  ;;  %vm5340_vm8 = vcmp.eq.f32.partialorder %v5332_v41, inf  ;;  %vm5342_vm1 = vcmp.eq.f32.partialorder %v5332_v41, 0.0  ;;  %v6154_v57 = vld [vmem:[%s6153_s30] sm:$0x1] }
 0x5d0   :  { %5101 = vmatpush.msra.mxu2 %v10659_v36  ;;  %5195 = vmatpush.msrb.mxu1 %v10616_v54 }
 0x5d1   :  { %4919 = vmatmul.f32.vlgmr.msrb.gmra.mxu0 %v4918_v47  ;;  %5075 = vmatmul.f32.vlgmr.msra.gmra.mxu1 %v10652_v26  ;;  %v5289_v47 = vld [vmem:[%s5285_s10 + $0x18] sm:$0xff] }
 0x5d2   :  { %5140 = vmatpush.msra.mxu3 %v5139_v15  ;;  %5040 = vmatpush.msra.mxu0 %v4943_v53  ;;  %v8061_v15 = vld [vmem:[%s6180_s24] ss:$0 sm:$0xff]  ;;  %s8214_s24 = smov 4  }
 0x5d3   :  { %5107 = vmatmul.f32.vlgmr.msra.gmra.mxu2 %v5106_v32  ;;  %5197 = vmatpush.msrb.mxu1 %v10636_v63 }
 0x5d4   :  { %5146 = vmatpush.msra.mxu3 %v5145_v60  ;;  %5224 = vmatpush.msrb.mxu2 %v5125_v29  ;;  %v5288_v60 = vld [vmem:[%s5285_s10 + $0x10] sm:$0xff] }
 0x5d5   :  { %5148 = vmatmul.f32.vlgmr.msra.gmra.mxu3 %v10662_v34  ;;  %5044 = vmatpush.msra.mxu0 %v4949_v46  ;;  %v8111_v16 = vpop.eup %8110 }
 0x5d6   :  { %5199 = vmatpush.msrb.mxu1 %v10647_v42  ;;  %5228 = vmatpush.msrb.mxu2 %v5131_v35  ;;  %v5334_v21 = vmul.f32 %v8111_v16, %v5332_v41 }
 0x5d7   :  { %5255 = vmatpush.msrb.mxu3 %v10616_v54  ;;  %5048 = vmatpush.msra.mxu0 %v4955_v40 }
 0x5d8   :  { %5201 = vmatpush.msrb.mxu1 %v10659_v36  ;;  %5232 = vmatpush.msrb.mxu2 %v5137_v44  ;;  %v5335_v2 = vmul.f32 %v8111_v16, %v5334_v21  ;;  %v10798_v21 = vand.u32 4294901760, %v5289_v47 }
 0x5d9   :  { %5257 = vmatpush.msrb.mxu3 %v10636_v63  ;;  %5050 = vmatmul.f32.vlgmr.msra.gmra.mxu0 %v10652_v26 }
 0x5da   :  { %5205 = vmatmul.f32.vlgmr.msrb.gmra.mxu1 %v5104_v24  ;;  %5166 = vmatpush.msrb.mxu0 %v10634_v0  ;;  %v5336_v53 = vmul.f32 0.5, %v5335_v2  ;;  %v5343_v0 = vand.u32 2147483648, %v5332_v41  ;;  %v10800_v2 = vand.u32 4294901760, %v5288_v60 }
 0x5db   :  { %5236 = vmatpush.msrb.mxu2 %v5143_v25  ;;  %5259 = vmatpush.msrb.mxu3 %v10647_v42 }
 0x5dc   :  { %5238 = vmatmul.f32.vlgmr.msrb.gmra.mxu2 %v10662_v34  ;;  %5169 = vmatpush.msrb.mxu0 %v10656_v50  ;;  %v5337_v45 = vsub.f32 1.5, %v5336_v53  ;;  %v5286_v53 = vld [vmem:[%s5285_s10] sm:$0xff] }
 0x5dd   :  { %5261 = vmatpush.msrb.mxu3 %v10659_v36 }
 0x5de   :  { %5263 = vmatmul.f32.vlgmr.msrb.gmra.mxu3 %v10662_v34  ;;  %5172 = vmatpush.msrb.mxu0 %v10667_v19  ;;  %v5338_v54 = vmul.f32 %v8111_v16, %v5337_v45 }
 0x5df   :  { %5502 = vmatpush.msra.mxu3 %v10798_v21 }
 0x5e0   :  { %5175 = vmatpush.msrb.mxu0 %v10678_v56  ;;  %v5339_v43 = vmul.f32 %v5338_v54, %v5332_v41 }
 0x5e1   :  { %5178 = vmatmul.f32.vlgmr.msrb.gmra.mxu0 %v10683_v62  ;;  %5504 = vmatpush.msra.mxu3 %v10800_v2 }
 0x5e2   :  { %v5341_v63 = vsel %vm5340_vm8, %v5332_v41, %v5339_v43  ;;  %vm11579_vm8 = vcmask 1040384   ;;  %v5431_v43 = vsub.f32 %v5289_v47, %v10798_v21  ;;  %5402 = vmatpush.msra.mxu0 %v10798_v21 }
 0x5e3   :  { %v5344_v26 = vsel %vm5342_vm1, %v5343_v0, %v5341_v63  ;;  %v6197_v16 = vsel %vm11579_vm8, %v6154_v57, %v8059_v20  ;;  %vm11580_vm1 = vcmask 1041408  }
 0x5e4   :  { %5473 = vmatpush.msra.mxu2 %v5431_v43  ;;  %5404 = vmatpush.msra.mxu0 %v10800_v2 }
 0x624   :  { %v5348_v51 = vpop.xlane.xlu1 %5347 }
 0x625   :  { %8112 = vrsqrt.f32 %v5348_v51  ;;  %vm5356_vm11 = vcmp.eq.f32.partialorder %v5348_v51, inf  ;;  %v5359_v4 = vand.u32 2147483648, %v5348_v51  ;;  %vm5358_vm2 = vcmp.eq.f32.partialorder %v5348_v51, 0.0 }
 0x62b   :  { %v8113_v46 = vpop.eup %8112 }
 0x62c   :  { %v5350_v40 = vmul.f32 %v8113_v46, %v5348_v51 }
 0x62e   :  { %v5351_v55 = vmul.f32 %v8113_v46, %v5350_v40  ;;  %v10754_v9 = vpop.f32.mrf.mxu1 }
 0x630   :  { %v5352_v48 = vmul.f32 0.5, %v5351_v55 }
 0x632   :  { %v5353_v23 = vsub.f32 1.5, %v5352_v48 }
 0x634   :  { %v5354_v5 = vmul.f32 %v8113_v46, %v5353_v23  ;;  %v6198_v46 = vsel %vm11580_vm1, %v6197_v16, %v8060_v18  ;;  %v5437_v23 = vsub.f32 %v5288_v60, %v10800_v2 }
 0x636   :  { %v5355_v10 = vmul.f32 %v5354_v5, %v5348_v51  ;;  %v10756_v61 = vpop.f32.mrf.mxu0  ;;  %v10758_v12 = vpop.f32.mrf.mxu2  ;;  %v10811_v5 = vand.u32 4294901760, %v5286_v53  ;;  %5476 = vmatpush.msra.mxu2 %v5437_v23 }
 0x637   :  { %v10760_v58 = vpop.f32.mrf.mxu1 }
 0x638   :  { %v5357_v42 = vsel %vm5356_vm11, %v5348_v51, %v5355_v10  ;;  %v10762_v28 = vpop.f32.mrf.mxu3  ;;  %v5287_v51 = vld [vmem:[%s5285_s10 + $0x8] sm:$0xff]  ;;  %vm11581_vm11 = vcmask 1042432  }
 0x639   :  { %v5360_v29 = vsel %vm5358_vm2, %v5359_v4, %v5357_v42  ;;  %v10803_v40 = vand.u32 4294901760, %v5287_v51  ;;  %v10806_v48 = vsel %vm11581_vm11, %v6198_v46, %v8061_v15  ;;  %v5432_v4 = vand.u32 4294901760, %v5431_v43 }
 0x63a   :  { %v5361_v50 = vadd.f32 %v5360_v29, %v5344_v26  ;;  %v6200_v63 = vmul.f32 %v10806_v48, %v10806_v48  ;;  %v5438_v42 = vand.u32 4294901760, %v5437_v23  ;;  %v5449_v29 = vsub.f32 %v5286_v53, %v10811_v5 }
 0x63b   :  { %5506 = vmatpush.msra.mxu3 %v10803_v40  ;;  %5406 = vmatpush.msra.mxu0 %v10803_v40 }
 0x63c   :  { %8114 = vrcp.f32 %v5361_v50  ;;  %v5373_v62 = vand.u32 2147483648, %v5361_v50  ;;  %v5371_v52 = vand.u32 2147483647, %v5361_v50  ;;  %vm5367_vm10 = vweird.f32 %v5361_v50 }
 0x63d   :  { %5508 = vmatpush.msra.mxu3 %v10811_v5  ;;  %5408 = vmatpush.msra.mxu0 %v10811_v5 }
 0x63e   :  { %v10764_v36 = vpop.f32.mrf.mxu0  ;;  %v4732_v34 = vpop.f32.mrf.mxu2  ;;  %v5374_v11 = vor.u32 1.1754944e-38, %v5373_v62  ;;  %vm5372_vm4 = vcmp.eq.f32.partialorder %v5371_v52, 8.507059e+37  ;;  %v5433_v62 = vsub.f32 %v5431_v43, %v5432_v4 }
 0x63f   :  { %v10768_v3 = vpop.f32.mrf.mxu1  ;;  %5531 = vmatpush.msrb.mxu0 %v5432_v4 }
 0x640   :  { %v4773_v19 = vpop.f32.mrf.mxu3  ;;  %v5434_v20 = vand.u32 4294901760, %v5433_v62 }
 0x641   :  { %5535 = vmatpush.msrb.mxu0 %v5438_v42 }
 0x642   :  { %v8115_v37 = vpop.eup %8114  ;;  %5435 = vmatpush.msra.mxu1 %v5434_v20 }
 0x643   :  { %v5363_v35 = vmul.f32 %v8115_v37, %v5361_v50  ;;  %vm5368_vm0 = vweird.f32 %v8115_v37 }
 0x644   :  { %vm5369_vm5 = vmor %vm5367_vm10, %vm5368_vm0 }
 0x645   :  { %v5364_v56 = vsub.f32 1.0, %v5363_v35  ;;  %vm11582_vm0 = vmmov %vm11579_vm8 }
 0x646   :  { %v4803_v44 = vpop.f32.mrf.mxu0  ;;  %v10771_v7 = vpop.f32.mrf.mxu2  ;;  %vm11583_vm10 = vmmov %vm11580_vm1 }
 0x647   :  { %v5365_v38 = vmul.f32 %v8115_v37, %v5364_v56  ;;  %v4961_v41 = vpop.f32.mrf.mxu1  ;;  %v6201_v56 = vsel %vm101_vm3, %v6200_v63, 0.0 }
 0x648   :  { %v10777_v25 = vpop.f32.mrf.mxu3  ;;  %6202 = vadd.xlane.f32.xlu2 %v6201_v56 }
 0x649   :  { %v5366_v24 = vadd.f32 %v8115_v37, %v5365_v38  ;;  %v5439_v38 = vsub.f32 %v5437_v23, %v5438_v42 }
 0x64b   :  { %v5370_v27 = vsel %vm5369_vm5, %v8115_v37, %v5366_v24  ;;  %v4774_v37 = vadd.f32 %v4773_v19, %v4732_v34  ;;  %v5450_v24 = vand.u32 4294901760, %v5449_v29  ;;  %v5440_v34 = vand.u32 4294901760, %v5439_v38  ;;  %vm11584_vm5 = vmmov %vm11581_vm11 }
 0x64c   :  { %v5375_v32 = vsel %vm5372_vm4, %v5374_v11, %v5370_v27  ;;  %vm11585_vm4 = vcmask 125952  }
 0x64d   :  { %v5376_v45 = vmul.f32 %v5375_v32, %v5344_v26  ;;  %v5443_v26 = vsub.f32 %v5287_v51, %v10803_v40  ;;  %v4804_v11 = vadd.f32 %v4803_v44, %v4774_v37  ;;  %v5451_v18 = vsub.f32 %v5449_v29, %v5450_v24  ;;  %5441 = vmatpush.msra.mxu1 %v5440_v34 }
 0x64e   :  { %v4920_v54 = vpop.f32.mrf.mxu0  ;;  %v4991_v55 = vpop.f32.mrf.mxu2  ;;  %v4586_v32 = vadd.f32 %v10754_v9, %v10756_v61 }
 0x64f   :  { %v10815_v0 = vmul.f32 %v5376_v45, %v8328_v13  ;;  %v4962_v35 = vadd.f32 %v4961_v41, %v4920_v54  ;;  %v5444_v52 = vand.u32 4294901760, %v5443_v26  ;;  %5479 = vmatpush.msra.mxu2 %v5443_v26  ;;  %v5076_v47 = vpop.f32.mrf.mxu1  ;;  %v4831_v41 = vadd.f32 %v10768_v3, %v4804_v11 }
 0x650   :  { %v5018_v10 = vpop.f32.mrf.mxu3  ;;  %v5452_v53 = vand.u32 4294901760, %v5451_v18 }
 0x651   :  { %v10823_v50 = vand.u32 2147483647, %v10815_v0  ;;  %v5445_v19 = vsub.f32 %v5443_v26, %v5444_v52  ;;  %v4992_v15 = vadd.f32 %v4991_v55, %v4962_v35  ;;  %5482 = vmatpush.msra.mxu2 %v5449_v29  ;;  %v4616_v55 = vadd.f32 %v10758_v12, %v4586_v32  ;;  %5539 = vmatpush.msrb.mxu0 %v5444_v52 }
 0x652   :  { %v4864_v43 = vadd.f32 %v10771_v7, %v4831_v41 }
 0x653   :  { %v7833_v57 = vand.u32 8388607, %v10823_v50  ;;  %v5446_v44 = vand.u32 4294901760, %v5445_v19  ;;  %v5019_v46 = vadd.f32 %v5018_v10, %v4992_v15  ;;  %5543 = vmatpush.msrb.mxu0 %v5450_v24  ;;  %v4643_v10 = vadd.f32 %v10762_v28, %v4616_v55 }
 0x654   :  { %v4889_v42 = vadd.f32 %v10777_v25, %v4864_v43  ;;  %v7829_v56 = vand.u32 2139095040, %v10823_v50  ;;  %vm7867_vm8 = vweird.f32 %v10823_v50  ;;  %vm7866_vm1 = vcmp.lt.f32.partialorder %v10823_v50, 0.0 }
 0x655   :  { %v7834_v27 = vor.u32 8388608, %v7833_v57  ;;  %5447 = vmatpush.msra.mxu1 %v5446_v44  ;;  %v4676_v37 = vadd.f32 %v10764_v36, %v4643_v10  ;;  %vm7865_vm11 = vcmp.eq.f32.partialorder %v10823_v50, 0.0 }
 0x656   :  { %v5051_v60 = vpop.f32.mrf.mxu0  ;;  %v5108_v51 = vpop.f32.mrf.mxu2  ;;  %v5268_v52 = vrot.slane %v4889_v42, 7  ;;  %v7830_v36 = vshrl.u32 %v7829_v56, 23  ;;  %v5298_v42 = vld [vmem:[%s5294_s12 + $0x18] sm:$0xff] }
 0x657   :  { %v7836_v16 = vand.u32 8388607, %v7834_v27  ;;  %v5052_v9 = vadd.f32 %v5051_v60, %v5019_v46  ;;  %5453 = vmatpush.msra.mxu1 %v5452_v53  ;;  %v5206_v26 = vpop.f32.mrf.mxu1  ;;  %v4701_v57 = vadd.f32 %v10760_v58, %v4676_v37 }
 0x658   :  { %v5149_v54 = vpop.f32.mrf.mxu3 }
 0x659   :  { %v7837_v45 = vor.u32 1065353216, %v7836_v16  ;;  %v5150_v61 = vadd.f32 %v5149_v54, %v5108_v51  ;;  %5562 = vmatpush.msrb.mxu1 %v10798_v21  ;;  %v5077_v7 = vadd.f32 %v5076_v47, %v5052_v9  ;;  %v5276_v18 = vsel %vm11582_vm0, %v4701_v57, %v5268_v52 }
 0x65a   :  { %vm7864_vm0 = vcmp.eq.f32.partialorder %v10823_v50, 1.0 }
 0x65b   :  { %vm7838_vm2 = vcmp.ge.f32.partialorder %v7837_v45, 1.4142135  ;;  %v7839_v23 = vmul.f32 0.5, %v7837_v45  ;;  %5564 = vmatpush.msrb.mxu1 %v10800_v2  ;;  %v5271_v25 = vrot.slane %v5077_v7, 6  ;;  %v5297_v7 = vld [vmem:[%s5294_s12 + $0x10] sm:$0xff] }
 0x65c   :  { %v10883_v37 = vand.u32 4294901760, %v5297_v7 }
 0x65d   :  { %v7840_v3 = vsel %vm7838_vm2, %v7839_v23, %v7837_v45  ;;  %5566 = vmatpush.msrb.mxu1 %v10803_v40  ;;  %v5277_v27 = vsel %vm11583_vm10, %v5276_v18, %v5271_v25  ;;  %vm7895_vm10 = vcmp.eq.f32.partialorder %v10815_v0, 0  ;;  %v5295_v25 = vld [vmem:[%s5294_s12] sm:$0xff] }
 0x65e   :  { %v5179_v63 = vpop.f32.mrf.mxu0  ;;  %v7927_v4 = vadd.f32 -1.0, %v7840_v3  ;;  %v10896_v52 = vsub.f32 %v5297_v7, %v10883_v37  ;;  %v5304_v7 = vld [vmem:[%s5303_s23] sm:$0xff] }
 0x65f   :  { %v5180_v12 = vadd.f32 %v5179_v63, %v5150_v61  ;;  %v5239_v21 = vpop.f32.mrf.mxu2  ;;  %5568 = vmatpush.msrb.mxu1 %v10811_v5  ;;  %v7926_v5 = vadd.s32 4294967169, %v7830_v36 }
 0x660   :  { %v7844_v29 = vmul.f32 %v7927_v4, %v7927_v4  ;;  %v5626_v57 = vand.u32 4294901760, %v10896_v52 }
 0x661   :  { %v5207_v35 = vadd.f32 %v5206_v26, %v5180_v12  ;;  %v5264_v24 = vpop.f32.mrf.mxu3  ;;  %v7841_v16 = vadd.s32 1, %v7926_v5  ;;  %v10875_v12 = vand.u32 4294901760, %v5298_v42  ;;  %v5296_v26 = vld [vmem:[%s5294_s12 + $0x8] sm:$0xff]  ;;  %s7044_s12 = sshll.u32 %s11515_s5, 4  ;;  %s8212_s5 = smov [#allocation7]   ;;  %s7045_s12 = int_to_ptr.hbm [resolvable:$true] %s7044_s12 }
 0x662   :  { %v7845_v62 = vmul.f32 0.12621109, %v7844_v29  ;;  %v7847_v38 = vmul.f32 -0.20706727, %v7844_v29  ;;  %s7028_s20 = sshll.u32 %s8212_s5, 4  ;;  %s7029_s20 = int_to_ptr.vmem [resolvable:$true] %s7028_s20 }
 0x663   :  { %v5240_v28 = vadd.f32 %v5239_v21, %v5207_v35  ;;  %v7842_v54 = vsel %vm7838_vm2, %v7841_v16, %v7926_v5  ;;  %vm7898_vm2 = vcmp.gt.f32.partialorder %v10823_v50, 1065353216  ;;  %5590 = vmatpush.msrb.mxu2 %v10875_v12  ;;  %v10885_v35 = vand.u32 4294901760, %v5296_v26 }
 0x664   :  { %v7846_v2 = vadd.f32 0.21545328, %v7845_v62  ;;  %v7848_v11 = vadd.f32 -0.23896284, %v7847_v38  ;;  %v7862_v23 = vcvt.s32.f32 %v7842_v54  ;;  %v5307_v54 = vld [vmem:[%s5303_s23 + $0x18] sm:$0xff] }
 0x665   :  { %v5265_v20 = vadd.f32 %v5264_v24, %v5240_v28  ;;  %5592 = vmatpush.msrb.mxu2 %v10883_v37  ;;  %v10903_v24 = vsub.f32 %v5296_v26, %v10885_v35 }
 0x666   :  { %v7849_v34 = vmul.f32 %v7846_v2, %v7844_v29  ;;  %v7851_v19 = vmul.f32 %v7848_v11, %v7844_v29 }
 0x667   :  { %v5274_v40 = vrot.slane %v5265_v20, 5  ;;  %5594 = vmatpush.msrb.mxu2 %v10885_v35  ;;  %v10910_v20 = vand.u32 4294901760, %v5295_v25 }
 0x668   :  { %v7850_v15 = vadd.f32 0.28795174, %v7849_v34  ;;  %v7852_v47 = vadd.f32 -0.3607037, %v7851_v19  ;;  %v5632_v34 = vand.u32 4294901760, %v10903_v24 }
 0x669   :  { %v5278_v60 = vsel %vm11584_vm5, %v5277_v27, %v5274_v40  ;;  %vm11586_vm5 = vcmp.lt.f32.partialorder %v8339_v33, 0  ;;  %v5627_v40 = vsub.f32 %v10896_v52, %v5626_v57  ;;  %5596 = vmatpush.msrb.mxu2 %v10910_v20  ;;  %v10925_v27 = vsub.f32 %v5295_v25, %v10910_v20 }
 0x66a   :  { %5280 = vst.msk [vmem:[#allocation7 + $0x14] sm:$0xf] %vm11585_vm4, %v5278_v60  ;;  %v7853_v44 = vmul.f32 %v7850_v15, %v7844_v29  ;;  %v7855_v32 = vmul.f32 %v7852_v47, %v7844_v29  ;;  %vm10866_vm4 = vmxor %vm11586_vm5, %vm7898_vm2  ;;  %vm7897_vm2 = vcmp.lt.s32.totalorder %v10815_v0, 0  ;;  %v5633_v60 = vsub.f32 %v10903_v24, %v5632_v34 }
 0x66c   :  { %v7854_v41 = vadd.f32 0.48090908, %v7853_v44  ;;  %v7856_v58 = vadd.f32 -0.72134733, %v7855_v32  ;;  %v5628_v44 = vand.u32 4294901760, %v5627_v40 }
 0x66e   :  { %v7857_v51 = vmul.f32 %v7854_v41, %v7844_v29  ;;  %v7859_v46 = vmul.f32 %v7927_v4, %v7856_v58  ;;  %v10881_v29 = vsub.f32 %v5298_v42, %v10875_v12  ;;  %v5634_v41 = vand.u32 4294901760, %v5633_v60 }
 0x670   :  { %v7858_v53 = vadd.f32 1.442695, %v7857_v51  ;;  %v5620_v38 = vand.u32 4294901760, %v10881_v29 }
 0x672   :  { %v7860_v55 = vadd.f32 %v7859_v46, %v7858_v53  ;;  %v5621_v11 = vsub.f32 %v10881_v29, %v5620_v38 }
 0x674   :  { %v7861_v43 = vmul.f32 %v7927_v4, %v7860_v55  ;;  %v5622_v18 = vand.u32 4294901760, %v5621_v11 }
 0x676   :  { %v7863_v9 = vadd.f32 %v7862_v23, %v7861_v43  ;;  %5623 = vmatpush.msrb.mxu3 %v5622_v18  ;;  %v10955_v43 = vand.u32 4294901760, %v5307_v54 }
 0x678   :  { %v7868_v61 = vsel %vm7867_vm8, %v10823_v50, %v7863_v9  ;;  %vm7894_vm8 = vcmp.lt.f32.partialorder %v10815_v0, 0  ;;  %5629 = vmatpush.msrb.mxu3 %v5628_v44  ;;  %v5306_v9 = vld [vmem:[%s5303_s23 + $0x10] sm:$0xff]  ;;  %v5316_v44 = vld [vmem:[%s10994_s21 + $0x18] sm:$0xff] }
 0x679   :  { %v7869_v3 = vsel %vm7866_vm1, nan, %v7868_v61  ;;  %vm11589_vm1 = vmmov %vm11586_vm5  ;;  %v7917_v47 = vsel %vm7894_vm8, %v8437_v22, %v8375_v1 }
 0x67a   :  { %v7870_v63 = vsel %vm7865_vm11, -inf, %v7869_v3  ;;  %vm7907_vm11 = vmand %vm11589_vm1, %vm7895_vm10  ;;  %5635 = vmatpush.msrb.mxu3 %v5634_v41  ;;  %v10958_v3 = vsub.f32 %v5307_v54, %v10955_v43 }
 0x67b   :  { %v7871_v10 = vsel %vm7864_vm0, 0.0, %v7870_v63  ;;  %vm7909_vm0 = vmor %vm7907_vm11, %vm10866_vm4  ;;  %vm7911_vm4 = vcmp.eq.f32.partialorder %v10815_v0, 3212836864  ;;  %vm7919_vm11 = vcmp.ne.f32.partialorder %v10815_v0, %v10815_v0  ;;  %v5305_v63 = vld [vmem:[%s5303_s23 + $0x8] sm:$0xff]  ;;  %s7030_s23 = sshll.u32 %s11514_s4, 4  ;;  %s7031_s23 = int_to_ptr.hbm [resolvable:$true] %s7030_s23 }
 0x67c   :  { %v7872_v45 = vmul.f32 %v7871_v10, %v8339_v33  ;;  %vm7900_vm5 = vmand %vm7894_vm8, %vm8356_vm6  ;;  %v7910_v62 = vsel %vm7909_vm0, 2139095040, %v8210_v14  ;;  %vm7899_vm0 = vcmp.eq.f32.partialorder %v10823_v50, 2139095040  ;;  %v5638_v50 = vand.u32 4294901760, %v10925_v27 }
 0x67d   :  { %vm7904_vm1 = vmand %vm7897_vm2, %vm8390_vm7  ;;  %v7912_v36 = vsel %vm7911_vm4, 1065353216, %v7910_v62  ;;  %v10966_v42 = vand.u32 4294901760, %v5305_v63  ;;  %v5808_v26 = vand.u32 4294901760, %v10958_v3 }
 0x67e   :  { %8116 = vpow2.f32 %v7872_v45  ;;  %vm7921_vm2 = vmor %vm7919_vm11, %vm8458_vm15  ;;  %v5639_v16 = vsub.f32 %v10925_v27, %v5638_v50  ;;  %v10962_v45 = vand.u32 4294901760, %v5306_v9 }
 0x67f   :  { %v10985_v11 = vsub.f32 %v5305_v63, %v10966_v42  ;;  %v5809_v18 = vsub.f32 %v10958_v3, %v5808_v26 }
 0x680   :  { %v5640_v46 = vand.u32 4294901760, %v5639_v16 }
 0x682   :  { %5641 = vmatpush.msrb.mxu3 %v5640_v46  ;;  %v11022_v46 = vand.u32 4294901760, %v5316_v44 }
 0x684   :  { %v8117_v56 = vpop.eup %8116 }
 0x685   :  { %v7901_v21 = vsel %vm7900_vm5, 2143289344, %v8117_v56 }
 0x686   :  { %v7903_v28 = vsel %vm7895_vm10, %v8413_v17, %v7901_v21  ;;  %vm7896_vm10 = vcmp.eq.f32.partialorder %v10815_v0, 1065353216 }
 0x687   :  { %v7905_v2 = vxor.u32 2147483648, %v7903_v28  ;;  %vm7923_vm5 = vmor %vm7896_vm10, %vm7270_vm12 }
 0x689   :  { %v7906_v19 = vsel %vm7904_vm1, %v7905_v2, %v7903_v28  ;;  %v10980_v28 = vand.u32 4294901760, %v5304_v7 }
 0x68a   :  { %v7913_v15 = vsel %vm7269_vm14, %v7912_v36, %v7906_v19 }
 0x68b   :  { %v7918_v5 = vsel %vm7899_vm0, %v7917_v47, %v7913_v15  ;;  %v11005_v60 = vsub.f32 %v5304_v7, %v10980_v28 }
 0x68c   :  { %v7922_v32 = vsel %vm7921_vm2, 2143289344, %v7918_v5  ;;  %v5820_v5 = vand.u32 4294901760, %v10985_v11 }
 0x68d   :  { %v7924_v58 = vsel %vm7923_vm5, 1065353216, %v7922_v32 }
 0x68e   :  { %v7925_v51 = vsel %vm7271_vm13, %v10815_v0, %v7924_v58  ;;  %v5810_v58 = vand.u32 4294901760, %v5809_v18 }
 0x68f   :  { %v5379_v53 = vmul.f32 %v7925_v51, %v8504_v49 }
 0x691   :  { %v5380_v55 = vmax.f32 %v5379_v53, 0.0  ;;  %v5826_v53 = vand.u32 4294901760, %v11005_v60 }
 0x693   :  { %v5381_v23 = vmin.f32 %v5380_v55, 1.0  ;;  %v5315_v55 = vld [vmem:[%s10994_s21 + $0x10] sm:$0xff] }
 0x694   :  { %v11042_v63 = vand.u32 4294901760, %v5315_v55 }
 0x695   :  { %v5382_v61 = vsub.f32 1.0, %v5381_v23  ;;  %v5384_v0 = vmul.f32 %v5381_v23, %v10400_v31 }
 0x697   :  { %v5383_v10 = vmul.f32 %v5382_v61, %v10558_v6  ;;  %v10975_v6 = vsub.f32 %v5306_v9, %v10962_v45  ;;  %v5827_v9 = vsub.f32 %v11005_v60, %v5826_v53  ;;  %v11040_v61 = vsub.f32 %v5316_v44, %v11022_v46 }
 0x699   :  { %v10964_v4 = vadd.f32 %v5384_v0, %v5383_v10  ;;  %v5814_v40 = vand.u32 4294901760, %v10975_v6  ;;  %v5314_v10 = vld [vmem:[%s10994_s21 + $0x8] sm:$0xff]  ;;  %v5313_v0 = vld [vmem:[%s10994_s21] sm:$0xff] }
 0x69a   :  { %v11053_v7 = vand.u32 4294901760, %v5314_v10 }
 0x69b   :  { %v6216_v56 = vmul.f32 %v10964_v4, %v10964_v4  ;;  %v5387_v21 = vsel %vm159_vm9, %v10964_v4, 0  ;;  %v5574_v62 = vrot.slane %v10964_v4, 1  ;;  %v5815_v16 = vsub.f32 %v10975_v6, %v5814_v40 }
 0x69c   :  { %v10978_v31 = vand.u32 4294901760, %v5387_v21  ;;  %v5762_v54 = vrot.slane %v10964_v4, 2 }
 0x69d   :  { %v6217_v25 = vsel %vm101_vm3, %v6216_v56, 0.0  ;;  %v5575_v2 = vsel %vm159_vm9, %v5574_v62, 0  ;;  %v5816_v23 = vand.u32 4294901760, %v5815_v16  ;;  %v11062_v62 = vsub.f32 %v5315_v55, %v11042_v63 }
 0x69e   :  { %6218 = vadd.xlane.f32.xlu0 %v6217_v25  ;;  %5455 = vmatmul.f32.vlgmr.msra.gmra.mxu1 %v10978_v31  ;;  %v5410_v36 = vsub.f32 %v5387_v21, %v10978_v31  ;;  %v10989_v19 = vand.u32 4294901760, %v5575_v2  ;;  %v5996_v21 = vand.u32 4294901760, %v11040_v61 }
 0x69f   :  { %5690 = vmatpush.msra.mxu1 %v10875_v12 }
 0x6a0   :  { %5485 = vmatmul.f32.vlgmr.msra.gmra.mxu2 %v5410_v36  ;;  %v5411_v15 = vand.u32 4294901760, %v5410_v36  ;;  %v11002_v47 = vsub.f32 %v5575_v2, %v10989_v19  ;;  %v5997_v2 = vsub.f32 %v11040_v61, %v5996_v21 }
 0x6a1   :  { %5692 = vmatpush.msra.mxu1 %v10883_v37  ;;  %5719 = vmatpush.msra.mxu2 %v5620_v38 }
 0x6a2   :  { %5512 = vmatmul.f32.vlgmr.msra.gmra.mxu3 %v5411_v15  ;;  %v5412_v32 = vsub.f32 %v5410_v36, %v5411_v15  ;;  %v5599_v41 = vand.u32 4294901760, %v11002_v47  ;;  %v5998_v44 = vand.u32 4294901760, %v5997_v2 }
 0x6a3   :  { %5694 = vmatpush.msra.mxu1 %v10885_v35  ;;  %5723 = vmatpush.msra.mxu2 %v5626_v57  ;;  %v5821_v57 = vsub.f32 %v10985_v11, %v5820_v5 }
 0x6a4   :  { %v5413_v51 = vand.u32 4294901760, %v5412_v32  ;;  %v5600_v38 = vsub.f32 %v11002_v47, %v5599_v41  ;;  %5750 = vmatpush.msra.mxu3 %v10875_v12 }
 0x6a5   :  { %5696 = vmatpush.msra.mxu1 %v10910_v20  ;;  %5727 = vmatpush.msra.mxu2 %v5632_v34  ;;  %v5950_v34 = vrot.slane %v10964_v4, 3 }
 0x6a6   :  { %5414 = vmatmul.f32.vlgmr.msra.gmra.mxu0 %v5413_v51  ;;  %5570 = vmatmul.f32.vlgmr.msrb.gmra.mxu1 %v10978_v31  ;;  %v5601_v12 = vand.u32 4294901760, %v5600_v38 }
 0x6a7   :  { %5752 = vmatpush.msra.mxu3 %v10883_v37  ;;  %5661 = vmatpush.msra.mxu0 %v10881_v29  ;;  %v5822_v29 = vand.u32 4294901760, %v5821_v57  ;;  %v5763_v37 = vsel %vm159_vm9, %v5762_v54, 0  ;;  %v5951_v56 = vsel %vm159_vm9, %v5950_v34, 0 }
 0x6a8   :  { %5602 = vmatmul.f32.vlgmr.msrb.gmra.mxu2 %v5601_v12  ;;  %5811 = vmatpush.msrb.mxu1 %v5810_v58 }
 0x6a9   :  { %5731 = vmatpush.msra.mxu2 %v5638_v50  ;;  %5754 = vmatpush.msra.mxu3 %v10885_v35  ;;  %v5828_v35 = vand.u32 4294901760, %v5827_v9  ;;  %v11058_v50 = vand.u32 4294901760, %v5763_v37 }
 0x6aa   :  { %5643 = vmatmul.f32.vlgmr.msrb.gmra.mxu3 %v10989_v19  ;;  %5664 = vmatpush.msra.mxu0 %v10896_v52  ;;  %v11065_v52 = vand.u32 4294901760, %v5313_v0 }
 0x6ab   :  { %5756 = vmatpush.msra.mxu3 %v10910_v20  ;;  %5817 = vmatpush.msrb.mxu1 %v5816_v23  ;;  %v11068_v20 = vand.u32 4294901760, %v5951_v56  ;;  %v5786_v25 = vsub.f32 %v5763_v37, %v11058_v50 }
 0x6ac   :  { %5849 = vmatpush.msrb.mxu2 %v10958_v3  ;;  %5667 = vmatpush.msra.mxu0 %v10903_v24  ;;  %v11073_v24 = vsub.f32 %v5314_v10, %v11053_v7 }
 0x6ad   :  { %5823 = vmatpush.msrb.mxu1 %v5822_v29  ;;  %5878 = vmatpush.msrb.mxu3 %v10955_v43  ;;  %v11089_v36 = vsub.f32 %v5951_v56, %v11068_v20  ;;  %v5787_v15 = vand.u32 4294901760, %v5786_v25 }
 0x6ae   :  { %5545 = vmatmul.f32.vlgmr.msrb.gmra.mxu0 %v10978_v31  ;;  %5700 = vmatmul.f32.vlgmr.msra.gmra.mxu1 %v5599_v41  ;;  %v6002_v31 = vand.u32 4294901760, %v11062_v62  ;;  %v6008_v18 = vand.u32 4294901760, %v11073_v24 }
 0x6af   :  { %5852 = vmatpush.msrb.mxu2 %v10975_v6  ;;  %5670 = vmatpush.msra.mxu0 %v10925_v27  ;;  %v11084_v27 = vsub.f32 %v5313_v0, %v11065_v52  ;;  %v5975_v41 = vand.u32 4294901760, %v11089_v36  ;;  %v5788_v16 = vsub.f32 %v5786_v25, %v5787_v15 }
 0x6b0   :  { %5733 = vmatmul.f32.vlgmr.msra.gmra.mxu2 %v10989_v19  ;;  %5829 = vmatpush.msrb.mxu1 %v5828_v35  ;;  %v6003_v32 = vsub.f32 %v11062_v62, %v6002_v31 }
 0x6b1   :  { %5855 = vmatpush.msrb.mxu2 %v10985_v11  ;;  %5880 = vmatpush.msrb.mxu3 %v10962_v45  ;;  %v5976_v51 = vsub.f32 %v11089_v36, %v5975_v41  ;;  %v5789_v38 = vand.u32 4294901760, %v5788_v16  ;;  %v6159_v16 = vld [vmem:[%s6156_s8 + $0x10] sm:$0xff] }
 0x6b2   :  { %5758 = vmatmul.f32.vlgmr.msra.gmra.mxu3 %v10989_v19  ;;  %5778 = vmatpush.msrb.mxu0 %v10955_v43  ;;  %v6014_v19 = vand.u32 4294901760, %v11084_v27  ;;  %v6004_v58 = vand.u32 4294901760, %v6003_v32 }
 0x6b3   :  { %5858 = vmatpush.msrb.mxu2 %v11005_v60  ;;  %5882 = vmatpush.msrb.mxu3 %v10966_v42  ;;  %v5977_v57 = vand.u32 4294901760, %v5976_v51 }
 0x6b4   :  { %5938 = vmatpush.msra.mxu1 %v10955_v43  ;;  %5780 = vmatpush.msrb.mxu0 %v10962_v45  ;;  %v6009_v43 = vsub.f32 %v11073_v24, %v6008_v18 }
 0x6b5   :  { %5884 = vmatpush.msrb.mxu3 %v10980_v28  ;;  %5966 = vmatpush.msra.mxu2 %v11022_v46 }
 0x6b6   :  { %5673 = vmatmul.f32.vlgmr.msra.gmra.mxu0 %v11002_v47  ;;  %5831 = vmatmul.f32.vlgmr.msrb.gmra.mxu1 %v11058_v50  ;;  %v6015_v47 = vsub.f32 %v11084_v27, %v6014_v19 }
 0x6b7   :  { %5940 = vmatpush.msra.mxu1 %v10962_v45  ;;  %5782 = vmatpush.msrb.mxu0 %v10966_v42  ;;  %v6010_v45 = vand.u32 4294901760, %v6009_v43 }
 0x6b8   :  { %5861 = vmatmul.f32.vlgmr.msrb.gmra.mxu2 %v5786_v25  ;;  %5999 = vmatpush.msra.mxu3 %v5998_v44 }
 0x6b9   :  { %5942 = vmatpush.msra.mxu1 %v10966_v42  ;;  %5968 = vmatpush.msra.mxu2 %v11042_v63  ;;  %v6016_v42 = vand.u32 4294901760, %v6015_v47  ;;  %v6158_v47 = vld [vmem:[%s6156_s8 + $0x8] sm:$0xff] }
 0x6ba   :  { %5888 = vmatmul.f32.vlgmr.msrb.gmra.mxu3 %v5787_v15  ;;  %5784 = vmatpush.msrb.mxu0 %v10980_v28 }
 0x6bb   :  { %5944 = vmatpush.msra.mxu1 %v10980_v28  ;;  %5970 = vmatpush.msra.mxu2 %v11053_v7  ;;  %v6203_v3 = vpop.xlane.xlu2 %6202 }
 0x6bc   :  { %6005 = vmatpush.msra.mxu3 %v6004_v58  ;;  %5907 = vmatpush.msra.mxu0 %v5808_v26  ;;  %8118 = vrsqrt.f32 %v6203_v3  ;;  %vm6211_vm8 = vcmp.eq.f32.partialorder %v6203_v3, inf  ;;  %vm6213_vm4 = vcmp.eq.f32.partialorder %v6203_v3, 0.0  ;;  %v6160_v58 = vld [vmem:[%s6156_s8 + $0x18] sm:$0xff] }
 0x6bd   :  { %5972 = vmatpush.msra.mxu2 %v11065_v52  ;;  %6066 = vmatpush.msrb.mxu1 %v11022_v46 }
 0x6be   :  { %5790 = vmatmul.f32.vlgmr.msrb.gmra.mxu0 %v5789_v38  ;;  %5946 = vmatmul.f32.vlgmr.msra.gmra.mxu1 %v11058_v50  ;;  %v11166_v38 = vand.u32 4294901760, %v6159_v16 }
 0x6bf   :  { %6011 = vmatpush.msra.mxu3 %v6010_v45  ;;  %5911 = vmatpush.msra.mxu0 %v5814_v40  ;;  %v11164_v45 = vand.u32 4294901760, %v6160_v58 }
 0x6c0   :  { %5978 = vmatmul.f32.vlgmr.msra.gmra.mxu2 %v5977_v57  ;;  %6068 = vmatpush.msrb.mxu1 %v11042_v63 }
 0x6c1   :  { %6017 = vmatpush.msra.mxu3 %v6016_v42  ;;  %6095 = vmatpush.msrb.mxu2 %v5996_v21  ;;  %v6157_v42 = vld [vmem:[%s6156_s8] sm:$0xff] }
 0x6c2   :  { %6019 = vmatmul.f32.vlgmr.msra.gmra.mxu3 %v11068_v20  ;;  %5915 = vmatpush.msra.mxu0 %v5820_v5  ;;  %v8119_v26 = vpop.eup %8118 }
 0x6c3   :  { %6070 = vmatpush.msrb.mxu1 %v11053_v7  ;;  %6099 = vmatpush.msrb.mxu2 %v6002_v31  ;;  %v6205_v6 = vmul.f32 %v8119_v26, %v6203_v3 }
 0x6c4   :  { %6126 = vmatpush.msrb.mxu3 %v11022_v46  ;;  %5919 = vmatpush.msra.mxu0 %v5826_v53 }
 0x6c5   :  { %6072 = vmatpush.msrb.mxu1 %v11065_v52  ;;  %6103 = vmatpush.msrb.mxu2 %v6008_v18  ;;  %v6206_v28 = vmul.f32 %v8119_v26, %v6205_v6  ;;  %v11170_v6 = vand.u32 4294901760, %v6157_v42 }
 0x6c6   :  { %6128 = vmatpush.msrb.mxu3 %v11042_v63  ;;  %5921 = vmatmul.f32.vlgmr.msra.gmra.mxu0 %v11058_v50 }
 0x6c7   :  { %6076 = vmatmul.f32.vlgmr.msrb.gmra.mxu1 %v5975_v41  ;;  %6037 = vmatpush.msrb.mxu0 %v11040_v61  ;;  %v6207_v40 = vmul.f32 0.5, %v6206_v28  ;;  %v6214_v61 = vand.u32 2147483648, %v6203_v3 }
 0x6c8   :  { %6107 = vmatpush.msrb.mxu2 %v6014_v19  ;;  %6130 = vmatpush.msrb.mxu3 %v11053_v7 }
 0x6c9   :  { %6109 = vmatmul.f32.vlgmr.msrb.gmra.mxu2 %v11068_v20  ;;  %6040 = vmatpush.msrb.mxu0 %v11062_v62  ;;  %v6208_v60 = vsub.f32 1.5, %v6207_v40  ;;  %v6308_v40 = vsub.f32 %v6159_v16, %v11166_v38 }
 0x6ca   :  { %6132 = vmatpush.msrb.mxu3 %v11065_v52 }
 0x6cb   :  { %6134 = vmatmul.f32.vlgmr.msrb.gmra.mxu3 %v11068_v20  ;;  %6043 = vmatpush.msrb.mxu0 %v11073_v24  ;;  %v6209_v46 = vmul.f32 %v8119_v26, %v6208_v60  ;;  %v11168_v26 = vand.u32 4294901760, %v6158_v47 }
 0x6cc   :  { %6373 = vmatpush.msra.mxu3 %v11164_v45 }
 0x6cd   :  { %6046 = vmatpush.msrb.mxu0 %v11084_v27  ;;  %v6210_v23 = vmul.f32 %v6209_v46, %v6203_v3  ;;  %v6320_v46 = vsub.f32 %v6157_v42, %v11170_v6 }
 0x6ce   :  { %6049 = vmatmul.f32.vlgmr.msrb.gmra.mxu0 %v11089_v36  ;;  %6375 = vmatpush.msra.mxu3 %v11166_v38 }
 0x6cf   :  { %v6212_v63 = vsel %vm6211_vm8, %v6203_v3, %v6210_v23  ;;  %6273 = vmatpush.msra.mxu0 %v11164_v45 }
 0x6d0   :  { %v6215_v50 = vsel %vm6213_vm4, %v6214_v61, %v6212_v63  ;;  %v6321_v61 = vand.u32 4294901760, %v6320_v46  ;;  %6377 = vmatpush.msra.mxu3 %v11168_v26  ;;  %vm11590_vm4 = vcmask 1040384  }
 0x6d1   :  { %6275 = vmatpush.msra.mxu0 %v11166_v38 }
 0x6d2   :  { %6379 = vmatpush.msra.mxu3 %v11170_v6 }
 0x6d3   :  { %6277 = vmatpush.msra.mxu0 %v11168_v26 }
 0x6d5   :  { %6279 = vmatpush.msra.mxu0 %v11170_v6 }
 0x711   :  { %v6219_v11 = vpop.xlane.xlu0 %6218 }
 0x712   :  { %8120 = vrsqrt.f32 %v6219_v11  ;;  %vm6227_vm10 = vcmp.eq.f32.partialorder %v6219_v11, inf  ;;  %v6230_v0 = vand.u32 2147483648, %v6219_v11  ;;  %vm6229_vm1 = vcmp.eq.f32.partialorder %v6219_v11, 0.0 }
 0x718   :  { %v8121_v5 = vpop.eup %8120 }
 0x719   :  { %v6221_v53 = vmul.f32 %v8121_v5, %v6219_v11 }
 0x71b   :  { %v6222_v54 = vmul.f32 %v8121_v5, %v6221_v53  ;;  %v11142_v55 = vpop.f32.mrf.mxu1  ;;  %v6314_v53 = vsub.f32 %v6158_v47, %v11168_v26 }
 0x71d   :  { %v6223_v12 = vmul.f32 0.5, %v6222_v54 }
 0x71f   :  { %v6224_v34 = vsub.f32 1.5, %v6223_v12 }
 0x721   :  { %v6225_v9 = vmul.f32 %v8121_v5, %v6224_v34  ;;  %v6309_v34 = vand.u32 4294901760, %v6308_v40 }
 0x723   :  { %v6226_v10 = vmul.f32 %v6225_v9, %v6219_v11  ;;  %v11144_v29 = vpop.f32.mrf.mxu0  ;;  %v11146_v37 = vpop.f32.mrf.mxu2  ;;  %v6315_v9 = vand.u32 4294901760, %v6314_v53 }
 0x724   :  { %v11148_v56 = vpop.f32.mrf.mxu1 }
 0x725   :  { %v6228_v7 = vsel %vm6227_vm10, %v6219_v11, %v6226_v10  ;;  %v11150_v35 = vpop.f32.mrf.mxu3  ;;  %v6302_v11 = vsub.f32 %v6160_v58, %v11164_v45  ;;  %vm11591_vm10 = vcmask 1041408  }
 0x726   :  { %v6231_v21 = vsel %vm6229_vm1, %v6230_v0, %v6228_v7  ;;  %v6310_v7 = vsub.f32 %v6308_v40, %v6309_v34  ;;  %vm11592_vm1 = vcmask 1042432  }
 0x727   :  { %v6232_v62 = vadd.f32 %v6231_v21, %v6215_v50  ;;  %v6303_v12 = vand.u32 4294901760, %v6302_v11  ;;  %6344 = vmatpush.msra.mxu2 %v6302_v11 }
 0x729   :  { %8122 = vrcp.f32 %v6232_v62  ;;  %v6244_v36 = vand.u32 2147483648, %v6232_v62  ;;  %v6242_v32 = vand.u32 2147483647, %v6232_v62  ;;  %vm6238_vm0 = vweird.f32 %v6232_v62  ;;  %6347 = vmatpush.msra.mxu2 %v6308_v40  ;;  %6402 = vmatpush.msrb.mxu0 %v6303_v12 }
 0x72a   :  { %v6304_v0 = vsub.f32 %v6302_v11, %v6303_v12 }
 0x72b   :  { %v11152_v52 = vpop.f32.mrf.mxu0  ;;  %v5603_v20 = vpop.f32.mrf.mxu2  ;;  %v6245_v43 = vor.u32 1.1754944e-38, %v6244_v36  ;;  %vm6243_vm5 = vcmp.eq.f32.partialorder %v6242_v32, 8.507059e+37  ;;  %6350 = vmatpush.msra.mxu2 %v6314_v53  ;;  %6406 = vmatpush.msrb.mxu0 %v6309_v34 }
 0x72c   :  { %v11154_v2 = vpop.f32.mrf.mxu1 }
 0x72d   :  { %v5644_v24 = vpop.f32.mrf.mxu3  ;;  %6353 = vmatpush.msra.mxu2 %v6320_v46  ;;  %6410 = vmatpush.msrb.mxu0 %v6315_v9 }
 0x72e   :  { %v5645_v10 = vadd.f32 %v5644_v24, %v5603_v20 }
 0x72f   :  { %v8123_v25 = vpop.eup %8122  ;;  %6414 = vmatpush.msrb.mxu0 %v6321_v61 }
 0x730   :  { %v6234_v31 = vmul.f32 %v8123_v25, %v6232_v62  ;;  %vm6239_vm11 = vweird.f32 %v8123_v25  ;;  %v6305_v62 = vand.u32 4294901760, %v6304_v0 }
 0x731   :  { %vm6240_vm2 = vmor %vm6238_vm0, %vm6239_vm11  ;;  %vm11593_vm11 = vcmask 125952  }
 0x732   :  { %v6235_v27 = vsub.f32 1.0, %v6234_v31  ;;  %6306 = vmatpush.msra.mxu1 %v6305_v62 }
 0x733   :  { %v5674_v18 = vpop.f32.mrf.mxu0  ;;  %v11157_v15 = vpop.f32.mrf.mxu2 }
 0x734   :  { %v6236_v44 = vmul.f32 %v8123_v25, %v6235_v27  ;;  %v5832_v3 = vpop.f32.mrf.mxu1  ;;  %v5675_v21 = vadd.f32 %v5674_v18, %v5645_v10  ;;  %v6311_v27 = vand.u32 4294901760, %v6310_v7  ;;  %v5457_v18 = vadd.f32 %v11142_v55, %v11144_v29 }
 0x735   :  { %v11162_v19 = vpop.f32.mrf.mxu3 }
 0x736   :  { %v6237_v41 = vadd.f32 %v8123_v25, %v6236_v44  ;;  %6312 = vmatpush.msra.mxu1 %v6311_v27 }
 0x738   :  { %v6241_v51 = vsel %vm6240_vm2, %v8123_v25, %v6237_v41  ;;  %v6322_v25 = vsub.f32 %v6320_v46, %v6321_v61  ;;  %v5702_v41 = vadd.f32 %v11154_v2, %v5675_v21 }
 0x739   :  { %v6246_v57 = vsel %vm6243_vm5, %v6245_v43, %v6241_v51 }
 0x73a   :  { %v6247_v28 = vmul.f32 %v6246_v57, %v6215_v50  ;;  %v6316_v50 = vsub.f32 %v6314_v53, %v6315_v9  ;;  %v6323_v43 = vand.u32 4294901760, %v6322_v25  ;;  %v5487_v57 = vadd.f32 %v11146_v37, %v5457_v18 }
 0x73b   :  { %v5791_v60 = vpop.f32.mrf.mxu0  ;;  %v5862_v5 = vpop.f32.mrf.mxu2 }
 0x73c   :  { %v11179_v54 = vmul.f32 %v6247_v28, %v8328_v13  ;;  %v5833_v13 = vadd.f32 %v5832_v3, %v5791_v60  ;;  %v6317_v20 = vand.u32 4294901760, %v6316_v50  ;;  %v5947_v44 = vpop.f32.mrf.mxu1  ;;  %v5735_v3 = vadd.f32 %v11157_v15, %v5702_v41 }
 0x73d   :  { %v5889_v23 = vpop.f32.mrf.mxu3  ;;  %v5514_v60 = vadd.f32 %v11150_v35, %v5487_v57 }
 0x73e   :  { %v11184_v63 = vand.u32 2147483647, %v11179_v54  ;;  %v5863_v36 = vadd.f32 %v5862_v5, %v5833_v13  ;;  %6318 = vmatpush.msra.mxu1 %v6317_v20  ;;  %v5760_v37 = vadd.f32 %v11162_v19, %v5735_v3 }
 0x740   :  { %v7934_v31 = vand.u32 8388607, %v11184_v63  ;;  %v5890_v51 = vadd.f32 %v5889_v23, %v5863_v36  ;;  %6324 = vmatpush.msra.mxu1 %v6323_v43  ;;  %v7930_v23 = vand.u32 2139095040, %v11184_v63  ;;  %vm7968_vm0 = vweird.f32 %v11184_v63 }
 0x741   :  { %vm7967_vm2 = vcmp.lt.f32.partialorder %v11184_v63, 0.0  ;;  %vm7966_vm5 = vcmp.eq.f32.partialorder %v11184_v63, 0.0 }
 0x742   :  { %v7935_v24 = vor.u32 8388608, %v7934_v31  ;;  %6433 = vmatpush.msrb.mxu1 %v11164_v45  ;;  %v5547_v45 = vadd.f32 %v11152_v52, %v5514_v60 }
 0x743   :  { %v5922_v32 = vpop.f32.mrf.mxu0  ;;  %v5979_v16 = vpop.f32.mrf.mxu2 }
 0x744   :  { %v7937_v58 = vand.u32 8388607, %v7935_v24  ;;  %v5923_v55 = vadd.f32 %v5922_v32, %v5890_v51  ;;  %6435 = vmatpush.msrb.mxu1 %v11166_v38  ;;  %v6077_v53 = vpop.f32.mrf.mxu1  ;;  %v6139_v38 = vrot.slane %v5760_v37, 7  ;;  %v5572_v7 = vadd.f32 %v11148_v56, %v5547_v45  ;;  %v6168_v37 = vld [vmem:[%s6165_s11 + $0x10] sm:$0xff] }
 0x745   :  { %v6020_v42 = vpop.f32.mrf.mxu3 }
 0x746   :  { %v7938_v47 = vor.u32 1065353216, %v7937_v58  ;;  %v6021_v29 = vadd.f32 %v6020_v42, %v5979_v16  ;;  %v5948_v15 = vadd.f32 %v5947_v44, %v5923_v55  ;;  %6437 = vmatpush.msrb.mxu1 %v11168_v26  ;;  %v7931_v26 = vshrl.u32 %v7930_v23, 23 }
 0x747   :  { %v6147_v62 = vsel %vm11590_vm4, %v5572_v7, %v6139_v38  ;;  %vm7965_vm4 = vcmp.eq.f32.partialorder %v11184_v63, 1.0 }
 0x748   :  { %vm7939_vm8 = vcmp.ge.f32.partialorder %v7938_v47, 1.4142135  ;;  %v7940_v28 = vmul.f32 0.5, %v7938_v47  ;;  %6439 = vmatpush.msrb.mxu1 %v11170_v6  ;;  %v6142_v10 = vrot.slane %v5948_v15, 6  ;;  %v8027_v24 = vadd.s32 4294967169, %v7931_v26 }
 0x74a   :  { %v7941_v2 = vsel %vm7939_vm8, %v7940_v28, %v7938_v47  ;;  %v6148_v31 = vsel %vm11591_vm10, %v6147_v62, %v6142_v10  ;;  %v7942_v18 = vadd.s32 1, %v8027_v24  ;;  %vm7996_vm10 = vcmp.eq.f32.partialorder %v11179_v54, 0 }
 0x74b   :  { %v6050_v11 = vpop.f32.mrf.mxu0  ;;  %v8028_v40 = vadd.f32 -1.0, %v7941_v2 }
 0x74c   :  { %v6051_v5 = vadd.f32 %v6050_v11, %v6021_v29  ;;  %v6110_v34 = vpop.f32.mrf.mxu2  ;;  %v7943_v16 = vsel %vm7939_vm8, %v7942_v18, %v8027_v24  ;;  %vm7999_vm8 = vcmp.gt.f32.partialorder %v11184_v63, 1065353216  ;;  %v6176_v18 = vld [vmem:[%s6174_s7 + $0x8] sm:$0xff] }
 0x74d   :  { %v7945_v46 = vmul.f32 %v8028_v40, %v8028_v40  ;;  %v7963_v57 = vcvt.s32.f32 %v7943_v16  ;;  %v6175_v16 = vld [vmem:[%s6174_s7] sm:$0xff] }
 0x74e   :  { %v6078_v12 = vadd.f32 %v6077_v53, %v6051_v5  ;;  %v6135_v19 = vpop.f32.mrf.mxu3  ;;  %v6167_v5 = vld [vmem:[%s6165_s11 + $0x8] sm:$0xff]  ;;  %v11242_v53 = vand.u32 4294901760, %v6168_v37 }
 0x74f   :  { %v7946_v9 = vmul.f32 0.12621109, %v7945_v46  ;;  %v7948_v61 = vmul.f32 -0.20706727, %v7945_v46 }
 0x750   :  { %v6111_v35 = vadd.f32 %v6110_v34, %v6078_v12 }
 0x751   :  { %v7947_v0 = vadd.f32 0.21545328, %v7946_v9  ;;  %v7949_v13 = vadd.f32 -0.23896284, %v7948_v61  ;;  %v11255_v9 = vsub.f32 %v6168_v37, %v11242_v53 }
 0x752   :  { %v6136_v50 = vadd.f32 %v6135_v19, %v6111_v35  ;;  %v11269_v19 = vand.u32 4294901760, %v6166_v59 }
 0x753   :  { %v7950_v21 = vmul.f32 %v7947_v0, %v7945_v46  ;;  %v7952_v52 = vmul.f32 %v7949_v13, %v7945_v46  ;;  %v6497_v10 = vand.u32 4294901760, %v11255_v9 }
 0x754   :  { %v6145_v25 = vrot.slane %v6136_v50, 5  ;;  %v11284_v26 = vsub.f32 %v6166_v59, %v11269_v19 }
 0x755   :  { %v7951_v27 = vadd.f32 0.28795174, %v7950_v21  ;;  %v7953_v20 = vadd.f32 -0.3607037, %v7952_v52  ;;  %v6498_v50 = vsub.f32 %v11255_v9, %v6497_v10 }
 0x756   :  { %v6149_v6 = vsel %vm11592_vm1, %v6148_v31, %v6145_v25  ;;  %vm11594_vm1 = vcmp.lt.f32.partialorder %v8339_v33, 0 }
 0x757   :  { %6151 = vst.msk [vmem:[#allocation7 + $0x18] sm:$0xf] %vm11593_vm11, %v6149_v6  ;;  %v7954_v36 = vmul.f32 %v7951_v27, %v7945_v46  ;;  %v7956_v44 = vmul.f32 %v7953_v20, %v7945_v46  ;;  %vm11225_vm11 = vmxor %vm11594_vm1, %vm7999_vm8  ;;  %vm7998_vm8 = vcmp.lt.s32.totalorder %v11179_v54, 0  ;;  %v6499_v25 = vand.u32 4294901760, %v6498_v50  ;;  %v6178_v6 = vld [vmem:[%s6174_s7 + $0x18] sm:$0xff]  ;;  %v6186_v50 = vld [vmem:[%s11352_s2 + $0x10] sm:$0xff] }
 0x759   :  { %v7955_v32 = vadd.f32 0.48090908, %v7954_v36  ;;  %v7957_v56 = vadd.f32 -0.72134733, %v7956_v44  ;;  %v11314_v44 = vand.u32 4294901760, %v6178_v6 }
 0x75b   :  { %v7958_v41 = vmul.f32 %v7955_v32, %v7945_v46  ;;  %v7960_v58 = vmul.f32 %v8028_v40, %v7957_v56  ;;  %v11244_v46 = vand.u32 4294901760, %v6167_v5  ;;  %v6177_v32 = vld [vmem:[%s6174_s7 + $0x10] sm:$0xff] }
 0x75d   :  { %v7959_v43 = vadd.f32 1.442695, %v7958_v41  ;;  %v11262_v38 = vsub.f32 %v6167_v5, %v11244_v46 }
 0x75f   :  { %v7961_v51 = vadd.f32 %v7960_v58, %v7959_v43  ;;  %v6503_v0 = vand.u32 4294901760, %v11262_v38  ;;  %v11325_v58 = vand.u32 4294901760, %v6176_v18 }
 0x761   :  { %v7962_v42 = vmul.f32 %v8028_v40, %v7961_v51  ;;  %v6169_v40 = vld [vmem:[%s6165_s11 + $0x18] sm:$0xff]  ;;  %v6504_v52 = vsub.f32 %v11262_v38, %v6503_v0 }
 0x762   :  { %v11234_v60 = vand.u32 4294901760, %v6169_v40 }
 0x763   :  { %v7964_v3 = vadd.f32 %v7963_v57, %v7962_v42 }
 0x764   :  { %6461 = vmatpush.msrb.mxu2 %v11234_v60  ;;  %v11240_v15 = vsub.f32 %v6169_v40, %v11234_v60 }
 0x765   :  { %v7969_v28 = vsel %vm7968_vm0, %v11184_v63, %v7964_v3  ;;  %vm7995_vm0 = vcmp.lt.f32.partialorder %v11179_v54, 0  ;;  %v11339_v3 = vand.u32 4294901760, %v6175_v16 }
 0x766   :  { %v7970_v55 = vsel %vm7967_vm2, nan, %v7969_v28  ;;  %vm11597_vm2 = vmmov %vm11594_vm1  ;;  %6463 = vmatpush.msrb.mxu2 %v11242_v53  ;;  %v6491_v34 = vand.u32 4294901760, %v11240_v15  ;;  %v8018_v21 = vsel %vm7995_vm0, %v8437_v22, %v8375_v1  ;;  %v6505_v1 = vand.u32 4294901760, %v6504_v52 }
 0x767   :  { %v7971_v29 = vsel %vm7966_vm5, -inf, %v7970_v55  ;;  %vm8008_vm5 = vmand %vm11597_vm2, %vm7996_vm10  ;;  %vm8020_vm2 = vcmp.ne.f32.partialorder %v11179_v54, %v11179_v54  ;;  %v11343_v55 = vsub.f32 %v6176_v18, %v11325_v58  ;;  %v11363_v5 = vsub.f32 %v6175_v16, %v11339_v3 }
 0x768   :  { %v7972_v2 = vsel %vm7965_vm4, 0.0, %v7971_v29  ;;  %vm8010_vm4 = vmor %vm8008_vm5, %vm11225_vm11  ;;  %vm8012_vm11 = vcmp.eq.f32.partialorder %v11179_v54, 3212836864  ;;  %6465 = vmatpush.msrb.mxu2 %v11244_v46  ;;  %vm8000_vm5 = vcmp.eq.f32.partialorder %v11184_v63, 2139095040  ;;  %v6509_v63 = vand.u32 4294901760, %v11284_v26 }
 0x769   :  { %v7973_v47 = vmul.f32 %v7972_v2, %v8339_v33  ;;  %vm8001_vm1 = vmand %vm7995_vm0, %vm8356_vm6  ;;  %v8011_v23 = vsel %vm8010_vm4, 2139095040, %v8210_v14  ;;  %v6492_v14 = vsub.f32 %v11240_v15, %v6491_v34  ;;  %vm7997_vm6 = vcmp.eq.f32.partialorder %v11179_v54, 1065353216 }
 0x76a   :  { %6467 = vmatpush.msrb.mxu2 %v11269_v19  ;;  %v6510_v31 = vsub.f32 %v11284_v26, %v6509_v63  ;;  %v11319_v33 = vsub.f32 %v6178_v6, %v11314_v44 }
 0x76b   :  { %8124 = vpow2.f32 %v7973_v47  ;;  %v6493_v7 = vand.u32 4294901760, %v6492_v14 }
 0x76c   :  { %v6511_v20 = vand.u32 4294901760, %v6510_v31 }
 0x76d   :  { %6494 = vmatpush.msrb.mxu3 %v6493_v7 }
 0x76f   :  { %6500 = vmatpush.msrb.mxu3 %v6499_v25  ;;  %v6185_v25 = vld [vmem:[%s11352_s2 + $0x8] sm:$0xff] }
 0x771   :  { %v8125_v45 = vpop.eup %8124  ;;  %6506 = vmatpush.msrb.mxu3 %v6505_v1  ;;  %v11411_v1 = vand.u32 4294901760, %v6185_v25 }
 0x772   :  { %v8002_v12 = vsel %vm8001_vm1, 2143289344, %v8125_v45  ;;  %v6691_v45 = vand.u32 4294901760, %v11343_v55 }
 0x773   :  { %v8004_v61 = vsel %vm7996_vm10, %v8413_v17, %v8002_v12  ;;  %vm8005_vm10 = vmand %vm7998_vm8, %vm8390_vm7  ;;  %v8013_v17 = vsel %vm8012_vm11, 1065353216, %v8011_v23  ;;  %6512 = vmatpush.msrb.mxu3 %v6511_v20  ;;  %v6187_v12 = vld [vmem:[%s11352_s2 + $0x18] sm:$0xff] }
 0x774   :  { %v8006_v35 = vxor.u32 2147483648, %v8004_v61  ;;  %vm8022_vm7 = vmor %vm8020_vm2, %vm8458_vm15  ;;  %vm11600_vm15 = vcmask 1042432  }
 0x776   :  { %v8007_v13 = vsel %vm8005_vm10, %v8006_v35, %v8004_v61 }
 0x777   :  { %v8014_v8 = vsel %vm7269_vm14, %v8013_v17, %v8007_v13  ;;  %vm8024_vm14 = vmor %vm7997_vm6, %vm7270_vm12  ;;  %v6697_v17 = vand.u32 4294901760, %v11363_v5  ;;  %v11380_v13 = vand.u32 4294901760, %v6187_v12  ;;  %vm11599_vm12 = vcmask 1041408  }
 0x778   :  { %v8019_v62 = vsel %vm8000_vm5, %v8018_v21, %v8014_v8 }
 0x779   :  { %v8023_v39 = vsel %vm8022_vm7, 2143289344, %v8019_v62  ;;  %v6698_v21 = vsub.f32 %v11363_v5, %v6697_v17  ;;  %v11398_v52 = vsub.f32 %v6187_v12, %v11380_v13  ;;  %v11400_v62 = vand.u32 4294901760, %v6186_v50 }
 0x77a   :  { %v8025_v22 = vsel %vm8024_vm14, 1065353216, %v8023_v39  ;;  %v6184_v39 = vld [vmem:[%s11352_s2] sm:$0xff] }
 0x77b   :  { %v8026_v30 = vsel %vm7271_vm13, %v11179_v54, %v8025_v22  ;;  %v6867_v31 = vand.u32 4294901760, %v11398_v52  ;;  %vm11601_vm13 = vcmask 125952  }
 0x77c   :  { %v6250_v27 = vmul.f32 %v8026_v30, %v8504_v49  ;;  %v11321_v49 = vand.u32 4294901760, %v6177_v32  ;;  %v11420_v30 = vsub.f32 %v6186_v50, %v11400_v62 }
 0x77d   :  { %v6868_v20 = vsub.f32 %v11398_v52, %v6867_v31 }
 0x77e   :  { %v6251_v24 = vmax.f32 %v6250_v27, 0.0  ;;  %v11334_v42 = vsub.f32 %v6177_v32, %v11321_v49  ;;  %v6873_v6 = vand.u32 4294901760, %v11420_v30 }
 0x780   :  { %v6252_v36 = vmin.f32 %v6251_v24, 1.0  ;;  %v6685_v11 = vand.u32 4294901760, %v11334_v42  ;;  %v6874_v18 = vsub.f32 %v11420_v30, %v6873_v6 }
 0x782   :  { %v6253_v56 = vsub.f32 1.0, %v6252_v36  ;;  %v6255_v43 = vmul.f32 %v6252_v36, %v10806_v48  ;;  %v6679_v48 = vand.u32 4294901760, %v11319_v33  ;;  %v6686_v35 = vsub.f32 %v11334_v42, %v6685_v11 }
 0x784   :  { %v6254_v41 = vmul.f32 %v6253_v56, %v10964_v4  ;;  %v6680_v47 = vsub.f32 %v11319_v33, %v6679_v48  ;;  %v6687_v8 = vand.u32 4294901760, %v6686_v35  ;;  %v6869_v56 = vand.u32 4294901760, %v6868_v20 }
 0x786   :  { %v11323_v54 = vadd.f32 %v6255_v43, %v6254_v41  ;;  %v6681_v59 = vand.u32 4294901760, %v6680_v47 }
 0x788   :  { %v6258_v51 = vsel %vm159_vm9, %v11323_v54, 0  ;;  %7023 = vst.msk [vmem:[#allocation8] sm:$0xf] %vm101_vm3, %v11323_v54  ;;  %v6445_v4 = vrot.slane %v11323_v54, 1  ;;  %v6633_v7 = vrot.slane %v11323_v54, 2  ;;  %vm11598_vm3 = vcmask 1040384  }
 0x789   :  { %v11337_v57 = vand.u32 4294901760, %v6258_v51  ;;  %7047 = dma.vmem_to_hbm [thread:$0]  %s7043_s13, 64, %s7045_s12, [#allocation9]  }
 0x78a   :  { %v6446_v28 = vsel %vm159_vm9, %v6445_v4, 0 }
 0x78b   :  { %6326 = vmatmul.f32.vlgmr.msra.gmra.mxu1 %v11337_v57  ;;  %v6281_v29 = vsub.f32 %v6258_v51, %v11337_v57  ;;  %v11347_v2 = vand.u32 4294901760, %v6446_v28 }
 0x78c   :  { %6561 = vmatpush.msra.mxu1 %v11234_v60 }
 0x78d   :  { %6356 = vmatmul.f32.vlgmr.msra.gmra.mxu2 %v6281_v29  ;;  %v6282_v40 = vand.u32 4294901760, %v6281_v29  ;;  %v11360_v37 = vsub.f32 %v6446_v28, %v11347_v2 }
 0x78e   :  { %6563 = vmatpush.msra.mxu1 %v11242_v53  ;;  %6590 = vmatpush.msra.mxu2 %v6491_v34 }
 0x78f   :  { %6383 = vmatmul.f32.vlgmr.msra.gmra.mxu3 %v6282_v40  ;;  %v6283_v23 = vsub.f32 %v6281_v29, %v6282_v40  ;;  %v6470_v61 = vand.u32 4294901760, %v11360_v37 }
 0x790   :  { %6565 = vmatpush.msra.mxu1 %v11244_v46  ;;  %6594 = vmatpush.msra.mxu2 %v6497_v10  ;;  %v6692_v10 = vsub.f32 %v11343_v55, %v6691_v45 }
 0x791   :  { %v6284_v14 = vand.u32 4294901760, %v6283_v23  ;;  %v6471_v34 = vsub.f32 %v11360_v37, %v6470_v61  ;;  %6621 = vmatpush.msra.mxu3 %v11234_v60 }
 0x792   :  { %6567 = vmatpush.msra.mxu1 %v11269_v19  ;;  %6598 = vmatpush.msra.mxu2 %v6503_v0  ;;  %v6821_v0 = vrot.slane %v11323_v54, 3  ;;  %v6875_v54 = vand.u32 4294901760, %v6874_v18 }
 0x793   :  { %6285 = vmatmul.f32.vlgmr.msra.gmra.mxu0 %v6284_v14  ;;  %6441 = vmatmul.f32.vlgmr.msrb.gmra.mxu1 %v11337_v57  ;;  %v6472_v60 = vand.u32 4294901760, %v6471_v34 }
 0x794   :  { %6623 = vmatpush.msra.mxu3 %v11242_v53  ;;  %6532 = vmatpush.msra.mxu0 %v11240_v15  ;;  %v6693_v15 = vand.u32 4294901760, %v6692_v10  ;;  %v6634_v53 = vsel %vm159_vm9, %v6633_v7, 0  ;;  %v6822_v22 = vsel %vm159_vm9, %v6821_v0, 0 }
 0x795   :  { %6473 = vmatmul.f32.vlgmr.msrb.gmra.mxu2 %v6472_v60  ;;  %6682 = vmatpush.msrb.mxu1 %v6681_v59 }
 0x796   :  { %6602 = vmatpush.msra.mxu2 %v6509_v63  ;;  %6625 = vmatpush.msra.mxu3 %v11244_v46  ;;  %v6699_v46 = vand.u32 4294901760, %v6698_v21  ;;  %v11416_v63 = vand.u32 4294901760, %v6634_v53 }
 0x797   :  { %6514 = vmatmul.f32.vlgmr.msrb.gmra.mxu3 %v11347_v2  ;;  %6535 = vmatpush.msra.mxu0 %v11255_v9  ;;  %v11423_v9 = vand.u32 4294901760, %v6184_v39 }
 0x798   :  { %6627 = vmatpush.msra.mxu3 %v11269_v19  ;;  %6688 = vmatpush.msrb.mxu1 %v6687_v8  ;;  %v11426_v19 = vand.u32 4294901760, %v6822_v22  ;;  %v6657_v27 = vsub.f32 %v6634_v53, %v11416_v63 }
 0x799   :  { %6720 = vmatpush.msrb.mxu2 %v11319_v33  ;;  %6538 = vmatpush.msra.mxu0 %v11262_v38  ;;  %v11431_v38 = vsub.f32 %v6185_v25, %v11411_v1 }
 0x79a   :  { %6694 = vmatpush.msrb.mxu1 %v6693_v15  ;;  %6749 = vmatpush.msrb.mxu3 %v11314_v44  ;;  %v11447_v24 = vsub.f32 %v6822_v22, %v11426_v19  ;;  %v6658_v32 = vand.u32 4294901760, %v6657_v27 }
 0x79b   :  { %6416 = vmatmul.f32.vlgmr.msrb.gmra.mxu0 %v11337_v57  ;;  %6571 = vmatmul.f32.vlgmr.msra.gmra.mxu1 %v6470_v61  ;;  %v6879_v36 = vand.u32 4294901760, %v11431_v38 }
 0x79c   :  { %6723 = vmatpush.msrb.mxu2 %v11334_v42  ;;  %6541 = vmatpush.msra.mxu0 %v11284_v26  ;;  %v11442_v26 = vsub.f32 %v6184_v39, %v11423_v9  ;;  %v6846_v43 = vand.u32 4294901760, %v11447_v24  ;;  %v6659_v16 = vsub.f32 %v6657_v27, %v6658_v32 }
 0x79d   :  { %6604 = vmatmul.f32.vlgmr.msra.gmra.mxu2 %v11347_v2  ;;  %6700 = vmatpush.msrb.mxu1 %v6699_v46 }
 0x79e   :  { %6726 = vmatpush.msrb.mxu2 %v11343_v55  ;;  %6751 = vmatpush.msrb.mxu3 %v11321_v49  ;;  %v6885_v41 = vand.u32 4294901760, %v11442_v26  ;;  %v6847_v4 = vsub.f32 %v11447_v24, %v6846_v43  ;;  %v6660_v57 = vand.u32 4294901760, %v6659_v16 }
 0x79f   :  { %6629 = vmatmul.f32.vlgmr.msra.gmra.mxu3 %v11347_v2  ;;  %6649 = vmatpush.msrb.mxu0 %v11314_v44 }
 0x7a0   :  { %6729 = vmatpush.msrb.mxu2 %v11363_v5  ;;  %6753 = vmatpush.msrb.mxu3 %v11325_v58  ;;  %v6886_v51 = vsub.f32 %v11442_v26, %v6885_v41  ;;  %v6848_v28 = vand.u32 4294901760, %v6847_v4 }
 0x7a1   :  { %6809 = vmatpush.msra.mxu1 %v11314_v44  ;;  %6651 = vmatpush.msrb.mxu0 %v11321_v49  ;;  %v6880_v44 = vsub.f32 %v11431_v38, %v6879_v36 }
 0x7a2   :  { %6755 = vmatpush.msrb.mxu3 %v11339_v3  ;;  %6837 = vmatpush.msra.mxu2 %v11380_v13 }
 0x7a3   :  { %6544 = vmatmul.f32.vlgmr.msra.gmra.mxu0 %v11360_v37  ;;  %6702 = vmatmul.f32.vlgmr.msrb.gmra.mxu1 %v11416_v63 }
 0x7a4   :  { %6811 = vmatpush.msra.mxu1 %v11321_v49  ;;  %6653 = vmatpush.msrb.mxu0 %v11325_v58  ;;  %v6881_v49 = vand.u32 4294901760, %v6880_v44 }
 0x7a5   :  { %6732 = vmatmul.f32.vlgmr.msrb.gmra.mxu2 %v6657_v27  ;;  %6870 = vmatpush.msra.mxu3 %v6869_v56 }
 0x7a6   :  { %6813 = vmatpush.msra.mxu1 %v11325_v58  ;;  %6839 = vmatpush.msra.mxu2 %v11400_v62  ;;  %v6887_v58 = vand.u32 4294901760, %v6886_v51 }
 0x7a7   :  { %6759 = vmatmul.f32.vlgmr.msrb.gmra.mxu3 %v6658_v32  ;;  %6655 = vmatpush.msrb.mxu0 %v11339_v3 }
 0x7a8   :  { %6815 = vmatpush.msra.mxu1 %v11339_v3  ;;  %6841 = vmatpush.msra.mxu2 %v11411_v1 }
 0x7a9   :  { %6876 = vmatpush.msra.mxu3 %v6875_v54  ;;  %6778 = vmatpush.msra.mxu0 %v6679_v48 }
 0x7aa   :  { %6843 = vmatpush.msra.mxu2 %v11423_v9  ;;  %6937 = vmatpush.msrb.mxu1 %v11380_v13 }
 0x7ab   :  { %6661 = vmatmul.f32.vlgmr.msrb.gmra.mxu0 %v6660_v57  ;;  %6817 = vmatmul.f32.vlgmr.msra.gmra.mxu1 %v11416_v63 }
 0x7ac   :  { %6882 = vmatpush.msra.mxu3 %v6881_v49  ;;  %6782 = vmatpush.msra.mxu0 %v6685_v11 }
 0x7ad   :  { %6849 = vmatmul.f32.vlgmr.msra.gmra.mxu2 %v6848_v28  ;;  %6939 = vmatpush.msrb.mxu1 %v11400_v62 }
 0x7ae   :  { %6888 = vmatpush.msra.mxu3 %v6887_v58  ;;  %6966 = vmatpush.msrb.mxu2 %v6867_v31 }
 0x7af   :  { %6786 = vmatpush.msra.mxu0 %v6691_v45  ;;  %6890 = vmatmul.f32.vlgmr.msra.gmra.mxu3 %v11426_v19 }
 0x7b0   :  { %6941 = vmatpush.msrb.mxu1 %v11411_v1  ;;  %6970 = vmatpush.msrb.mxu2 %v6873_v6 }
 0x7b1   :  { %6997 = vmatpush.msrb.mxu3 %v11380_v13  ;;  %6790 = vmatpush.msra.mxu0 %v6697_v17 }
 0x7b2   :  { %6943 = vmatpush.msrb.mxu1 %v11423_v9  ;;  %6974 = vmatpush.msrb.mxu2 %v6879_v36 }
 0x7b3   :  { %6999 = vmatpush.msrb.mxu3 %v11400_v62  ;;  %6792 = vmatmul.f32.vlgmr.msra.gmra.mxu0 %v11416_v63 }
 0x7b4   :  { %6908 = vmatpush.msrb.mxu0 %v11398_v52  ;;  %6947 = vmatmul.f32.vlgmr.msrb.gmra.mxu1 %v6846_v43 }
 0x7b5   :  { %6978 = vmatpush.msrb.mxu2 %v6885_v41  ;;  %7001 = vmatpush.msrb.mxu3 %v11411_v1 }
 0x7b6   :  { %6911 = vmatpush.msrb.mxu0 %v11420_v30  ;;  %6980 = vmatmul.f32.vlgmr.msrb.gmra.mxu2 %v11426_v19 }
 0x7b7   :  { %7003 = vmatpush.msrb.mxu3 %v11423_v9 }
 0x7b8   :  { %6914 = vmatpush.msrb.mxu0 %v11431_v38  ;;  %7005 = vmatmul.f32.vlgmr.msrb.gmra.mxu3 %v11426_v19 }
 0x7ba   :  { %6917 = vmatpush.msrb.mxu0 %v11442_v26 }
 0x7bb   :  { %6920 = vmatmul.f32.vlgmr.msrb.gmra.mxu0 %v11447_v24 }
 0x808   :  { %v6327_v33 = vpop.f32.mrf.mxu1 }
 0x810   :  { %v6286_v48 = vpop.f32.mrf.mxu0  ;;  %v6357_v42 = vpop.f32.mrf.mxu2 }
 0x811   :  { %v6442_v3 = vpop.f32.mrf.mxu1  ;;  %v6328_v10 = vadd.f32 %v6327_v33, %v6286_v48 }
 0x812   :  { %v6384_v55 = vpop.f32.mrf.mxu3 }
 0x813   :  { %v6358_v0 = vadd.f32 %v6357_v42, %v6328_v10 }
 0x815   :  { %v6385_v15 = vadd.f32 %v6384_v55, %v6358_v0 }
 0x818   :  { %v6417_v29 = vpop.f32.mrf.mxu0  ;;  %v6474_v2 = vpop.f32.mrf.mxu2 }
 0x819   :  { %v6572_v11 = vpop.f32.mrf.mxu1  ;;  %v6418_v46 = vadd.f32 %v6417_v29, %v6385_v15 }
 0x81a   :  { %v6515_v47 = vpop.f32.mrf.mxu3 }
 0x81b   :  { %v6516_v59 = vadd.f32 %v6515_v47, %v6474_v2  ;;  %v6443_v27 = vadd.f32 %v6442_v3, %v6418_v46 }
 0x820   :  { %v6545_v40 = vpop.f32.mrf.mxu0  ;;  %v6605_v37 = vpop.f32.mrf.mxu2 }
 0x821   :  { %v6703_v45 = vpop.f32.mrf.mxu1  ;;  %v6546_v14 = vadd.f32 %v6545_v40, %v6516_v59 }
 0x822   :  { %v6630_v5 = vpop.f32.mrf.mxu3 }
 0x823   :  { %v6573_v7 = vadd.f32 %v6572_v11, %v6546_v14 }
 0x825   :  { %v6606_v21 = vadd.f32 %v6605_v37, %v6573_v7 }
 0x827   :  { %v6631_v53 = vadd.f32 %v6630_v5, %v6606_v21 }
 0x828   :  { %v6662_v12 = vpop.f32.mrf.mxu0  ;;  %v6733_v23 = vpop.f32.mrf.mxu2 }
 0x829   :  { %v6704_v35 = vadd.f32 %v6703_v45, %v6662_v12  ;;  %v6818_v17 = vpop.f32.mrf.mxu1  ;;  %v7010_v30 = vrot.slane %v6631_v53, 7 }
 0x82a   :  { %v6760_v61 = vpop.f32.mrf.mxu3 }
 0x82b   :  { %v6734_v34 = vadd.f32 %v6733_v23, %v6704_v35  ;;  %v7018_v6 = vsel %vm11598_vm3, %v6443_v27, %v7010_v30 }
 0x82d   :  { %v6761_v60 = vadd.f32 %v6760_v61, %v6734_v34 }
 0x830   :  { %v6793_v13 = vpop.f32.mrf.mxu0  ;;  %v6850_v50 = vpop.f32.mrf.mxu2 }
 0x831   :  { %v6794_v52 = vadd.f32 %v6793_v13, %v6761_v60  ;;  %v6948_v22 = vpop.f32.mrf.mxu1 }
 0x832   :  { %v6891_v8 = vpop.f32.mrf.mxu3 }
 0x833   :  { %v6892_v62 = vadd.f32 %v6891_v8, %v6850_v50  ;;  %v6819_v1 = vadd.f32 %v6818_v17, %v6794_v52 }
 0x835   :  { %v7013_v19 = vrot.slane %v6819_v1, 6 }
 0x837   :  { %v7019_v24 = vsel %vm11599_vm12, %v7018_v6, %v7013_v19 }
 0x838   :  { %v6921_v25 = vpop.f32.mrf.mxu0 }
 0x839   :  { %v6922_v39 = vadd.f32 %v6921_v25, %v6892_v62  ;;  %v6981_v31 = vpop.f32.mrf.mxu2 }
 0x83b   :  { %v6949_v63 = vadd.f32 %v6948_v22, %v6922_v39  ;;  %v7006_v38 = vpop.f32.mrf.mxu3 }
 0x83d   :  { %v6982_v9 = vadd.f32 %v6981_v31, %v6949_v63 }
 0x83f   :  { %v7007_v20 = vadd.f32 %v7006_v38, %v6982_v9 }
 0x841   :  { %v7016_v26 = vrot.slane %v7007_v20, 5 }
 0x843   :  { %v7020_v36 = vsel %vm11600_vm15, %v7019_v24, %v7016_v26 }
 0x844   :  { %7022 = vst.msk [vmem:[#allocation7 + $0x1c] sm:$0xf] %vm11601_vm13, %v7020_v36 }
 0x845   :  { %7036 = dma.vmem_to_hbm [thread:$0]  %s7029_s20, 512, %s7031_s23, [#allocation3], %s8213_s29, %s8213_s29, %s8214_s24  }
 0x846   :  { %8202 = dma.done.wait [#allocation3], 512  }
 0x847   :  { %8203 = vsyncadd [#allocation3], 4294966784 }
 0x848   :  { %8204 = dma.done.wait [#allocation9], 64  }
 0x849   :  { %8205 = vsyncadd [#allocation9], 4294967232 }
 0x84a   :  { %7056 = vsyncpa [#allocation3], 1 }
 0x84b   :  { %7057 = vsyncpa [#allocation9], 1 }
 0x84c   :  { %7058 = vsyncpa [#allocation4], 1 }
 0x84d   :  { %7059 = vsyncpa [#allocation6], 1 }

</bundles_post_ra>
